<compile_context>
chip_gen: v6e
topology: v6e:2x2x1
jax: 0.10.0
libtpu: 0.0.40
codegen_flags: <defaults>
</compile_context>

<pallas_src>
import functools
import math

import jax
import jax.numpy as jnp
from jax.experimental import pallas as pl
from jax.experimental.pallas import tpu as pltpu

F32 = jnp.float32
BF16 = jnp.bfloat16
NEG_INF = -1e9          # large finite negative: NaN-safe even for fully masked rows
EPS = 1e-5              # PyTorch LayerNorm default
_VMEM = pl.BlockSpec(memory_space=pltpu.MemorySpace.VMEM)


# ----------------------------- in-kernel helpers ----------------------------

def _layernorm(x, g, b, eps=EPS):
    """PyTorch LayerNorm semantics (biased var, eps inside sqrt); f32 math."""
    mu = jnp.mean(x, axis=-1, keepdims=True)
    var = jnp.mean(jnp.square(x - mu), axis=-1, keepdims=True)
    return (x - mu) * jax.lax.rsqrt(var + eps) * g + b


def _mha(q, k, v, mask_n, nhead):
    """All-heads attention in two batched MXU contractions.

    q: [B, Lq, E] bf16, k/v: [B, Lk, E] bf16, mask_n: [H*B, Lq, Lk] f32 additive.
    The 1/sqrt(Dh) scale is folded into the q-projection weights at init.
    Returns [B, Lq, E] f32 (heads concatenated in PyTorch order).
    """
    B, Lq, E = q.shape
    Dh = E // nhead

    def split_heads(t):                      # [B, L, E] -> [H*B, L, Dh]  (n = h*B + b)
        return jnp.concatenate([t[:, :, h * Dh:(h + 1) * Dh] for h in range(nhead)], axis=0)

    qh, kh, vh = split_heads(q), split_heads(k), split_heads(v)
    s = jnp.einsum('nqd,nkd->nqk', qh, kh,
                   preferred_element_type=jnp.float32) + mask_n          # [H*B, Lq, Lk]
    s = s - jnp.max(s, axis=-1, keepdims=True)
    p = jnp.exp(s)
    p = p * pl.reciprocal(jnp.sum(p, axis=-1, keepdims=True), approx=True)
    o = jnp.einsum('nqk,nkd->nqd', p.astype(BF16), vh,
                   preferred_element_type=jnp.float32)                   # [H*B, Lq, Dh]
    return jnp.concatenate([o[h * B:(h + 1) * B] for h in range(nhead)], axis=-1)


# ----------------------------- fused stack kernels ---------------------------

def _encoder_stack_kernel(x_ref, am_ref, kpm_ref,
                          wqkv_ref, bqkv_ref, wo_ref, bo_ref,
                          ln1g_ref, ln1b_ref,
                          w1_ref, b1_ref, w2_ref, b2_ref,
                          ln2g_ref, ln2b_ref,
                          fng_ref, fnb_ref,
                          o_ref, *, num_layers, nhead):
    x = x_ref[...]                                            # [B, S, E] f32
    B, S, E = x.shape

    # additive self-attention mask built once and reused by every layer / head
    mask3 = am_ref[...][None, :, :] + kpm_ref[...][:, None, :]           # [B, S, S]
    mask_n = jnp.concatenate([mask3] * nhead, axis=0)                    # [H*B, S, S]

    for li in range(num_layers):                              # static unroll of the whole stack
        xf = x.reshape(B * S, E)
        qkv = jnp.dot(xf.astype(BF16), wqkv_ref[li],
                      preferred_element_type=jnp.float32) + bqkv_ref[li]  # [B*S, 3E]
        qkv = qkv.astype(BF16).reshape(B, S, 3 * E)
        sa = _mha(qkv[..., :E], qkv[..., E:2 * E], qkv[..., 2 * E:], mask_n, nhead)
        sa = jnp.dot(sa.reshape(B * S, E).astype(BF16), wo_ref[li],
                     preferred_element_type=jnp.float32) + bo_ref[li]
        y = _layernorm(xf + sa, ln1g_ref[li], ln1b_ref[li])               # residual + LN fused

        h = jnp.maximum(jnp.dot(y.astype(BF16), w1_ref[li],
                                preferred_element_type=jnp.float32) + b1_ref[li], 0.0)
        h = jnp.dot(h.astype(BF16), w2_ref[li],
                    preferred_element_type=jnp.float32) + b2_ref[li]
        x = _layernorm(y + h, ln2g_ref[li], ln2b_ref[li]).reshape(B, S, E)

    # TransformerEncoder final LayerNorm fused into the same kernel
    o_ref[...] = _layernorm(x.reshape(B * S, E), fng_ref[...], fnb_ref[...]).reshape(B, S, E)


def _decoder_stack_kernel(x_ref, mem_ref, tam_ref, tkpm_ref, mkpm_ref,
                          sa_wqkv_ref, sa_bqkv_ref, sa_wo_ref, sa_bo_ref,
                          ln1g_ref, ln1b_ref,
                          ca_wq_ref, ca_bq_ref, ca_wkv_ref, ca_bkv_ref,
                          ca_wo_ref, ca_bo_ref,
                          ln2g_ref, ln2b_ref,
                          w1_ref, b1_ref, w2_ref, b2_ref,
                          ln3g_ref, ln3b_ref,
                          fng_ref, fnb_ref, gw_ref, gb_ref,
                          o_ref, *, num_layers, nhead):
    x = x_ref[...]                                            # [B, T, E] f32
    mem = mem_ref[...]                                        # [B, S, E] f32
    B, T, E = x.shape
    S = mem.shape[1]

    # masks built once for the whole stack
    tmask3 = tam_ref[...][None, :, :] + tkpm_ref[...][:, None, :]        # [B, T, T]
    tmask_n = jnp.concatenate([tmask3] * nhead, axis=0)                  # [H*B, T, T]
    cmask3 = jnp.broadcast_to(mkpm_ref[...][:, None, :], (B, T, S))      # [B, T, S]
    cmask_n = jnp.concatenate([cmask3] * nhead, axis=0)                  # [H*B, T, S]

    mem_bf = mem.reshape(B * S, E).astype(BF16)               # cast memory once, reused per layer

    for li in range(num_layers):
        xf = x.reshape(B * T, E)

        # --- masked self-attention (fused QKV projection) ---
        qkv = jnp.dot(xf.astype(BF16), sa_wqkv_ref[li],
                      preferred_element_type=jnp.float32) + sa_bqkv_ref[li]
        qkv = qkv.astype(BF16).reshape(B, T, 3 * E)
        sa = _mha(qkv[..., :E], qkv[..., E:2 * E], qkv[..., 2 * E:], tmask_n, nhead)
        sa = jnp.dot(sa.reshape(B * T, E).astype(BF16), sa_wo_ref[li],
                     preferred_element_type=jnp.float32) + sa_bo_ref[li]
        y = _layernorm(xf + sa, ln1g_ref[li], ln1b_ref[li])

        # --- cross-attention over encoder memory (fused KV projection) ---
        yb = y.astype(BF16)
        q = (jnp.dot(yb, ca_wq_ref[li], preferred_element_type=jnp.float32)
             + ca_bq_ref[li]).astype(BF16).reshape(B, T, E)
        kv = (jnp.dot(mem_bf, ca_wkv_ref[li], preferred_element_type=jnp.float32)
              + ca_bkv_ref[li]).astype(BF16).reshape(B, S, 2 * E)
        ca = _mha(q, kv[..., :E], kv[..., E:], cmask_n, nhead)
        ca = jnp.dot(ca.reshape(B * T, E).astype(BF16), ca_wo_ref[li],
                     preferred_element_type=jnp.float32) + ca_bo_ref[li]
        y = _layernorm(y + ca, ln2g_ref[li], ln2b_ref[li])

        # --- feed forward ---
        h = jnp.maximum(jnp.dot(y.astype(BF16), w1_ref[li],
                                preferred_element_type=jnp.float32) + b1_ref[li], 0.0)
        h = jnp.dot(h.astype(BF16), w2_ref[li],
                    preferred_element_type=jnp.float32) + b2_ref[li]
        x = _layernorm(y + h, ln3g_ref[li], ln3b_ref[li]).reshape(B, T, E)

    # TransformerDecoder final LayerNorm + generator fused (padded vocab -> lane-dense store)
    y = _layernorm(x.reshape(B * T, E), fng_ref[...], fnb_ref[...])
    logits = jnp.dot(y.astype(BF16), gw_ref[...],
                     preferred_element_type=jnp.float32) + gb_ref[...]    # [B*T, Vp]
    o_ref[...] = logits.reshape(B, T, gw_ref.shape[1])


# ----------------------------- pallas_call wrappers ---------------------------

def encoder_stack(x, p, fn_g, fn_b, src_am, src_kpm, nhead):
    B, S, E = x.shape
    num_layers = p["wqkv"].shape[0]
    FFd = p["w1"].shape[2]
    args = (x, src_am, src_kpm,
            p["wqkv"], p["bqkv"], p["wo"], p["bo"],
            p["ln1_g"], p["ln1_b"],
            p["w1"], p["b1"], p["w2"], p["b2"],
            p["ln2_g"], p["ln2_b"],
            fn_g, fn_b)
    flops = num_layers * (2 * B * S * E * 3 * E + 4 * B * S * S * E
                          + 2 * B * S * E * E + 4 * B * S * E * FFd)
    bytes_acc = sum(a.size * a.dtype.itemsize for a in args) + B * S * E * 4
    return pl.pallas_call(
        functools.partial(_encoder_stack_kernel, num_layers=num_layers, nhead=nhead),
        in_specs=[_VMEM] * len(args),
        out_specs=_VMEM,
        out_shape=jax.ShapeDtypeStruct((B, S, E), F32),
        cost_estimate=pl.CostEstimate(flops=int(flops),
                                      transcendentals=int(num_layers * nhead * B * S * S),
                                      bytes_accessed=int(bytes_acc)),
    )(*args)


def decoder_stack_and_generator(x, mem, p, fn_g, fn_b, gen_w, gen_b,
                                tgt_am, tgt_kpm, mem_kpm, nhead):
    B, T, E = x.shape
    S = mem.shape[1]
    Vp = gen_w.shape[1]
    num_layers = p["sa_wqkv"].shape[0]
    FFd = p["w1"].shape[2]
    args = (x, mem, tgt_am, tgt_kpm, mem_kpm,
            p["sa_wqkv"], p["sa_bqkv"], p["sa_wo"], p["sa_bo"],
            p["ln1_g"], p["ln1_b"],
            p["ca_wq"], p["ca_bq"], p["ca_wkv"], p["ca_bkv"], p["ca_wo"], p["ca_bo"],
            p["ln2_g"], p["ln2_b"],
            p["w1"], p["b1"], p["w2"], p["b2"],
            p["ln3_g"], p["ln3_b"],
            fn_g, fn_b, gen_w, gen_b)
    flops = num_layers * (2 * B * T * E * 3 * E + 4 * B * T * T * E + 2 * B * T * E * E
                          + 2 * B * T * E * E + 2 * B * S * E * 2 * E + 4 * B * T * S * E
                          + 2 * B * T * E * E + 4 * B * T * E * FFd) + 2 * B * T * E * Vp
    bytes_acc = sum(a.size * a.dtype.itemsize for a in args) + B * T * Vp * 4
    return pl.pallas_call(
        functools.partial(_decoder_stack_kernel, num_layers=num_layers, nhead=nhead),
        in_specs=[_VMEM] * len(args),
        out_specs=_VMEM,
        out_shape=jax.ShapeDtypeStruct((B, T, Vp), F32),
        cost_estimate=pl.CostEstimate(flops=int(flops),
                                      transcendentals=int(num_layers * nhead * B * (T * T + T * S)),
                                      bytes_accessed=int(bytes_acc)),
    )(*args)


# ----------------------------- model glue -------------------------------------

def make_pos_embedding(emb_size, maxlen):
    den = jnp.exp(-jnp.arange(0, emb_size, 2, dtype=F32) * math.log(10000.0) / emb_size)
    pos = jnp.arange(0, maxlen, dtype=F32).reshape(maxlen, 1)
    pe = jnp.zeros((maxlen, emb_size), F32)
    pe = pe.at[:, 0::2].set(jnp.sin(pos * den))
    pe = pe.at[:, 1::2].set(jnp.cos(pos * den))
    return pe                                                     # [maxlen, E]


def token_embed(tokens_lb, table, emb_size):
    # Transpose the tiny int id matrix (not the activations) so the gather is born batch-first:
    # removes the [L, B, E] -> [B, L, E] activation relayout in XLA entirely.
    # TODO(synk): embedding gather + positional add stay in plain JAX (no tiny-scale Pallas win).
    return jnp.take(table, tokens_lb.T, axis=0) * math.sqrt(emb_size)    # [B, L, E]


def seq2seq_forward(params, src, trg, src_mask, tgt_mask,
                    src_padding_mask, tgt_padding_mask, memory_key_padding_mask,
                    *, nhead, tgt_vocab_size):
    E = params["src_emb"].shape[1]
    S, T = src.shape[0], trg.shape[0]
    pe = params["pos_emb"]

    src_x = (token_embed(src, params["src_emb"], E) + pe[None, :S, :]).astype(F32)   # [B, S, E]
    tgt_x = (token_embed(trg, params["tgt_emb"], E) + pe[None, :T, :]).astype(F32)   # [B, T, E]

    src_am = src_mask.astype(F32)                                         # [S, S] additive
    tgt_am = tgt_mask.astype(F32)                                         # [T, T] additive
    src_kpm = jnp.where(src_padding_mask, NEG_INF, 0.0).astype(F32)       # [B, S]
    tgt_kpm = jnp.where(tgt_padding_mask, NEG_INF, 0.0).astype(F32)       # [B, T]
    mem_kpm = jnp.where(memory_key_padding_mask, NEG_INF, 0.0).astype(F32)  # [B, S]

    mem = encoder_stack(src_x, params["enc"],
                        params["enc_norm_g"], params["enc_norm_b"],
                        src_am, src_kpm, nhead)                           # [B, S, E]

    logits_pad = decoder_stack_and_generator(tgt_x, mem, params["dec"],
                                             params["dec_norm_g"], params["dec_norm_b"],
                                             params["gen_w"], params["gen_b"],
                                             tgt_am, tgt_kpm, mem_kpm, nhead)  # [B, T, Vp]

    # tiny (~7 KB) relayout to PyTorch [T, B, V] layout + vocab un-pad, fused in XLA
    return jnp.transpose(logits_pad, (1, 0, 2))[:, :, :tgt_vocab_size]


# ----------------------------- params init ------------------------------------

def init_params(key, num_encoder_layers, num_decoder_layers, emb_size, nhead,
                src_vocab, tgt_vocab, dim_feedforward, maxlen):
    keys = iter(jax.random.split(key, 256))
    scale_q = 1.0 / math.sqrt(emb_size // nhead)   # attention scale folded into q projections

    def dense(shape, scale=0.05):
        return scale * jax.random.normal(next(keys), shape, F32)

    def ln():
        return jnp.ones((1, emb_size), F32), jnp.zeros((1, emb_size), F32)

    def enc_layer():
        g1, b1 = ln(); g2, b2 = ln()
        wqkv = dense((emb_size, 3 * emb_size)).at[:, :emb_size].multiply(scale_q)
        bqkv = dense((1, 3 * emb_size)).at[:, :emb_size].multiply(scale_q)
        return {
            "wqkv": wqkv.astype(BF16), "bqkv": bqkv,
            "wo": dense((emb_size, emb_size)).astype(BF16), "bo": dense((1, emb_size)),
            "ln1_g": g1, "ln1_b": b1,
            "w1": dense((emb_size, dim_feedforward)).astype(BF16), "b1": dense((1, dim_feedforward)),
            "w2": dense((dim_feedforward, emb_size)).astype(BF16), "b2": dense((1, emb_size)),
            "ln2_g": g2, "ln2_b": b2,
        }

    def dec_layer():
        g1, b1 = ln(); g2, b2 = ln(); g3, b3 = ln()
        sa_wqkv = dense((emb_size, 3 * emb_size)).at[:, :emb_size].multiply(scale_q)
        sa_bqkv = dense((1, 3 * emb_size)).at[:, :emb_size].multiply(scale_q)
        return {
            "sa_wqkv": sa_wqkv.astype(BF16), "sa_bqkv": sa_bqkv,
            "sa_wo": dense((emb_size, emb_size)).astype(BF16), "sa_bo": dense((1, emb_size)),
            "ln1_g": g1, "ln1_b": b1,
            "ca_wq": (scale_q * dense((emb_size, emb_size))).astype(BF16),
            "ca_bq": scale_q * dense((1, emb_size)),
            "ca_wkv": dense((emb_size, 2 * emb_size)).astype(BF16),
            "ca_bkv": dense((1, 2 * emb_size)),
            "ca_wo": dense((emb_size, emb_size)).astype(BF16), "ca_bo": dense((1, emb_size)),
            "ln2_g": g2, "ln2_b": b2,
            "w1": dense((emb_size, dim_feedforward)).astype(BF16), "b1": dense((1, dim_feedforward)),
            "w2": dense((dim_feedforward, emb_size)).astype(BF16), "b2": dense((1, emb_size)),
            "ln3_g": g3, "ln3_b": b3,
        }

    def stack(layers):   # stack per-parameter across layers -> leading [num_layers, ...] axis
        return {k: jnp.stack([l[k] for l in layers], axis=0) for k in layers[0]}

    # generator padded to a 128-lane-multiple vocab for lane-dense output stores
    vp = ((tgt_vocab + 127) // 128) * 128
    gen_w = jnp.zeros((emb_size, vp), F32).at[:, :tgt_vocab].set(dense((emb_size, tgt_vocab)))
    gen_b = jnp.zeros((1, vp), F32).at[:, :tgt_vocab].set(dense((1, tgt_vocab)))

    eg, eb = ln(); dg, db = ln()
    return {
        "src_emb": dense((src_vocab, emb_size), 1.0),
        "tgt_emb": dense((tgt_vocab, emb_size), 1.0),
        "pos_emb": make_pos_embedding(emb_size, maxlen),
        "enc": stack([enc_layer() for _ in range(num_encoder_layers)]),
        "dec": stack([dec_layer() for _ in range(num_decoder_layers)]),
        "enc_norm_g": eg, "enc_norm_b": eb,
        "dec_norm_g": dg, "dec_norm_b": db,
        "gen_w": gen_w.astype(BF16), "gen_b": gen_b,
    }


# --------------------------------- main ----------------------------------------

if __name__ == "__main__":
    NUM_ENC, NUM_DEC = 2, 2
    EMB, NHEAD, FF = 32, 4, 64
    SRC_VOCAB, TGT_VOCAB = 64, 72
    B, S, T = 2, 8, 7
    MAXLEN = 32

    key = jax.random.PRNGKey(0)
    pkey, skey, tkey = jax.random.split(key, 3)
    params = init_params(pkey, NUM_ENC, NUM_DEC, EMB, NHEAD, SRC_VOCAB, TGT_VOCAB, FF, MAXLEN)

    src = jax.random.randint(skey, (S, B), 0, SRC_VOCAB, jnp.int32)   # [src_len, batch]
    trg = jax.random.randint(tkey, (T, B), 0, TGT_VOCAB, jnp.int32)   # [tgt_len, batch]

    src_mask = jnp.zeros((S, S), F32)                                  # no source masking
    tgt_mask = jnp.where(jnp.triu(jnp.ones((T, T), bool), k=1),        # causal mask (finite -1e9)
                         NEG_INF, 0.0).astype(F32)
    src_padding_mask = jnp.zeros((B, S), bool).at[1, S - 1].set(True)  # True = pad
    tgt_padding_mask = jnp.zeros((B, T), bool).at[1, T - 1].set(True)
    memory_key_padding_mask = src_padding_mask

    fwd = jax.jit(functools.partial(seq2seq_forward, nhead=NHEAD, tgt_vocab_size=TGT_VOCAB))
    logits = fwd(params, src, trg, src_mask, tgt_mask,
                 src_padding_mask, tgt_padding_mask, memory_key_padding_mask)
    jax.block_until_ready(logits)

    assert logits.shape == (T, B, TGT_VOCAB), logits.shape
    assert bool(jnp.all(jnp.isfinite(logits)))
    print("KERNEL_OK")
</pallas_src>

<mosaic_0001>
module attributes {stable_mosaic.version = 11 : i64} {
  func.func @_encoder_stack_kernel(%arg0: memref<2x8x32xf32, #tpu.memory_space<vmem>>, %arg1: memref<8x8xf32, #tpu.memory_space<vmem>>, %arg2: memref<2x8xf32, #tpu.memory_space<vmem>>, %arg3: memref<2x32x96xbf16, #tpu.memory_space<vmem>>, %arg4: memref<2x1x96xf32, #tpu.memory_space<vmem>>, %arg5: memref<2x32x32xbf16, #tpu.memory_space<vmem>>, %arg6: memref<2x1x32xf32, #tpu.memory_space<vmem>>, %arg7: memref<2x1x32xf32, #tpu.memory_space<vmem>>, %arg8: memref<2x1x32xf32, #tpu.memory_space<vmem>>, %arg9: memref<2x32x64xbf16, #tpu.memory_space<vmem>>, %arg10: memref<2x1x64xf32, #tpu.memory_space<vmem>>, %arg11: memref<2x64x32xbf16, #tpu.memory_space<vmem>>, %arg12: memref<2x1x32xf32, #tpu.memory_space<vmem>>, %arg13: memref<2x1x32xf32, #tpu.memory_space<vmem>>, %arg14: memref<2x1x32xf32, #tpu.memory_space<vmem>>, %arg15: memref<1x32xf32, #tpu.memory_space<vmem>>, %arg16: memref<1x32xf32, #tpu.memory_space<vmem>>, %arg17: memref<2x8x32xf32, #tpu.memory_space<vmem>>) attributes {dimension_semantics = [], scalar_prefetch = 0 : i64, scratch_operands = 0 : i64, tpu.core_type = #tpu.core_type<tc>} {
    %c0 = arith.constant 0 : index
    %c0_0 = arith.constant 0 : index
    %c0_1 = arith.constant 0 : index
    %0 = vector.load %arg0[%c0, %c0_0, %c0_1] : memref<2x8x32xf32, #tpu.memory_space<vmem>>, vector<2x8x32xf32>
    %c0_2 = arith.constant 0 : index
    %c0_3 = arith.constant 0 : index
    %1 = vector.load %arg1[%c0_2, %c0_3] : memref<8x8xf32, #tpu.memory_space<vmem>>, vector<8x8xf32>
    %2 = vector.shape_cast %1 : vector<8x8xf32> to vector<1x8x8xf32>
    %c0_4 = arith.constant 0 : index
    %c0_5 = arith.constant 0 : index
    %3 = vector.load %arg2[%c0_4, %c0_5] : memref<2x8xf32, #tpu.memory_space<vmem>>, vector<2x8xf32>
    %4 = vector.shape_cast %3 : vector<2x8xf32> to vector<2x1x8xf32>
    %5 = vector.broadcast %2 : vector<1x8x8xf32> to vector<2x8x8xf32>
    %6 = vector.broadcast %4 : vector<2x1x8xf32> to vector<2x8x8xf32>
    %7 = arith.addf %5, %6 : vector<2x8x8xf32>
    %8 = tpu.concatenate %7, %7, %7, %7 in 0 : vector<2x8x8xf32>, vector<2x8x8xf32>, vector<2x8x8xf32>, vector<2x8x8xf32> -> vector<8x8x8xf32>
    %9 = vector.shape_cast %0 : vector<2x8x32xf32> to vector<16x32xf32>
    %10 = arith.truncf %9 : vector<16x32xf32> to vector<16x32xbf16>
    %c0_6 = arith.constant 0 : index
    %c0_7 = arith.constant 0 : index
    %c0_8 = arith.constant 0 : index
    %11 = vector.load %arg3[%c0_6, %c0_7, %c0_8] : memref<2x32x96xbf16, #tpu.memory_space<vmem>>, vector<1x32x96xbf16>
    %12 = vector.shape_cast %11 : vector<1x32x96xbf16> to vector<32x96xbf16>
    %cst = arith.constant dense<0.000000e+00> : vector<16x96xf32>
    %13 = tpu.matmul %10, %12, %cst {dimension_numbers = #tpu.dot_dimension_numbers<[1], [0], [0], [1], [0, 0, 1, 1], [], []>} : vector<16x32xbf16>, vector<32x96xbf16>, vector<16x96xf32> -> vector<16x96xf32>
    %c0_9 = arith.constant 0 : index
    %c0_10 = arith.constant 0 : index
    %c0_11 = arith.constant 0 : index
    %14 = vector.load %arg4[%c0_9, %c0_10, %c0_11] : memref<2x1x96xf32, #tpu.memory_space<vmem>>, vector<1x1x96xf32>
    %15 = vector.shape_cast %14 : vector<1x1x96xf32> to vector<1x96xf32>
    %16 = vector.broadcast %15 : vector<1x96xf32> to vector<16x96xf32>
    %17 = arith.addf %13, %16 : vector<16x96xf32>
    %18 = arith.truncf %17 : vector<16x96xf32> to vector<16x96xbf16>
    %19 = vector.shape_cast %18 : vector<16x96xbf16> to vector<2x8x96xbf16>
    %20 = vector.extract_strided_slice %19 {offsets = [0, 0, 0], sizes = [2, 8, 32], strides = [1, 1, 1]} : vector<2x8x96xbf16> to vector<2x8x32xbf16>
    %21 = vector.extract_strided_slice %19 {offsets = [0, 0, 32], sizes = [2, 8, 32], strides = [1, 1, 1]} : vector<2x8x96xbf16> to vector<2x8x32xbf16>
    %22 = vector.extract_strided_slice %19 {offsets = [0, 0, 64], sizes = [2, 8, 32], strides = [1, 1, 1]} : vector<2x8x96xbf16> to vector<2x8x32xbf16>
    %23 = vector.extract_strided_slice %20 {offsets = [0, 0, 0], sizes = [2, 8, 8], strides = [1, 1, 1]} : vector<2x8x32xbf16> to vector<2x8x8xbf16>
    %24 = vector.extract_strided_slice %20 {offsets = [0, 0, 8], sizes = [2, 8, 8], strides = [1, 1, 1]} : vector<2x8x32xbf16> to vector<2x8x8xbf16>
    %25 = vector.extract_strided_slice %20 {offsets = [0, 0, 16], sizes = [2, 8, 8], strides = [1, 1, 1]} : vector<2x8x32xbf16> to vector<2x8x8xbf16>
    %26 = vector.extract_strided_slice %20 {offsets = [0, 0, 24], sizes = [2, 8, 8], strides = [1, 1, 1]} : vector<2x8x32xbf16> to vector<2x8x8xbf16>
    %27 = tpu.concatenate %23, %24, %25, %26 in 0 : vector<2x8x8xbf16>, vector<2x8x8xbf16>, vector<2x8x8xbf16>, vector<2x8x8xbf16> -> vector<8x8x8xbf16>
    %28 = vector.extract_strided_slice %21 {offsets = [0, 0, 0], sizes = [2, 8, 8], strides = [1, 1, 1]} : vector<2x8x32xbf16> to vector<2x8x8xbf16>
    %29 = vector.extract_strided_slice %21 {offsets = [0, 0, 8], sizes = [2, 8, 8], strides = [1, 1, 1]} : vector<2x8x32xbf16> to vector<2x8x8xbf16>
    %30 = vector.extract_strided_slice %21 {offsets = [0, 0, 16], sizes = [2, 8, 8], strides = [1, 1, 1]} : vector<2x8x32xbf16> to vector<2x8x8xbf16>
    %31 = vector.extract_strided_slice %21 {offsets = [0, 0, 24], sizes = [2, 8, 8], strides = [1, 1, 1]} : vector<2x8x32xbf16> to vector<2x8x8xbf16>
    %32 = tpu.concatenate %28, %29, %30, %31 in 0 : vector<2x8x8xbf16>, vector<2x8x8xbf16>, vector<2x8x8xbf16>, vector<2x8x8xbf16> -> vector<8x8x8xbf16>
    %33 = vector.extract_strided_slice %22 {offsets = [0, 0, 0], sizes = [2, 8, 8], strides = [1, 1, 1]} : vector<2x8x32xbf16> to vector<2x8x8xbf16>
    %34 = vector.extract_strided_slice %22 {offsets = [0, 0, 8], sizes = [2, 8, 8], strides = [1, 1, 1]} : vector<2x8x32xbf16> to vector<2x8x8xbf16>
    %35 = vector.extract_strided_slice %22 {offsets = [0, 0, 16], sizes = [2, 8, 8], strides = [1, 1, 1]} : vector<2x8x32xbf16> to vector<2x8x8xbf16>
    %36 = vector.extract_strided_slice %22 {offsets = [0, 0, 24], sizes = [2, 8, 8], strides = [1, 1, 1]} : vector<2x8x32xbf16> to vector<2x8x8xbf16>
    %37 = tpu.concatenate %33, %34, %35, %36 in 0 : vector<2x8x8xbf16>, vector<2x8x8xbf16>, vector<2x8x8xbf16>, vector<2x8x8xbf16> -> vector<8x8x8xbf16>
    "tpu.trace_start"() <{level = 10 : i32, message = "nqd,nkd->nqk"}> : () -> ()
    %cst_12 = arith.constant dense<0.000000e+00> : vector<8x8x8xf32>
    %38 = tpu.matmul %27, %32, %cst_12 {dimension_numbers = #tpu.dot_dimension_numbers<[2], [2], [1], [1], [0, 0, 0, 1, 1, 1], [0], [0]>} : vector<8x8x8xbf16>, vector<8x8x8xbf16>, vector<8x8x8xf32> -> vector<8x8x8xf32>
    "tpu.trace_stop"() : () -> ()
    %39 = arith.addf %38, %8 : vector<8x8x8xf32>
    %cst_13 = arith.constant dense<0xFF800000> : vector<8x8xf32>
    %40 = vector.multi_reduction <maximumf>, %39, %cst_13 [2] : vector<8x8x8xf32> to vector<8x8xf32>
    %41 = vector.shape_cast %40 : vector<8x8xf32> to vector<8x8x1xf32>
    %42 = vector.broadcast %41 : vector<8x8x1xf32> to vector<8x8x8xf32>
    %43 = arith.subf %39, %42 : vector<8x8x8xf32>
    %44 = math.exp %43 : vector<8x8x8xf32>
    %cst_14 = arith.constant dense<0.000000e+00> : vector<8x8xf32>
    %45 = vector.multi_reduction <add>, %44, %cst_14 [2] : vector<8x8x8xf32> to vector<8x8xf32>
    %46 = vector.shape_cast %45 : vector<8x8xf32> to vector<8x8x1xf32>
    %47 = tpu.reciprocal %46 {approx = true} : vector<8x8x1xf32> -> vector<8x8x1xf32>
    %48 = vector.broadcast %47 : vector<8x8x1xf32> to vector<8x8x8xf32>
    %49 = arith.mulf %44, %48 : vector<8x8x8xf32>
    %50 = arith.truncf %49 : vector<8x8x8xf32> to vector<8x8x8xbf16>
    "tpu.trace_start"() <{level = 10 : i32, message = "nqk,nkd->nqd"}> : () -> ()
    %cst_15 = arith.constant dense<0.000000e+00> : vector<8x8x8xf32>
    %51 = tpu.matmul %50, %37, %cst_15 {dimension_numbers = #tpu.dot_dimension_numbers<[2], [1], [1], [2], [0, 0, 0, 1, 1, 2], [0], [0]>} : vector<8x8x8xbf16>, vector<8x8x8xbf16>, vector<8x8x8xf32> -> vector<8x8x8xf32>
    "tpu.trace_stop"() : () -> ()
    %52 = vector.extract_strided_slice %51 {offsets = [0, 0, 0], sizes = [2, 8, 8], strides = [1, 1, 1]} : vector<8x8x8xf32> to vector<2x8x8xf32>
    %53 = vector.extract_strided_slice %51 {offsets = [2, 0, 0], sizes = [2, 8, 8], strides = [1, 1, 1]} : vector<8x8x8xf32> to vector<2x8x8xf32>
    %54 = vector.extract_strided_slice %51 {offsets = [4, 0, 0], sizes = [2, 8, 8], strides = [1, 1, 1]} : vector<8x8x8xf32> to vector<2x8x8xf32>
    %55 = vector.extract_strided_slice %51 {offsets = [6, 0, 0], sizes = [2, 8, 8], strides = [1, 1, 1]} : vector<8x8x8xf32> to vector<2x8x8xf32>
    %56 = tpu.concatenate %52, %53, %54, %55 in 2 : vector<2x8x8xf32>, vector<2x8x8xf32>, vector<2x8x8xf32>, vector<2x8x8xf32> -> vector<2x8x32xf32>
    %57 = vector.shape_cast %56 : vector<2x8x32xf32> to vector<16x32xf32>
    %58 = arith.truncf %57 : vector<16x32xf32> to vector<16x32xbf16>
    %c0_16 = arith.constant 0 : index
    %c0_17 = arith.constant 0 : index
    %c0_18 = arith.constant 0 : index
    %59 = vector.load %arg5[%c0_16, %c0_17, %c0_18] : memref<2x32x32xbf16, #tpu.memory_space<vmem>>, vector<1x32x32xbf16>
    %60 = vector.shape_cast %59 : vector<1x32x32xbf16> to vector<32x32xbf16>
    %cst_19 = arith.constant dense<0.000000e+00> : vector<16x32xf32>
    %61 = tpu.matmul %58, %60, %cst_19 {dimension_numbers = #tpu.dot_dimension_numbers<[1], [0], [0], [1], [0, 0, 1, 1], [], []>} : vector<16x32xbf16>, vector<32x32xbf16>, vector<16x32xf32> -> vector<16x32xf32>
    %c0_20 = arith.constant 0 : index
    %c0_21 = arith.constant 0 : index
    %c0_22 = arith.constant 0 : index
    %62 = vector.load %arg6[%c0_20, %c0_21, %c0_22] : memref<2x1x32xf32, #tpu.memory_space<vmem>>, vector<1x1x32xf32>
    %63 = vector.shape_cast %62 : vector<1x1x32xf32> to vector<1x32xf32>
    %64 = vector.broadcast %63 : vector<1x32xf32> to vector<16x32xf32>
    %65 = arith.addf %61, %64 : vector<16x32xf32>
    %66 = arith.addf %9, %65 : vector<16x32xf32>
    %c0_23 = arith.constant 0 : index
    %c0_24 = arith.constant 0 : index
    %c0_25 = arith.constant 0 : index
    %67 = vector.load %arg7[%c0_23, %c0_24, %c0_25] : memref<2x1x32xf32, #tpu.memory_space<vmem>>, vector<1x1x32xf32>
    %68 = vector.shape_cast %67 : vector<1x1x32xf32> to vector<1x32xf32>
    %c0_26 = arith.constant 0 : index
    %c0_27 = arith.constant 0 : index
    %c0_28 = arith.constant 0 : index
    %69 = vector.load %arg8[%c0_26, %c0_27, %c0_28] : memref<2x1x32xf32, #tpu.memory_space<vmem>>, vector<1x1x32xf32>
    %70 = vector.shape_cast %69 : vector<1x1x32xf32> to vector<1x32xf32>
    %cst_29 = arith.constant dense<0.000000e+00> : vector<16xf32>
    %71 = vector.multi_reduction <add>, %66, %cst_29 [1] : vector<16x32xf32> to vector<16xf32>
    %72 = vector.shape_cast %71 : vector<16xf32> to vector<16x1xf32>
    %cst_30 = arith.constant 3.200000e+01 : f32
    %73 = vector.broadcast %cst_30 : f32 to vector<16x1xf32>
    %74 = arith.divf %72, %73 : vector<16x1xf32>
    %75 = vector.broadcast %74 : vector<16x1xf32> to vector<16x32xf32>
    %76 = arith.subf %66, %75 : vector<16x32xf32>
    %77 = arith.mulf %76, %76 : vector<16x32xf32>
    %cst_31 = arith.constant dense<0.000000e+00> : vector<16xf32>
    %78 = vector.multi_reduction <add>, %77, %cst_31 [1] : vector<16x32xf32> to vector<16xf32>
    %79 = vector.shape_cast %78 : vector<16xf32> to vector<16x1xf32>
    %cst_32 = arith.constant 3.200000e+01 : f32
    %80 = vector.broadcast %cst_32 : f32 to vector<16x1xf32>
    %81 = arith.divf %79, %80 : vector<16x1xf32>
    %82 = vector.broadcast %74 : vector<16x1xf32> to vector<16x32xf32>
    %83 = arith.subf %66, %82 : vector<16x32xf32>
    %cst_33 = arith.constant 9.99999974E-6 : f32
    %84 = vector.broadcast %cst_33 : f32 to vector<16x1xf32>
    %85 = arith.addf %81, %84 : vector<16x1xf32>
    %86 = math.rsqrt %85 : vector<16x1xf32>
    %87 = vector.broadcast %86 : vector<16x1xf32> to vector<16x32xf32>
    %88 = arith.mulf %83, %87 : vector<16x32xf32>
    %89 = vector.broadcast %68 : vector<1x32xf32> to vector<16x32xf32>
    %90 = arith.mulf %88, %89 : vector<16x32xf32>
    %91 = vector.broadcast %70 : vector<1x32xf32> to vector<16x32xf32>
    %92 = arith.addf %90, %91 : vector<16x32xf32>
    %93 = arith.truncf %92 : vector<16x32xf32> to vector<16x32xbf16>
    %c0_34 = arith.constant 0 : index
    %c0_35 = arith.constant 0 : index
    %c0_36 = arith.constant 0 : index
    %94 = vector.load %arg9[%c0_34, %c0_35, %c0_36] : memref<2x32x64xbf16, #tpu.memory_space<vmem>>, vector<1x32x64xbf16>
    %95 = vector.shape_cast %94 : vector<1x32x64xbf16> to vector<32x64xbf16>
    %cst_37 = arith.constant dense<0.000000e+00> : vector<16x64xf32>
    %96 = tpu.matmul %93, %95, %cst_37 {dimension_numbers = #tpu.dot_dimension_numbers<[1], [0], [0], [1], [0, 0, 1, 1], [], []>} : vector<16x32xbf16>, vector<32x64xbf16>, vector<16x64xf32> -> vector<16x64xf32>
    %c0_38 = arith.constant 0 : index
    %c0_39 = arith.constant 0 : index
    %c0_40 = arith.constant 0 : index
    %97 = vector.load %arg10[%c0_38, %c0_39, %c0_40] : memref<2x1x64xf32, #tpu.memory_space<vmem>>, vector<1x1x64xf32>
    %98 = vector.shape_cast %97 : vector<1x1x64xf32> to vector<1x64xf32>
    %99 = vector.broadcast %98 : vector<1x64xf32> to vector<16x64xf32>
    %100 = arith.addf %96, %99 : vector<16x64xf32>
    %cst_41 = arith.constant 0.000000e+00 : f32
    %101 = vector.broadcast %cst_41 : f32 to vector<16x64xf32>
    %102 = arith.maximumf %100, %101 : vector<16x64xf32>
    %103 = arith.truncf %102 : vector<16x64xf32> to vector<16x64xbf16>
    %c0_42 = arith.constant 0 : index
    %c0_43 = arith.constant 0 : index
    %c0_44 = arith.constant 0 : index
    %104 = vector.load %arg11[%c0_42, %c0_43, %c0_44] : memref<2x64x32xbf16, #tpu.memory_space<vmem>>, vector<1x64x32xbf16>
    %105 = vector.shape_cast %104 : vector<1x64x32xbf16> to vector<64x32xbf16>
    %cst_45 = arith.constant dense<0.000000e+00> : vector<16x32xf32>
    %106 = tpu.matmul %103, %105, %cst_45 {dimension_numbers = #tpu.dot_dimension_numbers<[1], [0], [0], [1], [0, 0, 1, 1], [], []>} : vector<16x64xbf16>, vector<64x32xbf16>, vector<16x32xf32> -> vector<16x32xf32>
    %c0_46 = arith.constant 0 : index
    %c0_47 = arith.constant 0 : index
    %c0_48 = arith.constant 0 : index
    %107 = vector.load %arg12[%c0_46, %c0_47, %c0_48] : memref<2x1x32xf32, #tpu.memory_space<vmem>>, vector<1x1x32xf32>
    %108 = vector.shape_cast %107 : vector<1x1x32xf32> to vector<1x32xf32>
    %109 = vector.broadcast %108 : vector<1x32xf32> to vector<16x32xf32>
    %110 = arith.addf %106, %109 : vector<16x32xf32>
    %111 = arith.addf %92, %110 : vector<16x32xf32>
    %c0_49 = arith.constant 0 : index
    %c0_50 = arith.constant 0 : index
    %c0_51 = arith.constant 0 : index
    %112 = vector.load %arg13[%c0_49, %c0_50, %c0_51] : memref<2x1x32xf32, #tpu.memory_space<vmem>>, vector<1x1x32xf32>
    %113 = vector.shape_cast %112 : vector<1x1x32xf32> to vector<1x32xf32>
    %c0_52 = arith.constant 0 : index
    %c0_53 = arith.constant 0 : index
    %c0_54 = arith.constant 0 : index
    %114 = vector.load %arg14[%c0_52, %c0_53, %c0_54] : memref<2x1x32xf32, #tpu.memory_space<vmem>>, vector<1x1x32xf32>
    %115 = vector.shape_cast %114 : vector<1x1x32xf32> to vector<1x32xf32>
    %cst_55 = arith.constant dense<0.000000e+00> : vector<16xf32>
    %116 = vector.multi_reduction <add>, %111, %cst_55 [1] : vector<16x32xf32> to vector<16xf32>
    %117 = vector.shape_cast %116 : vector<16xf32> to vector<16x1xf32>
    %cst_56 = arith.constant 3.200000e+01 : f32
    %118 = vector.broadcast %cst_56 : f32 to vector<16x1xf32>
    %119 = arith.divf %117, %118 : vector<16x1xf32>
    %120 = vector.broadcast %119 : vector<16x1xf32> to vector<16x32xf32>
    %121 = arith.subf %111, %120 : vector<16x32xf32>
    %122 = arith.mulf %121, %121 : vector<16x32xf32>
    %cst_57 = arith.constant dense<0.000000e+00> : vector<16xf32>
    %123 = vector.multi_reduction <add>, %122, %cst_57 [1] : vector<16x32xf32> to vector<16xf32>
    %124 = vector.shape_cast %123 : vector<16xf32> to vector<16x1xf32>
    %cst_58 = arith.constant 3.200000e+01 : f32
    %125 = vector.broadcast %cst_58 : f32 to vector<16x1xf32>
    %126 = arith.divf %124, %125 : vector<16x1xf32>
    %127 = vector.broadcast %119 : vector<16x1xf32> to vector<16x32xf32>
    %128 = arith.subf %111, %127 : vector<16x32xf32>
    %cst_59 = arith.constant 9.99999974E-6 : f32
    %129 = vector.broadcast %cst_59 : f32 to vector<16x1xf32>
    %130 = arith.addf %126, %129 : vector<16x1xf32>
    %131 = math.rsqrt %130 : vector<16x1xf32>
    %132 = vector.broadcast %131 : vector<16x1xf32> to vector<16x32xf32>
    %133 = arith.mulf %128, %132 : vector<16x32xf32>
    %134 = vector.broadcast %113 : vector<1x32xf32> to vector<16x32xf32>
    %135 = arith.mulf %133, %134 : vector<16x32xf32>
    %136 = vector.broadcast %115 : vector<1x32xf32> to vector<16x32xf32>
    %137 = arith.addf %135, %136 : vector<16x32xf32>
    %138 = vector.shape_cast %137 : vector<16x32xf32> to vector<2x8x32xf32>
    %139 = vector.shape_cast %138 : vector<2x8x32xf32> to vector<16x32xf32>
    %140 = arith.truncf %139 : vector<16x32xf32> to vector<16x32xbf16>
    %c1 = arith.constant 1 : index
    %c0_60 = arith.constant 0 : index
    %c0_61 = arith.constant 0 : index
    %141 = vector.load %arg3[%c1, %c0_60, %c0_61] : memref<2x32x96xbf16, #tpu.memory_space<vmem>>, vector<1x32x96xbf16>
    %142 = vector.shape_cast %141 : vector<1x32x96xbf16> to vector<32x96xbf16>
    %cst_62 = arith.constant dense<0.000000e+00> : vector<16x96xf32>
    %143 = tpu.matmul %140, %142, %cst_62 {dimension_numbers = #tpu.dot_dimension_numbers<[1], [0], [0], [1], [0, 0, 1, 1], [], []>} : vector<16x32xbf16>, vector<32x96xbf16>, vector<16x96xf32> -> vector<16x96xf32>
    %c1_63 = arith.constant 1 : index
    %c0_64 = arith.constant 0 : index
    %c0_65 = arith.constant 0 : index
    %144 = vector.load %arg4[%c1_63, %c0_64, %c0_65] : memref<2x1x96xf32, #tpu.memory_space<vmem>>, vector<1x1x96xf32>
    %145 = vector.shape_cast %144 : vector<1x1x96xf32> to vector<1x96xf32>
    %146 = vector.broadcast %145 : vector<1x96xf32> to vector<16x96xf32>
    %147 = arith.addf %143, %146 : vector<16x96xf32>
    %148 = arith.truncf %147 : vector<16x96xf32> to vector<16x96xbf16>
    %149 = vector.shape_cast %148 : vector<16x96xbf16> to vector<2x8x96xbf16>
    %150 = vector.extract_strided_slice %149 {offsets = [0, 0, 0], sizes = [2, 8, 32], strides = [1, 1, 1]} : vector<2x8x96xbf16> to vector<2x8x32xbf16>
    %151 = vector.extract_strided_slice %149 {offsets = [0, 0, 32], sizes = [2, 8, 32], strides = [1, 1, 1]} : vector<2x8x96xbf16> to vector<2x8x32xbf16>
    %152 = vector.extract_strided_slice %149 {offsets = [0, 0, 64], sizes = [2, 8, 32], strides = [1, 1, 1]} : vector<2x8x96xbf16> to vector<2x8x32xbf16>
    %153 = vector.extract_strided_slice %150 {offsets = [0, 0, 0], sizes = [2, 8, 8], strides = [1, 1, 1]} : vector<2x8x32xbf16> to vector<2x8x8xbf16>
    %154 = vector.extract_strided_slice %150 {offsets = [0, 0, 8], sizes = [2, 8, 8], strides = [1, 1, 1]} : vector<2x8x32xbf16> to vector<2x8x8xbf16>
    %155 = vector.extract_strided_slice %150 {offsets = [0, 0, 16], sizes = [2, 8, 8], strides = [1, 1, 1]} : vector<2x8x32xbf16> to vector<2x8x8xbf16>
    %156 = vector.extract_strided_slice %150 {offsets = [0, 0, 24], sizes = [2, 8, 8], strides = [1, 1, 1]} : vector<2x8x32xbf16> to vector<2x8x8xbf16>
    %157 = tpu.concatenate %153, %154, %155, %156 in 0 : vector<2x8x8xbf16>, vector<2x8x8xbf16>, vector<2x8x8xbf16>, vector<2x8x8xbf16> -> vector<8x8x8xbf16>
    %158 = vector.extract_strided_slice %151 {offsets = [0, 0, 0], sizes = [2, 8, 8], strides = [1, 1, 1]} : vector<2x8x32xbf16> to vector<2x8x8xbf16>
    %159 = vector.extract_strided_slice %151 {offsets = [0, 0, 8], sizes = [2, 8, 8], strides = [1, 1, 1]} : vector<2x8x32xbf16> to vector<2x8x8xbf16>
    %160 = vector.extract_strided_slice %151 {offsets = [0, 0, 16], sizes = [2, 8, 8], strides = [1, 1, 1]} : vector<2x8x32xbf16> to vector<2x8x8xbf16>
    %161 = vector.extract_strided_slice %151 {offsets = [0, 0, 24], sizes = [2, 8, 8], strides = [1, 1, 1]} : vector<2x8x32xbf16> to vector<2x8x8xbf16>
    %162 = tpu.concatenate %158, %159, %160, %161 in 0 : vector<2x8x8xbf16>, vector<2x8x8xbf16>, vector<2x8x8xbf16>, vector<2x8x8xbf16> -> vector<8x8x8xbf16>
    %163 = vector.extract_strided_slice %152 {offsets = [0, 0, 0], sizes = [2, 8, 8], strides = [1, 1, 1]} : vector<2x8x32xbf16> to vector<2x8x8xbf16>
    %164 = vector.extract_strided_slice %152 {offsets = [0, 0, 8], sizes = [2, 8, 8], strides = [1, 1, 1]} : vector<2x8x32xbf16> to vector<2x8x8xbf16>
    %165 = vector.extract_strided_slice %152 {offsets = [0, 0, 16], sizes = [2, 8, 8], strides = [1, 1, 1]} : vector<2x8x32xbf16> to vector<2x8x8xbf16>
    %166 = vector.extract_strided_slice %152 {offsets = [0, 0, 24], sizes = [2, 8, 8], strides = [1, 1, 1]} : vector<2x8x32xbf16> to vector<2x8x8xbf16>
    %167 = tpu.concatenate %163, %164, %165, %166 in 0 : vector<2x8x8xbf16>, vector<2x8x8xbf16>, vector<2x8x8xbf16>, vector<2x8x8xbf16> -> vector<8x8x8xbf16>
    "tpu.trace_start"() <{level = 10 : i32, message = "nqd,nkd->nqk"}> : () -> ()
    %cst_66 = arith.constant dense<0.000000e+00> : vector<8x8x8xf32>
    %168 = tpu.matmul %157, %162, %cst_66 {dimension_numbers = #tpu.dot_dimension_numbers<[2], [2], [1], [1], [0, 0, 0, 1, 1, 1], [0], [0]>} : vector<8x8x8xbf16>, vector<8x8x8xbf16>, vector<8x8x8xf32> -> vector<8x8x8xf32>
    "tpu.trace_stop"() : () -> ()
    %169 = arith.addf %168, %8 : vector<8x8x8xf32>
    %cst_67 = arith.constant dense<0xFF800000> : vector<8x8xf32>
    %170 = vector.multi_reduction <maximumf>, %169, %cst_67 [2] : vector<8x8x8xf32> to vector<8x8xf32>
    %171 = vector.shape_cast %170 : vector<8x8xf32> to vector<8x8x1xf32>
    %172 = vector.broadcast %171 : vector<8x8x1xf32> to vector<8x8x8xf32>
    %173 = arith.subf %169, %172 : vector<8x8x8xf32>
    %174 = math.exp %173 : vector<8x8x8xf32>
    %cst_68 = arith.constant dense<0.000000e+00> : vector<8x8xf32>
    %175 = vector.multi_reduction <add>, %174, %cst_68 [2] : vector<8x8x8xf32> to vector<8x8xf32>
    %176 = vector.shape_cast %175 : vector<8x8xf32> to vector<8x8x1xf32>
    %177 = tpu.reciprocal %176 {approx = true} : vector<8x8x1xf32> -> vector<8x8x1xf32>
    %178 = vector.broadcast %177 : vector<8x8x1xf32> to vector<8x8x8xf32>
    %179 = arith.mulf %174, %178 : vector<8x8x8xf32>
    %180 = arith.truncf %179 : vector<8x8x8xf32> to vector<8x8x8xbf16>
    "tpu.trace_start"() <{level = 10 : i32, message = "nqk,nkd->nqd"}> : () -> ()
    %cst_69 = arith.constant dense<0.000000e+00> : vector<8x8x8xf32>
    %181 = tpu.matmul %180, %167, %cst_69 {dimension_numbers = #tpu.dot_dimension_numbers<[2], [1], [1], [2], [0, 0, 0, 1, 1, 2], [0], [0]>} : vector<8x8x8xbf16>, vector<8x8x8xbf16>, vector<8x8x8xf32> -> vector<8x8x8xf32>
    "tpu.trace_stop"() : () -> ()
    %182 = vector.extract_strided_slice %181 {offsets = [0, 0, 0], sizes = [2, 8, 8], strides = [1, 1, 1]} : vector<8x8x8xf32> to vector<2x8x8xf32>
    %183 = vector.extract_strided_slice %181 {offsets = [2, 0, 0], sizes = [2, 8, 8], strides = [1, 1, 1]} : vector<8x8x8xf32> to vector<2x8x8xf32>
    %184 = vector.extract_strided_slice %181 {offsets = [4, 0, 0], sizes = [2, 8, 8], strides = [1, 1, 1]} : vector<8x8x8xf32> to vector<2x8x8xf32>
    %185 = vector.extract_strided_slice %181 {offsets = [6, 0, 0], sizes = [2, 8, 8], strides = [1, 1, 1]} : vector<8x8x8xf32> to vector<2x8x8xf32>
    %186 = tpu.concatenate %182, %183, %184, %185 in 2 : vector<2x8x8xf32>, vector<2x8x8xf32>, vector<2x8x8xf32>, vector<2x8x8xf32> -> vector<2x8x32xf32>
    %187 = vector.shape_cast %186 : vector<2x8x32xf32> to vector<16x32xf32>
    %188 = arith.truncf %187 : vector<16x32xf32> to vector<16x32xbf16>
    %c1_70 = arith.constant 1 : index
    %c0_71 = arith.constant 0 : index
    %c0_72 = arith.constant 0 : index
    %189 = vector.load %arg5[%c1_70, %c0_71, %c0_72] : memref<2x32x32xbf16, #tpu.memory_space<vmem>>, vector<1x32x32xbf16>
    %190 = vector.shape_cast %189 : vector<1x32x32xbf16> to vector<32x32xbf16>
    %cst_73 = arith.constant dense<0.000000e+00> : vector<16x32xf32>
    %191 = tpu.matmul %188, %190, %cst_73 {dimension_numbers = #tpu.dot_dimension_numbers<[1], [0], [0], [1], [0, 0, 1, 1], [], []>} : vector<16x32xbf16>, vector<32x32xbf16>, vector<16x32xf32> -> vector<16x32xf32>
    %c1_74 = arith.constant 1 : index
    %c0_75 = arith.constant 0 : index
    %c0_76 = arith.constant 0 : index
    %192 = vector.load %arg6[%c1_74, %c0_75, %c0_76] : memref<2x1x32xf32, #tpu.memory_space<vmem>>, vector<1x1x32xf32>
    %193 = vector.shape_cast %192 : vector<1x1x32xf32> to vector<1x32xf32>
    %194 = vector.broadcast %193 : vector<1x32xf32> to vector<16x32xf32>
    %195 = arith.addf %191, %194 : vector<16x32xf32>
    %196 = arith.addf %139, %195 : vector<16x32xf32>
    %c1_77 = arith.constant 1 : index
    %c0_78 = arith.constant 0 : index
    %c0_79 = arith.constant 0 : index
    %197 = vector.load %arg7[%c1_77, %c0_78, %c0_79] : memref<2x1x32xf32, #tpu.memory_space<vmem>>, vector<1x1x32xf32>
    %198 = vector.shape_cast %197 : vector<1x1x32xf32> to vector<1x32xf32>
    %c1_80 = arith.constant 1 : index
    %c0_81 = arith.constant 0 : index
    %c0_82 = arith.constant 0 : index
    %199 = vector.load %arg8[%c1_80, %c0_81, %c0_82] : memref<2x1x32xf32, #tpu.memory_space<vmem>>, vector<1x1x32xf32>
    %200 = vector.shape_cast %199 : vector<1x1x32xf32> to vector<1x32xf32>
    %cst_83 = arith.constant dense<0.000000e+00> : vector<16xf32>
    %201 = vector.multi_reduction <add>, %196, %cst_83 [1] : vector<16x32xf32> to vector<16xf32>
    %202 = vector.shape_cast %201 : vector<16xf32> to vector<16x1xf32>
    %cst_84 = arith.constant 3.200000e+01 : f32
    %203 = vector.broadcast %cst_84 : f32 to vector<16x1xf32>
    %204 = arith.divf %202, %203 : vector<16x1xf32>
    %205 = vector.broadcast %204 : vector<16x1xf32> to vector<16x32xf32>
    %206 = arith.subf %196, %205 : vector<16x32xf32>
    %207 = arith.mulf %206, %206 : vector<16x32xf32>
    %cst_85 = arith.constant dense<0.000000e+00> : vector<16xf32>
    %208 = vector.multi_reduction <add>, %207, %cst_85 [1] : vector<16x32xf32> to vector<16xf32>
    %209 = vector.shape_cast %208 : vector<16xf32> to vector<16x1xf32>
    %cst_86 = arith.constant 3.200000e+01 : f32
    %210 = vector.broadcast %cst_86 : f32 to vector<16x1xf32>
    %211 = arith.divf %209, %210 : vector<16x1xf32>
    %212 = vector.broadcast %204 : vector<16x1xf32> to vector<16x32xf32>
    %213 = arith.subf %196, %212 : vector<16x32xf32>
    %cst_87 = arith.constant 9.99999974E-6 : f32
    %214 = vector.broadcast %cst_87 : f32 to vector<16x1xf32>
    %215 = arith.addf %211, %214 : vector<16x1xf32>
    %216 = math.rsqrt %215 : vector<16x1xf32>
    %217 = vector.broadcast %216 : vector<16x1xf32> to vector<16x32xf32>
    %218 = arith.mulf %213, %217 : vector<16x32xf32>
    %219 = vector.broadcast %198 : vector<1x32xf32> to vector<16x32xf32>
    %220 = arith.mulf %218, %219 : vector<16x32xf32>
    %221 = vector.broadcast %200 : vector<1x32xf32> to vector<16x32xf32>
    %222 = arith.addf %220, %221 : vector<16x32xf32>
    %223 = arith.truncf %222 : vector<16x32xf32> to vector<16x32xbf16>
    %c1_88 = arith.constant 1 : index
    %c0_89 = arith.constant 0 : index
    %c0_90 = arith.constant 0 : index
    %224 = vector.load %arg9[%c1_88, %c0_89, %c0_90] : memref<2x32x64xbf16, #tpu.memory_space<vmem>>, vector<1x32x64xbf16>
    %225 = vector.shape_cast %224 : vector<1x32x64xbf16> to vector<32x64xbf16>
    %cst_91 = arith.constant dense<0.000000e+00> : vector<16x64xf32>
    %226 = tpu.matmul %223, %225, %cst_91 {dimension_numbers = #tpu.dot_dimension_numbers<[1], [0], [0], [1], [0, 0, 1, 1], [], []>} : vector<16x32xbf16>, vector<32x64xbf16>, vector<16x64xf32> -> vector<16x64xf32>
    %c1_92 = arith.constant 1 : index
    %c0_93 = arith.constant 0 : index
    %c0_94 = arith.constant 0 : index
    %227 = vector.load %arg10[%c1_92, %c0_93, %c0_94] : memref<2x1x64xf32, #tpu.memory_space<vmem>>, vector<1x1x64xf32>
    %228 = vector.shape_cast %227 : vector<1x1x64xf32> to vector<1x64xf32>
    %229 = vector.broadcast %228 : vector<1x64xf32> to vector<16x64xf32>
    %230 = arith.addf %226, %229 : vector<16x64xf32>
    %cst_95 = arith.constant 0.000000e+00 : f32
    %231 = vector.broadcast %cst_95 : f32 to vector<16x64xf32>
    %232 = arith.maximumf %230, %231 : vector<16x64xf32>
    %233 = arith.truncf %232 : vector<16x64xf32> to vector<16x64xbf16>
    %c1_96 = arith.constant 1 : index
    %c0_97 = arith.constant 0 : index
    %c0_98 = arith.constant 0 : index
    %234 = vector.load %arg11[%c1_96, %c0_97, %c0_98] : memref<2x64x32xbf16, #tpu.memory_space<vmem>>, vector<1x64x32xbf16>
    %235 = vector.shape_cast %234 : vector<1x64x32xbf16> to vector<64x32xbf16>
    %cst_99 = arith.constant dense<0.000000e+00> : vector<16x32xf32>
    %236 = tpu.matmul %233, %235, %cst_99 {dimension_numbers = #tpu.dot_dimension_numbers<[1], [0], [0], [1], [0, 0, 1, 1], [], []>} : vector<16x64xbf16>, vector<64x32xbf16>, vector<16x32xf32> -> vector<16x32xf32>
    %c1_100 = arith.constant 1 : index
    %c0_101 = arith.constant 0 : index
    %c0_102 = arith.constant 0 : index
    %237 = vector.load %arg12[%c1_100, %c0_101, %c0_102] : memref<2x1x32xf32, #tpu.memory_space<vmem>>, vector<1x1x32xf32>
    %238 = vector.shape_cast %237 : vector<1x1x32xf32> to vector<1x32xf32>
    %239 = vector.broadcast %238 : vector<1x32xf32> to vector<16x32xf32>
    %240 = arith.addf %236, %239 : vector<16x32xf32>
    %241 = arith.addf %222, %240 : vector<16x32xf32>
    %c1_103 = arith.constant 1 : index
    %c0_104 = arith.constant 0 : index
    %c0_105 = arith.constant 0 : index
    %242 = vector.load %arg13[%c1_103, %c0_104, %c0_105] : memref<2x1x32xf32, #tpu.memory_space<vmem>>, vector<1x1x32xf32>
    %243 = vector.shape_cast %242 : vector<1x1x32xf32> to vector<1x32xf32>
    %c1_106 = arith.constant 1 : index
    %c0_107 = arith.constant 0 : index
    %c0_108 = arith.constant 0 : index
    %244 = vector.load %arg14[%c1_106, %c0_107, %c0_108] : memref<2x1x32xf32, #tpu.memory_space<vmem>>, vector<1x1x32xf32>
    %245 = vector.shape_cast %244 : vector<1x1x32xf32> to vector<1x32xf32>
    %cst_109 = arith.constant dense<0.000000e+00> : vector<16xf32>
    %246 = vector.multi_reduction <add>, %241, %cst_109 [1] : vector<16x32xf32> to vector<16xf32>
    %247 = vector.shape_cast %246 : vector<16xf32> to vector<16x1xf32>
    %cst_110 = arith.constant 3.200000e+01 : f32
    %248 = vector.broadcast %cst_110 : f32 to vector<16x1xf32>
    %249 = arith.divf %247, %248 : vector<16x1xf32>
    %250 = vector.broadcast %249 : vector<16x1xf32> to vector<16x32xf32>
    %251 = arith.subf %241, %250 : vector<16x32xf32>
    %252 = arith.mulf %251, %251 : vector<16x32xf32>
    %cst_111 = arith.constant dense<0.000000e+00> : vector<16xf32>
    %253 = vector.multi_reduction <add>, %252, %cst_111 [1] : vector<16x32xf32> to vector<16xf32>
    %254 = vector.shape_cast %253 : vector<16xf32> to vector<16x1xf32>
    %cst_112 = arith.constant 3.200000e+01 : f32
    %255 = vector.broadcast %cst_112 : f32 to vector<16x1xf32>
    %256 = arith.divf %254, %255 : vector<16x1xf32>
    %257 = vector.broadcast %249 : vector<16x1xf32> to vector<16x32xf32>
    %258 = arith.subf %241, %257 : vector<16x32xf32>
    %cst_113 = arith.constant 9.99999974E-6 : f32
    %259 = vector.broadcast %cst_113 : f32 to vector<16x1xf32>
    %260 = arith.addf %256, %259 : vector<16x1xf32>
    %261 = math.rsqrt %260 : vector<16x1xf32>
    %262 = vector.broadcast %261 : vector<16x1xf32> to vector<16x32xf32>
    %263 = arith.mulf %258, %262 : vector<16x32xf32>
    %264 = vector.broadcast %243 : vector<1x32xf32> to vector<16x32xf32>
    %265 = arith.mulf %263, %264 : vector<16x32xf32>
    %266 = vector.broadcast %245 : vector<1x32xf32> to vector<16x32xf32>
    %267 = arith.addf %265, %266 : vector<16x32xf32>
    %268 = vector.shape_cast %267 : vector<16x32xf32> to vector<2x8x32xf32>
    %269 = vector.shape_cast %268 : vector<2x8x32xf32> to vector<16x32xf32>
    %c0_114 = arith.constant 0 : index
    %c0_115 = arith.constant 0 : index
    %270 = vector.load %arg15[%c0_114, %c0_115] : memref<1x32xf32, #tpu.memory_space<vmem>>, vector<1x32xf32>
    %c0_116 = arith.constant 0 : index
    %c0_117 = arith.constant 0 : index
    %271 = vector.load %arg16[%c0_116, %c0_117] : memref<1x32xf32, #tpu.memory_space<vmem>>, vector<1x32xf32>
    %cst_118 = arith.constant dense<0.000000e+00> : vector<16xf32>
    %272 = vector.multi_reduction <add>, %269, %cst_118 [1] : vector<16x32xf32> to vector<16xf32>
    %273 = vector.shape_cast %272 : vector<16xf32> to vector<16x1xf32>
    %cst_119 = arith.constant 3.200000e+01 : f32
    %274 = vector.broadcast %cst_119 : f32 to vector<16x1xf32>
    %275 = arith.divf %273, %274 : vector<16x1xf32>
    %276 = vector.broadcast %275 : vector<16x1xf32> to vector<16x32xf32>
    %277 = arith.subf %269, %276 : vector<16x32xf32>
    %278 = arith.mulf %277, %277 : vector<16x32xf32>
    %cst_120 = arith.constant dense<0.000000e+00> : vector<16xf32>
    %279 = vector.multi_reduction <add>, %278, %cst_120 [1] : vector<16x32xf32> to vector<16xf32>
    %280 = vector.shape_cast %279 : vector<16xf32> to vector<16x1xf32>
    %cst_121 = arith.constant 3.200000e+01 : f32
    %281 = vector.broadcast %cst_121 : f32 to vector<16x1xf32>
    %282 = arith.divf %280, %281 : vector<16x1xf32>
    %283 = vector.broadcast %275 : vector<16x1xf32> to vector<16x32xf32>
    %284 = arith.subf %269, %283 : vector<16x32xf32>
    %cst_122 = arith.constant 9.99999974E-6 : f32
    %285 = vector.broadcast %cst_122 : f32 to vector<16x1xf32>
    %286 = arith.addf %282, %285 : vector<16x1xf32>
    %287 = math.rsqrt %286 : vector<16x1xf32>
    %288 = vector.broadcast %287 : vector<16x1xf32> to vector<16x32xf32>
    %289 = arith.mulf %284, %288 : vector<16x32xf32>
    %290 = vector.broadcast %270 : vector<1x32xf32> to vector<16x32xf32>
    %291 = arith.mulf %289, %290 : vector<16x32xf32>
    %292 = vector.broadcast %271 : vector<1x32xf32> to vector<16x32xf32>
    %293 = arith.addf %291, %292 : vector<16x32xf32>
    %294 = vector.shape_cast %293 : vector<16x32xf32> to vector<2x8x32xf32>
    %c0_123 = arith.constant 0 : index
    %c0_124 = arith.constant 0 : index
    %c0_125 = arith.constant 0 : index
    %295 = vector.load %arg17[%c0_123, %c0_124, %c0_125] : memref<2x8x32xf32, #tpu.memory_space<vmem>>, vector<2x8x32xf32>
    tpu.vector_store %arg17[%c0_123, %c0_124, %c0_125], %294 {strides = array<i32>} : memref<2x8x32xf32, #tpu.memory_space<vmem>>, vector<2x8x32xf32>,
    return
  }
}

module attributes {stable_mosaic.version = 11 : i64} {
  func.func @_decoder_stack_kernel(%arg0: memref<2x7x32xf32, #tpu.memory_space<vmem>>, %arg1: memref<2x8x32xf32, #tpu.memory_space<vmem>>, %arg2: memref<7x7xf32, #tpu.memory_space<vmem>>, %arg3: memref<2x7xf32, #tpu.memory_space<vmem>>, %arg4: memref<2x8xf32, #tpu.memory_space<vmem>>, %arg5: memref<2x32x96xbf16, #tpu.memory_space<vmem>>, %arg6: memref<2x1x96xf32, #tpu.memory_space<vmem>>, %arg7: memref<2x32x32xbf16, #tpu.memory_space<vmem>>, %arg8: memref<2x1x32xf32, #tpu.memory_space<vmem>>, %arg9: memref<2x1x32xf32, #tpu.memory_space<vmem>>, %arg10: memref<2x1x32xf32, #tpu.memory_space<vmem>>, %arg11: memref<2x32x32xbf16, #tpu.memory_space<vmem>>, %arg12: memref<2x1x32xf32, #tpu.memory_space<vmem>>, %arg13: memref<2x32x64xbf16, #tpu.memory_space<vmem>>, %arg14: memref<2x1x64xf32, #tpu.memory_space<vmem>>, %arg15: memref<2x32x32xbf16, #tpu.memory_space<vmem>>, %arg16: memref<2x1x32xf32, #tpu.memory_space<vmem>>, %arg17: memref<2x1x32xf32, #tpu.memory_space<vmem>>, %arg18: memref<2x1x32xf32, #tpu.memory_space<vmem>>, %arg19: memref<2x32x64xbf16, #tpu.memory_space<vmem>>, %arg20: memref<2x1x64xf32, #tpu.memory_space<vmem>>, %arg21: memref<2x64x32xbf16, #tpu.memory_space<vmem>>, %arg22: memref<2x1x32xf32, #tpu.memory_space<vmem>>, %arg23: memref<2x1x32xf32, #tpu.memory_space<vmem>>, %arg24: memref<2x1x32xf32, #tpu.memory_space<vmem>>, %arg25: memref<1x32xf32, #tpu.memory_space<vmem>>, %arg26: memref<1x32xf32, #tpu.memory_space<vmem>>, %arg27: memref<32x128xbf16, #tpu.memory_space<vmem>>, %arg28: memref<1x128xf32, #tpu.memory_space<vmem>>, %arg29: memref<2x7x128xf32, #tpu.memory_space<vmem>>) attributes {dimension_semantics = [], scalar_prefetch = 0 : i64, scratch_operands = 0 : i64, tpu.core_type = #tpu.core_type<tc>} {
    %c0 = arith.constant 0 : index
    %c0_0 = arith.constant 0 : index
    %c0_1 = arith.constant 0 : index
    %0 = vector.load %arg0[%c0, %c0_0, %c0_1] : memref<2x7x32xf32, #tpu.memory_space<vmem>>, vector<2x7x32xf32>
    %c0_2 = arith.constant 0 : index
    %c0_3 = arith.constant 0 : index
    %c0_4 = arith.constant 0 : index
    %1 = vector.load %arg1[%c0_2, %c0_3, %c0_4] : memref<2x8x32xf32, #tpu.memory_space<vmem>>, vector<2x8x32xf32>
    %c0_5 = arith.constant 0 : index
    %c0_6 = arith.constant 0 : index
    %2 = vector.load %arg2[%c0_5, %c0_6] : memref<7x7xf32, #tpu.memory_space<vmem>>, vector<7x7xf32>
    %3 = vector.shape_cast %2 : vector<7x7xf32> to vector<1x7x7xf32>
    %c0_7 = arith.constant 0 : index
    %c0_8 = arith.constant 0 : index
    %4 = vector.load %arg3[%c0_7, %c0_8] : memref<2x7xf32, #tpu.memory_space<vmem>>, vector<2x7xf32>
    %5 = vector.shape_cast %4 : vector<2x7xf32> to vector<2x1x7xf32>
    %6 = vector.broadcast %3 : vector<1x7x7xf32> to vector<2x7x7xf32>
    %7 = vector.broadcast %5 : vector<2x1x7xf32> to vector<2x7x7xf32>
    %8 = arith.addf %6, %7 : vector<2x7x7xf32>
    %9 = tpu.concatenate %8, %8, %8, %8 in 0 : vector<2x7x7xf32>, vector<2x7x7xf32>, vector<2x7x7xf32>, vector<2x7x7xf32> -> vector<8x7x7xf32>
    %c0_9 = arith.constant 0 : index
    %c0_10 = arith.constant 0 : index
    %10 = vector.load %arg4[%c0_9, %c0_10] : memref<2x8xf32, #tpu.memory_space<vmem>>, vector<2x8xf32>
    %11 = vector.shape_cast %10 : vector<2x8xf32> to vector<2x1x8xf32>
    %12 = vector.shape_cast %11 : vector<2x1x8xf32> to vector<2x1x8xf32>
    %13 = vector.broadcast %12 : vector<2x1x8xf32> to vector<2x7x8xf32>
    %14 = tpu.concatenate %13, %13, %13, %13 in 0 : vector<2x7x8xf32>, vector<2x7x8xf32>, vector<2x7x8xf32>, vector<2x7x8xf32> -> vector<8x7x8xf32>
    %15 = vector.shape_cast %1 : vector<2x8x32xf32> to vector<16x32xf32>
    %16 = arith.truncf %15 : vector<16x32xf32> to vector<16x32xbf16>
    %17 = vector.shape_cast %0 : vector<2x7x32xf32> to vector<14x32xf32>
    %18 = arith.truncf %17 : vector<14x32xf32> to vector<14x32xbf16>
    %c0_11 = arith.constant 0 : index
    %c0_12 = arith.constant 0 : index
    %c0_13 = arith.constant 0 : index
    %19 = vector.load %arg5[%c0_11, %c0_12, %c0_13] : memref<2x32x96xbf16, #tpu.memory_space<vmem>>, vector<1x32x96xbf16>
    %20 = vector.shape_cast %19 : vector<1x32x96xbf16> to vector<32x96xbf16>
    %cst = arith.constant dense<0.000000e+00> : vector<14x96xf32>
    %21 = tpu.matmul %18, %20, %cst {dimension_numbers = #tpu.dot_dimension_numbers<[1], [0], [0], [1], [0, 0, 1, 1], [], []>} : vector<14x32xbf16>, vector<32x96xbf16>, vector<14x96xf32> -> vector<14x96xf32>
    %c0_14 = arith.constant 0 : index
    %c0_15 = arith.constant 0 : index
    %c0_16 = arith.constant 0 : index
    %22 = vector.load %arg6[%c0_14, %c0_15, %c0_16] : memref<2x1x96xf32, #tpu.memory_space<vmem>>, vector<1x1x96xf32>
    %23 = vector.shape_cast %22 : vector<1x1x96xf32> to vector<1x96xf32>
    %24 = vector.broadcast %23 : vector<1x96xf32> to vector<14x96xf32>
    %25 = arith.addf %21, %24 : vector<14x96xf32>
    %26 = arith.truncf %25 : vector<14x96xf32> to vector<14x96xbf16>
    %27 = vector.shape_cast %26 : vector<14x96xbf16> to vector<2x7x96xbf16>
    %28 = vector.extract_strided_slice %27 {offsets = [0, 0, 0], sizes = [2, 7, 32], strides = [1, 1, 1]} : vector<2x7x96xbf16> to vector<2x7x32xbf16>
    %29 = vector.extract_strided_slice %27 {offsets = [0, 0, 32], sizes = [2, 7, 32], strides = [1, 1, 1]} : vector<2x7x96xbf16> to vector<2x7x32xbf16>
    %30 = vector.extract_strided_slice %27 {offsets = [0, 0, 64], sizes = [2, 7, 32], strides = [1, 1, 1]} : vector<2x7x96xbf16> to vector<2x7x32xbf16>
    %31 = vector.extract_strided_slice %28 {offsets = [0, 0, 0], sizes = [2, 7, 8], strides = [1, 1, 1]} : vector<2x7x32xbf16> to vector<2x7x8xbf16>
    %32 = vector.extract_strided_slice %28 {offsets = [0, 0, 8], sizes = [2, 7, 8], strides = [1, 1, 1]} : vector<2x7x32xbf16> to vector<2x7x8xbf16>
    %33 = vector.extract_strided_slice %28 {offsets = [0, 0, 16], sizes = [2, 7, 8], strides = [1, 1, 1]} : vector<2x7x32xbf16> to vector<2x7x8xbf16>
    %34 = vector.extract_strided_slice %28 {offsets = [0, 0, 24], sizes = [2, 7, 8], strides = [1, 1, 1]} : vector<2x7x32xbf16> to vector<2x7x8xbf16>
    %35 = tpu.concatenate %31, %32, %33, %34 in 0 : vector<2x7x8xbf16>, vector<2x7x8xbf16>, vector<2x7x8xbf16>, vector<2x7x8xbf16> -> vector<8x7x8xbf16>
    %36 = vector.extract_strided_slice %29 {offsets = [0, 0, 0], sizes = [2, 7, 8], strides = [1, 1, 1]} : vector<2x7x32xbf16> to vector<2x7x8xbf16>
    %37 = vector.extract_strided_slice %29 {offsets = [0, 0, 8], sizes = [2, 7, 8], strides = [1, 1, 1]} : vector<2x7x32xbf16> to vector<2x7x8xbf16>
    %38 = vector.extract_strided_slice %29 {offsets = [0, 0, 16], sizes = [2, 7, 8], strides = [1, 1, 1]} : vector<2x7x32xbf16> to vector<2x7x8xbf16>
    %39 = vector.extract_strided_slice %29 {offsets = [0, 0, 24], sizes = [2, 7, 8], strides = [1, 1, 1]} : vector<2x7x32xbf16> to vector<2x7x8xbf16>
    %40 = tpu.concatenate %36, %37, %38, %39 in 0 : vector<2x7x8xbf16>, vector<2x7x8xbf16>, vector<2x7x8xbf16>, vector<2x7x8xbf16> -> vector<8x7x8xbf16>
    %41 = vector.extract_strided_slice %30 {offsets = [0, 0, 0], sizes = [2, 7, 8], strides = [1, 1, 1]} : vector<2x7x32xbf16> to vector<2x7x8xbf16>
    %42 = vector.extract_strided_slice %30 {offsets = [0, 0, 8], sizes = [2, 7, 8], strides = [1, 1, 1]} : vector<2x7x32xbf16> to vector<2x7x8xbf16>
    %43 = vector.extract_strided_slice %30 {offsets = [0, 0, 16], sizes = [2, 7, 8], strides = [1, 1, 1]} : vector<2x7x32xbf16> to vector<2x7x8xbf16>
    %44 = vector.extract_strided_slice %30 {offsets = [0, 0, 24], sizes = [2, 7, 8], strides = [1, 1, 1]} : vector<2x7x32xbf16> to vector<2x7x8xbf16>
    %45 = tpu.concatenate %41, %42, %43, %44 in 0 : vector<2x7x8xbf16>, vector<2x7x8xbf16>, vector<2x7x8xbf16>, vector<2x7x8xbf16> -> vector<8x7x8xbf16>
    "tpu.trace_start"() <{level = 10 : i32, message = "nqd,nkd->nqk"}> : () -> ()
    %cst_17 = arith.constant dense<0.000000e+00> : vector<8x7x7xf32>
    %46 = tpu.matmul %35, %40, %cst_17 {dimension_numbers = #tpu.dot_dimension_numbers<[2], [2], [1], [1], [0, 0, 0, 1, 1, 1], [0], [0]>} : vector<8x7x8xbf16>, vector<8x7x8xbf16>, vector<8x7x7xf32> -> vector<8x7x7xf32>
    "tpu.trace_stop"() : () -> ()
    %47 = arith.addf %46, %9 : vector<8x7x7xf32>
    %cst_18 = arith.constant dense<0xFF800000> : vector<8x7xf32>
    %48 = vector.multi_reduction <maximumf>, %47, %cst_18 [2] : vector<8x7x7xf32> to vector<8x7xf32>
    %49 = vector.shape_cast %48 : vector<8x7xf32> to vector<8x7x1xf32>
    %50 = vector.broadcast %49 : vector<8x7x1xf32> to vector<8x7x7xf32>
    %51 = arith.subf %47, %50 : vector<8x7x7xf32>
    %52 = math.exp %51 : vector<8x7x7xf32>
    %cst_19 = arith.constant dense<0.000000e+00> : vector<8x7xf32>
    %53 = vector.multi_reduction <add>, %52, %cst_19 [2] : vector<8x7x7xf32> to vector<8x7xf32>
    %54 = vector.shape_cast %53 : vector<8x7xf32> to vector<8x7x1xf32>
    %55 = tpu.reciprocal %54 {approx = true} : vector<8x7x1xf32> -> vector<8x7x1xf32>
    %56 = vector.broadcast %55 : vector<8x7x1xf32> to vector<8x7x7xf32>
    %57 = arith.mulf %52, %56 : vector<8x7x7xf32>
    %58 = arith.truncf %57 : vector<8x7x7xf32> to vector<8x7x7xbf16>
    "tpu.trace_start"() <{level = 10 : i32, message = "nqk,nkd->nqd"}> : () -> ()
    %cst_20 = arith.constant dense<0.000000e+00> : vector<8x7x8xf32>
    %59 = tpu.matmul %58, %45, %cst_20 {dimension_numbers = #tpu.dot_dimension_numbers<[2], [1], [1], [2], [0, 0, 0, 1, 1, 2], [0], [0]>} : vector<8x7x7xbf16>, vector<8x7x8xbf16>, vector<8x7x8xf32> -> vector<8x7x8xf32>
    "tpu.trace_stop"() : () -> ()
    %60 = vector.extract_strided_slice %59 {offsets = [0, 0, 0], sizes = [2, 7, 8], strides = [1, 1, 1]} : vector<8x7x8xf32> to vector<2x7x8xf32>
    %61 = vector.extract_strided_slice %59 {offsets = [2, 0, 0], sizes = [2, 7, 8], strides = [1, 1, 1]} : vector<8x7x8xf32> to vector<2x7x8xf32>
    %62 = vector.extract_strided_slice %59 {offsets = [4, 0, 0], sizes = [2, 7, 8], strides = [1, 1, 1]} : vector<8x7x8xf32> to vector<2x7x8xf32>
    %63 = vector.extract_strided_slice %59 {offsets = [6, 0, 0], sizes = [2, 7, 8], strides = [1, 1, 1]} : vector<8x7x8xf32> to vector<2x7x8xf32>
    %64 = tpu.concatenate %60, %61, %62, %63 in 2 : vector<2x7x8xf32>, vector<2x7x8xf32>, vector<2x7x8xf32>, vector<2x7x8xf32> -> vector<2x7x32xf32>
    %65 = vector.shape_cast %64 : vector<2x7x32xf32> to vector<14x32xf32>
    %66 = arith.truncf %65 : vector<14x32xf32> to vector<14x32xbf16>
    %c0_21 = arith.constant 0 : index
    %c0_22 = arith.constant 0 : index
    %c0_23 = arith.constant 0 : index
    %67 = vector.load %arg7[%c0_21, %c0_22, %c0_23] : memref<2x32x32xbf16, #tpu.memory_space<vmem>>, vector<1x32x32xbf16>
    %68 = vector.shape_cast %67 : vector<1x32x32xbf16> to vector<32x32xbf16>
    %cst_24 = arith.constant dense<0.000000e+00> : vector<14x32xf32>
    %69 = tpu.matmul %66, %68, %cst_24 {dimension_numbers = #tpu.dot_dimension_numbers<[1], [0], [0], [1], [0, 0, 1, 1], [], []>} : vector<14x32xbf16>, vector<32x32xbf16>, vector<14x32xf32> -> vector<14x32xf32>
    %c0_25 = arith.constant 0 : index
    %c0_26 = arith.constant 0 : index
    %c0_27 = arith.constant 0 : index
    %70 = vector.load %arg8[%c0_25, %c0_26, %c0_27] : memref<2x1x32xf32, #tpu.memory_space<vmem>>, vector<1x1x32xf32>
    %71 = vector.shape_cast %70 : vector<1x1x32xf32> to vector<1x32xf32>
    %72 = vector.broadcast %71 : vector<1x32xf32> to vector<14x32xf32>
    %73 = arith.addf %69, %72 : vector<14x32xf32>
    %74 = arith.addf %17, %73 : vector<14x32xf32>
    %c0_28 = arith.constant 0 : index
    %c0_29 = arith.constant 0 : index
    %c0_30 = arith.constant 0 : index
    %75 = vector.load %arg9[%c0_28, %c0_29, %c0_30] : memref<2x1x32xf32, #tpu.memory_space<vmem>>, vector<1x1x32xf32>
    %76 = vector.shape_cast %75 : vector<1x1x32xf32> to vector<1x32xf32>
    %c0_31 = arith.constant 0 : index
    %c0_32 = arith.constant 0 : index
    %c0_33 = arith.constant 0 : index
    %77 = vector.load %arg10[%c0_31, %c0_32, %c0_33] : memref<2x1x32xf32, #tpu.memory_space<vmem>>, vector<1x1x32xf32>
    %78 = vector.shape_cast %77 : vector<1x1x32xf32> to vector<1x32xf32>
    %cst_34 = arith.constant dense<0.000000e+00> : vector<14xf32>
    %79 = vector.multi_reduction <add>, %74, %cst_34 [1] : vector<14x32xf32> to vector<14xf32>
    %80 = vector.shape_cast %79 : vector<14xf32> to vector<14x1xf32>
    %cst_35 = arith.constant 3.200000e+01 : f32
    %81 = vector.broadcast %cst_35 : f32 to vector<14x1xf32>
    %82 = arith.divf %80, %81 : vector<14x1xf32>
    %83 = vector.broadcast %82 : vector<14x1xf32> to vector<14x32xf32>
    %84 = arith.subf %74, %83 : vector<14x32xf32>
    %85 = arith.mulf %84, %84 : vector<14x32xf32>
    %cst_36 = arith.constant dense<0.000000e+00> : vector<14xf32>
    %86 = vector.multi_reduction <add>, %85, %cst_36 [1] : vector<14x32xf32> to vector<14xf32>
    %87 = vector.shape_cast %86 : vector<14xf32> to vector<14x1xf32>
    %cst_37 = arith.constant 3.200000e+01 : f32
    %88 = vector.broadcast %cst_37 : f32 to vector<14x1xf32>
    %89 = arith.divf %87, %88 : vector<14x1xf32>
    %90 = vector.broadcast %82 : vector<14x1xf32> to vector<14x32xf32>
    %91 = arith.subf %74, %90 : vector<14x32xf32>
    %cst_38 = arith.constant 9.99999974E-6 : f32
    %92 = vector.broadcast %cst_38 : f32 to vector<14x1xf32>
    %93 = arith.addf %89, %92 : vector<14x1xf32>
    %94 = math.rsqrt %93 : vector<14x1xf32>
    %95 = vector.broadcast %94 : vector<14x1xf32> to vector<14x32xf32>
    %96 = arith.mulf %91, %95 : vector<14x32xf32>
    %97 = vector.broadcast %76 : vector<1x32xf32> to vector<14x32xf32>
    %98 = arith.mulf %96, %97 : vector<14x32xf32>
    %99 = vector.broadcast %78 : vector<1x32xf32> to vector<14x32xf32>
    %100 = arith.addf %98, %99 : vector<14x32xf32>
    %101 = arith.truncf %100 : vector<14x32xf32> to vector<14x32xbf16>
    %c0_39 = arith.constant 0 : index
    %c0_40 = arith.constant 0 : index
    %c0_41 = arith.constant 0 : index
    %102 = vector.load %arg11[%c0_39, %c0_40, %c0_41] : memref<2x32x32xbf16, #tpu.memory_space<vmem>>, vector<1x32x32xbf16>
    %103 = vector.shape_cast %102 : vector<1x32x32xbf16> to vector<32x32xbf16>
    %cst_42 = arith.constant dense<0.000000e+00> : vector<14x32xf32>
    %104 = tpu.matmul %101, %103, %cst_42 {dimension_numbers = #tpu.dot_dimension_numbers<[1], [0], [0], [1], [0, 0, 1, 1], [], []>} : vector<14x32xbf16>, vector<32x32xbf16>, vector<14x32xf32> -> vector<14x32xf32>
    %c0_43 = arith.constant 0 : index
    %c0_44 = arith.constant 0 : index
    %c0_45 = arith.constant 0 : index
    %105 = vector.load %arg12[%c0_43, %c0_44, %c0_45] : memref<2x1x32xf32, #tpu.memory_space<vmem>>, vector<1x1x32xf32>
    %106 = vector.shape_cast %105 : vector<1x1x32xf32> to vector<1x32xf32>
    %107 = vector.broadcast %106 : vector<1x32xf32> to vector<14x32xf32>
    %108 = arith.addf %104, %107 : vector<14x32xf32>
    %109 = arith.truncf %108 : vector<14x32xf32> to vector<14x32xbf16>
    %110 = vector.shape_cast %109 : vector<14x32xbf16> to vector<2x7x32xbf16>
    %c0_46 = arith.constant 0 : index
    %c0_47 = arith.constant 0 : index
    %c0_48 = arith.constant 0 : index
    %111 = vector.load %arg13[%c0_46, %c0_47, %c0_48] : memref<2x32x64xbf16, #tpu.memory_space<vmem>>, vector<1x32x64xbf16>
    %112 = vector.shape_cast %111 : vector<1x32x64xbf16> to vector<32x64xbf16>
    %cst_49 = arith.constant dense<0.000000e+00> : vector<16x64xf32>
    %113 = tpu.matmul %16, %112, %cst_49 {dimension_numbers = #tpu.dot_dimension_numbers<[1], [0], [0], [1], [0, 0, 1, 1], [], []>} : vector<16x32xbf16>, vector<32x64xbf16>, vector<16x64xf32> -> vector<16x64xf32>
    %c0_50 = arith.constant 0 : index
    %c0_51 = arith.constant 0 : index
    %c0_52 = arith.constant 0 : index
    %114 = vector.load %arg14[%c0_50, %c0_51, %c0_52] : memref<2x1x64xf32, #tpu.memory_space<vmem>>, vector<1x1x64xf32>
    %115 = vector.shape_cast %114 : vector<1x1x64xf32> to vector<1x64xf32>
    %116 = vector.broadcast %115 : vector<1x64xf32> to vector<16x64xf32>
    %117 = arith.addf %113, %116 : vector<16x64xf32>
    %118 = arith.truncf %117 : vector<16x64xf32> to vector<16x64xbf16>
    %119 = vector.shape_cast %118 : vector<16x64xbf16> to vector<2x8x64xbf16>
    %120 = vector.extract_strided_slice %119 {offsets = [0, 0, 0], sizes = [2, 8, 32], strides = [1, 1, 1]} : vector<2x8x64xbf16> to vector<2x8x32xbf16>
    %121 = vector.extract_strided_slice %119 {offsets = [0, 0, 32], sizes = [2, 8, 32], strides = [1, 1, 1]} : vector<2x8x64xbf16> to vector<2x8x32xbf16>
    %122 = vector.extract_strided_slice %110 {offsets = [0, 0, 0], sizes = [2, 7, 8], strides = [1, 1, 1]} : vector<2x7x32xbf16> to vector<2x7x8xbf16>
    %123 = vector.extract_strided_slice %110 {offsets = [0, 0, 8], sizes = [2, 7, 8], strides = [1, 1, 1]} : vector<2x7x32xbf16> to vector<2x7x8xbf16>
    %124 = vector.extract_strided_slice %110 {offsets = [0, 0, 16], sizes = [2, 7, 8], strides = [1, 1, 1]} : vector<2x7x32xbf16> to vector<2x7x8xbf16>
    %125 = vector.extract_strided_slice %110 {offsets = [0, 0, 24], sizes = [2, 7, 8], strides = [1, 1, 1]} : vector<2x7x32xbf16> to vector<2x7x8xbf16>
    %126 = tpu.concatenate %122, %123, %124, %125 in 0 : vector<2x7x8xbf16>, vector<2x7x8xbf16>, vector<2x7x8xbf16>, vector<2x7x8xbf16> -> vector<8x7x8xbf16>
    %127 = vector.extract_strided_slice %120 {offsets = [0, 0, 0], sizes = [2, 8, 8], strides = [1, 1, 1]} : vector<2x8x32xbf16> to vector<2x8x8xbf16>
    %128 = vector.extract_strided_slice %120 {offsets = [0, 0, 8], sizes = [2, 8, 8], strides = [1, 1, 1]} : vector<2x8x32xbf16> to vector<2x8x8xbf16>
    %129 = vector.extract_strided_slice %120 {offsets = [0, 0, 16], sizes = [2, 8, 8], strides = [1, 1, 1]} : vector<2x8x32xbf16> to vector<2x8x8xbf16>
    %130 = vector.extract_strided_slice %120 {offsets = [0, 0, 24], sizes = [2, 8, 8], strides = [1, 1, 1]} : vector<2x8x32xbf16> to vector<2x8x8xbf16>
    %131 = tpu.concatenate %127, %128, %129, %130 in 0 : vector<2x8x8xbf16>, vector<2x8x8xbf16>, vector<2x8x8xbf16>, vector<2x8x8xbf16> -> vector<8x8x8xbf16>
    %132 = vector.extract_strided_slice %121 {offsets = [0, 0, 0], sizes = [2, 8, 8], strides = [1, 1, 1]} : vector<2x8x32xbf16> to vector<2x8x8xbf16>
    %133 = vector.extract_strided_slice %121 {offsets = [0, 0, 8], sizes = [2, 8, 8], strides = [1, 1, 1]} : vector<2x8x32xbf16> to vector<2x8x8xbf16>
    %134 = vector.extract_strided_slice %121 {offsets = [0, 0, 16], sizes = [2, 8, 8], strides = [1, 1, 1]} : vector<2x8x32xbf16> to vector<2x8x8xbf16>
    %135 = vector.extract_strided_slice %121 {offsets = [0, 0, 24], sizes = [2, 8, 8], strides = [1, 1, 1]} : vector<2x8x32xbf16> to vector<2x8x8xbf16>
    %136 = tpu.concatenate %132, %133, %134, %135 in 0 : vector<2x8x8xbf16>, vector<2x8x8xbf16>, vector<2x8x8xbf16>, vector<2x8x8xbf16> -> vector<8x8x8xbf16>
    "tpu.trace_start"() <{level = 10 : i32, message = "nqd,nkd->nqk"}> : () -> ()
    %cst_53 = arith.constant dense<0.000000e+00> : vector<8x7x8xf32>
    %137 = tpu.matmul %126, %131, %cst_53 {dimension_numbers = #tpu.dot_dimension_numbers<[2], [2], [1], [1], [0, 0, 0, 1, 1, 1], [0], [0]>} : vector<8x7x8xbf16>, vector<8x8x8xbf16>, vector<8x7x8xf32> -> vector<8x7x8xf32>
    "tpu.trace_stop"() : () -> ()
    %138 = arith.addf %137, %14 : vector<8x7x8xf32>
    %cst_54 = arith.constant dense<0xFF800000> : vector<8x7xf32>
    %139 = vector.multi_reduction <maximumf>, %138, %cst_54 [2] : vector<8x7x8xf32> to vector<8x7xf32>
    %140 = vector.shape_cast %139 : vector<8x7xf32> to vector<8x7x1xf32>
    %141 = vector.broadcast %140 : vector<8x7x1xf32> to vector<8x7x8xf32>
    %142 = arith.subf %138, %141 : vector<8x7x8xf32>
    %143 = math.exp %142 : vector<8x7x8xf32>
    %cst_55 = arith.constant dense<0.000000e+00> : vector<8x7xf32>
    %144 = vector.multi_reduction <add>, %143, %cst_55 [2] : vector<8x7x8xf32> to vector<8x7xf32>
    %145 = vector.shape_cast %144 : vector<8x7xf32> to vector<8x7x1xf32>
    %146 = tpu.reciprocal %145 {approx = true} : vector<8x7x1xf32> -> vector<8x7x1xf32>
    %147 = vector.broadcast %146 : vector<8x7x1xf32> to vector<8x7x8xf32>
    %148 = arith.mulf %143, %147 : vector<8x7x8xf32>
    %149 = arith.truncf %148 : vector<8x7x8xf32> to vector<8x7x8xbf16>
    "tpu.trace_start"() <{level = 10 : i32, message = "nqk,nkd->nqd"}> : () -> ()
    %cst_56 = arith.constant dense<0.000000e+00> : vector<8x7x8xf32>
    %150 = tpu.matmul %149, %136, %cst_56 {dimension_numbers = #tpu.dot_dimension_numbers<[2], [1], [1], [2], [0, 0, 0, 1, 1, 2], [0], [0]>} : vector<8x7x8xbf16>, vector<8x8x8xbf16>, vector<8x7x8xf32> -> vector<8x7x8xf32>
    "tpu.trace_stop"() : () -> ()
    %151 = vector.extract_strided_slice %150 {offsets = [0, 0, 0], sizes = [2, 7, 8], strides = [1, 1, 1]} : vector<8x7x8xf32> to vector<2x7x8xf32>
    %152 = vector.extract_strided_slice %150 {offsets = [2, 0, 0], sizes = [2, 7, 8], strides = [1, 1, 1]} : vector<8x7x8xf32> to vector<2x7x8xf32>
    %153 = vector.extract_strided_slice %150 {offsets = [4, 0, 0], sizes = [2, 7, 8], strides = [1, 1, 1]} : vector<8x7x8xf32> to vector<2x7x8xf32>
    %154 = vector.extract_strided_slice %150 {offsets = [6, 0, 0], sizes = [2, 7, 8], strides = [1, 1, 1]} : vector<8x7x8xf32> to vector<2x7x8xf32>
    %155 = tpu.concatenate %151, %152, %153, %154 in 2 : vector<2x7x8xf32>, vector<2x7x8xf32>, vector<2x7x8xf32>, vector<2x7x8xf32> -> vector<2x7x32xf32>
    %156 = vector.shape_cast %155 : vector<2x7x32xf32> to vector<14x32xf32>
    %157 = arith.truncf %156 : vector<14x32xf32> to vector<14x32xbf16>
    %c0_57 = arith.constant 0 : index
    %c0_58 = arith.constant 0 : index
    %c0_59 = arith.constant 0 : index
    %158 = vector.load %arg15[%c0_57, %c0_58, %c0_59] : memref<2x32x32xbf16, #tpu.memory_space<vmem>>, vector<1x32x32xbf16>
    %159 = vector.shape_cast %158 : vector<1x32x32xbf16> to vector<32x32xbf16>
    %cst_60 = arith.constant dense<0.000000e+00> : vector<14x32xf32>
    %160 = tpu.matmul %157, %159, %cst_60 {dimension_numbers = #tpu.dot_dimension_numbers<[1], [0], [0], [1], [0, 0, 1, 1], [], []>} : vector<14x32xbf16>, vector<32x32xbf16>, vector<14x32xf32> -> vector<14x32xf32>
    %c0_61 = arith.constant 0 : index
    %c0_62 = arith.constant 0 : index
    %c0_63 = arith.constant 0 : index
    %161 = vector.load %arg16[%c0_61, %c0_62, %c0_63] : memref<2x1x32xf32, #tpu.memory_space<vmem>>, vector<1x1x32xf32>
    %162 = vector.shape_cast %161 : vector<1x1x32xf32> to vector<1x32xf32>
    %163 = vector.broadcast %162 : vector<1x32xf32> to vector<14x32xf32>
    %164 = arith.addf %160, %163 : vector<14x32xf32>
    %165 = arith.addf %100, %164 : vector<14x32xf32>
    %c0_64 = arith.constant 0 : index
    %c0_65 = arith.constant 0 : index
    %c0_66 = arith.constant 0 : index
    %166 = vector.load %arg17[%c0_64, %c0_65, %c0_66] : memref<2x1x32xf32, #tpu.memory_space<vmem>>, vector<1x1x32xf32>
    %167 = vector.shape_cast %166 : vector<1x1x32xf32> to vector<1x32xf32>
    %c0_67 = arith.constant 0 : index
    %c0_68 = arith.constant 0 : index
    %c0_69 = arith.constant 0 : index
    %168 = vector.load %arg18[%c0_67, %c0_68, %c0_69] : memref<2x1x32xf32, #tpu.memory_space<vmem>>, vector<1x1x32xf32>
    %169 = vector.shape_cast %168 : vector<1x1x32xf32> to vector<1x32xf32>
    %cst_70 = arith.constant dense<0.000000e+00> : vector<14xf32>
    %170 = vector.multi_reduction <add>, %165, %cst_70 [1] : vector<14x32xf32> to vector<14xf32>
    %171 = vector.shape_cast %170 : vector<14xf32> to vector<14x1xf32>
    %cst_71 = arith.constant 3.200000e+01 : f32
    %172 = vector.broadcast %cst_71 : f32 to vector<14x1xf32>
    %173 = arith.divf %171, %172 : vector<14x1xf32>
    %174 = vector.broadcast %173 : vector<14x1xf32> to vector<14x32xf32>
    %175 = arith.subf %165, %174 : vector<14x32xf32>
    %176 = arith.mulf %175, %175 : vector<14x32xf32>
    %cst_72 = arith.constant dense<0.000000e+00> : vector<14xf32>
    %177 = vector.multi_reduction <add>, %176, %cst_72 [1] : vector<14x32xf32> to vector<14xf32>
    %178 = vector.shape_cast %177 : vector<14xf32> to vector<14x1xf32>
    %cst_73 = arith.constant 3.200000e+01 : f32
    %179 = vector.broadcast %cst_73 : f32 to vector<14x1xf32>
    %180 = arith.divf %178, %179 : vector<14x1xf32>
    %181 = vector.broadcast %173 : vector<14x1xf32> to vector<14x32xf32>
    %182 = arith.subf %165, %181 : vector<14x32xf32>
    %cst_74 = arith.constant 9.99999974E-6 : f32
    %183 = vector.broadcast %cst_74 : f32 to vector<14x1xf32>
    %184 = arith.addf %180, %183 : vector<14x1xf32>
    %185 = math.rsqrt %184 : vector<14x1xf32>
    %186 = vector.broadcast %185 : vector<14x1xf32> to vector<14x32xf32>
    %187 = arith.mulf %182, %186 : vector<14x32xf32>
    %188 = vector.broadcast %167 : vector<1x32xf32> to vector<14x32xf32>
    %189 = arith.mulf %187, %188 : vector<14x32xf32>
    %190 = vector.broadcast %169 : vector<1x32xf32> to vector<14x32xf32>
    %191 = arith.addf %189, %190 : vector<14x32xf32>
    %192 = arith.truncf %191 : vector<14x32xf32> to vector<14x32xbf16>
    %c0_75 = arith.constant 0 : index
    %c0_76 = arith.constant 0 : index
    %c0_77 = arith.constant 0 : index
    %193 = vector.load %arg19[%c0_75, %c0_76, %c0_77] : memref<2x32x64xbf16, #tpu.memory_space<vmem>>, vector<1x32x64xbf16>
    %194 = vector.shape_cast %193 : vector<1x32x64xbf16> to vector<32x64xbf16>
    %cst_78 = arith.constant dense<0.000000e+00> : vector<14x64xf32>
    %195 = tpu.matmul %192, %194, %cst_78 {dimension_numbers = #tpu.dot_dimension_numbers<[1], [0], [0], [1], [0, 0, 1, 1], [], []>} : vector<14x32xbf16>, vector<32x64xbf16>, vector<14x64xf32> -> vector<14x64xf32>
    %c0_79 = arith.constant 0 : index
    %c0_80 = arith.constant 0 : index
    %c0_81 = arith.constant 0 : index
    %196 = vector.load %arg20[%c0_79, %c0_80, %c0_81] : memref<2x1x64xf32, #tpu.memory_space<vmem>>, vector<1x1x64xf32>
    %197 = vector.shape_cast %196 : vector<1x1x64xf32> to vector<1x64xf32>
    %198 = vector.broadcast %197 : vector<1x64xf32> to vector<14x64xf32>
    %199 = arith.addf %195, %198 : vector<14x64xf32>
    %cst_82 = arith.constant 0.000000e+00 : f32
    %200 = vector.broadcast %cst_82 : f32 to vector<14x64xf32>
    %201 = arith.maximumf %199, %200 : vector<14x64xf32>
    %202 = arith.truncf %201 : vector<14x64xf32> to vector<14x64xbf16>
    %c0_83 = arith.constant 0 : index
    %c0_84 = arith.constant 0 : index
    %c0_85 = arith.constant 0 : index
    %203 = vector.load %arg21[%c0_83, %c0_84, %c0_85] : memref<2x64x32xbf16, #tpu.memory_space<vmem>>, vector<1x64x32xbf16>
    %204 = vector.shape_cast %203 : vector<1x64x32xbf16> to vector<64x32xbf16>
    %cst_86 = arith.constant dense<0.000000e+00> : vector<14x32xf32>
    %205 = tpu.matmul %202, %204, %cst_86 {dimension_numbers = #tpu.dot_dimension_numbers<[1], [0], [0], [1], [0, 0, 1, 1], [], []>} : vector<14x64xbf16>, vector<64x32xbf16>, vector<14x32xf32> -> vector<14x32xf32>
    %c0_87 = arith.constant 0 : index
    %c0_88 = arith.constant 0 : index
    %c0_89 = arith.constant 0 : index
    %206 = vector.load %arg22[%c0_87, %c0_88, %c0_89] : memref<2x1x32xf32, #tpu.memory_space<vmem>>, vector<1x1x32xf32>
    %207 = vector.shape_cast %206 : vector<1x1x32xf32> to vector<1x32xf32>
    %208 = vector.broadcast %207 : vector<1x32xf32> to vector<14x32xf32>
    %209 = arith.addf %205, %208 : vector<14x32xf32>
    %210 = arith.addf %191, %209 : vector<14x32xf32>
    %c0_90 = arith.constant 0 : index
    %c0_91 = arith.constant 0 : index
    %c0_92 = arith.constant 0 : index
    %211 = vector.load %arg23[%c0_90, %c0_91, %c0_92] : memref<2x1x32xf32, #tpu.memory_space<vmem>>, vector<1x1x32xf32>
    %212 = vector.shape_cast %211 : vector<1x1x32xf32> to vector<1x32xf32>
    %c0_93 = arith.constant 0 : index
    %c0_94 = arith.constant 0 : index
    %c0_95 = arith.constant 0 : index
    %213 = vector.load %arg24[%c0_93, %c0_94, %c0_95] : memref<2x1x32xf32, #tpu.memory_space<vmem>>, vector<1x1x32xf32>
    %214 = vector.shape_cast %213 : vector<1x1x32xf32> to vector<1x32xf32>
    %cst_96 = arith.constant dense<0.000000e+00> : vector<14xf32>
    %215 = vector.multi_reduction <add>, %210, %cst_96 [1] : vector<14x32xf32> to vector<14xf32>
    %216 = vector.shape_cast %215 : vector<14xf32> to vector<14x1xf32>
    %cst_97 = arith.constant 3.200000e+01 : f32
    %217 = vector.broadcast %cst_97 : f32 to vector<14x1xf32>
    %218 = arith.divf %216, %217 : vector<14x1xf32>
    %219 = vector.broadcast %218 : vector<14x1xf32> to vector<14x32xf32>
    %220 = arith.subf %210, %219 : vector<14x32xf32>
    %221 = arith.mulf %220, %220 : vector<14x32xf32>
    %cst_98 = arith.constant dense<0.000000e+00> : vector<14xf32>
    %222 = vector.multi_reduction <add>, %221, %cst_98 [1] : vector<14x32xf32> to vector<14xf32>
    %223 = vector.shape_cast %222 : vector<14xf32> to vector<14x1xf32>
    %cst_99 = arith.constant 3.200000e+01 : f32
    %224 = vector.broadcast %cst_99 : f32 to vector<14x1xf32>
    %225 = arith.divf %223, %224 : vector<14x1xf32>
    %226 = vector.broadcast %218 : vector<14x1xf32> to vector<14x32xf32>
    %227 = arith.subf %210, %226 : vector<14x32xf32>
    %cst_100 = arith.constant 9.99999974E-6 : f32
    %228 = vector.broadcast %cst_100 : f32 to vector<14x1xf32>
    %229 = arith.addf %225, %228 : vector<14x1xf32>
    %230 = math.rsqrt %229 : vector<14x1xf32>
    %231 = vector.broadcast %230 : vector<14x1xf32> to vector<14x32xf32>
    %232 = arith.mulf %227, %231 : vector<14x32xf32>
    %233 = vector.broadcast %212 : vector<1x32xf32> to vector<14x32xf32>
    %234 = arith.mulf %232, %233 : vector<14x32xf32>
    %235 = vector.broadcast %214 : vector<1x32xf32> to vector<14x32xf32>
    %236 = arith.addf %234, %235 : vector<14x32xf32>
    %237 = vector.shape_cast %236 : vector<14x32xf32> to vector<2x7x32xf32>
    %238 = vector.shape_cast %237 : vector<2x7x32xf32> to vector<14x32xf32>
    %239 = arith.truncf %238 : vector<14x32xf32> to vector<14x32xbf16>
    %c1 = arith.constant 1 : index
    %c0_101 = arith.constant 0 : index
    %c0_102 = arith.constant 0 : index
    %240 = vector.load %arg5[%c1, %c0_101, %c0_102] : memref<2x32x96xbf16, #tpu.memory_space<vmem>>, vector<1x32x96xbf16>
    %241 = vector.shape_cast %240 : vector<1x32x96xbf16> to vector<32x96xbf16>
    %cst_103 = arith.constant dense<0.000000e+00> : vector<14x96xf32>
    %242 = tpu.matmul %239, %241, %cst_103 {dimension_numbers = #tpu.dot_dimension_numbers<[1], [0], [0], [1], [0, 0, 1, 1], [], []>} : vector<14x32xbf16>, vector<32x96xbf16>, vector<14x96xf32> -> vector<14x96xf32>
    %c1_104 = arith.constant 1 : index
    %c0_105 = arith.constant 0 : index
    %c0_106 = arith.constant 0 : index
    %243 = vector.load %arg6[%c1_104, %c0_105, %c0_106] : memref<2x1x96xf32, #tpu.memory_space<vmem>>, vector<1x1x96xf32>
    %244 = vector.shape_cast %243 : vector<1x1x96xf32> to vector<1x96xf32>
    %245 = vector.broadcast %244 : vector<1x96xf32> to vector<14x96xf32>
    %246 = arith.addf %242, %245 : vector<14x96xf32>
    %247 = arith.truncf %246 : vector<14x96xf32> to vector<14x96xbf16>
    %248 = vector.shape_cast %247 : vector<14x96xbf16> to vector<2x7x96xbf16>
    %249 = vector.extract_strided_slice %248 {offsets = [0, 0, 0], sizes = [2, 7, 32], strides = [1, 1, 1]} : vector<2x7x96xbf16> to vector<2x7x32xbf16>
    %250 = vector.extract_strided_slice %248 {offsets = [0, 0, 32], sizes = [2, 7, 32], strides = [1, 1, 1]} : vector<2x7x96xbf16> to vector<2x7x32xbf16>
    %251 = vector.extract_strided_slice %248 {offsets = [0, 0, 64], sizes = [2, 7, 32], strides = [1, 1, 1]} : vector<2x7x96xbf16> to vector<2x7x32xbf16>
    %252 = vector.extract_strided_slice %249 {offsets = [0, 0, 0], sizes = [2, 7, 8], strides = [1, 1, 1]} : vector<2x7x32xbf16> to vector<2x7x8xbf16>
    %253 = vector.extract_strided_slice %249 {offsets = [0, 0, 8], sizes = [2, 7, 8], strides = [1, 1, 1]} : vector<2x7x32xbf16> to vector<2x7x8xbf16>
    %254 = vector.extract_strided_slice %249 {offsets = [0, 0, 16], sizes = [2, 7, 8], strides = [1, 1, 1]} : vector<2x7x32xbf16> to vector<2x7x8xbf16>
    %255 = vector.extract_strided_slice %249 {offsets = [0, 0, 24], sizes = [2, 7, 8], strides = [1, 1, 1]} : vector<2x7x32xbf16> to vector<2x7x8xbf16>
    %256 = tpu.concatenate %252, %253, %254, %255 in 0 : vector<2x7x8xbf16>, vector<2x7x8xbf16>, vector<2x7x8xbf16>, vector<2x7x8xbf16> -> vector<8x7x8xbf16>
    %257 = vector.extract_strided_slice %250 {offsets = [0, 0, 0], sizes = [2, 7, 8], strides = [1, 1, 1]} : vector<2x7x32xbf16> to vector<2x7x8xbf16>
    %258 = vector.extract_strided_slice %250 {offsets = [0, 0, 8], sizes = [2, 7, 8], strides = [1, 1, 1]} : vector<2x7x32xbf16> to vector<2x7x8xbf16>
    %259 = vector.extract_strided_slice %250 {offsets = [0, 0, 16], sizes = [2, 7, 8], strides = [1, 1, 1]} : vector<2x7x32xbf16> to vector<2x7x8xbf16>
    %260 = vector.extract_strided_slice %250 {offsets = [0, 0, 24], sizes = [2, 7, 8], strides = [1, 1, 1]} : vector<2x7x32xbf16> to vector<2x7x8xbf16>
    %261 = tpu.concatenate %257, %258, %259, %260 in 0 : vector<2x7x8xbf16>, vector<2x7x8xbf16>, vector<2x7x8xbf16>, vector<2x7x8xbf16> -> vector<8x7x8xbf16>
    %262 = vector.extract_strided_slice %251 {offsets = [0, 0, 0], sizes = [2, 7, 8], strides = [1, 1, 1]} : vector<2x7x32xbf16> to vector<2x7x8xbf16>
    %263 = vector.extract_strided_slice %251 {offsets = [0, 0, 8], sizes = [2, 7, 8], strides = [1, 1, 1]} : vector<2x7x32xbf16> to vector<2x7x8xbf16>
    %264 = vector.extract_strided_slice %251 {offsets = [0, 0, 16], sizes = [2, 7, 8], strides = [1, 1, 1]} : vector<2x7x32xbf16> to vector<2x7x8xbf16>
    %265 = vector.extract_strided_slice %251 {offsets = [0, 0, 24], sizes = [2, 7, 8], strides = [1, 1, 1]} : vector<2x7x32xbf16> to vector<2x7x8xbf16>
    %266 = tpu.concatenate %262, %263, %264, %265 in 0 : vector<2x7x8xbf16>, vector<2x7x8xbf16>, vector<2x7x8xbf16>, vector<2x7x8xbf16> -> vector<8x7x8xbf16>
    "tpu.trace_start"() <{level = 10 : i32, message = "nqd,nkd->nqk"}> : () -> ()
    %cst_107 = arith.constant dense<0.000000e+00> : vector<8x7x7xf32>
    %267 = tpu.matmul %256, %261, %cst_107 {dimension_numbers = #tpu.dot_dimension_numbers<[2], [2], [1], [1], [0, 0, 0, 1, 1, 1], [0], [0]>} : vector<8x7x8xbf16>, vector<8x7x8xbf16>, vector<8x7x7xf32> -> vector<8x7x7xf32>
    "tpu.trace_stop"() : () -> ()
    %268 = arith.addf %267, %9 : vector<8x7x7xf32>
    %cst_108 = arith.constant dense<0xFF800000> : vector<8x7xf32>
    %269 = vector.multi_reduction <maximumf>, %268, %cst_108 [2] : vector<8x7x7xf32> to vector<8x7xf32>
    %270 = vector.shape_cast %269 : vector<8x7xf32> to vector<8x7x1xf32>
    %271 = vector.broadcast %270 : vector<8x7x1xf32> to vector<8x7x7xf32>
    %272 = arith.subf %268, %271 : vector<8x7x7xf32>
    %273 = math.exp %272 : vector<8x7x7xf32>
    %cst_109 = arith.constant dense<0.000000e+00> : vector<8x7xf32>
    %274 = vector.multi_reduction <add>, %273, %cst_109 [2] : vector<8x7x7xf32> to vector<8x7xf32>
    %275 = vector.shape_cast %274 : vector<8x7xf32> to vector<8x7x1xf32>
    %276 = tpu.reciprocal %275 {approx = true} : vector<8x7x1xf32> -> vector<8x7x1xf32>
    %277 = vector.broadcast %276 : vector<8x7x1xf32> to vector<8x7x7xf32>
    %278 = arith.mulf %273, %277 : vector<8x7x7xf32>
    %279 = arith.truncf %278 : vector<8x7x7xf32> to vector<8x7x7xbf16>
    "tpu.trace_start"() <{level = 10 : i32, message = "nqk,nkd->nqd"}> : () -> ()
    %cst_110 = arith.constant dense<0.000000e+00> : vector<8x7x8xf32>
    %280 = tpu.matmul %279, %266, %cst_110 {dimension_numbers = #tpu.dot_dimension_numbers<[2], [1], [1], [2], [0, 0, 0, 1, 1, 2], [0], [0]>} : vector<8x7x7xbf16>, vector<8x7x8xbf16>, vector<8x7x8xf32> -> vector<8x7x8xf32>
    "tpu.trace_stop"() : () -> ()
    %281 = vector.extract_strided_slice %280 {offsets = [0, 0, 0], sizes = [2, 7, 8], strides = [1, 1, 1]} : vector<8x7x8xf32> to vector<2x7x8xf32>
    %282 = vector.extract_strided_slice %280 {offsets = [2, 0, 0], sizes = [2, 7, 8], strides = [1, 1, 1]} : vector<8x7x8xf32> to vector<2x7x8xf32>
    %283 = vector.extract_strided_slice %280 {offsets = [4, 0, 0], sizes = [2, 7, 8], strides = [1, 1, 1]} : vector<8x7x8xf32> to vector<2x7x8xf32>
    %284 = vector.extract_strided_slice %280 {offsets = [6, 0, 0], sizes = [2, 7, 8], strides = [1, 1, 1]} : vector<8x7x8xf32> to vector<2x7x8xf32>
    %285 = tpu.concatenate %281, %282, %283, %284 in 2 : vector<2x7x8xf32>, vector<2x7x8xf32>, vector<2x7x8xf32>, vector<2x7x8xf32> -> vector<2x7x32xf32>
    %286 = vector.shape_cast %285 : vector<2x7x32xf32> to vector<14x32xf32>
    %287 = arith.truncf %286 : vector<14x32xf32> to vector<14x32xbf16>
    %c1_111 = arith.constant 1 : index
    %c0_112 = arith.constant 0 : index
    %c0_113 = arith.constant 0 : index
    %288 = vector.load %arg7[%c1_111, %c0_112, %c0_113] : memref<2x32x32xbf16, #tpu.memory_space<vmem>>, vector<1x32x32xbf16>
    %289 = vector.shape_cast %288 : vector<1x32x32xbf16> to vector<32x32xbf16>
    %cst_114 = arith.constant dense<0.000000e+00> : vector<14x32xf32>
    %290 = tpu.matmul %287, %289, %cst_114 {dimension_numbers = #tpu.dot_dimension_numbers<[1], [0], [0], [1], [0, 0, 1, 1], [], []>} : vector<14x32xbf16>, vector<32x32xbf16>, vector<14x32xf32> -> vector<14x32xf32>
    %c1_115 = arith.constant 1 : index
    %c0_116 = arith.constant 0 : index
    %c0_117 = arith.constant 0 : index
    %291 = vector.load %arg8[%c1_115, %c0_116, %c0_117] : memref<2x1x32xf32, #tpu.memory_space<vmem>>, vector<1x1x32xf32>
    %292 = vector.shape_cast %291 : vector<1x1x32xf32> to vector<1x32xf32>
    %293 = vector.broadcast %292 : vector<1x32xf32> to vector<14x32xf32>
    %294 = arith.addf %290, %293 : vector<14x32xf32>
    %295 = arith.addf %238, %294 : vector<14x32xf32>
    %c1_118 = arith.constant 1 : index
    %c0_119 = arith.constant 0 : index
    %c0_120 = arith.constant 0 : index
    %296 = vector.load %arg9[%c1_118, %c0_119, %c0_120] : memref<2x1x32xf32, #tpu.memory_space<vmem>>, vector<1x1x32xf32>
    %297 = vector.shape_cast %296 : vector<1x1x32xf32> to vector<1x32xf32>
    %c1_121 = arith.constant 1 : index
    %c0_122 = arith.constant 0 : index
    %c0_123 = arith.constant 0 : index
    %298 = vector.load %arg10[%c1_121, %c0_122, %c0_123] : memref<2x1x32xf32, #tpu.memory_space<vmem>>, vector<1x1x32xf32>
    %299 = vector.shape_cast %298 : vector<1x1x32xf32> to vector<1x32xf32>
    %cst_124 = arith.constant dense<0.000000e+00> : vector<14xf32>
    %300 = vector.multi_reduction <add>, %295, %cst_124 [1] : vector<14x32xf32> to vector<14xf32>
    %301 = vector.shape_cast %300 : vector<14xf32> to vector<14x1xf32>
    %cst_125 = arith.constant 3.200000e+01 : f32
    %302 = vector.broadcast %cst_125 : f32 to vector<14x1xf32>
    %303 = arith.divf %301, %302 : vector<14x1xf32>
    %304 = vector.broadcast %303 : vector<14x1xf32> to vector<14x32xf32>
    %305 = arith.subf %295, %304 : vector<14x32xf32>
    %306 = arith.mulf %305, %305 : vector<14x32xf32>
    %cst_126 = arith.constant dense<0.000000e+00> : vector<14xf32>
    %307 = vector.multi_reduction <add>, %306, %cst_126 [1] : vector<14x32xf32> to vector<14xf32>
    %308 = vector.shape_cast %307 : vector<14xf32> to vector<14x1xf32>
    %cst_127 = arith.constant 3.200000e+01 : f32
    %309 = vector.broadcast %cst_127 : f32 to vector<14x1xf32>
    %310 = arith.divf %308, %309 : vector<14x1xf32>
    %311 = vector.broadcast %303 : vector<14x1xf32> to vector<14x32xf32>
    %312 = arith.subf %295, %311 : vector<14x32xf32>
    %cst_128 = arith.constant 9.99999974E-6 : f32
    %313 = vector.broadcast %cst_128 : f32 to vector<14x1xf32>
    %314 = arith.addf %310, %313 : vector<14x1xf32>
    %315 = math.rsqrt %314 : vector<14x1xf32>
    %316 = vector.broadcast %315 : vector<14x1xf32> to vector<14x32xf32>
    %317 = arith.mulf %312, %316 : vector<14x32xf32>
    %318 = vector.broadcast %297 : vector<1x32xf32> to vector<14x32xf32>
    %319 = arith.mulf %317, %318 : vector<14x32xf32>
    %320 = vector.broadcast %299 : vector<1x32xf32> to vector<14x32xf32>
    %321 = arith.addf %319, %320 : vector<14x32xf32>
    %322 = arith.truncf %321 : vector<14x32xf32> to vector<14x32xbf16>
    %c1_129 = arith.constant 1 : index
    %c0_130 = arith.constant 0 : index
    %c0_131 = arith.constant 0 : index
    %323 = vector.load %arg11[%c1_129, %c0_130, %c0_131] : memref<2x32x32xbf16, #tpu.memory_space<vmem>>, vector<1x32x32xbf16>
    %324 = vector.shape_cast %323 : vector<1x32x32xbf16> to vector<32x32xbf16>
    %cst_132 = arith.constant dense<0.000000e+00> : vector<14x32xf32>
    %325 = tpu.matmul %322, %324, %cst_132 {dimension_numbers = #tpu.dot_dimension_numbers<[1], [0], [0], [1], [0, 0, 1, 1], [], []>} : vector<14x32xbf16>, vector<32x32xbf16>, vector<14x32xf32> -> vector<14x32xf32>
    %c1_133 = arith.constant 1 : index
    %c0_134 = arith.constant 0 : index
    %c0_135 = arith.constant 0 : index
    %326 = vector.load %arg12[%c1_133, %c0_134, %c0_135] : memref<2x1x32xf32, #tpu.memory_space<vmem>>, vector<1x1x32xf32>
    %327 = vector.shape_cast %326 : vector<1x1x32xf32> to vector<1x32xf32>
    %328 = vector.broadcast %327 : vector<1x32xf32> to vector<14x32xf32>
    %329 = arith.addf %325, %328 : vector<14x32xf32>
    %330 = arith.truncf %329 : vector<14x32xf32> to vector<14x32xbf16>
    %331 = vector.shape_cast %330 : vector<14x32xbf16> to vector<2x7x32xbf16>
    %c1_136 = arith.constant 1 : index
    %c0_137 = arith.constant 0 : index
    %c0_138 = arith.constant 0 : index
    %332 = vector.load %arg13[%c1_136, %c0_137, %c0_138] : memref<2x32x64xbf16, #tpu.memory_space<vmem>>, vector<1x32x64xbf16>
    %333 = vector.shape_cast %332 : vector<1x32x64xbf16> to vector<32x64xbf16>
    %cst_139 = arith.constant dense<0.000000e+00> : vector<16x64xf32>
    %334 = tpu.matmul %16, %333, %cst_139 {dimension_numbers = #tpu.dot_dimension_numbers<[1], [0], [0], [1], [0, 0, 1, 1], [], []>} : vector<16x32xbf16>, vector<32x64xbf16>, vector<16x64xf32> -> vector<16x64xf32>
    %c1_140 = arith.constant 1 : index
    %c0_141 = arith.constant 0 : index
    %c0_142 = arith.constant 0 : index
    %335 = vector.load %arg14[%c1_140, %c0_141, %c0_142] : memref<2x1x64xf32, #tpu.memory_space<vmem>>, vector<1x1x64xf32>
    %336 = vector.shape_cast %335 : vector<1x1x64xf32> to vector<1x64xf32>
    %337 = vector.broadcast %336 : vector<1x64xf32> to vector<16x64xf32>
    %338 = arith.addf %334, %337 : vector<16x64xf32>
    %339 = arith.truncf %338 : vector<16x64xf32> to vector<16x64xbf16>
    %340 = vector.shape_cast %339 : vector<16x64xbf16> to vector<2x8x64xbf16>
    %341 = vector.extract_strided_slice %340 {offsets = [0, 0, 0], sizes = [2, 8, 32], strides = [1, 1, 1]} : vector<2x8x64xbf16> to vector<2x8x32xbf16>
    %342 = vector.extract_strided_slice %340 {offsets = [0, 0, 32], sizes = [2, 8, 32], strides = [1, 1, 1]} : vector<2x8x64xbf16> to vector<2x8x32xbf16>
    %343 = vector.extract_strided_slice %331 {offsets = [0, 0, 0], sizes = [2, 7, 8], strides = [1, 1, 1]} : vector<2x7x32xbf16> to vector<2x7x8xbf16>
    %344 = vector.extract_strided_slice %331 {offsets = [0, 0, 8], sizes = [2, 7, 8], strides = [1, 1, 1]} : vector<2x7x32xbf16> to vector<2x7x8xbf16>
    %345 = vector.extract_strided_slice %331 {offsets = [0, 0, 16], sizes = [2, 7, 8], strides = [1, 1, 1]} : vector<2x7x32xbf16> to vector<2x7x8xbf16>
    %346 = vector.extract_strided_slice %331 {offsets = [0, 0, 24], sizes = [2, 7, 8], strides = [1, 1, 1]} : vector<2x7x32xbf16> to vector<2x7x8xbf16>
    %347 = tpu.concatenate %343, %344, %345, %346 in 0 : vector<2x7x8xbf16>, vector<2x7x8xbf16>, vector<2x7x8xbf16>, vector<2x7x8xbf16> -> vector<8x7x8xbf16>
    %348 = vector.extract_strided_slice %341 {offsets = [0, 0, 0], sizes = [2, 8, 8], strides = [1, 1, 1]} : vector<2x8x32xbf16> to vector<2x8x8xbf16>
    %349 = vector.extract_strided_slice %341 {offsets = [0, 0, 8], sizes = [2, 8, 8], strides = [1, 1, 1]} : vector<2x8x32xbf16> to vector<2x8x8xbf16>
    %350 = vector.extract_strided_slice %341 {offsets = [0, 0, 16], sizes = [2, 8, 8], strides = [1, 1, 1]} : vector<2x8x32xbf16> to vector<2x8x8xbf16>
    %351 = vector.extract_strided_slice %341 {offsets = [0, 0, 24], sizes = [2, 8, 8], strides = [1, 1, 1]} : vector<2x8x32xbf16> to vector<2x8x8xbf16>
    %352 = tpu.concatenate %348, %349, %350, %351 in 0 : vector<2x8x8xbf16>, vector<2x8x8xbf16>, vector<2x8x8xbf16>, vector<2x8x8xbf16> -> vector<8x8x8xbf16>
    %353 = vector.extract_strided_slice %342 {offsets = [0, 0, 0], sizes = [2, 8, 8], strides = [1, 1, 1]} : vector<2x8x32xbf16> to vector<2x8x8xbf16>
    %354 = vector.extract_strided_slice %342 {offsets = [0, 0, 8], sizes = [2, 8, 8], strides = [1, 1, 1]} : vector<2x8x32xbf16> to vector<2x8x8xbf16>
    %355 = vector.extract_strided_slice %342 {offsets = [0, 0, 16], sizes = [2, 8, 8], strides = [1, 1, 1]} : vector<2x8x32xbf16> to vector<2x8x8xbf16>
    %356 = vector.extract_strided_slice %342 {offsets = [0, 0, 24], sizes = [2, 8, 8], strides = [1, 1, 1]} : vector<2x8x32xbf16> to vector<2x8x8xbf16>
    %357 = tpu.concatenate %353, %354, %355, %356 in 0 : vector<2x8x8xbf16>, vector<2x8x8xbf16>, vector<2x8x8xbf16>, vector<2x8x8xbf16> -> vector<8x8x8xbf16>
    "tpu.trace_start"() <{level = 10 : i32, message = "nqd,nkd->nqk"}> : () -> ()
    %cst_143 = arith.constant dense<0.000000e+00> : vector<8x7x8xf32>
    %358 = tpu.matmul %347, %352, %cst_143 {dimension_numbers = #tpu.dot_dimension_numbers<[2], [2], [1], [1], [0, 0, 0, 1, 1, 1], [0], [0]>} : vector<8x7x8xbf16>, vector<8x8x8xbf16>, vector<8x7x8xf32> -> vector<8x7x8xf32>
    "tpu.trace_stop"() : () -> ()
    %359 = arith.addf %358, %14 : vector<8x7x8xf32>
    %cst_144 = arith.constant dense<0xFF800000> : vector<8x7xf32>
    %360 = vector.multi_reduction <maximumf>, %359, %cst_144 [2] : vector<8x7x8xf32> to vector<8x7xf32>
    %361 = vector.shape_cast %360 : vector<8x7xf32> to vector<8x7x1xf32>
    %362 = vector.broadcast %361 : vector<8x7x1xf32> to vector<8x7x8xf32>
    %363 = arith.subf %359, %362 : vector<8x7x8xf32>
    %364 = math.exp %363 : vector<8x7x8xf32>
    %cst_145 = arith.constant dense<0.000000e+00> : vector<8x7xf32>
    %365 = vector.multi_reduction <add>, %364, %cst_145 [2] : vector<8x7x8xf32> to vector<8x7xf32>
    %366 = vector.shape_cast %365 : vector<8x7xf32> to vector<8x7x1xf32>
    %367 = tpu.reciprocal %366 {approx = true} : vector<8x7x1xf32> -> vector<8x7x1xf32>
    %368 = vector.broadcast %367 : vector<8x7x1xf32> to vector<8x7x8xf32>
    %369 = arith.mulf %364, %368 : vector<8x7x8xf32>
    %370 = arith.truncf %369 : vector<8x7x8xf32> to vector<8x7x8xbf16>
    "tpu.trace_start"() <{level = 10 : i32, message = "nqk,nkd->nqd"}> : () -> ()
    %cst_146 = arith.constant dense<0.000000e+00> : vector<8x7x8xf32>
    %371 = tpu.matmul %370, %357, %cst_146 {dimension_numbers = #tpu.dot_dimension_numbers<[2], [1], [1], [2], [0, 0, 0, 1, 1, 2], [0], [0]>} : vector<8x7x8xbf16>, vector<8x8x8xbf16>, vector<8x7x8xf32> -> vector<8x7x8xf32>
    "tpu.trace_stop"() : () -> ()
    %372 = vector.extract_strided_slice %371 {offsets = [0, 0, 0], sizes = [2, 7, 8], strides = [1, 1, 1]} : vector<8x7x8xf32> to vector<2x7x8xf32>
    %373 = vector.extract_strided_slice %371 {offsets = [2, 0, 0], sizes = [2, 7, 8], strides = [1, 1, 1]} : vector<8x7x8xf32> to vector<2x7x8xf32>
    %374 = vector.extract_strided_slice %371 {offsets = [4, 0, 0], sizes = [2, 7, 8], strides = [1, 1, 1]} : vector<8x7x8xf32> to vector<2x7x8xf32>
    %375 = vector.extract_strided_slice %371 {offsets = [6, 0, 0], sizes = [2, 7, 8], strides = [1, 1, 1]} : vector<8x7x8xf32> to vector<2x7x8xf32>
    %376 = tpu.concatenate %372, %373, %374, %375 in 2 : vector<2x7x8xf32>, vector<2x7x8xf32>, vector<2x7x8xf32>, vector<2x7x8xf32> -> vector<2x7x32xf32>
    %377 = vector.shape_cast %376 : vector<2x7x32xf32> to vector<14x32xf32>
    %378 = arith.truncf %377 : vector<14x32xf32> to vector<14x32xbf16>
    %c1_147 = arith.constant 1 : index
    %c0_148 = arith.constant 0 : index
    %c0_149 = arith.constant 0 : index
    %379 = vector.load %arg15[%c1_147, %c0_148, %c0_149] : memref<2x32x32xbf16, #tpu.memory_space<vmem>>, vector<1x32x32xbf16>
    %380 = vector.shape_cast %379 : vector<1x32x32xbf16> to vector<32x32xbf16>
    %cst_150 = arith.constant dense<0.000000e+00> : vector<14x32xf32>
    %381 = tpu.matmul %378, %380, %cst_150 {dimension_numbers = #tpu.dot_dimension_numbers<[1], [0], [0], [1], [0, 0, 1, 1], [], []>} : vector<14x32xbf16>, vector<32x32xbf16>, vector<14x32xf32> -> vector<14x32xf32>
    %c1_151 = arith.constant 1 : index
    %c0_152 = arith.constant 0 : index
    %c0_153 = arith.constant 0 : index
    %382 = vector.load %arg16[%c1_151, %c0_152, %c0_153] : memref<2x1x32xf32, #tpu.memory_space<vmem>>, vector<1x1x32xf32>
    %383 = vector.shape_cast %382 : vector<1x1x32xf32> to vector<1x32xf32>
    %384 = vector.broadcast %383 : vector<1x32xf32> to vector<14x32xf32>
    %385 = arith.addf %381, %384 : vector<14x32xf32>
    %386 = arith.addf %321, %385 : vector<14x32xf32>
    %c1_154 = arith.constant 1 : index
    %c0_155 = arith.constant 0 : index
    %c0_156 = arith.constant 0 : index
    %387 = vector.load %arg17[%c1_154, %c0_155, %c0_156] : memref<2x1x32xf32, #tpu.memory_space<vmem>>, vector<1x1x32xf32>
    %388 = vector.shape_cast %387 : vector<1x1x32xf32> to vector<1x32xf32>
    %c1_157 = arith.constant 1 : index
    %c0_158 = arith.constant 0 : index
    %c0_159 = arith.constant 0 : index
    %389 = vector.load %arg18[%c1_157, %c0_158, %c0_159] : memref<2x1x32xf32, #tpu.memory_space<vmem>>, vector<1x1x32xf32>
    %390 = vector.shape_cast %389 : vector<1x1x32xf32> to vector<1x32xf32>
    %cst_160 = arith.constant dense<0.000000e+00> : vector<14xf32>
    %391 = vector.multi_reduction <add>, %386, %cst_160 [1] : vector<14x32xf32> to vector<14xf32>
    %392 = vector.shape_cast %391 : vector<14xf32> to vector<14x1xf32>
    %cst_161 = arith.constant 3.200000e+01 : f32
    %393 = vector.broadcast %cst_161 : f32 to vector<14x1xf32>
    %394 = arith.divf %392, %393 : vector<14x1xf32>
    %395 = vector.broadcast %394 : vector<14x1xf32> to vector<14x32xf32>
    %396 = arith.subf %386, %395 : vector<14x32xf32>
    %397 = arith.mulf %396, %396 : vector<14x32xf32>
    %cst_162 = arith.constant dense<0.000000e+00> : vector<14xf32>
    %398 = vector.multi_reduction <add>, %397, %cst_162 [1] : vector<14x32xf32> to vector<14xf32>
    %399 = vector.shape_cast %398 : vector<14xf32> to vector<14x1xf32>
    %cst_163 = arith.constant 3.200000e+01 : f32
    %400 = vector.broadcast %cst_163 : f32 to vector<14x1xf32>
    %401 = arith.divf %399, %400 : vector<14x1xf32>
    %402 = vector.broadcast %394 : vector<14x1xf32> to vector<14x32xf32>
    %403 = arith.subf %386, %402 : vector<14x32xf32>
    %cst_164 = arith.constant 9.99999974E-6 : f32
    %404 = vector.broadcast %cst_164 : f32 to vector<14x1xf32>
    %405 = arith.addf %401, %404 : vector<14x1xf32>
    %406 = math.rsqrt %405 : vector<14x1xf32>
    %407 = vector.broadcast %406 : vector<14x1xf32> to vector<14x32xf32>
    %408 = arith.mulf %403, %407 : vector<14x32xf32>
    %409 = vector.broadcast %388 : vector<1x32xf32> to vector<14x32xf32>
    %410 = arith.mulf %408, %409 : vector<14x32xf32>
    %411 = vector.broadcast %390 : vector<1x32xf32> to vector<14x32xf32>
    %412 = arith.addf %410, %411 : vector<14x32xf32>
    %413 = arith.truncf %412 : vector<14x32xf32> to vector<14x32xbf16>
    %c1_165 = arith.constant 1 : index
    %c0_166 = arith.constant 0 : index
    %c0_167 = arith.constant 0 : index
    %414 = vector.load %arg19[%c1_165, %c0_166, %c0_167] : memref<2x32x64xbf16, #tpu.memory_space<vmem>>, vector<1x32x64xbf16>
    %415 = vector.shape_cast %414 : vector<1x32x64xbf16> to vector<32x64xbf16>
    %cst_168 = arith.constant dense<0.000000e+00> : vector<14x64xf32>
    %416 = tpu.matmul %413, %415, %cst_168 {dimension_numbers = #tpu.dot_dimension_numbers<[1], [0], [0], [1], [0, 0, 1, 1], [], []>} : vector<14x32xbf16>, vector<32x64xbf16>, vector<14x64xf32> -> vector<14x64xf32>
    %c1_169 = arith.constant 1 : index
    %c0_170 = arith.constant 0 : index
    %c0_171 = arith.constant 0 : index
    %417 = vector.load %arg20[%c1_169, %c0_170, %c0_171] : memref<2x1x64xf32, #tpu.memory_space<vmem>>, vector<1x1x64xf32>
    %418 = vector.shape_cast %417 : vector<1x1x64xf32> to vector<1x64xf32>
    %419 = vector.broadcast %418 : vector<1x64xf32> to vector<14x64xf32>
    %420 = arith.addf %416, %419 : vector<14x64xf32>
    %cst_172 = arith.constant 0.000000e+00 : f32
    %421 = vector.broadcast %cst_172 : f32 to vector<14x64xf32>
    %422 = arith.maximumf %420, %421 : vector<14x64xf32>
    %423 = arith.truncf %422 : vector<14x64xf32> to vector<14x64xbf16>
    %c1_173 = arith.constant 1 : index
    %c0_174 = arith.constant 0 : index
    %c0_175 = arith.constant 0 : index
    %424 = vector.load %arg21[%c1_173, %c0_174, %c0_175] : memref<2x64x32xbf16, #tpu.memory_space<vmem>>, vector<1x64x32xbf16>
    %425 = vector.shape_cast %424 : vector<1x64x32xbf16> to vector<64x32xbf16>
    %cst_176 = arith.constant dense<0.000000e+00> : vector<14x32xf32>
    %426 = tpu.matmul %423, %425, %cst_176 {dimension_numbers = #tpu.dot_dimension_numbers<[1], [0], [0], [1], [0, 0, 1, 1], [], []>} : vector<14x64xbf16>, vector<64x32xbf16>, vector<14x32xf32> -> vector<14x32xf32>
    %c1_177 = arith.constant 1 : index
    %c0_178 = arith.constant 0 : index
    %c0_179 = arith.constant 0 : index
    %427 = vector.load %arg22[%c1_177, %c0_178, %c0_179] : memref<2x1x32xf32, #tpu.memory_space<vmem>>, vector<1x1x32xf32>
    %428 = vector.shape_cast %427 : vector<1x1x32xf32> to vector<1x32xf32>
    %429 = vector.broadcast %428 : vector<1x32xf32> to vector<14x32xf32>
    %430 = arith.addf %426, %429 : vector<14x32xf32>
    %431 = arith.addf %412, %430 : vector<14x32xf32>
    %c1_180 = arith.constant 1 : index
    %c0_181 = arith.constant 0 : index
    %c0_182 = arith.constant 0 : index
    %432 = vector.load %arg23[%c1_180, %c0_181, %c0_182] : memref<2x1x32xf32, #tpu.memory_space<vmem>>, vector<1x1x32xf32>
    %433 = vector.shape_cast %432 : vector<1x1x32xf32> to vector<1x32xf32>
    %c1_183 = arith.constant 1 : index
    %c0_184 = arith.constant 0 : index
    %c0_185 = arith.constant 0 : index
    %434 = vector.load %arg24[%c1_183, %c0_184, %c0_185] : memref<2x1x32xf32, #tpu.memory_space<vmem>>, vector<1x1x32xf32>
    %435 = vector.shape_cast %434 : vector<1x1x32xf32> to vector<1x32xf32>
    %cst_186 = arith.constant dense<0.000000e+00> : vector<14xf32>
    %436 = vector.multi_reduction <add>, %431, %cst_186 [1] : vector<14x32xf32> to vector<14xf32>
    %437 = vector.shape_cast %436 : vector<14xf32> to vector<14x1xf32>
    %cst_187 = arith.constant 3.200000e+01 : f32
    %438 = vector.broadcast %cst_187 : f32 to vector<14x1xf32>
    %439 = arith.divf %437, %438 : vector<14x1xf32>
    %440 = vector.broadcast %439 : vector<14x1xf32> to vector<14x32xf32>
    %441 = arith.subf %431, %440 : vector<14x32xf32>
    %442 = arith.mulf %441, %441 : vector<14x32xf32>
    %cst_188 = arith.constant dense<0.000000e+00> : vector<14xf32>
    %443 = vector.multi_reduction <add>, %442, %cst_188 [1] : vector<14x32xf32> to vector<14xf32>
    %444 = vector.shape_cast %443 : vector<14xf32> to vector<14x1xf32>
    %cst_189 = arith.constant 3.200000e+01 : f32
    %445 = vector.broadcast %cst_189 : f32 to vector<14x1xf32>
    %446 = arith.divf %444, %445 : vector<14x1xf32>
    %447 = vector.broadcast %439 : vector<14x1xf32> to vector<14x32xf32>
    %448 = arith.subf %431, %447 : vector<14x32xf32>
    %cst_190 = arith.constant 9.99999974E-6 : f32
    %449 = vector.broadcast %cst_190 : f32 to vector<14x1xf32>
    %450 = arith.addf %446, %449 : vector<14x1xf32>
    %451 = math.rsqrt %450 : vector<14x1xf32>
    %452 = vector.broadcast %451 : vector<14x1xf32> to vector<14x32xf32>
    %453 = arith.mulf %448, %452 : vector<14x32xf32>
    %454 = vector.broadcast %433 : vector<1x32xf32> to vector<14x32xf32>
    %455 = arith.mulf %453, %454 : vector<14x32xf32>
    %456 = vector.broadcast %435 : vector<1x32xf32> to vector<14x32xf32>
    %457 = arith.addf %455, %456 : vector<14x32xf32>
    %458 = vector.shape_cast %457 : vector<14x32xf32> to vector<2x7x32xf32>
    %459 = vector.shape_cast %458 : vector<2x7x32xf32> to vector<14x32xf32>
    %c0_191 = arith.constant 0 : index
    %c0_192 = arith.constant 0 : index
    %460 = vector.load %arg25[%c0_191, %c0_192] : memref<1x32xf32, #tpu.memory_space<vmem>>, vector<1x32xf32>
    %c0_193 = arith.constant 0 : index
    %c0_194 = arith.constant 0 : index
    %461 = vector.load %arg26[%c0_193, %c0_194] : memref<1x32xf32, #tpu.memory_space<vmem>>, vector<1x32xf32>
    %cst_195 = arith.constant dense<0.000000e+00> : vector<14xf32>
    %462 = vector.multi_reduction <add>, %459, %cst_195 [1] : vector<14x32xf32> to vector<14xf32>
    %463 = vector.shape_cast %462 : vector<14xf32> to vector<14x1xf32>
    %cst_196 = arith.constant 3.200000e+01 : f32
    %464 = vector.broadcast %cst_196 : f32 to vector<14x1xf32>
    %465 = arith.divf %463, %464 : vector<14x1xf32>
    %466 = vector.broadcast %465 : vector<14x1xf32> to vector<14x32xf32>
    %467 = arith.subf %459, %466 : vector<14x32xf32>
    %468 = arith.mulf %467, %467 : vector<14x32xf32>
    %cst_197 = arith.constant dense<0.000000e+00> : vector<14xf32>
    %469 = vector.multi_reduction <add>, %468, %cst_197 [1] : vector<14x32xf32> to vector<14xf32>
    %470 = vector.shape_cast %469 : vector<14xf32> to vector<14x1xf32>
    %cst_198 = arith.constant 3.200000e+01 : f32
    %471 = vector.broadcast %cst_198 : f32 to vector<14x1xf32>
    %472 = arith.divf %470, %471 : vector<14x1xf32>
    %473 = vector.broadcast %465 : vector<14x1xf32> to vector<14x32xf32>
    %474 = arith.subf %459, %473 : vector<14x32xf32>
    %cst_199 = arith.constant 9.99999974E-6 : f32
    %475 = vector.broadcast %cst_199 : f32 to vector<14x1xf32>
    %476 = arith.addf %472, %475 : vector<14x1xf32>
    %477 = math.rsqrt %476 : vector<14x1xf32>
    %478 = vector.broadcast %477 : vector<14x1xf32> to vector<14x32xf32>
    %479 = arith.mulf %474, %478 : vector<14x32xf32>
    %480 = vector.broadcast %460 : vector<1x32xf32> to vector<14x32xf32>
    %481 = arith.mulf %479, %480 : vector<14x32xf32>
    %482 = vector.broadcast %461 : vector<1x32xf32> to vector<14x32xf32>
    %483 = arith.addf %481, %482 : vector<14x32xf32>
    %484 = arith.truncf %483 : vector<14x32xf32> to vector<14x32xbf16>
    %c0_200 = arith.constant 0 : index
    %c0_201 = arith.constant 0 : index
    %485 = vector.load %arg27[%c0_200, %c0_201] : memref<32x128xbf16, #tpu.memory_space<vmem>>, vector<32x128xbf16>
    %cst_202 = arith.constant dense<0.000000e+00> : vector<14x128xf32>
    %486 = tpu.matmul %484, %485, %cst_202 {dimension_numbers = #tpu.dot_dimension_numbers<[1], [0], [0], [1], [0, 0, 1, 1], [], []>} : vector<14x32xbf16>, vector<32x128xbf16>, vector<14x128xf32> -> vector<14x128xf32>
    %c0_203 = arith.constant 0 : index
    %c0_204 = arith.constant 0 : index
    %487 = vector.load %arg28[%c0_203, %c0_204] : memref<1x128xf32, #tpu.memory_space<vmem>>, vector<1x128xf32>
    %488 = vector.broadcast %487 : vector<1x128xf32> to vector<14x128xf32>
    %489 = arith.addf %486, %488 : vector<14x128xf32>
    %490 = vector.shape_cast %489 : vector<14x128xf32> to vector<2x7x128xf32>
    %c0_205 = arith.constant 0 : index
    %c0_206 = arith.constant 0 : index
    %c0_207 = arith.constant 0 : index
    %491 = vector.load %arg29[%c0_205, %c0_206, %c0_207] : memref<2x7x128xf32, #tpu.memory_space<vmem>>, vector<2x7x128xf32>
    tpu.vector_store %arg29[%c0_205, %c0_206, %c0_207], %490 {strides = array<i32>} : memref<2x7x128xf32, #tpu.memory_space<vmem>>, vector<2x7x128xf32>,
    return
  }
}

</mosaic_0001>

<bundles_post_ra>
// kernel: seq2seq_forward.2
= control target key start
LH: loop header
LB: loop body
LE: loop exit
PB: predicated region body
PF: predicated region fallthrough
CT: control target
= control target key end

     0   :  { %v3405_v0 = vmov 0.0   ;;  %vm3406_vm0 = vmmov 0   ;;  %vm120_vm1 = vcmask 261120   ;;  %s3407_s21 = smov 112   ;;  %s3408_s22 = smov 120   ;;  %vm185_vm2 = vcmask 64512   ;;  %s4119_s3 = inlined_call_operand.vmem [shape: bf16[2,32,96], index: 3, kind: input, shape index: {}]   ;;  %s4120_s0 = inlined_call_operand.vmem [shape: f32[2,8,32], index: 0, kind: input, shape index: {}]   ;;  %s4121_s4 = inlined_call_operand.vmem [shape: f32[2,1,96], index: 4, kind: input, shape index: {}]   ;;  %s4122_s2 = inlined_call_operand.vmem [shape: f32[2,8], index: 2, kind: input, shape index: {}]   ;;  %s4123_s1 = inlined_call_operand.vmem [shape: f32[8,8], index: 1, kind: input, shape index: {}]   ;;  %s4124_s5 = inlined_call_operand.vmem [shape: bf16[2,32,32], index: 5, kind: input, shape index: {}]   ;;  %s4125_s6 = inlined_call_operand.vmem [shape: f32[2,1,32], index: 6, kind: input, shape index: {}]   ;;  %s4126_s9 = inlined_call_operand.vmem [shape: bf16[2,32,64], index: 9, kind: input, shape index: {}]   ;;  %s4127_s11 = inlined_call_operand.vmem [shape: bf16[2,64,32], index: 11, kind: input, shape index: {}]   ;;  %s4128_s7 = inlined_call_operand.vmem [shape: f32[2,1,32], index: 7, kind: input, shape index: {}]   ;;  %s4129_s8 = inlined_call_operand.vmem [shape: f32[2,1,32], index: 8, kind: input, shape index: {}]   ;;  %s4130_s10 = inlined_call_operand.vmem [shape: f32[2,1,64], index: 10, kind: input, shape index: {}]   ;;  %s4131_s12 = inlined_call_operand.vmem [shape: f32[2,1,32], index: 12, kind: input, shape index: {}]   ;;  %s4132_s13 = inlined_call_operand.vmem [shape: f32[2,1,32], index: 13, kind: input, shape index: {}]   ;;  %s4133_s14 = inlined_call_operand.vmem [shape: f32[2,1,32], index: 14, kind: input, shape index: {}]   ;;  %s4134_s15 = inlined_call_operand.vmem [shape: f32[1,32], index: 15, kind: input, shape index: {}]   ;;  %s4135_s16 = inlined_call_operand.vmem [shape: f32[1,32], index: 16, kind: input, shape index: {}]   ;;  %s4136_s17 = inlined_call_operand.vmem [shape: f32[2,8,32], index: 17, kind: output, shape index: {}]  }
   0x1   :  { %4139 = sst [smem:[#allocation2_spill]] %s4119_s3  ;;  %2996 = vmatprep.subr.bf16.mxu1 %v3405_v0  ;;  %3000 = vmatprep.mubr.msk.bf16.mxu1 %vm3406_vm0, %v3405_v0  ;;  %v2778_v6 = vld [vmem:[%s4121_s4] ss:$0 sm:$0xff]  ;;  %s3409_s23 = smov 104   ;;  %vm681_vm3 = vcmask 1043456   ;;  %v73_v47 = vlaneseq  ;;  %vm1087_vm4 = vcmask 130048  }
   0x2   :  { %4140 = sst [smem:[#allocation3_spill]] %s4120_s0  ;;  %3010 = vmatprep.subr.bf16.mxu0 %v3405_v0  ;;  %3012 = vmatprep.mubr.msk.bf16.mxu0 %vm3406_vm0, %v3405_v0  ;;  %s3410_s24 = smov 96   ;;  %v3412_v45 = vmov 1966171168   ;;  %v59_v58 = vld [vmem:[%s4123_s1] sm:$0xff]  ;;  %vm1090_vm5 = vcmask 195584  }
   0x3   :  { %s4141_s26 = sld [smem:[#allocation2_spill]]  ;;  %s3411_s25 = smov 64   ;;  %v71_v46 = vunpack.c.l.s4 %v3412_v45  ;;  %v74_v49 = vshrl.u32 %v73_v47, 7  ;;  %vm1318_vm6 = vcmask 523264  }
   0x4   :  { %s4142_s30 = sld [smem:[#allocation3_spill]]  ;;  %v2777_v50 = vld.sshfl [vmem:[%s4122_s2] sm:$0x11 pattern:$0x75316420]  ;;  %s3413_s1 = smov 8  }
   0x5   :  { %v72_v48 = vunpack.c.0.s8 %v71_v46  ;;  %v69_v52 = vcombine.high %v2777_v50, %v2777_v50  ;;  %v86_v54 = vsub.s32 0, %v74_v49  ;;  %s3414_s0 = smov 16   ;;  %s3415_s20 = smov 24  }
   0x7   :  { %v75_v51 = vsub.s32 %v72_v48, %v74_v49 }
   0x9   :  { %v3301_v1 = vld [vmem:[%s4141_s26 + $0x8] sm:$0xff]   ;;  %v3302_v2 = vld [vmem:[%s4141_s26] sm:$0xff]   ;;  %v76_v53 = vrot.slane %v2777_v50, %v75_v51  ;;  %v83_v55 = vrot.slane %v69_v52, %v75_v51 }
   0xa   :  { %2997 = vmatpush3.bf16.msra.mxu1 %v3301_v1  ;;  %v3521_v3 = vld [vmem:[%s4142_s30] sm:$0xff]  ;;  %v3526_v4 = vld [vmem:[%s4142_s30 + $0x8] sm:$0xff] }
   0xb   :  { %2998 = vmatprep.subr.bf16.mxu1 %v3405_v0  ;;  %v96_v5 = vpack.c.bf16 %v3526_v4, %v3521_v3  ;;  %v87_v56 = vrot.slane %v76_v53, %v86_v54  ;;  %v91_v57 = vrot.slane %v83_v55, %v86_v54 }
   0xd   :  { %v3626_v59 = vadd.f32 %v87_v56, %v59_v58  ;;  %v3628_v60 = vadd.f32 %v91_v57, %v59_v58 }
   0xe   :  { %2999 = vmatpush3.bf16.msra.mxu1 %v3302_v2 }
   0xf   :  { %3004 = vmatprep.subr.bf16.mxu1 %v3405_v0 }
  0x11   :  { %3001 = vmatmul.mubr.msk.bf16.vlgmr.msra.gmra.mxu1 %vm120_vm1, %v96_v5 }
  0x12   :  { %3006 = vmatprep.mubr.msk.bf16.mxu1 %vm3406_vm0, %v3405_v0 }
  0xd1   :  { %v158_v7 = vpop.f32.mrf.mxu1 }
  0xd2   :  { %v159_v8 = vadd.f32 %v2778_v6, %v158_v7 }
  0xd3   :  { %v3002_v9 = vpop.f32.mrf.mxu1 }
  0xd4   :  { %v2900_v10 = vpack.c.bf16 %v159_v8, %v159_v8 }
  0xd5   :  { %v161_v11 = vpop.f32.mrf.mxu1 }
  0xd6   :  { %v162_v12 = vadd.f32 %v2778_v6, %v161_v11  ;;  %175 = vrot.lane.b32.xlu1 %v2900_v10, %s3407_s21  ;;  %171 = vrot.lane.b32.xlu0 %v2900_v10, %s3408_s22 }
  0xd7   :  { %v3003_v13 = vpop.f32.mrf.mxu1 }
  0xd8   :  { %v3540_v14 = vpack.c.bf16 %v162_v12, %v162_v12 }
  0xda   :  { %177 = vrot.lane.b32.xlu1 %v3540_v14, %s3407_s21  ;;  %173 = vrot.lane.b32.xlu0 %v3540_v14, %s3408_s22 }
  0xde   :  { %181 = vrot.lane.b32.xlu1 %v3540_v14, %s3409_s23  ;;  %179 = vrot.lane.b32.xlu0 %v2900_v10, %s3409_s23 }
  0xe2   :  { %232 = vrot.lane.b32.xlu1 %v3540_v14, %s3410_s24  ;;  %183 = vrot.lane.b32.xlu0 %v2900_v10, %s3410_s24 }
 0x148   :  { %v176_v15 = vpop.permute.xlu1 %175  ;;  %v172_v16 = vpop.permute.xlu0 %171 }
 0x149   :  { %v3552_v17 = vcombine.low %v172_v16, %v172_v16  ;;  %v3556_v20 = vcombine.low %v176_v15, %v176_v15 }
 0x14b   :  { %282 = vrot.lane.b32.xlu0 %v3552_v17, %s3410_s24 }
 0x14c   :  { %v178_v18 = vpop.permute.xlu1 %177  ;;  %v174_v19 = vpop.permute.xlu0 %173 }
 0x14d   :  { %v3558_v21 = vcombine.low %v174_v19, %v174_v19  ;;  %v3564_v24 = vcombine.low %v178_v18, %v178_v18 }
 0x14f   :  { %382 = vrot.lane.b32.xlu0 %v3556_v20, %s3410_s24  ;;  %332 = vrot.lane.b32.xlu1 %v3558_v21, %s3410_s24 }
 0x150   :  { %v182_v22 = vpop.permute.xlu1 %181  ;;  %v180_v23 = vpop.permute.xlu0 %179 }
 0x151   :  { %v3566_v25 = vcombine.low %v180_v23, %v180_v23  ;;  %v3572_v28 = vcombine.low %v182_v22, %v182_v22 }
 0x153   :  { %432 = vrot.lane.b32.xlu1 %v3564_v24, %s3410_s24  ;;  %482 = vrot.lane.b32.xlu0 %v3566_v25, %s3410_s24 }
 0x154   :  { %v233_v26 = vpop.permute.xlu1 %232  ;;  %v184_v27 = vpop.permute.xlu0 %183 }
 0x155   :  { %v190_v29 = vsel %vm185_vm2, %v184_v27, 0  ;;  %v238_v30 = vsel %vm185_vm2, %v233_v26, 0 }
 0x156   :  { %3005 = vmatpush3.bf16.xpose.msra.mxu1 %v190_v29  ;;  %3011 = vmatpush3.bf16.xpose.msra.mxu0 %v238_v30 }
 0x157   :  { %532 = vrot.lane.b32.xlu1 %v3572_v28, %s3410_s24  ;;  %3016 = vmatprep.subr.bf16.mxu1 %v3405_v0 }
 0x158   :  { %3022 = vmatprep.subr.bf16.mxu0 %v3405_v0 }
 0x15b   :  { %676 = vrot.lane.b32.xlu1 %v2900_v10, %s3411_s25 }
 0x15d   :  { %3007 = vmatmul.mubr.msk.bf16.vlgmr.msra.gmra.mxu1 %vm185_vm2, %v2900_v10  ;;  %3013 = vmatmul.mubr.msk.bf16.vlgmr.msra.gmra.mxu0 %vm185_vm2, %v3540_v14 }
 0x15e   :  { %3018 = vmatprep.mubr.msk.bf16.mxu1 %vm3406_vm0, %v3405_v0  ;;  %3024 = vmatprep.mubr.msk.bf16.mxu0 %vm3406_vm0, %v3405_v0 }
 0x1bd   :  { %v283_v31 = vpop.permute.xlu0 %282 }
 0x1be   :  { %v288_v32 = vsel %vm185_vm2, %v283_v31, 0 }
 0x1bf   :  { %3017 = vmatpush3.bf16.xpose.msra.mxu1 %v288_v32 }
 0x1c0   :  { %3028 = vmatprep.subr.bf16.mxu1 %v3405_v0 }
 0x1c1   :  { %v333_v33 = vpop.permute.xlu1 %332  ;;  %v383_v35 = vpop.permute.xlu0 %382 }
 0x1c2   :  { %v338_v34 = vsel %vm185_vm2, %v333_v33, 0  ;;  %v388_v36 = vsel %vm185_vm2, %v383_v35, 0 }
 0x1c3   :  { %3023 = vmatpush3.bf16.xpose.msra.mxu0 %v338_v34 }
 0x1c4   :  { %3034 = vmatprep.subr.bf16.mxu0 %v3405_v0 }
 0x1c5   :  { %v433_v37 = vpop.permute.xlu1 %432  ;;  %v483_v39 = vpop.permute.xlu0 %482 }
 0x1c6   :  { %3019 = vmatmul.mubr.msk.bf16.vlgmr.msra.gmra.mxu1 %vm185_vm2, %v172_v16  ;;  %v438_v38 = vsel %vm185_vm2, %v433_v37, 0  ;;  %v488_v41 = vsel %vm185_vm2, %v483_v39, 0 }
 0x1c7   :  { %3029 = vmatpush3.bf16.xpose.msra.mxu1 %v388_v36  ;;  %3030 = vmatprep.mubr.msk.bf16.mxu1 %vm3406_vm0, %v3405_v0 }
 0x1c8   :  { %3040 = vmatprep.subr.bf16.mxu1 %v3405_v0 }
 0x1c9   :  { %v533_v40 = vpop.permute.xlu1 %532 }
 0x1ca   :  { %3025 = vmatmul.mubr.msk.bf16.vlgmr.msra.gmra.mxu0 %vm185_vm2, %v174_v19  ;;  %v538_v42 = vsel %vm185_vm2, %v533_v40, 0 }
 0x1cb   :  { %3035 = vmatpush3.bf16.xpose.msra.mxu0 %v438_v38  ;;  %3036 = vmatprep.mubr.msk.bf16.mxu0 %vm3406_vm0, %v3405_v0 }
 0x1cc   :  { %3046 = vmatprep.subr.bf16.mxu0 %v3405_v0 }
 0x1cd   :  { %v677_v43 = vpop.permute.xlu1 %676 }
 0x1ce   :  { %3031 = vmatmul.mubr.msk.bf16.vlgmr.msra.gmra.mxu1 %vm185_vm2, %v176_v15  ;;  %v683_v44 = vsel %vm681_vm3, %v677_v43, 0 }
 0x1cf   :  { %3041 = vmatpush3.bf16.xpose.msra.mxu1 %v488_v41  ;;  %3042 = vmatprep.mubr.msk.bf16.mxu1 %vm3406_vm0, %v3405_v0 }
 0x1d0   :  { %3052 = vmatprep.subr.bf16.mxu1 %v3405_v0 }
 0x1d2   :  { %3037 = vmatmul.mubr.msk.bf16.vlgmr.msra.gmra.mxu0 %vm185_vm2, %v178_v18 }
 0x1d3   :  { %3047 = vmatpush3.bf16.xpose.msra.mxu0 %v538_v42  ;;  %3048 = vmatprep.mubr.msk.bf16.mxu0 %vm3406_vm0, %v3405_v0 }
 0x1d4   :  { %3058 = vmatprep.subr.bf16.mxu0 %v3405_v0 }
 0x1d6   :  { %3043 = vmatmul.mubr.msk.bf16.vlgmr.msra.gmra.mxu1 %vm185_vm2, %v180_v23 }
 0x1d7   :  { %3053 = vmatpush3.bf16.msra.mxu1 %v683_v44  ;;  %3054 = vmatprep.mubr.msk.bf16.mxu1 %vm3406_vm0, %v3405_v0 }
 0x1d8   :  { %3064 = vmatprep.subr.bf16.mxu1 %v3405_v0 }
 0x1da   :  { %3049 = vmatmul.mubr.msk.bf16.vlgmr.msra.gmra.mxu0 %vm185_vm2, %v182_v22 }
 0x1db   :  { %3060 = vmatprep.mubr.msk.bf16.mxu0 %vm3406_vm0, %v3405_v0 }
 0x21d   :  { %v226_v61 = vpop.f32.mrf.mxu1  ;;  %v274_v62 = vpop.f32.mrf.mxu0 }
 0x21e   :  { %v227_v63 = vadd.f32 %v226_v61, %v3626_v59  ;;  %v275_v1 = vadd.f32 %v274_v62, %v3628_v60 }
 0x21f   :  { %v3008_v2 = vpop.f32.mrf.mxu1  ;;  %v3014_v5 = vpop.f32.mrf.mxu0 }
 0x220   :  { %v583_v6 = vsel %vm185_vm2, %v275_v1, -inf  ;;  %v580_v7 = vsel %vm185_vm2, %v227_v63, -inf }
 0x221   :  { %v277_v8 = vpop.f32.mrf.mxu0  ;;  %584 = vmax.xlane.f32.xlu1 %v583_v6  ;;  %581 = vmax.xlane.f32.xlu0 %v580_v7  ;;  %v229_v9 = vpop.f32.mrf.mxu1 }
 0x223   :  { %v3009_v10 = vpop.f32.mrf.mxu1  ;;  %v3015_v11 = vpop.f32.mrf.mxu0 }
 0x286   :  { %v324_v12 = vpop.f32.mrf.mxu1 }
 0x287   :  { %v325_v13 = vadd.f32 %v324_v12, %v3626_v59 }
 0x288   :  { %v3020_v15 = vpop.f32.mrf.mxu1 }
 0x289   :  { %v586_v16 = vsel %vm185_vm2, %v325_v13, -inf }
 0x28a   :  { %v374_v18 = vpop.f32.mrf.mxu0  ;;  %587 = vmax.xlane.f32.xlu0 %v586_v16  ;;  %v327_v19 = vpop.f32.mrf.mxu1 }
 0x28b   :  { %v375_v22 = vadd.f32 %v374_v18, %v3628_v60 }
 0x28c   :  { %v3021_v23 = vpop.f32.mrf.mxu1  ;;  %v3026_v26 = vpop.f32.mrf.mxu0 }
 0x28d   :  { %v589_v27 = vsel %vm185_vm2, %v375_v22, -inf }
 0x28e   :  { %v377_v29 = vpop.f32.mrf.mxu0  ;;  %590 = vmax.xlane.f32.xlu0 %v589_v27  ;;  %v424_v30 = vpop.f32.mrf.mxu1 }
 0x28f   :  { %v3639_v31 = vadd.f32 %v424_v30, %v3626_v59 }
 0x290   :  { %v3027_v32 = vpop.f32.mrf.mxu0  ;;  %v3032_v33 = vpop.f32.mrf.mxu1 }
 0x291   :  { %v592_v34 = vsel %vm185_vm2, %v3639_v31, -inf }
 0x292   :  { %v474_v35 = vpop.f32.mrf.mxu0  ;;  %593 = vmax.xlane.f32.xlu1 %v592_v34  ;;  %v427_v36 = vpop.f32.mrf.mxu1 }
 0x293   :  { %v3644_v37 = vadd.f32 %v474_v35, %v3628_v60 }
 0x294   :  { %v3033_v38 = vpop.f32.mrf.mxu1  ;;  %v3038_v39 = vpop.f32.mrf.mxu0 }
 0x295   :  { %v595_v40 = vsel %vm185_vm2, %v3644_v37, -inf }
 0x296   :  { %v477_v41 = vpop.f32.mrf.mxu0  ;;  %596 = vmax.xlane.f32.xlu0 %v595_v40  ;;  %v524_v42 = vpop.f32.mrf.mxu1 }
 0x297   :  { %v525_v43 = vadd.f32 %v524_v42, %v3626_v59 }
 0x298   :  { %v3039_v44 = vpop.f32.mrf.mxu0  ;;  %v3044_v45 = vpop.f32.mrf.mxu1 }
 0x299   :  { %v598_v46 = vsel %vm185_vm2, %v525_v43, -inf }
 0x29a   :  { %v574_v47 = vpop.f32.mrf.mxu0  ;;  %599 = vmax.xlane.f32.xlu1 %v598_v46  ;;  %v527_v48 = vpop.f32.mrf.mxu1 }
 0x29b   :  { %v575_v49 = vadd.f32 %v574_v47, %v3628_v60 }
 0x29c   :  { %v3045_v50 = vpop.f32.mrf.mxu1  ;;  %v3050_v51 = vpop.f32.mrf.mxu0 }
 0x29d   :  { %v601_v52 = vsel %vm185_vm2, %v575_v49, -inf }
 0x29e   :  { %v577_v53 = vpop.f32.mrf.mxu0  ;;  %602 = vmax.xlane.f32.xlu0 %v601_v52 }
 0x2a0   :  { %v3051_v54 = vpop.f32.mrf.mxu0 }
 0x2aa   :  { %v585_v55 = vpop.xlane.xlu1 %584  ;;  %v582_v56 = vpop.xlane.xlu0 %581 }
 0x2ab   :  { %773 = vrot.lane.b32.xlu1 %v3552_v17, %s3411_s25  ;;  %v605_v57 = vsub.f32 %v275_v1, %v585_v55  ;;  %v604_v58 = vsub.f32 %v227_v63, %v582_v56 }
 0x2ad   :  { %v614_v61 = vmul.f32 1.442695, %v605_v57  ;;  %v612_v62 = vmul.f32 1.442695, %v604_v58 }
 0x2af   :  { %821 = vrot.lane.b32.xlu1 %v3558_v21, %s3411_s25  ;;  %3321 = vpow2.f32 %v614_v61 }
 0x2b0   :  { %3323 = vpow2.f32 %v612_v62 }
 0x2b4   :  { %725 = vrot.lane.b32.xlu0 %v3540_v14, %s3411_s25 }
 0x2bc   :  { %v3322_v2 = vpop.eup %3321 }
 0x2bd   :  { %v3324_v5 = vpop.eup %3323  ;;  %v631_v6 = vsel %vm185_vm2, %v3322_v2, 0.0 }
 0x2be   :  { %v628_v17 = vsel %vm185_vm2, %v3324_v5, 0.0 }
 0x2d3   :  { %632 = vadd.xlane.f32.xlu0 %v631_v6  ;;  %629 = vadd.xlane.f32.xlu1 %v628_v17 }
 0x313   :  { %v588_v21 = vpop.xlane.xlu0 %587 }
 0x314   :  { %v606_v7 = vsub.f32 %v325_v13, %v588_v21 }
 0x316   :  { %v616_v8 = vmul.f32 1.442695, %v606_v7 }
 0x317   :  { %v591_v14 = vpop.xlane.xlu0 %590 }
 0x318   :  { %3325 = vpow2.f32 %v616_v8  ;;  %v607_v9 = vsub.f32 %v375_v22, %v591_v14 }
 0x31a   :  { %v618_v1 = vmul.f32 1.442695, %v607_v9 }
 0x31b   :  { %v594_v19 = vpop.xlane.xlu1 %593 }
 0x31c   :  { %3327 = vpow2.f32 %v618_v1  ;;  %v608_v22 = vsub.f32 %v3639_v31, %v594_v19 }
 0x31e   :  { %v620_v27 = vmul.f32 1.442695, %v608_v22 }
 0x31f   :  { %v597_v63 = vpop.xlane.xlu0 %596 }
 0x320   :  { %v609_v26 = vsub.f32 %v3644_v37, %v597_v63  ;;  %3329 = vpow2.f32 %v620_v27 }
 0x322   :  { %v622_v30 = vmul.f32 1.442695, %v609_v26 }
 0x323   :  { %v600_v23 = vpop.xlane.xlu1 %599 }
 0x324   :  { %v610_v29 = vsub.f32 %v525_v43, %v600_v23  ;;  %3331 = vpow2.f32 %v622_v30 }
 0x325   :  { %v3660_v10 = vpop.eup %3325 }
 0x326   :  { %v634_v11 = vsel %vm185_vm2, %v3660_v10, 0.0  ;;  %v624_v32 = vmul.f32 1.442695, %v610_v29 }
 0x327   :  { %v603_v12 = vpop.xlane.xlu0 %602  ;;  %635 = vadd.xlane.f32.xlu1 %v634_v11  ;;  %v774_v35 = vpop.permute.xlu1 %773 }
 0x328   :  { %v611_v33 = vsub.f32 %v575_v49, %v603_v12  ;;  %3333 = vpow2.f32 %v624_v32  ;;  %v779_v51 = vsel %vm681_vm3, %v774_v35, 0 }
 0x329   :  { %v3664_v15 = vpop.eup %3327 }
 0x32a   :  { %v637_v16 = vsel %vm185_vm2, %v3664_v15, 0.0  ;;  %v626_v34 = vmul.f32 1.442695, %v611_v33 }
 0x32b   :  { %638 = vadd.xlane.f32.xlu0 %v637_v16  ;;  %v726_v13 = vpop.permute.xlu0 %725  ;;  %v822_v36 = vpop.permute.xlu1 %821 }
 0x32c   :  { %v731_v18 = vsel %vm681_vm3, %v726_v13, 0  ;;  %3335 = vpow2.f32 %v626_v34  ;;  %v827_v50 = vsel %vm681_vm3, %v822_v36, 0 }
 0x32d   :  { %3059 = vmatpush3.bf16.msra.mxu0 %v731_v18 }
 0x32e   :  { %3070 = vmatprep.subr.bf16.mxu0 %v3405_v0 }
 0x338   :  { %917 = vrot.lane.b32.xlu1 %v3564_v24, %s3411_s25  ;;  %v3676_v24 = vpop.eup %3329 }
 0x339   :  { %v640_v31 = vsel %vm185_vm2, %v3676_v24, 0.0 }
 0x341   :  { %869 = vrot.lane.b32.xlu0 %v3556_v20, %s3411_s25  ;;  %v3678_v20 = vpop.eup %3331 }
 0x342   :  { %v3682_v37 = vpop.eup %3333  ;;  %v643_v40 = vsel %vm185_vm2, %v3678_v20, 0.0 }
 0x343   :  { %v646_v41 = vsel %vm185_vm2, %v3682_v37, 0.0  ;;  %v3688_v42 = vpop.eup %3335 }
 0x344   :  { %v649_v43 = vsel %vm185_vm2, %v3688_v42, 0.0 }
 0x35c   :  { %v633_v38 = vpop.xlane.xlu0 %632  ;;  %641 = vadd.xlane.f32.xlu1 %v640_v31  ;;  %v630_v39 = vpop.xlane.xlu1 %629 }
 0x35d   :  { %3337 = vrcp.f32 %v633_v38 }
 0x35e   :  { %3339 = vrcp.f32 %v630_v39 }
 0x360   :  { %644 = vadd.xlane.f32.xlu0 %v643_v40  ;;  %647 = vadd.xlane.f32.xlu1 %v646_v41 }
 0x364   :  { %650 = vadd.xlane.f32.xlu0 %v649_v43 }
 0x36a   :  { %v3338_v44 = vpop.eup %3337 }
 0x36b   :  { %v3340_v45 = vpop.eup %3339  ;;  %v661_v46 = vmul.f32 %v3338_v44, %v3322_v2 }
 0x36c   :  { %v660_v47 = vmul.f32 %v3340_v45, %v3324_v5 }
 0x36d   :  { %v669_v48 = vpack.c.bf16 %v661_v46, %v661_v46 }
 0x36e   :  { %v668_v49 = vpack.c.bf16 %v660_v47, %v660_v47  ;;  %v3304_v47 = vld [vmem:[%s4124_s5] sm:$0xff]  }
 0x36f   :  { %3061 = vmatmul.mubr.msk.bf16.vlgmr.msra.gmra.mxu0 %vm185_vm2, %v669_v48 }
 0x370   :  { %3055 = vmatmul.mubr.msk.bf16.vlgmr.msra.gmra.mxu1 %vm185_vm2, %v668_v49  ;;  %3071 = vmatpush3.bf16.msra.mxu0 %v827_v50 }
 0x371   :  { %3065 = vmatpush3.bf16.msra.mxu1 %v779_v51  ;;  %1013 = vrot.lane.b32.xlu1 %v3572_v28, %s3411_s25 }
 0x372   :  { %3066 = vmatprep.mubr.msk.bf16.mxu1 %vm3406_vm0, %v3405_v0  ;;  %3076 = vmatprep.subr.bf16.mxu1 %v3405_v0 }
 0x373   :  { %3072 = vmatprep.mubr.msk.bf16.mxu0 %vm3406_vm0, %v3405_v0  ;;  %3082 = vmatprep.subr.bf16.mxu0 %v3405_v0 }
 0x37a   :  { %965 = vrot.lane.b32.xlu0 %v3566_v25, %s3411_s25 }
 0x3b0   :  { %v636_v52 = vpop.xlane.xlu1 %635 }
 0x3b1   :  { %3341 = vrcp.f32 %v636_v52 }
 0x3b4   :  { %v639_v53 = vpop.xlane.xlu0 %638  ;;  %v918_v62 = vpop.permute.xlu1 %917 }
 0x3b5   :  { %3343 = vrcp.f32 %v639_v53  ;;  %v923_v2 = vsel %vm681_vm3, %v918_v62, 0 }
 0x3b8   :  { %v870_v55 = vpop.permute.xlu0 %869 }
 0x3b9   :  { %v875_v58 = vsel %vm681_vm3, %v870_v55, 0 }
 0x3be   :  { %v3342_v54 = vpop.eup %3341 }
 0x3bf   :  { %v662_v28 = vmul.f32 %v3342_v54, %v3660_v10 }
 0x3c1   :  { %v670_v56 = vpack.c.bf16 %v662_v28, %v662_v28 }
 0x3c2   :  { %v3344_v57 = vpop.eup %3343 }
 0x3c3   :  { %3067 = vmatmul.mubr.msk.bf16.vlgmr.msra.gmra.mxu1 %vm185_vm2, %v670_v56  ;;  %v663_v61 = vmul.f32 %v3344_v57, %v3664_v15 }
 0x3c4   :  { %3077 = vmatpush3.bf16.msra.mxu1 %v875_v58  ;;  %3078 = vmatprep.mubr.msk.bf16.mxu1 %vm3406_vm0, %v3405_v0 }
 0x3c5   :  { %v671_v25 = vpack.c.bf16 %v663_v61, %v663_v61  ;;  %3088 = vmatprep.subr.bf16.mxu1 %v3405_v0 }
 0x3c7   :  { %3073 = vmatmul.mubr.msk.bf16.vlgmr.msra.gmra.mxu0 %vm185_vm2, %v671_v25 }
 0x3c8   :  { %3083 = vmatpush3.bf16.msra.mxu0 %v923_v2  ;;  %3084 = vmatprep.mubr.msk.bf16.mxu0 %vm3406_vm0, %v3405_v0 }
 0x3c9   :  { %3094 = vmatprep.subr.bf16.mxu0 %v3405_v0 }
 0x3e5   :  { %v642_v5 = vpop.xlane.xlu1 %641 }
 0x3e6   :  { %3345 = vrcp.f32 %v642_v5 }
 0x3e9   :  { %v645_v6 = vpop.xlane.xlu0 %644  ;;  %v648_v17 = vpop.xlane.xlu1 %647 }
 0x3ea   :  { %3347 = vrcp.f32 %v645_v6 }
 0x3eb   :  { %3349 = vrcp.f32 %v648_v17 }
 0x3ed   :  { %v651_v21 = vpop.xlane.xlu0 %650  ;;  %v1014_v12 = vpop.permute.xlu1 %1013 }
 0x3ee   :  { %3351 = vrcp.f32 %v651_v21  ;;  %v1019_v18 = vsel %vm681_vm3, %v1014_v12, 0 }
 0x3f1   :  { %v966_v14 = vpop.permute.xlu0 %965 }
 0x3f2   :  { %v971_v10 = vsel %vm681_vm3, %v966_v14, 0 }
 0x3f3   :  { %v3346_v7 = vpop.eup %3345 }
 0x3f4   :  { %v664_v8 = vmul.f32 %v3346_v7, %v3676_v24 }
 0x3f6   :  { %v672_v9 = vpack.c.bf16 %v664_v8, %v664_v8 }
 0x3f7   :  { %v3348_v1 = vpop.eup %3347 }
 0x3f8   :  { %v3350_v63 = vpop.eup %3349  ;;  %3079 = vmatmul.mubr.msk.bf16.vlgmr.msra.gmra.mxu1 %vm185_vm2, %v672_v9  ;;  %v665_v11 = vmul.f32 %v3348_v1, %v3678_v20 }
 0x3f9   :  { %3089 = vmatpush3.bf16.msra.mxu1 %v971_v10  ;;  %3090 = vmatprep.mubr.msk.bf16.mxu1 %vm3406_vm0, %v3405_v0  ;;  %v666_v16 = vmul.f32 %v3350_v63, %v3682_v37 }
 0x3fa   :  { %v673_v15 = vpack.c.bf16 %v665_v11, %v665_v11  ;;  %3100 = vmatprep.subr.bf16.mxu1 %v3405_v0 }
 0x3fb   :  { %v3352_v13 = vpop.eup %3351  ;;  %v674_v19 = vpack.c.bf16 %v666_v16, %v666_v16  ;;  %v2806_v16 = vld [vmem:[%s4125_s6] ss:$0 sm:$0xff] }
 0x3fc   :  { %3085 = vmatmul.mubr.msk.bf16.vlgmr.msra.gmra.mxu0 %vm185_vm2, %v673_v15  ;;  %v667_v22 = vmul.f32 %v3352_v13, %v3688_v42  ;;  %v3303_v42 = vld [vmem:[%s4124_s5 + $0x8] sm:$0xff]  }
 0x3fd   :  { %3095 = vmatpush3.bf16.msra.mxu0 %v1019_v18  ;;  %3096 = vmatprep.mubr.msk.bf16.mxu0 %vm3406_vm0, %v3405_v0 }
 0x3fe   :  { %3108 = vmatprep.subr.bf16.mxu0 %v3405_v0  ;;  %v675_v23 = vpack.c.bf16 %v667_v22, %v667_v22 }
 0x400   :  { %3091 = vmatmul.mubr.msk.bf16.vlgmr.msra.gmra.mxu1 %vm185_vm2, %v674_v19 }
 0x401   :  { %3104 = vmatprep.mubr.msk.bf16.mxu1 %vm3406_vm0, %v3405_v0  ;;  %3101 = vmatpush3.bf16.msra.mxu1 %v3303_v42 }
 0x402   :  { %3102 = vmatprep.subr.bf16.mxu1 %v3405_v0 }
 0x404   :  { %3097 = vmatmul.mubr.msk.bf16.vlgmr.msra.gmra.mxu0 %vm185_vm2, %v675_v23 }
 0x405   :  { %3112 = vmatprep.mubr.msk.bf16.mxu0 %vm3406_vm0, %v3405_v0  ;;  %3103 = vmatpush3.bf16.msra.mxu1 %v3304_v47 }
 0x406   :  { %3116 = vmatprep.subr.bf16.mxu1 %v3405_v0 }
 0x42f   :  { %v767_v26 = vpop.f32.mrf.mxu0 }
 0x430   :  { %v719_v27 = vpop.f32.mrf.mxu1 }
 0x431   :  { %v3062_v29 = vpop.f32.mrf.mxu0 }
 0x432   :  { %v3056_v30 = vpop.f32.mrf.mxu1 }
 0x433   :  { %v770_v32 = vpop.f32.mrf.mxu0 }
 0x434   :  { %v722_v33 = vpop.f32.mrf.mxu1 }
 0x435   :  { %v3063_v34 = vpop.f32.mrf.mxu0 }
 0x436   :  { %v3057_v35 = vpop.f32.mrf.mxu1 }
 0x483   :  { %v815_v24 = vpop.f32.mrf.mxu1 }
 0x485   :  { %v3068_v36 = vpop.f32.mrf.mxu1 }
 0x487   :  { %v818_v20 = vpop.f32.mrf.mxu1  ;;  %v863_v31 = vpop.f32.mrf.mxu0 }
 0x488   :  { %v3271_v37 = vpack.i.bf16 %v863_v31, %v815_v24 }
 0x489   :  { %v3069_v38 = vpop.f32.mrf.mxu1  ;;  %v3074_v39 = vpop.f32.mrf.mxu0 }
 0x48a   :  { %3272 = vrot.lane.b32.xlu0 %v3271_v37, %s3413_s1  ;;  %v3306_v39 = vld [vmem:[%s4126_s9] sm:$0xff]  }
 0x48b   :  { %v866_v40 = vpop.f32.mrf.mxu0 }
 0x48c   :  { %v3307_v40 = vld [vmem:[%s4127_s11 + $0x18] sm:$0xff]  }
 0x48d   :  { %v3075_v41 = vpop.f32.mrf.mxu0 }
 0x4b8   :  { %v911_v43 = vpop.f32.mrf.mxu1 }
 0x4ba   :  { %v3080_v44 = vpop.f32.mrf.mxu1 }
 0x4bc   :  { %v914_v45 = vpop.f32.mrf.mxu1  ;;  %v959_v46 = vpop.f32.mrf.mxu0 }
 0x4bd   :  { %v3276_v48 = vpack.i.bf16 %v959_v46, %v911_v43 }
 0x4be   :  { %v3081_v49 = vpop.f32.mrf.mxu1  ;;  %v3086_v50 = vpop.f32.mrf.mxu0 }
 0x4bf   :  { %3277 = vrot.lane.b32.xlu1 %v3276_v48, %s3414_s0  ;;  %v2810_v49 = vld [vmem:[%s4128_s7] ss:$0 sm:$0xff] }
 0x4c0   :  { %v962_v51 = vpop.f32.mrf.mxu0  ;;  %v1007_v52 = vpop.f32.mrf.mxu1 }
 0x4c2   :  { %v3087_v53 = vpop.f32.mrf.mxu0  ;;  %v3092_v54 = vpop.f32.mrf.mxu1 }
 0x4c3   :  { %v2811_v53 = vld [vmem:[%s4129_s8] ss:$0 sm:$0xff] }
 0x4c4   :  { %v1010_v28 = vpop.f32.mrf.mxu1  ;;  %v1055_v55 = vpop.f32.mrf.mxu0 }
 0x4c5   :  { %v3281_v56 = vpack.i.bf16 %v1055_v55, %v1007_v52 }
 0x4c6   :  { %v3093_v57 = vpop.f32.mrf.mxu1  ;;  %v3098_v58 = vpop.f32.mrf.mxu0 }
 0x4c7   :  { %3282 = vrot.lane.b32.xlu0 %v3281_v56, %s3415_s20  ;;  %v3308_v57 = vld [vmem:[%s4127_s11 + $0x10] sm:$0xff]   ;;  %v3309_v58 = vld [vmem:[%s4127_s11 + $0x8] sm:$0xff]  }
 0x4c8   :  { %v1058_v61 = vpop.f32.mrf.mxu0 }
 0x4c9   :  { %v3310_v61 = vld [vmem:[%s4127_s11] sm:$0xff]  }
 0x4ca   :  { %v3099_v62 = vpop.f32.mrf.mxu0 }
 0x4cb   :  { %v2812_v62 = vld [vmem:[%s4130_s10] ss:$0 sm:$0xff] }
 0x4fc   :  { %v3273_v25 = vpop.permute.xlu0 %3272 }
 0x4fd   :  { %v3275_v5 = vunpack.i.h.bf16 %v3273_v25  ;;  %v3274_v6 = vunpack.i.l.bf16 %v3273_v25 }
 0x4ff   :  { %v1086_v8 = vsel %vm185_vm2, %v767_v26, %v3275_v5  ;;  %v1085_v14 = vsel %vm185_vm2, %v719_v27, %v3274_v6 }
 0x531   :  { %v3278_v2 = vpop.permute.xlu1 %3277 }
 0x532   :  { %v3280_v17 = vunpack.i.h.bf16 %v3278_v2  ;;  %v3279_v21 = vunpack.i.l.bf16 %v3278_v2 }
 0x534   :  { %v1089_v63 = vsel %vm1087_vm4, %v1086_v8, %v3280_v17  ;;  %v1088_v10 = vsel %vm1087_vm4, %v1085_v14, %v3279_v21 }
 0x539   :  { %v3283_v7 = vpop.permute.xlu0 %3282 }
 0x53a   :  { %v3285_v9 = vunpack.i.h.bf16 %v3283_v7  ;;  %v3284_v1 = vunpack.i.l.bf16 %v3283_v7 }
 0x53c   :  { %v1092_v11 = vsel %vm1090_vm5, %v1089_v63, %v3285_v9  ;;  %v1091_v12 = vsel %vm1090_vm5, %v1088_v10, %v3284_v1  ;;  %v2816_v9 = vld [vmem:[%s4131_s12] ss:$0 sm:$0xff] }
 0x53d   :  { %v1093_v15 = vpack.c.bf16 %v1092_v11, %v1091_v12 }
 0x53f   :  { %3105 = vmatmul.mubr.msk.bf16.vlgmr.msra.gmra.mxu1 %vm120_vm1, %v1093_v15 }
 0x540   :  { %3124 = vmatprep.mubr.msk.bf16.mxu1 %vm3406_vm0, %v3405_v0  ;;  %3117 = vmatpush3.bf16.msra.mxu1 %v3307_v40 }
 0x541   :  { %3118 = vmatprep.subr.bf16.mxu1 %v3405_v0 }
 0x544   :  { %3119 = vmatpush3.bf16.msra.mxu1 %v3308_v57 }
 0x545   :  { %3120 = vmatprep.subr.bf16.mxu1 %v3405_v0 }
 0x548   :  { %3121 = vmatpush3.bf16.msra.mxu1 %v3309_v58 }
 0x549   :  { %3122 = vmatprep.subr.bf16.mxu1 %v3405_v0 }
 0x54c   :  { %3123 = vmatpush3.bf16.msra.mxu1 %v3310_v61 }
 0x54d   :  { %3142 = vmatprep.subr.bf16.mxu1 %v3405_v0 }
 0x5ff   :  { %v1154_v13 = vpop.f32.mrf.mxu1 }
 0x600   :  { %v1155_v18 = vadd.f32 %v2806_v16, %v1154_v13 }
 0x601   :  { %v3106_v19 = vpop.f32.mrf.mxu1 }
 0x602   :  { %v1161_v22 = vadd.f32 %v1155_v18, %v3521_v3 }
 0x603   :  { %v1157_v23 = vpop.f32.mrf.mxu1 }
 0x604   :  { %v1158_v26 = vadd.f32 %v2806_v16, %v1157_v23  ;;  %v1165_v27 = vsel %vm120_vm1, %v1161_v22, 0.0 }
 0x605   :  { %1166 = vadd.xlane.f32.xlu1 %v1165_v27  ;;  %v3107_v29 = vpop.f32.mrf.mxu1 }
 0x606   :  { %v1162_v30 = vadd.f32 %v1158_v26, %v3526_v4  ;;  %v3305_v4 = vld [vmem:[%s4126_s9 + $0x8] sm:$0xff]  }
 0x607   :  { %3109 = vmatpush3.bf16.msra.mxu0 %v3305_v4 }
 0x608   :  { %v1168_v32 = vsel %vm120_vm1, %v1162_v30, 0.0  ;;  %3110 = vmatprep.subr.bf16.mxu0 %v3405_v0 }
 0x609   :  { %1169 = vadd.xlane.f32.xlu0 %v1168_v32 }
 0x60b   :  { %3111 = vmatpush3.bf16.msra.mxu0 %v3306_v39 }
 0x60c   :  { %3128 = vmatprep.subr.bf16.mxu0 %v3405_v0 }
 0x68e   :  { %v1167_v33 = vpop.xlane.xlu1 %1166 }
 0x68f   :  { %v1172_v34 = vmul.f32 0.03125, %v1167_v33 }
 0x691   :  { %v1174_v35 = vsub.f32 %v1161_v22, %v1172_v34 }
 0x692   :  { %v1170_v24 = vpop.xlane.xlu0 %1169 }
 0x693   :  { %v1173_v36 = vmul.f32 0.03125, %v1170_v24  ;;  %v1176_v20 = vmul.f32 %v1174_v35, %v1174_v35  ;;  %v3311_v24 = vld [vmem:[%s4141_s26 + $0x18] sm:$0xff]  }
 0x695   :  { %v1175_v31 = vsub.f32 %v1162_v30, %v1173_v36  ;;  %v1178_v3 = vsel %vm120_vm1, %v1176_v20, 0.0  ;;  %v3312_v36 = vld [vmem:[%s4141_s26 + $0x10] sm:$0xff]  }
 0x696   :  { %1179 = vadd.xlane.f32.xlu0 %v1178_v3 }
 0x697   :  { %v1177_v37 = vmul.f32 %v1175_v31, %v1175_v31 }
 0x699   :  { %v1181_v38 = vsel %vm120_vm1, %v1177_v37, 0.0 }
 0x69a   :  { %1182 = vadd.xlane.f32.xlu1 %v1181_v38 }
 0x71f   :  { %v1180_v41 = vpop.xlane.xlu0 %1179 }
 0x720   :  { %v1184_v42 = vmul.f32 0.03125, %v1180_v41  ;;  %v2822_v41 = vld [vmem:[%s4132_s13] ss:$0 sm:$0xff] }
 0x722   :  { %v1186_v43 = vadd.f32 1e-05, %v1184_v42 }
 0x723   :  { %v1183_v44 = vpop.xlane.xlu1 %1182 }
 0x724   :  { %3353 = vrsqrt.f32 %v1186_v43  ;;  %v1185_v45 = vmul.f32 0.03125, %v1183_v44 }
 0x726   :  { %v1187_v46 = vadd.f32 1e-05, %v1185_v45  ;;  %v2823_v45 = vld [vmem:[%s4133_s14] ss:$0 sm:$0xff] }
 0x728   :  { %3355 = vrsqrt.f32 %v1187_v46 }
 0x731   :  { %v3354_v47 = vpop.eup %3353 }
 0x732   :  { %v1190_v48 = vmul.f32 %v3354_v47, %v1174_v35 }
 0x734   :  { %v1198_v52 = vmul.f32 %v2810_v49, %v1190_v48 }
 0x735   :  { %v3356_v50 = vpop.eup %3355 }
 0x736   :  { %v1191_v51 = vmul.f32 %v3356_v50, %v1175_v31  ;;  %v1206_v28 = vadd.f32 %v2811_v53, %v1198_v52  ;;  %v2829_v50 = vld [vmem:[%s4121_s4 + $0x1] ss:$0 sm:$0xff] }
 0x738   :  { %v1199_v54 = vmul.f32 %v2810_v49, %v1191_v51 }
 0x73a   :  { %v1207_v55 = vadd.f32 %v2811_v53, %v1199_v54 }
 0x73c   :  { %v1208_v56 = vpack.c.bf16 %v1207_v55, %v1206_v28 }
 0x73e   :  { %3113 = vmatmul.mubr.msk.bf16.vlgmr.msra.gmra.mxu0 %vm120_vm1, %v1208_v56 }
 0x73f   :  { %3132 = vmatprep.mubr.msk.bf16.mxu0 %vm3406_vm0, %v3405_v0  ;;  %3129 = vmatpush3.bf16.msra.mxu0 %v3311_v24 }
 0x740   :  { %3130 = vmatprep.subr.bf16.mxu0 %v3405_v0 }
 0x743   :  { %3131 = vmatpush3.bf16.msra.mxu0 %v3312_v36 }
 0x744   :  { %3136 = vmatprep.subr.bf16.mxu0 %v3405_v0 }
 0x7fe   :  { %v1269_v25 = vpop.f32.mrf.mxu0 }
 0x7ff   :  { %v1270_v5 = vadd.f32 %v2812_v62, %v1269_v25 }
 0x800   :  { %v3114_v2 = vpop.f32.mrf.mxu0 }
 0x801   :  { %v1276_v7 = vmax.f32 %v1270_v5, 0.0 }
 0x802   :  { %v1272_v6 = vpop.f32.mrf.mxu0 }
 0x803   :  { %v1273_v17 = vadd.f32 %v2812_v62, %v1272_v6 }
 0x804   :  { %v3115_v21 = vpop.f32.mrf.mxu0 }
 0x805   :  { %v1277_v8 = vmax.f32 %v1273_v17, 0.0 }
 0x807   :  { %v1278_v14 = vpack.c.bf16 %v1277_v8, %v1276_v7 }
 0x809   :  { %3125 = vmatmul.mubr.msk.bf16.vlgmr.msra.gmra.mxu1 %vm1318_vm6, %v1278_v14 }
 0x80a   :  { %3144 = vmatprep.mubr.msk.bf16.mxu1 %vm3406_vm0, %v3405_v0 }
 0x8c9   :  { %v1356_v1 = vpop.f32.mrf.mxu1 }
 0x8ca   :  { %v1357_v63 = vadd.f32 %v2816_v9, %v1356_v1 }
 0x8cb   :  { %v3126_v10 = vpop.f32.mrf.mxu1 }
 0x8cc   :  { %v1363_v11 = vadd.f32 %v1357_v63, %v1206_v28 }
 0x8cd   :  { %v1359_v12 = vpop.f32.mrf.mxu1 }
 0x8ce   :  { %v1360_v15 = vadd.f32 %v2816_v9, %v1359_v12  ;;  %v1367_v16 = vsel %vm120_vm1, %v1363_v11, 0.0 }
 0x8cf   :  { %1368 = vadd.xlane.f32.xlu0 %v1367_v16  ;;  %v3127_v13 = vpop.f32.mrf.mxu1 }
 0x8d0   :  { %v1364_v18 = vadd.f32 %v1360_v15, %v1207_v55 }
 0x8d2   :  { %v1370_v19 = vsel %vm120_vm1, %v1364_v18, 0.0 }
 0x8d3   :  { %1371 = vadd.xlane.f32.xlu1 %v1370_v19 }
 0x958   :  { %v1369_v22 = vpop.xlane.xlu0 %1368 }
 0x959   :  { %v1373_v23 = vmul.f32 0.03125, %v1369_v22 }
 0x95b   :  { %v1375_v26 = vsub.f32 %v1363_v11, %v1373_v23 }
 0x95c   :  { %v1372_v27 = vpop.xlane.xlu1 %1371 }
 0x95d   :  { %v1374_v29 = vmul.f32 0.03125, %v1372_v27  ;;  %v1377_v30 = vmul.f32 %v1375_v26, %v1375_v26 }
 0x95f   :  { %v1376_v32 = vsub.f32 %v1364_v18, %v1374_v29  ;;  %v1379_v33 = vsel %vm120_vm1, %v1377_v30, 0.0 }
 0x960   :  { %1380 = vadd.xlane.f32.xlu0 %v1379_v33 }
 0x961   :  { %v1378_v34 = vmul.f32 %v1376_v32, %v1376_v32 }
 0x963   :  { %v1382_v35 = vsel %vm120_vm1, %v1378_v34, 0.0 }
 0x964   :  { %1383 = vadd.xlane.f32.xlu1 %v1382_v35 }
 0x9e9   :  { %v1381_v20 = vpop.xlane.xlu0 %1380 }
 0x9ea   :  { %v1385_v31 = vmul.f32 0.03125, %v1381_v20 }
 0x9ec   :  { %v1387_v3 = vadd.f32 1e-05, %v1385_v31 }
 0x9ed   :  { %v1384_v37 = vpop.xlane.xlu1 %1383 }
 0x9ee   :  { %3357 = vrsqrt.f32 %v1387_v3  ;;  %v1386_v38 = vmul.f32 0.03125, %v1384_v37 }
 0x9f0   :  { %v1388_v4 = vadd.f32 1e-05, %v1386_v38 }
 0x9f2   :  { %3359 = vrsqrt.f32 %v1388_v4 }
 0x9fb   :  { %v3358_v39 = vpop.eup %3357 }
 0x9fc   :  { %v1391_v40 = vmul.f32 %v3358_v39, %v1375_v26 }
 0x9fe   :  { %v1399_v44 = vmul.f32 %v2822_v41, %v1391_v40 }
 0x9ff   :  { %v3360_v42 = vpop.eup %3359 }
 0xa00   :  { %v1392_v43 = vmul.f32 %v3360_v42, %v1376_v32  ;;  %v3827_v47 = vadd.f32 %v2823_v45, %v1399_v44 }
 0xa02   :  { %v1400_v46 = vmul.f32 %v2822_v41, %v1392_v43 }
 0xa04   :  { %v3829_v48 = vadd.f32 %v2823_v45, %v1400_v46 }
 0xa06   :  { %v1409_v49 = vpack.c.bf16 %v3829_v48, %v3827_v47 }
 0xa08   :  { %3133 = vmatmul.mubr.msk.bf16.vlgmr.msra.gmra.mxu0 %vm120_vm1, %v1409_v49 }
 0xa09   :  { %3138 = vmatprep.mubr.msk.bf16.mxu0 %vm3406_vm0, %v3405_v0 }
 0xac8   :  { %v1472_v51 = vpop.f32.mrf.mxu0 }
 0xac9   :  { %v1473_v52 = vadd.f32 %v2829_v50, %v1472_v51 }
 0xaca   :  { %v3134_v53 = vpop.f32.mrf.mxu0 }
 0xacb   :  { %v2902_v54 = vpack.c.bf16 %v1473_v52, %v1473_v52 }
 0xacc   :  { %v1475_v28 = vpop.f32.mrf.mxu0 }
 0xacd   :  { %v1476_v55 = vadd.f32 %v2829_v50, %v1475_v28  ;;  %1485 = vrot.lane.b32.xlu0 %v2902_v54, %s3408_s22 }
 0xace   :  { %v3135_v56 = vpop.f32.mrf.mxu0 }
 0xacf   :  { %v2903_v57 = vpack.c.bf16 %v1476_v55, %v1476_v55 }
 0xad1   :  { %1491 = vrot.lane.b32.xlu0 %v2903_v57, %s3407_s21  ;;  %1487 = vrot.lane.b32.xlu1 %v2903_v57, %s3408_s22 }
 0xad5   :  { %1495 = vrot.lane.b32.xlu0 %v2903_v57, %s3409_s23  ;;  %1489 = vrot.lane.b32.xlu1 %v2902_v54, %s3407_s21 }
 0xad9   :  { %1545 = vrot.lane.b32.xlu0 %v2903_v57, %s3410_s24  ;;  %1493 = vrot.lane.b32.xlu1 %v2902_v54, %s3409_s23 }
 0xadd   :  { %1497 = vrot.lane.b32.xlu1 %v2902_v54, %s3410_s24 }
 0xb3f   :  { %v1486_v58 = vpop.permute.xlu0 %1485 }
 0xb40   :  { %v3847_v61 = vcombine.low %v1486_v58, %v1486_v58 }
 0xb42   :  { %1595 = vrot.lane.b32.xlu1 %v3847_v61, %s3410_s24 }
 0xb43   :  { %v1492_v62 = vpop.permute.xlu0 %1491  ;;  %v1488_v25 = vpop.permute.xlu1 %1487 }
 0xb44   :  { %v3851_v2 = vcombine.low %v1488_v25, %v1488_v25  ;;  %v3857_v17 = vcombine.low %v1492_v62, %v1492_v62 }
 0xb46   :  { %1645 = vrot.lane.b32.xlu0 %v3851_v2, %s3410_s24 }
 0xb47   :  { %v3855_v5 = vpop.permute.xlu0 %1495  ;;  %v1490_v6 = vpop.permute.xlu1 %1489 }
 0xb48   :  { %v3859_v21 = vcombine.low %v1490_v6, %v1490_v6  ;;  %v3867_v14 = vcombine.low %v3855_v5, %v3855_v5 }
 0xb4a   :  { %1745 = vrot.lane.b32.xlu0 %v3857_v17, %s3410_s24  ;;  %1695 = vrot.lane.b32.xlu1 %v3859_v21, %s3410_s24 }
 0xb4b   :  { %v1546_v7 = vpop.permute.xlu0 %1545  ;;  %v1494_v8 = vpop.permute.xlu1 %1493 }
 0xb4c   :  { %v1551_v9 = vsel %vm185_vm2, %v1546_v7, 0  ;;  %v3870_v1 = vcombine.low %v1494_v8, %v1494_v8 }
 0xb4d   :  { %3143 = vmatpush3.bf16.xpose.msra.mxu1 %v1551_v9 }
 0xb4e   :  { %1845 = vrot.lane.b32.xlu0 %v3867_v14, %s3410_s24  ;;  %1795 = vrot.lane.b32.xlu1 %v3870_v1, %s3410_s24 }
 0xb4f   :  { %v1498_v63 = vpop.permute.xlu1 %1497  ;;  %3154 = vmatprep.subr.bf16.mxu1 %v3405_v0 }
 0xb50   :  { %v1503_v10 = vsel %vm185_vm2, %v1498_v63, 0 }
 0xb51   :  { %3137 = vmatpush3.bf16.xpose.msra.mxu0 %v1503_v10 }
 0xb52   :  { %1989 = vrot.lane.b32.xlu0 %v2902_v54, %s3411_s25  ;;  %2037 = vrot.lane.b32.xlu1 %v2903_v57, %s3411_s25 }
 0xb53   :  { %3148 = vmatprep.subr.bf16.mxu0 %v3405_v0 }
 0xb54   :  { %3145 = vmatmul.mubr.msk.bf16.vlgmr.msra.gmra.mxu1 %vm185_vm2, %v2903_v57 }
 0xb55   :  { %3156 = vmatprep.mubr.msk.bf16.mxu1 %vm3406_vm0, %v3405_v0 }
 0xb58   :  { %3139 = vmatmul.mubr.msk.bf16.vlgmr.msra.gmra.mxu0 %vm185_vm2, %v2902_v54 }
 0xb59   :  { %3150 = vmatprep.mubr.msk.bf16.mxu0 %vm3406_vm0, %v3405_v0 }
 0xbb4   :  { %v1596_v11 = vpop.permute.xlu1 %1595 }
 0xbb5   :  { %v1601_v12 = vsel %vm185_vm2, %v1596_v11, 0 }
 0xbb6   :  { %3149 = vmatpush3.bf16.xpose.msra.mxu0 %v1601_v12 }
 0xbb7   :  { %3160 = vmatprep.subr.bf16.mxu0 %v3405_v0 }
 0xbb8   :  { %v1646_v15 = vpop.permute.xlu0 %1645 }
 0xbb9   :  { %v1651_v16 = vsel %vm185_vm2, %v1646_v15, 0 }
 0xbba   :  { %3155 = vmatpush3.bf16.xpose.msra.mxu1 %v1651_v16 }
 0xbbb   :  { %3166 = vmatprep.subr.bf16.mxu1 %v3405_v0 }
 0xbbc   :  { %v1696_v13 = vpop.permute.xlu1 %1695  ;;  %v1746_v19 = vpop.permute.xlu0 %1745 }
 0xbbd   :  { %v1701_v18 = vsel %vm185_vm2, %v1696_v13, 0  ;;  %3151 = vmatmul.mubr.msk.bf16.vlgmr.msra.gmra.mxu0 %vm185_vm2, %v1486_v58  ;;  %v1751_v22 = vsel %vm185_vm2, %v1746_v19, 0 }
 0xbbe   :  { %3161 = vmatpush3.bf16.xpose.msra.mxu0 %v1701_v18  ;;  %3162 = vmatprep.mubr.msk.bf16.mxu0 %vm3406_vm0, %v3405_v0 }
 0xbbf   :  { %3172 = vmatprep.subr.bf16.mxu0 %v3405_v0 }
 0xbc0   :  { %v1796_v23 = vpop.permute.xlu1 %1795  ;;  %v1846_v26 = vpop.permute.xlu0 %1845 }
 0xbc1   :  { %3157 = vmatmul.mubr.msk.bf16.vlgmr.msra.gmra.mxu1 %vm185_vm2, %v1488_v25  ;;  %v1801_v27 = vsel %vm185_vm2, %v1796_v23, 0  ;;  %v1851_v29 = vsel %vm185_vm2, %v1846_v26, 0 }
 0xbc2   :  { %3167 = vmatpush3.bf16.xpose.msra.mxu1 %v1751_v22  ;;  %3168 = vmatprep.mubr.msk.bf16.mxu1 %vm3406_vm0, %v3405_v0 }
 0xbc3   :  { %3178 = vmatprep.subr.bf16.mxu1 %v3405_v0 }
 0xbc4   :  { %v1990_v30 = vpop.permute.xlu0 %1989  ;;  %v2038_v33 = vpop.permute.xlu1 %2037 }
 0xbc5   :  { %3163 = vmatmul.mubr.msk.bf16.vlgmr.msra.gmra.mxu0 %vm185_vm2, %v1490_v6  ;;  %v1995_v32 = vsel %vm681_vm3, %v1990_v30, 0  ;;  %v2043_v34 = vsel %vm681_vm3, %v2038_v33, 0 }
 0xbc6   :  { %3173 = vmatpush3.bf16.xpose.msra.mxu0 %v1801_v27  ;;  %3174 = vmatprep.mubr.msk.bf16.mxu0 %vm3406_vm0, %v3405_v0 }
 0xbc7   :  { %3184 = vmatprep.subr.bf16.mxu0 %v3405_v0 }
 0xbc9   :  { %3169 = vmatmul.mubr.msk.bf16.vlgmr.msra.gmra.mxu1 %vm185_vm2, %v1492_v62 }
 0xbca   :  { %3179 = vmatpush3.bf16.xpose.msra.mxu1 %v1851_v29  ;;  %3180 = vmatprep.mubr.msk.bf16.mxu1 %vm3406_vm0, %v3405_v0 }
 0xbcb   :  { %3190 = vmatprep.subr.bf16.mxu1 %v3405_v0 }
 0xbcd   :  { %3175 = vmatmul.mubr.msk.bf16.vlgmr.msra.gmra.mxu0 %vm185_vm2, %v1494_v8 }
 0xbce   :  { %3185 = vmatpush3.bf16.msra.mxu0 %v1995_v32  ;;  %3186 = vmatprep.mubr.msk.bf16.mxu0 %vm3406_vm0, %v3405_v0 }
 0xbcf   :  { %3196 = vmatprep.subr.bf16.mxu0 %v3405_v0 }
 0xbd1   :  { %3181 = vmatmul.mubr.msk.bf16.vlgmr.msra.gmra.mxu1 %vm185_vm2, %v3855_v5 }
 0xbd2   :  { %3191 = vmatpush3.bf16.msra.mxu1 %v2043_v34  ;;  %3192 = vmatprep.mubr.msk.bf16.mxu1 %vm3406_vm0, %v3405_v0 }
 0xbd3   :  { %3202 = vmatprep.subr.bf16.mxu1 %v3405_v0 }
 0xc14   :  { %v1587_v35 = vpop.f32.mrf.mxu1 }
 0xc15   :  { %v1588_v24 = vadd.f32 %v1587_v35, %v3628_v60 }
 0xc16   :  { %v3146_v36 = vpop.f32.mrf.mxu1 }
 0xc17   :  { %v1896_v20 = vsel %vm185_vm2, %v1588_v24, -inf }
 0xc18   :  { %v1539_v31 = vpop.f32.mrf.mxu0  ;;  %1897 = vmax.xlane.f32.xlu0 %v1896_v20  ;;  %v1590_v3 = vpop.f32.mrf.mxu1 }
 0xc19   :  { %v1540_v37 = vadd.f32 %v1539_v31, %v3626_v59 }
 0xc1a   :  { %v3140_v38 = vpop.f32.mrf.mxu0  ;;  %v3147_v4 = vpop.f32.mrf.mxu1 }
 0xc1b   :  { %v1893_v39 = vsel %vm185_vm2, %v1540_v37, -inf }
 0xc1c   :  { %1894 = vmax.xlane.f32.xlu1 %v1893_v39  ;;  %v1542_v40 = vpop.f32.mrf.mxu0 }
 0xc1e   :  { %v3141_v41 = vpop.f32.mrf.mxu0 }
 0xc7d   :  { %v1637_v42 = vpop.f32.mrf.mxu0 }
 0xc7e   :  { %v1638_v43 = vadd.f32 %v1637_v42, %v3626_v59 }
 0xc7f   :  { %v3152_v44 = vpop.f32.mrf.mxu0 }
 0xc80   :  { %v1899_v45 = vsel %vm185_vm2, %v1638_v43, -inf }
 0xc81   :  { %v1640_v46 = vpop.f32.mrf.mxu0  ;;  %1900 = vmax.xlane.f32.xlu0 %v1899_v45  ;;  %v1687_v49 = vpop.f32.mrf.mxu1 }
 0xc82   :  { %v1688_v50 = vadd.f32 %v1687_v49, %v3628_v60 }
 0xc83   :  { %v3153_v51 = vpop.f32.mrf.mxu0  ;;  %v3158_v52 = vpop.f32.mrf.mxu1 }
 0xc84   :  { %v1902_v53 = vsel %vm185_vm2, %v1688_v50, -inf }
 0xc85   :  { %v1737_v54 = vpop.f32.mrf.mxu0  ;;  %1903 = vmax.xlane.f32.xlu1 %v1902_v53  ;;  %v1690_v28 = vpop.f32.mrf.mxu1 }
 0xc86   :  { %v3931_v55 = vadd.f32 %v1737_v54, %v3626_v59 }
 0xc87   :  { %v3159_v56 = vpop.f32.mrf.mxu1  ;;  %v3164_v57 = vpop.f32.mrf.mxu0 }
 0xc88   :  { %v1905_v58 = vsel %vm185_vm2, %v3931_v55, -inf }
 0xc89   :  { %v1740_v62 = vpop.f32.mrf.mxu0  ;;  %1906 = vmax.xlane.f32.xlu0 %v1905_v58  ;;  %v1787_v25 = vpop.f32.mrf.mxu1 }
 0xc8a   :  { %v1788_v5 = vadd.f32 %v1787_v25, %v3628_v60 }
 0xc8b   :  { %v3165_v6 = vpop.f32.mrf.mxu0  ;;  %v3170_v7 = vpop.f32.mrf.mxu1 }
 0xc8c   :  { %v1908_v8 = vsel %vm185_vm2, %v1788_v5, -inf }
 0xc8d   :  { %v1837_v9 = vpop.f32.mrf.mxu0  ;;  %1909 = vmax.xlane.f32.xlu1 %v1908_v8  ;;  %v1790_v63 = vpop.f32.mrf.mxu1 }
 0xc8e   :  { %v3938_v10 = vadd.f32 %v1837_v9, %v3626_v59 }
 0xc8f   :  { %v3171_v11 = vpop.f32.mrf.mxu1  ;;  %v3176_v12 = vpop.f32.mrf.mxu0 }
 0xc90   :  { %v1911_v15 = vsel %vm185_vm2, %v3938_v10, -inf }
 0xc91   :  { %v1840_v16 = vpop.f32.mrf.mxu0  ;;  %1912 = vmax.xlane.f32.xlu0 %v1911_v15  ;;  %v1887_v13 = vpop.f32.mrf.mxu1 }
 0xc92   :  { %v1888_v18 = vadd.f32 %v1887_v13, %v3628_v60 }
 0xc93   :  { %v3177_v19 = vpop.f32.mrf.mxu0  ;;  %v3182_v22 = vpop.f32.mrf.mxu1 }
 0xc94   :  { %v1914_v23 = vsel %vm185_vm2, %v1888_v18, -inf }
 0xc95   :  { %1915 = vmax.xlane.f32.xlu1 %v1914_v23  ;;  %v1890_v26 = vpop.f32.mrf.mxu1 }
 0xc97   :  { %v3183_v27 = vpop.f32.mrf.mxu1 }
 0xca1   :  { %v1898_v30 = vpop.xlane.xlu0 %1897 }
 0xca2   :  { %v1918_v32 = vsub.f32 %v1588_v24, %v1898_v30 }
 0xca4   :  { %v1927_v34 = vmul.f32 1.442695, %v1918_v32 }
 0xca5   :  { %v1895_v59 = vpop.xlane.xlu1 %1894 }
 0xca6   :  { %2085 = vrot.lane.b32.xlu1 %v3847_v61, %s3411_s25  ;;  %v1917_v29 = vsub.f32 %v1540_v37, %v1895_v59 }
 0xca7   :  { %2133 = vrot.lane.b32.xlu0 %v3851_v2, %s3411_s25 }
 0xca8   :  { %v1925_v33 = vmul.f32 1.442695, %v1917_v29 }
 0xcaa   :  { %3361 = vpow2.f32 %v1925_v33 }
 0xcab   :  { %3363 = vpow2.f32 %v1927_v34 }
 0xcb7   :  { %v3362_v60 = vpop.eup %3361 }
 0xcb8   :  { %v1941_v35 = vsel %vm185_vm2, %v3362_v60, 0.0  ;;  %v3364_v36 = vpop.eup %3363 }
 0xcb9   :  { %v1944_v20 = vsel %vm185_vm2, %v3364_v36, 0.0 }
 0xcc6   :  { %1942 = vadd.xlane.f32.xlu0 %v1941_v35 }
 0xcca   :  { %1945 = vadd.xlane.f32.xlu1 %v1944_v20 }
 0xcdb   :  { %2181 = vrot.lane.b32.xlu1 %v3859_v21, %s3411_s25 }
 0xd0a   :  { %v1901_v61 = vpop.xlane.xlu0 %1900 }
 0xd0b   :  { %v1919_v2 = vsub.f32 %v1638_v43, %v1901_v61 }
 0xd0d   :  { %v1929_v31 = vmul.f32 1.442695, %v1919_v2 }
 0xd0e   :  { %v1904_v3 = vpop.xlane.xlu1 %1903 }
 0xd0f   :  { %3365 = vpow2.f32 %v1929_v31  ;;  %v1920_v24 = vsub.f32 %v1688_v50, %v1904_v3 }
 0xd11   :  { %v1931_v37 = vmul.f32 1.442695, %v1920_v24 }
 0xd12   :  { %v1907_v52 = vpop.xlane.xlu0 %1906 }
 0xd13   :  { %3367 = vpow2.f32 %v1931_v37  ;;  %v1921_v53 = vsub.f32 %v3931_v55, %v1907_v52 }
 0xd15   :  { %v1933_v28 = vmul.f32 1.442695, %v1921_v53 }
 0xd16   :  { %v1910_v38 = vpop.xlane.xlu1 %1909 }
 0xd17   :  { %v1922_v4 = vsub.f32 %v1788_v5, %v1910_v38 }
 0xd19   :  { %v1935_v39 = vmul.f32 1.442695, %v1922_v4 }
 0xd1a   :  { %v1913_v54 = vpop.xlane.xlu0 %1912 }
 0xd1b   :  { %3369 = vpow2.f32 %v1935_v39  ;;  %v1923_v56 = vsub.f32 %v3938_v10, %v1913_v54 }
 0xd1c   :  { %v3952_v40 = vpop.eup %3365 }
 0xd1d   :  { %v1947_v41 = vsel %vm185_vm2, %v3952_v40, 0.0  ;;  %v1937_v57 = vmul.f32 1.442695, %v1923_v56 }
 0xd1e   :  { %1948 = vadd.xlane.f32.xlu0 %v1947_v41  ;;  %v1916_v42 = vpop.xlane.xlu1 %1915  ;;  %v2134_v58 = vpop.permute.xlu0 %2133 }
 0xd1f   :  { %v1924_v21 = vsub.f32 %v1888_v18, %v1916_v42  ;;  %v2139_v15 = vsel %vm681_vm3, %v2134_v58, 0 }
 0xd20   :  { %v3956_v44 = vpop.eup %3367 }
 0xd21   :  { %v1939_v43 = vmul.f32 1.442695, %v1924_v21  ;;  %v1950_v45 = vsel %vm185_vm2, %v3956_v44, 0.0 }
 0xd22   :  { %1951 = vadd.xlane.f32.xlu1 %v1950_v45  ;;  %v2086_v25 = vpop.permute.xlu1 %2085 }
 0xd23   :  { %3371 = vpow2.f32 %v1939_v43  ;;  %v2091_v10 = vsel %vm681_vm3, %v2086_v25, 0 }
 0xd24   :  { %3373 = vpow2.f32 %v1933_v28 }
 0xd25   :  { %3375 = vpow2.f32 %v1937_v57 }
 0xd28   :  { %v3960_v46 = vpop.eup %3369 }
 0xd29   :  { %v1956_v49 = vsel %vm185_vm2, %v3960_v46, 0.0 }
 0xd2a   :  { %1957 = vadd.xlane.f32.xlu1 %v1956_v49 }
 0xd30   :  { %v3964_v50 = vpop.eup %3371 }
 0xd31   :  { %v1962_v51 = vsel %vm185_vm2, %v3964_v50, 0.0  ;;  %v3974_v62 = vpop.eup %3373 }
 0xd32   :  { %1963 = vadd.xlane.f32.xlu1 %v1962_v51  ;;  %v3978_v55 = vpop.eup %3375 }
 0xd33   :  { %v1959_v7 = vsel %vm185_vm2, %v3978_v55, 0.0 }
 0xd34   :  { %2229 = vrot.lane.b32.xlu0 %v3857_v17, %s3411_s25  ;;  %v1953_v17 = vsel %vm185_vm2, %v3974_v62, 0.0 }
 0xd43   :  { %2277 = vrot.lane.b32.xlu1 %v3870_v1, %s3411_s25 }
 0xd4f   :  { %v1943_v5 = vpop.xlane.xlu0 %1942 }
 0xd50   :  { %3377 = vrcp.f32 %v1943_v5 }
 0xd53   :  { %1954 = vadd.xlane.f32.xlu0 %v1953_v17  ;;  %v1946_v6 = vpop.xlane.xlu1 %1945 }
 0xd54   :  { %3379 = vrcp.f32 %v1946_v6 }
 0xd57   :  { %1960 = vadd.xlane.f32.xlu0 %v1959_v7  ;;  %v2182_v16 = vpop.permute.xlu1 %2181 }
 0xd58   :  { %v2187_v59 = vsel %vm681_vm3, %v2182_v16, 0 }
 0xd5d   :  { %v3378_v1 = vpop.eup %3377 }
 0xd5e   :  { %v1973_v8 = vmul.f32 %v3378_v1, %v3362_v60  ;;  %v3313_v1 = vld [vmem:[%s4124_s5 + $0x18] sm:$0xff]  }
 0xd60   :  { %v1981_v9 = vpack.c.bf16 %v1973_v8, %v1973_v8 }
 0xd61   :  { %v3380_v63 = vpop.eup %3379 }
 0xd62   :  { %3187 = vmatmul.mubr.msk.bf16.vlgmr.msra.gmra.mxu0 %vm185_vm2, %v1981_v9  ;;  %v1974_v11 = vmul.f32 %v3380_v63, %v3364_v36 }
 0xd63   :  { %3197 = vmatpush3.bf16.msra.mxu0 %v2091_v10  ;;  %3198 = vmatprep.mubr.msk.bf16.mxu0 %vm3406_vm0, %v3405_v0 }
 0xd64   :  { %v1982_v12 = vpack.c.bf16 %v1974_v11, %v1974_v11  ;;  %3208 = vmatprep.subr.bf16.mxu0 %v3405_v0 }
 0xd66   :  { %3193 = vmatmul.mubr.msk.bf16.vlgmr.msra.gmra.mxu1 %vm185_vm2, %v1982_v12  ;;  %v3314_v12 = vld [vmem:[%s4124_s5 + $0x10] sm:$0xff]  }
 0xd67   :  { %3203 = vmatpush3.bf16.msra.mxu1 %v2139_v15  ;;  %3204 = vmatprep.mubr.msk.bf16.mxu1 %vm3406_vm0, %v3405_v0 }
 0xd68   :  { %3214 = vmatprep.subr.bf16.mxu1 %v3405_v0 }
 0xd6d   :  { %2325 = vrot.lane.b32.xlu0 %v3867_v14, %s3411_s25 }
 0xda7   :  { %v1949_v13 = vpop.xlane.xlu0 %1948 }
 0xda8   :  { %3381 = vrcp.f32 %v1949_v13 }
 0xdab   :  { %v1952_v18 = vpop.xlane.xlu1 %1951  ;;  %v2230_v30 = vpop.permute.xlu0 %2229 }
 0xdac   :  { %3383 = vrcp.f32 %v1952_v18  ;;  %v2235_v32 = vsel %vm681_vm3, %v2230_v30, 0 }
 0xdb3   :  { %v1958_v19 = vpop.xlane.xlu1 %1957 }
 0xdb4   :  { %3385 = vrcp.f32 %v1958_v19 }
 0xdb5   :  { %v3382_v22 = vpop.eup %3381 }
 0xdb6   :  { %v1975_v23 = vmul.f32 %v3382_v22, %v3952_v40 }
 0xdb8   :  { %v1983_v26 = vpack.c.bf16 %v1975_v23, %v1975_v23 }
 0xdb9   :  { %v3384_v27 = vpop.eup %3383 }
 0xdba   :  { %3199 = vmatmul.mubr.msk.bf16.vlgmr.msra.gmra.mxu0 %vm185_vm2, %v1983_v26  ;;  %v1976_v29 = vmul.f32 %v3384_v27, %v3956_v44 }
 0xdbb   :  { %3209 = vmatpush3.bf16.msra.mxu0 %v2187_v59  ;;  %3210 = vmatprep.mubr.msk.bf16.mxu0 %vm3406_vm0, %v3405_v0  ;;  %v1964_v35 = vpop.xlane.xlu1 %1963 }
 0xdbc   :  { %v1984_v14 = vpack.c.bf16 %v1976_v29, %v1976_v29  ;;  %3220 = vmatprep.subr.bf16.mxu0 %v3405_v0  ;;  %3387 = vrcp.f32 %v1964_v35 }
 0xdbe   :  { %3205 = vmatmul.mubr.msk.bf16.vlgmr.msra.gmra.mxu1 %vm185_vm2, %v1984_v14 }
 0xdbf   :  { %3215 = vmatpush3.bf16.msra.mxu1 %v2235_v32  ;;  %3216 = vmatprep.mubr.msk.bf16.mxu1 %vm3406_vm0, %v3405_v0  ;;  %v2278_v4 = vpop.permute.xlu1 %2277 }
 0xdc0   :  { %3226 = vmatprep.subr.bf16.mxu1 %v3405_v0  ;;  %v2283_v41 = vsel %vm681_vm3, %v2278_v4, 0 }
 0xdc1   :  { %v3386_v33 = vpop.eup %3385 }
 0xdc2   :  { %v1978_v34 = vmul.f32 %v3386_v33, %v3960_v46 }
 0xdc4   :  { %v1986_v60 = vpack.c.bf16 %v1978_v34, %v1978_v34 }
 0xdc6   :  { %3217 = vmatmul.mubr.msk.bf16.vlgmr.msra.gmra.mxu1 %vm185_vm2, %v1986_v60 }
 0xdc7   :  { %3228 = vmatprep.mubr.msk.bf16.mxu1 %vm3406_vm0, %v3405_v0 }
 0xdc9   :  { %v3388_v20 = vpop.eup %3387 }
 0xdca   :  { %v1980_v2 = vmul.f32 %v3388_v20, %v3964_v50 }
 0xdcc   :  { %v1988_v24 = vpack.c.bf16 %v1980_v2, %v1980_v2 }
 0xddc   :  { %v1955_v36 = vpop.xlane.xlu0 %1954 }
 0xddd   :  { %3389 = vrcp.f32 %v1955_v36 }
 0xde0   :  { %v1961_v61 = vpop.xlane.xlu0 %1960 }
 0xde1   :  { %3391 = vrcp.f32 %v1961_v61 }
 0xde4   :  { %v2326_v31 = vpop.permute.xlu0 %2325 }
 0xde5   :  { %v2331_v3 = vsel %vm681_vm3, %v2326_v31, 0 }
 0xde6   :  { %3227 = vmatpush3.bf16.msra.mxu1 %v2331_v3 }
 0xde7   :  { %3240 = vmatprep.subr.bf16.mxu1 %v3405_v0 }
 0xde9   :  { %3229 = vmatmul.mubr.msk.bf16.vlgmr.msra.gmra.mxu1 %vm185_vm2, %v1988_v24 }
 0xdea   :  { %v3390_v37 = vpop.eup %3389  ;;  %3244 = vmatprep.mubr.msk.bf16.mxu1 %vm3406_vm0, %v3405_v0 }
 0xdeb   :  { %v1977_v38 = vmul.f32 %v3390_v37, %v3974_v62  ;;  %v2862_v37 = vld [vmem:[%s4125_s6 + $0x1] ss:$0 sm:$0xff] }
 0xded   :  { %v1985_v39 = vpack.c.bf16 %v1977_v38, %v1977_v38 }
 0xdee   :  { %v3392_v40 = vpop.eup %3391 }
 0xdef   :  { %3211 = vmatmul.mubr.msk.bf16.vlgmr.msra.gmra.mxu0 %vm185_vm2, %v1985_v39  ;;  %v1979_v42 = vmul.f32 %v3392_v40, %v3978_v55 }
 0xdf0   :  { %3221 = vmatpush3.bf16.msra.mxu0 %v2283_v41  ;;  %3222 = vmatprep.mubr.msk.bf16.mxu0 %vm3406_vm0, %v3405_v0 }
 0xdf1   :  { %3232 = vmatprep.subr.bf16.mxu0 %v3405_v0  ;;  %v1987_v21 = vpack.c.bf16 %v1979_v42, %v1979_v42 }
 0xdf7   :  { %3223 = vmatmul.mubr.msk.bf16.vlgmr.msra.gmra.mxu0 %vm185_vm2, %v1987_v21 }
 0xdf8   :  { %3236 = vmatprep.mubr.msk.bf16.mxu0 %vm3406_vm0, %v3405_v0  ;;  %3233 = vmatpush3.bf16.msra.mxu0 %v3313_v1 }
 0xdf9   :  { %3234 = vmatprep.subr.bf16.mxu0 %v3405_v0 }
 0xdfc   :  { %3235 = vmatpush3.bf16.msra.mxu0 %v3314_v12 }
 0xdfd   :  { %3248 = vmatprep.subr.bf16.mxu0 %v3405_v0 }
 0xe22   :  { %v2031_v44 = vpop.f32.mrf.mxu0 }
 0xe24   :  { %v3188_v43 = vpop.f32.mrf.mxu0 }
 0xe26   :  { %v2034_v45 = vpop.f32.mrf.mxu0  ;;  %v2079_v46 = vpop.f32.mrf.mxu1 }
 0xe28   :  { %v3189_v49 = vpop.f32.mrf.mxu0  ;;  %v3194_v50 = vpop.f32.mrf.mxu1 }
 0xe2a   :  { %v2082_v51 = vpop.f32.mrf.mxu1 }
 0xe2c   :  { %v3195_v52 = vpop.f32.mrf.mxu1 }
 0xe7a   :  { %v2127_v53 = vpop.f32.mrf.mxu0 }
 0xe7c   :  { %v3200_v54 = vpop.f32.mrf.mxu0 }
 0xe7e   :  { %v2130_v28 = vpop.f32.mrf.mxu0  ;;  %v2175_v56 = vpop.f32.mrf.mxu1 }
 0xe7f   :  { %v3286_v57 = vpack.i.bf16 %v2175_v56, %v2127_v53 }
 0xe80   :  { %v3201_v58 = vpop.f32.mrf.mxu0  ;;  %v3206_v62 = vpop.f32.mrf.mxu1 }
 0xe81   :  { %3287 = vrot.lane.b32.xlu1 %v3286_v57, %s3413_s1  ;;  %v3316_v57 = vld [vmem:[%s4126_s9 + $0x10] sm:$0xff]   ;;  %v3317_v58 = vld [vmem:[%s4127_s11 + $0x38] sm:$0xff]  }
 0xe82   :  { %v2178_v25 = vpop.f32.mrf.mxu1 }
 0xe84   :  { %v3207_v5 = vpop.f32.mrf.mxu1 }
 0xe86   :  { %v2271_v17 = vpop.f32.mrf.mxu1 }
 0xe88   :  { %v3218_v55 = vpop.f32.mrf.mxu1 }
 0xe8a   :  { %v2274_v6 = vpop.f32.mrf.mxu1 }
 0xe8c   :  { %v3219_v7 = vpop.f32.mrf.mxu1 }
 0xea9   :  { %v2367_v8 = vpop.f32.mrf.mxu1 }
 0xeab   :  { %v3230_v9 = vpop.f32.mrf.mxu1 }
 0xead   :  { %v2370_v63 = vpop.f32.mrf.mxu1 }
 0xeaf   :  { %v2223_v10 = vpop.f32.mrf.mxu0  ;;  %v3231_v11 = vpop.f32.mrf.mxu1 }
 0xeb0   :  { %v3291_v15 = vpack.i.bf16 %v2271_v17, %v2223_v10  ;;  %v2869_v11 = vld [vmem:[%s4129_s8 + $0x1] ss:$0 sm:$0xff] }
 0xeb1   :  { %v3212_v16 = vpop.f32.mrf.mxu0 }
 0xeb2   :  { %3292 = vrot.lane.b32.xlu0 %v3291_v15, %s3414_s0 }
 0xeb3   :  { %v2226_v13 = vpop.f32.mrf.mxu0 }
 0xeb5   :  { %v3213_v18 = vpop.f32.mrf.mxu0 }
 0xeb6   :  { %v3318_v18 = vld [vmem:[%s4127_s11 + $0x30] sm:$0xff]  }
 0xeb7   :  { %v2319_v19 = vpop.f32.mrf.mxu0 }
 0xeb8   :  { %v3296_v22 = vpack.i.bf16 %v2367_v8, %v2319_v19  ;;  %v2868_v8 = vld [vmem:[%s4128_s7 + $0x1] ss:$0 sm:$0xff]  ;;  %v3319_v19 = vld [vmem:[%s4127_s11 + $0x28] sm:$0xff]  }
 0xeb9   :  { %v3224_v23 = vpop.f32.mrf.mxu0 }
 0xeba   :  { %3297 = vrot.lane.b32.xlu1 %v3296_v22, %s3415_s20  ;;  %v3320_v22 = vld [vmem:[%s4127_s11 + $0x20] sm:$0xff]  }
 0xebb   :  { %v2322_v26 = vpop.f32.mrf.mxu0  ;;  %v2875_v23 = vld [vmem:[%s4130_s10 + $0x1] ss:$0 sm:$0xff] }
 0xebd   :  { %v3225_v27 = vpop.f32.mrf.mxu0 }
 0xef3   :  { %v3288_v59 = vpop.permute.xlu1 %3287 }
 0xef4   :  { %v3290_v30 = vunpack.i.h.bf16 %v3288_v59  ;;  %v3289_v14 = vunpack.i.l.bf16 %v3288_v59 }
 0xef6   :  { %v2398_v60 = vsel %vm185_vm2, %v2079_v46, %v3290_v30  ;;  %v2397_v35 = vsel %vm185_vm2, %v2031_v44, %v3289_v14 }
 0xf24   :  { %v3293_v29 = vpop.permute.xlu0 %3292 }
 0xf25   :  { %v3295_v32 = vunpack.i.h.bf16 %v3293_v29  ;;  %v3294_v33 = vunpack.i.l.bf16 %v3293_v29 }
 0xf27   :  { %v2400_v61 = vsel %vm1087_vm4, %v2398_v60, %v3295_v32  ;;  %v2399_v2 = vsel %vm1087_vm4, %v2397_v35, %v3294_v33 }
 0xf2c   :  { %v3298_v34 = vpop.permute.xlu1 %3297 }
 0xf2d   :  { %v3300_v36 = vunpack.i.h.bf16 %v3298_v34  ;;  %v3299_v20 = vunpack.i.l.bf16 %v3298_v34 }
 0xf2f   :  { %v2402_v31 = vsel %vm1090_vm5, %v2400_v61, %v3300_v36  ;;  %v2401_v3 = vsel %vm1090_vm5, %v2399_v2, %v3299_v20 }
 0xf30   :  { %v2403_v24 = vpack.c.bf16 %v2402_v31, %v2401_v3 }
 0xf32   :  { %3237 = vmatmul.mubr.msk.bf16.vlgmr.msra.gmra.mxu0 %vm120_vm1, %v2403_v24 }
 0xf33   :  { %3256 = vmatprep.mubr.msk.bf16.mxu0 %vm3406_vm0, %v3405_v0  ;;  %3249 = vmatpush3.bf16.msra.mxu0 %v3317_v58 }
 0xf34   :  { %3250 = vmatprep.subr.bf16.mxu0 %v3405_v0 }
 0xf37   :  { %3251 = vmatpush3.bf16.msra.mxu0 %v3318_v18 }
 0xf38   :  { %3252 = vmatprep.subr.bf16.mxu0 %v3405_v0 }
 0xf3b   :  { %3253 = vmatpush3.bf16.msra.mxu0 %v3319_v19 }
 0xf3c   :  { %3254 = vmatprep.subr.bf16.mxu0 %v3405_v0 }
 0xf3f   :  { %3255 = vmatpush3.bf16.msra.mxu0 %v3320_v22 }
 0xff2   :  { %v2466_v38 = vpop.f32.mrf.mxu0 }
 0xff3   :  { %v2467_v4 = vadd.f32 %v2862_v37, %v2466_v38 }
 0xff4   :  { %v3238_v39 = vpop.f32.mrf.mxu0 }
 0xff5   :  { %v2473_v40 = vadd.f32 %v2467_v4, %v3827_v47 }
 0xff6   :  { %v2469_v41 = vpop.f32.mrf.mxu0 }
 0xff7   :  { %v2470_v42 = vadd.f32 %v2862_v37, %v2469_v41  ;;  %v2479_v21 = vsel %vm120_vm1, %v2473_v40, 0.0 }
 0xff8   :  { %2480 = vadd.xlane.f32.xlu0 %v2479_v21  ;;  %v3239_v44 = vpop.f32.mrf.mxu0 }
 0xff9   :  { %v2474_v43 = vadd.f32 %v2470_v42, %v3829_v48  ;;  %v3315_v48 = vld [vmem:[%s4126_s9 + $0x18] sm:$0xff]  }
 0xffa   :  { %3241 = vmatpush3.bf16.msra.mxu1 %v3315_v48 }
 0xffb   :  { %v2482_v45 = vsel %vm120_vm1, %v2474_v43, 0.0  ;;  %3242 = vmatprep.subr.bf16.mxu1 %v3405_v0  ;;  %v2888_v0 = vld [vmem:[%s4131_s12 + $0x1] ss:$0 sm:$0xff] }
 0xffc   :  { %2483 = vadd.xlane.f32.xlu1 %v2482_v45 }
 0xffe   :  { %3243 = vmatpush3.bf16.msra.mxu1 %v3316_v57 }
0x1081   :  { %v2481_v46 = vpop.xlane.xlu0 %2480 }
0x1082   :  { %v2485_v49 = vmul.f32 0.03125, %v2481_v46 }
0x1084   :  { %v2487_v50 = vsub.f32 %v2473_v40, %v2485_v49 }
0x1085   :  { %v2484_v51 = vpop.xlane.xlu1 %2483 }
0x1086   :  { %v2486_v52 = vmul.f32 0.03125, %v2484_v51  ;;  %v2489_v53 = vmul.f32 %v2487_v50, %v2487_v50 }
0x1088   :  { %v2488_v54 = vsub.f32 %v2474_v43, %v2486_v52  ;;  %v2491_v47 = vsel %vm120_vm1, %v2489_v53, 0.0 }
0x1089   :  { %2492 = vadd.xlane.f32.xlu0 %v2491_v47  ;;  %v2896_v47 = vld [vmem:[%s4132_s13 + $0x1] ss:$0 sm:$0xff] }
0x108a   :  { %v2490_v28 = vmul.f32 %v2488_v54, %v2488_v54 }
0x108c   :  { %v2494_v56 = vsel %vm120_vm1, %v2490_v28, 0.0 }
0x108d   :  { %2495 = vadd.xlane.f32.xlu0 %v2494_v56  ;;  %v2897_v56 = vld [vmem:[%s4133_s14 + $0x1] ss:$0 sm:$0xff] }
0x1112   :  { %v2493_v62 = vpop.xlane.xlu0 %2492 }
0x1113   :  { %v2497_v25 = vmul.f32 0.03125, %v2493_v62 }
0x1115   :  { %v2499_v5 = vadd.f32 1e-05, %v2497_v25 }
0x1116   :  { %v2496_v17 = vpop.xlane.xlu0 %2495 }
0x1117   :  { %3393 = vrsqrt.f32 %v2499_v5  ;;  %v2498_v55 = vmul.f32 0.03125, %v2496_v17 }
0x1119   :  { %v2500_v6 = vadd.f32 1e-05, %v2498_v55 }
0x111b   :  { %3395 = vrsqrt.f32 %v2500_v6 }
0x1124   :  { %v3394_v7 = vpop.eup %3393 }
0x1125   :  { %v2503_v1 = vmul.f32 %v3394_v7, %v2487_v50 }
0x1127   :  { %v2511_v10 = vmul.f32 %v2868_v8, %v2503_v1 }
0x1128   :  { %v3396_v9 = vpop.eup %3395 }
0x1129   :  { %v2504_v63 = vmul.f32 %v3396_v9, %v2488_v54  ;;  %v2519_v15 = vadd.f32 %v2869_v11, %v2511_v10 }
0x112b   :  { %v2512_v12 = vmul.f32 %v2868_v8, %v2504_v63 }
0x112d   :  { %v2520_v16 = vadd.f32 %v2869_v11, %v2512_v12 }
0x112f   :  { %v2521_v13 = vpack.c.bf16 %v2520_v16, %v2519_v15 }
0x1131   :  { %3245 = vmatmul.mubr.msk.bf16.vlgmr.msra.gmra.mxu1 %vm120_vm1, %v2521_v13 }
0x11f1   :  { %v2584_v26 = vpop.f32.mrf.mxu1 }
0x11f2   :  { %v2585_v59 = vadd.f32 %v2875_v23, %v2584_v26 }
0x11f3   :  { %v3246_v27 = vpop.f32.mrf.mxu1 }
0x11f4   :  { %v2591_v32 = vmax.f32 %v2585_v59, 0.0  ;;  %v2898_v27 = vld [vmem:[%s4134_s15] ss:$0 sm:$0xff] }
0x11f5   :  { %v2587_v29 = vpop.f32.mrf.mxu1 }
0x11f6   :  { %v2588_v30 = vadd.f32 %v2875_v23, %v2587_v29  ;;  %v2899_v29 = vld [vmem:[%s4135_s16] ss:$0 sm:$0xff] }
0x11f7   :  { %v3247_v14 = vpop.f32.mrf.mxu1 }
0x11f8   :  { %v2592_v33 = vmax.f32 %v2588_v30, 0.0 }
0x11fa   :  { %v2593_v34 = vpack.c.bf16 %v2592_v33, %v2591_v32 }
0x11fc   :  { %3257 = vmatmul.mubr.msk.bf16.vlgmr.msra.gmra.mxu0 %vm1318_vm6, %v2593_v34 }
0x12bc   :  { %v2672_v60 = vpop.f32.mrf.mxu0 }
0x12bd   :  { %v2673_v35 = vadd.f32 %v2888_v0, %v2672_v60 }
0x12be   :  { %v3258_v36 = vpop.f32.mrf.mxu0 }
0x12bf   :  { %v2679_v20 = vadd.f32 %v2673_v35, %v2519_v15 }
0x12c0   :  { %v2675_v61 = vpop.f32.mrf.mxu0 }
0x12c1   :  { %v2676_v2 = vadd.f32 %v2888_v0, %v2675_v61  ;;  %v2685_v31 = vsel %vm120_vm1, %v2679_v20, 0.0 }
0x12c2   :  { %2686 = vadd.xlane.f32.xlu1 %v2685_v31  ;;  %v3259_v3 = vpop.f32.mrf.mxu0 }
0x12c3   :  { %v2680_v24 = vadd.f32 %v2676_v2, %v2520_v16 }
0x12c5   :  { %v2688_v37 = vsel %vm120_vm1, %v2680_v24, 0.0 }
0x12c6   :  { %2689 = vadd.xlane.f32.xlu0 %v2688_v37 }
0x134b   :  { %v2687_v38 = vpop.xlane.xlu1 %2686 }
0x134c   :  { %v2691_v4 = vmul.f32 0.03125, %v2687_v38 }
0x134e   :  { %v2693_v39 = vsub.f32 %v2679_v20, %v2691_v4 }
0x134f   :  { %v2690_v40 = vpop.xlane.xlu0 %2689 }
0x1350   :  { %v2692_v41 = vmul.f32 0.03125, %v2690_v40  ;;  %v2695_v42 = vmul.f32 %v2693_v39, %v2693_v39 }
0x1352   :  { %v2694_v21 = vsub.f32 %v2680_v24, %v2692_v41  ;;  %v2697_v44 = vsel %vm120_vm1, %v2695_v42, 0.0 }
0x1353   :  { %2698 = vadd.xlane.f32.xlu1 %v2697_v44 }
0x1354   :  { %v2696_v43 = vmul.f32 %v2694_v21, %v2694_v21 }
0x1356   :  { %v2700_v45 = vsel %vm120_vm1, %v2696_v43, 0.0 }
0x1357   :  { %2701 = vadd.xlane.f32.xlu0 %v2700_v45 }
0x13dc   :  { %v2699_v46 = vpop.xlane.xlu1 %2698 }
0x13dd   :  { %v2703_v49 = vmul.f32 0.03125, %v2699_v46 }
0x13df   :  { %v2705_v50 = vadd.f32 1e-05, %v2703_v49 }
0x13e0   :  { %v2702_v51 = vpop.xlane.xlu0 %2701 }
0x13e1   :  { %3397 = vrsqrt.f32 %v2705_v50  ;;  %v2704_v52 = vmul.f32 0.03125, %v2702_v51 }
0x13e3   :  { %v2706_v53 = vadd.f32 1e-05, %v2704_v52 }
0x13e5   :  { %3399 = vrsqrt.f32 %v2706_v53 }
0x13ee   :  { %v3398_v54 = vpop.eup %3397 }
0x13ef   :  { %v2709_v28 = vmul.f32 %v3398_v54, %v2693_v39 }
0x13f1   :  { %v2717_v48 = vmul.f32 %v2896_v47, %v2709_v28 }
0x13f2   :  { %v3400_v57 = vpop.eup %3399 }
0x13f3   :  { %v2725_v58 = vadd.f32 %v2897_v56, %v2717_v48  ;;  %v2710_v62 = vmul.f32 %v3400_v57, %v2694_v21 }
0x13f5   :  { %v2729_v25 = vsel %vm120_vm1, %v2725_v58, 0.0  ;;  %v2718_v5 = vmul.f32 %v2896_v47, %v2710_v62 }
0x13f6   :  { %2730 = vadd.xlane.f32.xlu1 %v2729_v25 }
0x13f7   :  { %v2726_v17 = vadd.f32 %v2897_v56, %v2718_v5 }
0x13f9   :  { %v2732_v55 = vsel %vm120_vm1, %v2726_v17, 0.0 }
0x13fa   :  { %2733 = vadd.xlane.f32.xlu0 %v2732_v55 }
0x147f   :  { %v2731_v6 = vpop.xlane.xlu1 %2730 }
0x1480   :  { %v2735_v7 = vmul.f32 0.03125, %v2731_v6 }
0x1482   :  { %v2737_v1 = vsub.f32 %v2725_v58, %v2735_v7 }
0x1483   :  { %v2734_v8 = vpop.xlane.xlu0 %2733 }
0x1484   :  { %v2736_v9 = vmul.f32 0.03125, %v2734_v8  ;;  %v2739_v63 = vmul.f32 %v2737_v1, %v2737_v1 }
0x1486   :  { %v2738_v10 = vsub.f32 %v2726_v17, %v2736_v9  ;;  %v2741_v11 = vsel %vm120_vm1, %v2739_v63, 0.0 }
0x1487   :  { %2742 = vadd.xlane.f32.xlu1 %v2741_v11 }
0x1488   :  { %v2740_v12 = vmul.f32 %v2738_v10, %v2738_v10 }
0x148a   :  { %v2744_v15 = vsel %vm120_vm1, %v2740_v12, 0.0 }
0x148b   :  { %2745 = vadd.xlane.f32.xlu0 %v2744_v15 }
0x1510   :  { %v2743_v16 = vpop.xlane.xlu1 %2742 }
0x1511   :  { %v2747_v13 = vmul.f32 0.03125, %v2743_v16 }
0x1513   :  { %v2749_v18 = vadd.f32 1e-05, %v2747_v13 }
0x1514   :  { %v2746_v19 = vpop.xlane.xlu0 %2745 }
0x1515   :  { %3401 = vrsqrt.f32 %v2749_v18  ;;  %v2748_v22 = vmul.f32 0.03125, %v2746_v19 }
0x1517   :  { %v2750_v23 = vadd.f32 1e-05, %v2748_v22 }
0x1519   :  { %3403 = vrsqrt.f32 %v2750_v23 }
0x1522   :  { %v3402_v26 = vpop.eup %3401 }
0x1523   :  { %v2753_v59 = vmul.f32 %v3402_v26, %v2737_v1 }
0x1525   :  { %v2761_v30 = vmul.f32 %v2898_v27, %v2753_v59 }
0x1526   :  { %v3404_v14 = vpop.eup %3403 }
0x1527   :  { %v2769_v32 = vadd.f32 %v2899_v29, %v2761_v30  ;;  %v2754_v33 = vmul.f32 %v3404_v14, %v2738_v10 }
0x1529   :  { %2771 = vst.msk [vmem:[%s4136_s17] sm:$0xff] %vm120_vm1, %v2769_v32  ;;  %v2762_v34 = vmul.f32 %v2898_v27, %v2754_v33 }
0x152b   :  { %v2770_v0 = vadd.f32 %v2899_v29, %v2762_v34 }
0x152d   :  { %2772 = vst.msk [vmem:[%s4136_s17 + $0x8] sm:$0xff] %vm120_vm1, %v2770_v0 }

// kernel: seq2seq_forward.3
= control target key start
LH: loop header
LB: loop body
LE: loop exit
PB: predicated region body
PF: predicated region fallthrough
CT: control target
= control target key end

     0   :  { %v141_v0 = vlaneseq  ;;  %v17691_v1 = vmov 0.0   ;;  %s14117_s3 = smov 5   ;;  %vm14118_vm0 = vmmov 0   ;;  %v14119_v2 = vmov 1966171168   ;;  %s14120_s10 = smov 6   ;;  %s17690_s0 = inlined_call_operand.smem [shape: u32[30], index: -1, kind: input, shape index: {}] }
   0x1   :  { %13374 = vmatprep.subr.bf16.mxu0 %v17691_v1  ;;  %s14163_s6 = sld [smem:[%s17690_s0 + %s14117_s3]]   ;;  %13378 = vmatprep.mubr.msk.bf16.mxu0 %vm14118_vm0, %v17691_v1  ;;  %v139_v3 = vunpack.c.l.s4 %v14119_v2  ;;  %vm426_vm1 = vcmask 261120   ;;  %s14121_s14 = smov 112   ;;  %vm659_vm2 = vcmask 64512   ;;  %vm1337_vm3 = vcmask 1042432  }
   0x2   :  { %s1_s9 = sld [smem:[%s17690_s0]]   ;;  %v14170_v4 = vshrl.u32 %v141_v0, 7  ;;  %13382 = vmatprep.subr.bf16.mxu1 %v17691_v1  ;;  %13384 = vmatprep.mubr.msk.bf16.mxu1 %vm14118_vm0, %v17691_v1  ;;  %s14122_s15 = smov 120   ;;  %vm1338_vm4 = vcmask 1043456   ;;  %vm1234_vm5 = vcmask 55296   ;;  %vm1333_vm6 = vcmask 56320  }
   0x3   :  { %v140_v5 = vunpack.c.0.s8 %v139_v3  ;;  %s14257_s13 = sld [smem:[%s17690_s0 + %s14120_s10]]   ;;  %s14123_s16 = smov 104   ;;  %vm1746_vm7 = vcmask 130048   ;;  %vm1749_vm8 = vcmask 195584   ;;  %vm2245_vm9 = vcmask 259072  }
   0x4   :  { %s14124_s17 = smov 96   ;;  %s17697_s18 = smov 64   ;;  %vm3711_vm10 = vcmask 63488   ;;  %vm5402_vm11 = vcmask 523264  }
   0x5   :  { %v14176_v6 = vsub.s32 %v140_v5, %v14170_v4  ;;  %s14127_s19 = smov 3   ;;  %s14128_s23 = smov 2  }
   0x6   :  { %s12939_s22 = sld [smem:[%s17690_s0 + %s14127_s19]]   ;;  %s17695_s27 = smov 8  }
   0x7   :  { %v13924_v7 = vld [vmem:[%s14163_s6 + $0x8] sm:$0xff]   ;;  %v13925_v8 = vld [vmem:[%s14163_s6] sm:$0xff]   ;;  %s12938_s26 = sld [smem:[%s17690_s0 + %s14128_s23]]   ;;  %s17693_s28 = smov 16  }
   0x8   :  { %13375 = vmatpush3.bf16.msra.mxu0 %v13924_v7  ;;  %v123_v9 = vld [vmem:[%s1_s9] sm:$0x7f]  ;;  %v124_v10 = vld [vmem:[%s1_s9 + $0x8] sm:$0x7f]  ;;  %s14131_s29 = smov 7   ;;  %s14132_s3 = smov 24  }
   0x9   :  { %13376 = vmatprep.subr.bf16.mxu0 %v17691_v1  ;;  %v201_v11 = vcombine.high %v123_v9, %v123_v9  ;;  %v208_v12 = vrot.slane %v123_v9, %v14176_v6  ;;  %v249_v13 = vcombine.high %v124_v10, %v124_v10  ;;  %v256_v14 = vrot.slane %v124_v10, %v14176_v6  ;;  %v12969_v58 = vld [vmem:[%s14257_s13] ss:$0 sm:$0xff]  ;;  %s14537_s2 = sld [smem:[%s17690_s0 + %s14131_s29]]   ;;  %s14133_s8 = smov 13  }
   0xa   :  { %s14581_s7 = sld [smem:[%s17690_s0 + %s17695_s27]]   ;;  %s14134_s12 = smov 1  }
   0xb   :  { %v215_v15 = vrot.slane %v201_v11, %v14176_v6  ;;  %v216_v16 = vcombine.high %v208_v12, %v208_v12  ;;  %v14185_v17 = vrot.slane %v208_v12, %v14176_v6  ;;  %v263_v18 = vrot.slane %v249_v13, %v14176_v6  ;;  %s14788_s11 = sld [smem:[%s17690_s0 + %s14133_s8]]   ;;  %s14137_s4 = smov 10  }
   0xc   :  { %13377 = vmatpush3.bf16.msra.mxu0 %v13925_v8  ;;  %v264_v19 = vcombine.high %v256_v14, %v256_v14  ;;  %v14189_v20 = vrot.slane %v256_v14, %v14176_v6  ;;  %s12937_s21 = sld [smem:[%s17690_s0 + %s14134_s12]]   ;;  %s14138_s10 = smov 14  }
   0xd   :  { %v217_v21 = vcombine.high %v215_v15, %v215_v15  ;;  %v14192_v22 = vrot.slane %v215_v15, %v14176_v6  ;;  %v14195_v23 = vrot.slane %v216_v16, %v14176_v6  ;;  %v265_v24 = vcombine.high %v263_v18, %v263_v18  ;;  %13388 = vmatprep.subr.bf16.mxu0 %v17691_v1  ;;  %s14820_s9 = sld [smem:[%s17690_s0 + %s14137_s4]]   ;;  %s14141_s5 = smov 15  }
   0xe   :  { %v14199_v25 = vrot.slane %v263_v18, %v14176_v6  ;;  %v14202_v26 = vrot.slane %v264_v19, %v14176_v6  ;;  %v14206_v27 = vcombine.high %v14189_v20, %v14189_v20  ;;  %s14947_s20 = sld [smem:[%s17690_s0 + %s14138_s10]]   ;;  %s14142_s23 = smov 19  }
   0xf   :  { %v14209_v28 = vrot.slane %v217_v21, %v14176_v6  ;;  %v14213_v29 = vcombine.high %v14192_v22, %v14192_v22  ;;  %v14216_v30 = vrot.slane %v265_v24, %v14176_v6  ;;  %v311_v31 = vcombine.low %v14185_v17, %v14195_v23  ;;  %s15242_s12 = sld [smem:[%s17690_s0 + %s14141_s5]]   ;;  %s14144_s19 = smov 17  }
  0x10   :  { %v14222_v32 = vcombine.high %v14199_v25, %v14199_v25  ;;  %v14226_v33 = vcombine.high %v14202_v26, %v14202_v26  ;;  %v12968_v34 = vcombine.high %v14185_v17, %v14195_v23  ;;  %v360_v35 = vcombine.low %v14202_v26, %v14206_v27  ;;  %s15453_s30 = sld [smem:[%s17690_s0 + %s14142_s23]]   ;;  %s14145_s29 = smov 18  }
  0x11   :  { %v313_v36 = vcombine.low %v14192_v22, %v14209_v28  ;;  %v314_v37 = vcombine.low %v14213_v29, %v14189_v20  ;;  %v321_v38 = vrot.slane %v311_v31, %v14176_v6  ;;  %s14147_s8 = smov 22  }
  0x12   :  { %v328_v39 = vrot.slane %v12968_v34, %v14176_v6  ;;  %v361_v40 = vcombine.low %v14226_v33, %v14199_v25  ;;  %v362_v41 = vcombine.low %v14216_v30, %v14222_v32  ;;  %v369_v42 = vrot.slane %v360_v35, %v14176_v6  ;;  %s15616_s23 = sld [smem:[%s17690_s0 + %s14147_s8]]  }
  0x13   :  { %v335_v43 = vrot.slane %v313_v36, %v14176_v6  ;;  %v342_v44 = vrot.slane %v314_v37, %v14176_v6 }
  0x14   :  { %v343_v45 = vcombine.low %v321_v38, %v328_v39  ;;  %v376_v46 = vrot.slane %v361_v40, %v14176_v6  ;;  %v383_v47 = vrot.slane %v362_v41, %v14176_v6 }
  0x15   :  { %v344_v48 = vcombine.low %v335_v43, %v342_v44 }
  0x16   :  { %v351_v49 = vrot.slane %v343_v45, %v14176_v6  ;;  %v384_v50 = vcombine.low %v369_v42, %v376_v46  ;;  %v398_v51 = vrot.slane %v383_v47, %v14176_v6 }
  0x17   :  { %v358_v52 = vrot.slane %v344_v48, %v14176_v6 }
  0x18   :  { %v391_v53 = vrot.slane %v384_v50, %v14176_v6 }
  0x19   :  { %v359_v54 = vcombine.low %v351_v49, %v358_v52 }
  0x1a   :  { %v399_v55 = vcombine.low %v391_v53, %v398_v51 }
  0x1c   :  { %v402_v56 = vpack.c.bf16 %v399_v55, %v359_v54 }
  0x1e   :  { %13379 = vmatmul.mubr.msk.bf16.vlgmr.msra.gmra.mxu0 %vm426_vm1, %v402_v56 }
  0x1f   :  { %13390 = vmatprep.mubr.msk.bf16.mxu0 %vm14118_vm0, %v17691_v1 }
  0xde   :  { %v464_v57 = vpop.f32.mrf.mxu0 }
  0xdf   :  { %v465_v61 = vadd.f32 %v12969_v58, %v464_v57 }
  0xe0   :  { %v13380_v59 = vpop.f32.mrf.mxu0 }
  0xe2   :  { %v467_v60 = vpop.f32.mrf.mxu0 }
  0xe3   :  { %v468_v62 = vadd.f32 %v12969_v58, %v467_v60 }
  0xe4   :  { %v13381_v63 = vpop.f32.mrf.mxu0 }
  0xe5   :  { %v471_v0 = vpack.c.bf16 %v468_v62, %v465_v61  ;;  %v12973_v2 = vpack.c.bf16 %v468_v62, %v468_v62 }
  0xe7   :  { %v480_v3 = vrot.slane %v471_v0, %v14176_v6  ;;  %v487_v5 = vrot.slane %v12973_v2, %v14176_v6 }
  0xe9   :  { %v488_v7 = vcombine.high %v480_v3, %v480_v3  ;;  %v496_v8 = vrot.slane %v480_v3, %v14176_v6  ;;  %v503_v9 = vrot.slane %v487_v5, %v14176_v6  ;;  %v489_v12 = vcombine.high %v487_v5, %v487_v5 }
  0xeb   :  { %573 = vrot.lane.b32.xlu0 %v496_v8, %s14121_s14  ;;  %543 = vrot.lane.b32.xlu1 %v496_v8, %s14122_s15  ;;  %v510_v10 = vrot.slane %v488_v7, %v14176_v6  ;;  %v518_v11 = vcombine.high %v496_v8, %v496_v8  ;;  %v519_v13 = vcombine.high %v503_v9, %v503_v9  ;;  %v530_v16 = vunpack.i.h.s16 %v503_v9 }
  0xec   :  { %v517_v14 = vrot.slane %v489_v12, %v14176_v6 }
  0xed   :  { %v534_v15 = vunpack.i.h.s16 %v519_v13  ;;  %v520_v24 = vcombine.high %v510_v10, %v510_v10  ;;  %v633_v39 = vcombine.low %v496_v8, %v510_v10 }
  0xee   :  { %v12975_v18 = vpack.i.b16 %v517_v14, %v530_v16  ;;  %v532_v19 = vunpack.i.h.s16 %v517_v14 }
  0xef   :  { %547 = vrot.lane.b32.xlu0 %v518_v11, %s14122_s15  ;;  %545 = vrot.lane.b32.xlu1 %v510_v10, %s14122_s15  ;;  %v527_v31 = vunpack.i.l.s16 %v520_v24  ;;  %v528_v34 = vunpack.i.h.s16 %v520_v24  ;;  %v641_v43 = vrot.slane %v633_v39, %v14176_v6 }
  0xf0   :  { %v12976_v21 = vpack.i.b16 %v519_v13, %v532_v19 }
  0xf1   :  { %v12974_v35 = vpack.i.b16 %v503_v9, %v528_v34  ;;  %v634_v37 = vcombine.low %v518_v11, %v527_v31 }
  0xf2   :  { %v707_v38 = vcombine.low %v12976_v21, %v534_v15 }
  0xf3   :  { %577 = vrot.lane.b32.xlu0 %v518_v11, %s14121_s14  ;;  %575 = vrot.lane.b32.xlu1 %v510_v10, %s14121_s14  ;;  %v706_v36 = vcombine.low %v12974_v35, %v12975_v18  ;;  %v648_v41 = vrot.slane %v634_v37, %v14176_v6 }
  0xf4   :  { %v721_v42 = vrot.slane %v707_v38, %v14176_v6 }
  0xf5   :  { %v714_v40 = vrot.slane %v706_v36, %v14176_v6  ;;  %v649_v45 = vcombine.low %v641_v43, %v648_v41 }
  0xf7   :  { %557 = vrot.lane.b32.xlu0 %v534_v15, %s14122_s15  ;;  %587 = vrot.lane.b32.xlu1 %v534_v15, %s14121_s14  ;;  %v722_v44 = vcombine.low %v714_v40, %v721_v42  ;;  %v14298_v47 = vrot.slane %v649_v45, %v14176_v6 }
  0xf9   :  { %v14295_v46 = vrot.slane %v722_v44, %v14176_v6 }
  0xfb   :  { %553 = vrot.lane.b32.xlu0 %v12975_v18, %s14122_s15  ;;  %617 = vrot.lane.b32.xlu1 %v534_v15, %s14123_s16 }
  0xff   :  { %583 = vrot.lane.b32.xlu0 %v12975_v18, %s14121_s14  ;;  %555 = vrot.lane.b32.xlu1 %v12976_v21, %s14122_s15 }
 0x103   :  { %585 = vrot.lane.b32.xlu1 %v12976_v21, %s14121_s14  ;;  %549 = vrot.lane.b32.xlu0 %v527_v31, %s14122_s15 }
 0x107   :  { %551 = vrot.lane.b32.xlu1 %v12974_v35, %s14122_s15  ;;  %603 = vrot.lane.b32.xlu0 %v496_v8, %s14123_s16 }
 0x10b   :  { %605 = vrot.lane.b32.xlu1 %v510_v10, %s14123_s16  ;;  %579 = vrot.lane.b32.xlu0 %v527_v31, %s14121_s14 }
 0x10f   :  { %581 = vrot.lane.b32.xlu1 %v12974_v35, %s14121_s14  ;;  %609 = vrot.lane.b32.xlu0 %v527_v31, %s14123_s16 }
 0x113   :  { %611 = vrot.lane.b32.xlu1 %v12974_v35, %s14123_s16  ;;  %607 = vrot.lane.b32.xlu0 %v518_v11, %s14123_s16 }
 0x117   :  { %615 = vrot.lane.b32.xlu1 %v12976_v21, %s14123_s16  ;;  %613 = vrot.lane.b32.xlu0 %v12975_v18, %s14123_s16 }
 0x11b   :  { %730 = vrot.lane.b32.xlu1 %v14295_v46, %s14124_s17  ;;  %657 = vrot.lane.b32.xlu0 %v14298_v47, %s14124_s17 }
 0x15d   :  { %v574_v48 = vpop.permute.xlu0 %573  ;;  %v544_v49 = vpop.permute.xlu1 %543 }
 0x161   :  { %v548_v50 = vpop.permute.xlu0 %547  ;;  %v546_v51 = vpop.permute.xlu1 %545 }
 0x162   :  { %v782_v62 = vcombine.low %v544_v49, %v546_v51 }
 0x164   :  { %v790_v8 = vrot.slane %v782_v62, %v14176_v6 }
 0x165   :  { %v578_v52 = vpop.permute.xlu0 %577  ;;  %v576_v53 = vpop.permute.xlu1 %575 }
 0x166   :  { %v934_v18 = vcombine.low %v574_v48, %v576_v53 }
 0x168   :  { %v942_v38 = vrot.slane %v934_v18, %v14176_v6 }
 0x169   :  { %v558_v54 = vpop.permute.xlu0 %557  ;;  %v588_v55 = vpop.permute.xlu1 %587 }
 0x16a   :  { %v572_v63 = vunpack.i.l.s16 %v558_v54  ;;  %v602_v14 = vunpack.i.l.s16 %v588_v55 }
 0x16d   :  { %v554_v56 = vpop.permute.xlu0 %553  ;;  %v618_v57 = vpop.permute.xlu1 %617 }
 0x16e   :  { %v632_v53 = vunpack.i.l.s16 %v618_v57 }
 0x171   :  { %v584_v58 = vpop.permute.xlu0 %583  ;;  %v556_v59 = vpop.permute.xlu1 %555 }
 0x172   :  { %v859_v2 = vcombine.low %v556_v59, %v572_v63 }
 0x174   :  { %v873_v11 = vrot.slane %v859_v2, %v14176_v6 }
 0x175   :  { %v586_v60 = vpop.permute.xlu1 %585  ;;  %v550_v61 = vpop.permute.xlu0 %549 }
 0x176   :  { %v565_v0 = vunpack.i.l.s16 %v550_v61  ;;  %v1011_v31 = vcombine.low %v586_v60, %v602_v14 }
 0x178   :  { %v783_v3 = vcombine.low %v548_v50, %v565_v0  ;;  %v1025_v41 = vrot.slane %v1011_v31, %v14176_v6 }
 0x179   :  { %v552_v5 = vpop.permute.xlu1 %551  ;;  %v604_v7 = vpop.permute.xlu0 %603 }
 0x17a   :  { %v797_v9 = vrot.slane %v783_v3, %v14176_v6  ;;  %v858_v10 = vcombine.low %v552_v5, %v554_v56 }
 0x17c   :  { %v866_v12 = vrot.slane %v858_v10, %v14176_v6  ;;  %v798_v13 = vcombine.low %v790_v8, %v797_v9 }
 0x17d   :  { %v606_v15 = vpop.permute.xlu1 %605  ;;  %v580_v16 = vpop.permute.xlu0 %579 }
 0x17e   :  { %v874_v19 = vcombine.low %v866_v12, %v873_v11  ;;  %v595_v21 = vunpack.i.l.s16 %v580_v16  ;;  %v14309_v24 = vrot.slane %v798_v13, %v14176_v6  ;;  %v1086_v42 = vcombine.low %v604_v7, %v606_v15 }
 0x180   :  { %v935_v34 = vcombine.low %v578_v52, %v595_v21  ;;  %806 = vrot.lane.b32.xlu0 %v14309_v24, %s14124_s17  ;;  %v14314_v35 = vrot.slane %v874_v19, %v14176_v6  ;;  %v1094_v54 = vrot.slane %v1086_v42, %v14176_v6  ;;  %v14126_v21 = vmov 65535  }
 0x181   :  { %v582_v36 = vpop.permute.xlu1 %581  ;;  %v610_v37 = vpop.permute.xlu0 %609  ;;  %v1339_v31 = vsel %vm1337_vm3, 4294967295, %v14126_v21  ;;  %v14408_v42 = vsub.s32 0, %v14170_v4 }
 0x182   :  { %v949_v39 = vrot.slane %v935_v34, %v14176_v6  ;;  %v1010_v40 = vcombine.low %v582_v36, %v584_v58  ;;  %882 = vrot.lane.b32.xlu1 %v14314_v35, %s14124_s17  ;;  %v625_v44 = vunpack.i.l.s16 %v610_v37  ;;  %v14386_v37 = vsel %vm1338_vm4, %v1339_v31, 0 }
 0x184   :  { %v1018_v43 = vrot.slane %v1010_v40, %v14176_v6  ;;  %v950_v45 = vcombine.low %v942_v38, %v949_v39  ;;  %v12966_v40 = vld.sshfl [vmem:[%s12939_s22] sm:$0x11 pattern:$0x75316420]  ;;  %s14135_s22 = smov 11  }
 0x185   :  { %v612_v48 = vpop.permute.xlu1 %611  ;;  %v608_v49 = vpop.permute.xlu0 %607  ;;  %s14796_s25 = sld [smem:[%s17690_s0 + %s14135_s22]]  }
 0x186   :  { %v1026_v50 = vcombine.low %v1018_v43, %v1025_v41  ;;  %v1087_v51 = vcombine.low %v608_v49, %v625_v44  ;;  %v14323_v52 = vrot.slane %v950_v45, %v14176_v6  ;;  %v137_v41 = vcombine.high %v12966_v40, %v12966_v40  ;;  %s15285_s22 = sld [smem:[%s17690_s0 + %s17693_s28]]  }
 0x187   :  { %v144_v44 = vrot.slane %v12966_v40, %v14176_v6 }
 0x188   :  { %v1101_v55 = vrot.slane %v1087_v51, %v14176_v6  ;;  %958 = vrot.lane.b32.xlu0 %v14323_v52, %s14124_s17  ;;  %v14330_v56 = vrot.slane %v1026_v50, %v14176_v6  ;;  %v151_v43 = vrot.slane %v137_v41, %v14176_v6 }
 0x189   :  { %v616_v58 = vpop.permute.xlu1 %615  ;;  %v614_v59 = vpop.permute.xlu0 %613  ;;  %v155_v49 = vrot.slane %v144_v44, %v14408_v42 }
 0x18a   :  { %v1102_v60 = vcombine.low %v1094_v54, %v1101_v55  ;;  %v1163_v61 = vcombine.low %v616_v58, %v632_v53  ;;  %v1162_v62 = vcombine.low %v612_v48, %v614_v59  ;;  %1034 = vrot.lane.b32.xlu1 %v14330_v56, %s14124_s17  ;;  %v159_v45 = vrot.slane %v151_v43, %v14408_v42  ;;  %v127_v48 = vld [vmem:[%s12938_s26] sm:$0x7f]  ;;  %s14136_s26 = smov 9  }
 0x18b   :  { %v14416_v51 = vadd.f32 %v155_v49, %v127_v48  ;;  %s14815_s1 = sld [smem:[%s17690_s0 + %s14136_s26]]   ;;  %s14140_s26 = smov 4  }
 0x18c   :  { %v1177_v57 = vrot.slane %v1163_v61, %v14176_v6  ;;  %v1170_v63 = vrot.slane %v1162_v62, %v14176_v6  ;;  %v14337_v0 = vrot.slane %v1102_v60, %v14176_v6  ;;  %v14414_v50 = vadd.f32 %v159_v45, %v127_v48  ;;  %s12940_s4 = sld [smem:[%s17690_s0 + %s14140_s26]]  }
 0x18d   :  { %v731_v2 = vpop.permute.xlu1 %730  ;;  %v658_v3 = vpop.permute.xlu0 %657  ;;  %s15469_s26 = sld [smem:[%s17690_s0 + %s14144_s19]]  }
 0x18e   :  { %v1178_v5 = vcombine.low %v1170_v63, %v1177_v57  ;;  %v736_v7 = vsel %vm659_vm2, %v731_v2, 0  ;;  %1110 = vrot.lane.b32.xlu0 %v14337_v0, %s14124_s17  ;;  %v664_v8 = vsel %vm659_vm2, %v658_v3, 0 }
 0x18f   :  { %13383 = vmatpush3.bf16.xpose.msra.mxu1 %v664_v8  ;;  %13389 = vmatpush3.bf16.xpose.msra.mxu0 %v736_v7 }
 0x190   :  { %v14344_v9 = vrot.slane %v1178_v5, %v14176_v6  ;;  %13394 = vmatprep.subr.bf16.mxu1 %v17691_v1  ;;  %13400 = vmatprep.subr.bf16.mxu0 %v17691_v1 }
 0x192   :  { %1186 = vrot.lane.b32.xlu1 %v14344_v9, %s14124_s17 }
 0x196   :  { %13391 = vmatmul.mubr.msk.bf16.vlgmr.msra.gmra.mxu0 %vm659_vm2, %v14295_v46  ;;  %1331 = vrot.lane.b32.xlu1 %v14298_v47, %s17697_s18 }
 0x197   :  { %13385 = vmatmul.mubr.msk.bf16.vlgmr.msra.gmra.mxu1 %vm659_vm2, %v14298_v47  ;;  %13402 = vmatprep.mubr.msk.bf16.mxu0 %vm14118_vm0, %v17691_v1 }
 0x198   :  { %13396 = vmatprep.mubr.msk.bf16.mxu1 %vm14118_vm0, %v17691_v1 }
 0x1f2   :  { %v807_v10 = vpop.permute.xlu0 %806 }
 0x1f3   :  { %v812_v11 = vsel %vm659_vm2, %v807_v10, 0 }
 0x1f4   :  { %v883_v12 = vpop.permute.xlu1 %882  ;;  %13395 = vmatpush3.bf16.xpose.msra.mxu1 %v812_v11 }
 0x1f5   :  { %v888_v13 = vsel %vm659_vm2, %v883_v12, 0  ;;  %13406 = vmatprep.subr.bf16.mxu1 %v17691_v1 }
 0x1f6   :  { %13401 = vmatpush3.bf16.xpose.msra.mxu0 %v888_v13 }
 0x1f7   :  { %13412 = vmatprep.subr.bf16.mxu0 %v17691_v1 }
 0x1fa   :  { %v959_v14 = vpop.permute.xlu0 %958 }
 0x1fb   :  { %v964_v47 = vsel %vm659_vm2, %v959_v14, 0  ;;  %13397 = vmatmul.mubr.msk.bf16.vlgmr.msra.gmra.mxu1 %vm659_vm2, %v14309_v24 }
 0x1fc   :  { %v1035_v15 = vpop.permute.xlu1 %1034  ;;  %13407 = vmatpush3.bf16.xpose.msra.mxu1 %v964_v47  ;;  %13408 = vmatprep.mubr.msk.bf16.mxu1 %vm14118_vm0, %v17691_v1 }
 0x1fd   :  { %v1040_v16 = vsel %vm659_vm2, %v1035_v15, 0  ;;  %13403 = vmatmul.mubr.msk.bf16.vlgmr.msra.gmra.mxu0 %vm659_vm2, %v14314_v35  ;;  %13418 = vmatprep.subr.bf16.mxu1 %v17691_v1 }
 0x1fe   :  { %13413 = vmatpush3.bf16.xpose.msra.mxu0 %v1040_v16  ;;  %13414 = vmatprep.mubr.msk.bf16.mxu0 %vm14118_vm0, %v17691_v1 }
 0x1ff   :  { %13424 = vmatprep.subr.bf16.mxu0 %v17691_v1 }
 0x200   :  { %v1111_v18 = vpop.permute.xlu0 %1110 }
 0x201   :  { %v1116_v19 = vsel %vm659_vm2, %v1111_v18, 0 }
 0x203   :  { %13409 = vmatmul.mubr.msk.bf16.vlgmr.msra.gmra.mxu1 %vm659_vm2, %v14323_v52 }
 0x204   :  { %v1187_v34 = vpop.permute.xlu1 %1186  ;;  %13419 = vmatpush3.bf16.xpose.msra.mxu1 %v1116_v19  ;;  %13420 = vmatprep.mubr.msk.bf16.mxu1 %vm14118_vm0, %v17691_v1 }
 0x205   :  { %v1192_v36 = vsel %vm659_vm2, %v1187_v34, 0  ;;  %13415 = vmatmul.mubr.msk.bf16.vlgmr.msra.gmra.mxu0 %vm659_vm2, %v14330_v56  ;;  %13430 = vmatprep.subr.bf16.mxu1 %v17691_v1 }
 0x206   :  { %13425 = vmatpush3.bf16.xpose.msra.mxu0 %v1192_v36  ;;  %13426 = vmatprep.mubr.msk.bf16.mxu0 %vm14118_vm0, %v17691_v1 }
 0x207   :  { %13436 = vmatprep.subr.bf16.mxu0 %v17691_v1 }
 0x208   :  { %v1332_v38 = vpop.permute.xlu1 %1331 }
 0x209   :  { %v1342_v39 = vand.u32 %v14386_v37, %v1332_v38 }
 0x20b   :  { %13421 = vmatmul.mubr.msk.bf16.vlgmr.msra.gmra.mxu1 %vm659_vm2, %v14337_v0 }
 0x20c   :  { %13431 = vmatpush3.bf16.msra.mxu1 %v1342_v39  ;;  %13432 = vmatprep.mubr.msk.bf16.mxu1 %vm14118_vm0, %v17691_v1 }
 0x20d   :  { %13427 = vmatmul.mubr.msk.bf16.vlgmr.msra.gmra.mxu0 %vm659_vm2, %v14344_v9  ;;  %13442 = vmatprep.subr.bf16.mxu1 %v17691_v1 }
 0x20e   :  { %13438 = vmatprep.mubr.msk.bf16.mxu0 %vm14118_vm0, %v17691_v1 }
 0x256   :  { %v772_v53 = vpop.f32.mrf.mxu0 }
 0x257   :  { %v700_v54 = vpop.f32.mrf.mxu1  ;;  %v773_v55 = vadd.f32 %v772_v53, %v14414_v50 }
 0x258   :  { %v701_v58 = vadd.f32 %v700_v54, %v14416_v51  ;;  %v13392_v59 = vpop.f32.mrf.mxu0 }
 0x259   :  { %v13386_v60 = vpop.f32.mrf.mxu1  ;;  %v1238_v61 = vsel %vm1234_vm5, %v773_v55, -inf }
 0x25a   :  { %v1235_v62 = vsel %vm1234_vm5, %v701_v58, -inf  ;;  %1239 = vmax.xlane.f32.xlu1 %v1238_v61  ;;  %v775_v57 = vpop.f32.mrf.mxu0 }
 0x25b   :  { %1236 = vmax.xlane.f32.xlu0 %v1235_v62  ;;  %v703_v63 = vpop.f32.mrf.mxu1 }
 0x25c   :  { %v13393_v2 = vpop.f32.mrf.mxu0 }
 0x25d   :  { %v13387_v3 = vpop.f32.mrf.mxu1 }
 0x2bb   :  { %v848_v5 = vpop.f32.mrf.mxu1 }
 0x2bc   :  { %v849_v7 = vadd.f32 %v848_v5, %v14416_v51 }
 0x2bd   :  { %v13398_v8 = vpop.f32.mrf.mxu1  ;;  %v924_v10 = vpop.f32.mrf.mxu0 }
 0x2be   :  { %v925_v11 = vadd.f32 %v924_v10, %v14414_v50  ;;  %v1241_v12 = vsel %vm1234_vm5, %v849_v7, -inf }
 0x2bf   :  { %1242 = vmax.xlane.f32.xlu0 %v1241_v12  ;;  %v851_v13 = vpop.f32.mrf.mxu1  ;;  %v13404_v14 = vpop.f32.mrf.mxu0 }
 0x2c0   :  { %v1244_v16 = vsel %vm1234_vm5, %v925_v11, -inf }
 0x2c1   :  { %v13399_v47 = vpop.f32.mrf.mxu1  ;;  %v927_v15 = vpop.f32.mrf.mxu0 }
 0x2c3   :  { %v1000_v18 = vpop.f32.mrf.mxu1  ;;  %1245 = vmax.xlane.f32.xlu0 %v1244_v16  ;;  %v13405_v19 = vpop.f32.mrf.mxu0 }
 0x2c4   :  { %v14427_v21 = vadd.f32 %v1000_v18, %v14416_v51 }
 0x2c5   :  { %v13410_v31 = vpop.f32.mrf.mxu1  ;;  %v1076_v34 = vpop.f32.mrf.mxu0 }
 0x2c6   :  { %v14430_v36 = vadd.f32 %v1076_v34, %v14414_v50  ;;  %v1247_v38 = vsel %vm1234_vm5, %v14427_v21, -inf }
 0x2c7   :  { %v1003_v39 = vpop.f32.mrf.mxu1  ;;  %1248 = vmax.xlane.f32.xlu1 %v1247_v38  ;;  %v13416_v40 = vpop.f32.mrf.mxu0 }
 0x2c8   :  { %v1250_v41 = vsel %vm1234_vm5, %v14430_v36, -inf }
 0x2c9   :  { %v13411_v43 = vpop.f32.mrf.mxu1  ;;  %1251 = vmax.xlane.f32.xlu0 %v1250_v41  ;;  %v1079_v44 = vpop.f32.mrf.mxu0 }
 0x2cb   :  { %v13417_v45 = vpop.f32.mrf.mxu0  ;;  %v1152_v48 = vpop.f32.mrf.mxu1 }
 0x2cc   :  { %v1153_v49 = vadd.f32 %v1152_v48, %v14416_v51 }
 0x2cd   :  { %v13422_v53 = vpop.f32.mrf.mxu1  ;;  %v1228_v54 = vpop.f32.mrf.mxu0 }
 0x2ce   :  { %v1229_v59 = vadd.f32 %v1228_v54, %v14414_v50  ;;  %v1253_v60 = vsel %vm1234_vm5, %v1153_v49, -inf }
 0x2cf   :  { %v1155_v61 = vpop.f32.mrf.mxu1  ;;  %1254 = vmax.xlane.f32.xlu1 %v1253_v60  ;;  %v13428_v62 = vpop.f32.mrf.mxu0 }
 0x2d0   :  { %v1256_v57 = vsel %vm1234_vm5, %v1229_v59, -inf }
 0x2d1   :  { %v13423_v63 = vpop.f32.mrf.mxu1  ;;  %1257 = vmax.xlane.f32.xlu0 %v1256_v57  ;;  %v1231_v2 = vpop.f32.mrf.mxu0 }
 0x2d3   :  { %v13429_v3 = vpop.f32.mrf.mxu0 }
 0x2e0   :  { %1432 = vrot.lane.b32.xlu1 %v14309_v24, %s17697_s18 }
 0x2e3   :  { %v1240_v5 = vpop.xlane.xlu1 %1239 }
 0x2e4   :  { %1480 = vrot.lane.b32.xlu1 %v14314_v35, %s17697_s18  ;;  %v1237_v8 = vpop.xlane.xlu0 %1236  ;;  %v1260_v10 = vsub.f32 %v773_v55, %v1240_v5 }
 0x2e5   :  { %v1259_v12 = vsub.f32 %v701_v58, %v1237_v8 }
 0x2e6   :  { %v1269_v13 = vmul.f32 1.442695, %v1260_v10 }
 0x2e7   :  { %1384 = vrot.lane.b32.xlu0 %v14295_v46, %s17697_s18  ;;  %v1267_v14 = vmul.f32 1.442695, %v1259_v12 }
 0x2e8   :  { %13960 = vpow2.f32 %v1269_v13 }
 0x2e9   :  { %13962 = vpow2.f32 %v1267_v14 }
 0x2f5   :  { %v13961_v47 = vpop.eup %13960 }
 0x2f6   :  { %v14446_v15 = vpop.eup %13962  ;;  %v1286_v16 = vsel %vm1234_vm5, %v13961_v47, 0.0 }
 0x2f7   :  { %v1283_v24 = vsel %vm1234_vm5, %v14446_v15, 0.0 }
 0x306   :  { %1287 = vadd.xlane.f32.xlu0 %v1286_v16 }
 0x308   :  { %1284 = vadd.xlane.f32.xlu1 %v1283_v24 }
 0x348   :  { %v1243_v35 = vpop.xlane.xlu0 %1242 }
 0x349   :  { %v1261_v46 = vsub.f32 %v849_v7, %v1243_v35 }
 0x34b   :  { %v1271_v18 = vmul.f32 1.442695, %v1261_v46 }
 0x34c   :  { %v1246_v19 = vpop.xlane.xlu0 %1245 }
 0x34d   :  { %13964 = vpow2.f32 %v1271_v18  ;;  %v1262_v55 = vsub.f32 %v925_v11, %v1246_v19 }
 0x34f   :  { %v1273_v58 = vmul.f32 1.442695, %v1262_v55 }
 0x350   :  { %v1249_v11 = vpop.xlane.xlu1 %1248 }
 0x351   :  { %13966 = vpow2.f32 %v1273_v58  ;;  %v1263_v44 = vsub.f32 %v14427_v21, %v1249_v11 }
 0x352   :  { %v1252_v31 = vpop.xlane.xlu0 %1251 }
 0x353   :  { %v1264_v48 = vsub.f32 %v14430_v36, %v1252_v31  ;;  %v1275_v53 = vmul.f32 1.442695, %v1263_v44 }
 0x355   :  { %v1277_v60 = vmul.f32 1.442695, %v1264_v48  ;;  %13968 = vpow2.f32 %v1275_v53 }
 0x357   :  { %13970 = vpow2.f32 %v1277_v60 }
 0x358   :  { %v1255_v45 = vpop.xlane.xlu1 %1254 }
 0x359   :  { %v1265_v54 = vsub.f32 %v1153_v49, %v1255_v45 }
 0x35a   :  { %v14451_v34 = vpop.eup %13964  ;;  %v1258_v38 = vpop.xlane.xlu0 %1257 }
 0x35b   :  { %v1289_v39 = vsel %vm1234_vm5, %v14451_v34, 0.0  ;;  %v1279_v61 = vmul.f32 1.442695, %v1265_v54  ;;  %v1266_v62 = vsub.f32 %v1229_v59, %v1258_v38 }
 0x35c   :  { %1290 = vadd.xlane.f32.xlu1 %v1289_v39  ;;  %v1433_v63 = vpop.permute.xlu1 %1432 }
 0x35d   :  { %13972 = vpow2.f32 %v1279_v61  ;;  %v1281_v57 = vmul.f32 1.442695, %v1266_v62  ;;  %v1438_v18 = vand.u32 %v1433_v63, %v14386_v37 }
 0x35e   :  { %v14455_v40 = vpop.eup %13966  ;;  %v1385_v41 = vpop.permute.xlu0 %1384 }
 0x35f   :  { %v1390_v43 = vand.u32 %v1385_v41, %v14386_v37  ;;  %v1292_v7 = vsel %vm1234_vm5, %v14455_v40, 0.0  ;;  %13974 = vpow2.f32 %v1281_v57 }
 0x360   :  { %1293 = vadd.xlane.f32.xlu0 %v1292_v7  ;;  %v1481_v2 = vpop.permute.xlu1 %1480 }
 0x361   :  { %13437 = vmatpush3.bf16.msra.mxu0 %v1390_v43  ;;  %v1486_v35 = vand.u32 %v1481_v2, %v14386_v37 }
 0x362   :  { %13448 = vmatprep.subr.bf16.mxu0 %v17691_v1 }
 0x36d   :  { %1576 = vrot.lane.b32.xlu1 %v14330_v56, %s17697_s18  ;;  %v14467_v56 = vpop.eup %13968 }
 0x36e   :  { %v14469_v3 = vpop.eup %13970  ;;  %v1295_v21 = vsel %vm1234_vm5, %v14467_v56, 0.0 }
 0x36f   :  { %v14473_v36 = vpop.eup %13972  ;;  %v1298_v5 = vsel %vm1234_vm5, %v14469_v3, 0.0 }
 0x370   :  { %v1301_v59 = vsel %vm1234_vm5, %v14473_v36, 0.0  ;;  %v14479_v8 = vpop.eup %13974 }
 0x371   :  { %v1304_v10 = vsel %vm1234_vm5, %v14479_v8, 0.0 }
 0x376   :  { %1528 = vrot.lane.b32.xlu0 %v14323_v52, %s17697_s18 }
 0x38f   :  { %v1288_v52 = vpop.xlane.xlu0 %1287 }
 0x390   :  { %13976 = vrcp.f32 %v1288_v52 }
 0x391   :  { %1296 = vadd.xlane.f32.xlu1 %v1295_v21  ;;  %v1285_v49 = vpop.xlane.xlu1 %1284 }
 0x392   :  { %13978 = vrcp.f32 %v1285_v49 }
 0x395   :  { %1302 = vadd.xlane.f32.xlu1 %v1301_v59  ;;  %1299 = vadd.xlane.f32.xlu0 %v1298_v5 }
 0x399   :  { %1305 = vadd.xlane.f32.xlu0 %v1304_v10 }
 0x39d   :  { %v13977_v12 = vpop.eup %13976 }
 0x39e   :  { %v1316_v13 = vmul.f32 %v13977_v12, %v13961_v47 }
 0x39f   :  { %v13979_v14 = vpop.eup %13978 }
 0x3a0   :  { %v1324_v16 = vpack.c.bf16 %v1316_v13, %v1316_v13  ;;  %v1315_v24 = vmul.f32 %v13979_v14, %v14446_v15 }
 0x3a2   :  { %13439 = vmatmul.mubr.msk.bf16.vlgmr.msra.gmra.mxu0 %vm1333_vm6, %v1324_v16  ;;  %v1323_v46 = vpack.c.bf16 %v1315_v24, %v1315_v24 }
 0x3a3   :  { %13449 = vmatpush3.bf16.msra.mxu0 %v1486_v35  ;;  %13450 = vmatprep.mubr.msk.bf16.mxu0 %vm14118_vm0, %v17691_v1 }
 0x3a4   :  { %13433 = vmatmul.mubr.msk.bf16.vlgmr.msra.gmra.mxu1 %vm1333_vm6, %v1323_v46  ;;  %13460 = vmatprep.subr.bf16.mxu0 %v17691_v1 }
 0x3a5   :  { %13443 = vmatpush3.bf16.msra.mxu1 %v1438_v18  ;;  %13444 = vmatprep.mubr.msk.bf16.mxu1 %vm14118_vm0, %v17691_v1 }
 0x3a6   :  { %1672 = vrot.lane.b32.xlu1 %v14344_v9, %s17697_s18  ;;  %13454 = vmatprep.subr.bf16.mxu1 %v17691_v1 }
 0x3af   :  { %1624 = vrot.lane.b32.xlu0 %v14337_v0, %s17697_s18  ;;  %s15474_s18 = sld [smem:[%s17690_s0 + %s14145_s29]]   ;;  %s14148_s29 = smov 23  }
 0x3e5   :  { %v1291_v47 = vpop.xlane.xlu1 %1290 }
 0x3e6   :  { %13980 = vrcp.f32 %v1291_v47 }
 0x3e9   :  { %v1294_v15 = vpop.xlane.xlu0 %1293  ;;  %v1577_v41 = vpop.permute.xlu1 %1576 }
 0x3ea   :  { %13982 = vrcp.f32 %v1294_v15  ;;  %v1582_v43 = vand.u32 %v1577_v41, %v14386_v37 }
 0x3ed   :  { %v1529_v55 = vpop.permute.xlu0 %1528 }
 0x3ee   :  { %v1534_v39 = vand.u32 %v1529_v55, %v14386_v37 }
 0x3f3   :  { %v13981_v19 = vpop.eup %13980 }
 0x3f4   :  { %v1317_v58 = vmul.f32 %v13981_v19, %v14451_v34 }
 0x3f6   :  { %v1325_v31 = vpack.c.bf16 %v1317_v58, %v1317_v58 }
 0x3f7   :  { %v13983_v38 = vpop.eup %13982 }
 0x3f8   :  { %13445 = vmatmul.mubr.msk.bf16.vlgmr.msra.gmra.mxu1 %vm1333_vm6, %v1325_v31  ;;  %v1318_v9 = vmul.f32 %v13983_v38, %v14455_v40 }
 0x3f9   :  { %13455 = vmatpush3.bf16.msra.mxu1 %v1534_v39  ;;  %13456 = vmatprep.mubr.msk.bf16.mxu1 %vm14118_vm0, %v17691_v1 }
 0x3fa   :  { %v1326_v0 = vpack.c.bf16 %v1318_v9, %v1318_v9  ;;  %13466 = vmatprep.subr.bf16.mxu1 %v17691_v1 }
 0x3fc   :  { %13451 = vmatmul.mubr.msk.bf16.vlgmr.msra.gmra.mxu0 %vm1333_vm6, %v1326_v0 }
 0x3fd   :  { %13461 = vmatpush3.bf16.msra.mxu0 %v1582_v43  ;;  %13462 = vmatprep.mubr.msk.bf16.mxu0 %vm14118_vm0, %v17691_v1 }
 0x3fe   :  { %13472 = vmatprep.subr.bf16.mxu0 %v17691_v1 }
 0x41a   :  { %v1297_v34 = vpop.xlane.xlu1 %1296 }
 0x41b   :  { %13984 = vrcp.f32 %v1297_v34 }
 0x41e   :  { %v1303_v40 = vpop.xlane.xlu1 %1302  ;;  %v1300_v7 = vpop.xlane.xlu0 %1299 }
 0x41f   :  { %13986 = vrcp.f32 %v1303_v40 }
 0x420   :  { %13988 = vrcp.f32 %v1300_v7 }
 0x422   :  { %v1306_v11 = vpop.xlane.xlu0 %1305  ;;  %v1673_v62 = vpop.permute.xlu1 %1672 }
 0x423   :  { %13990 = vrcp.f32 %v1306_v11  ;;  %v1678_v52 = vand.u32 %v1673_v62, %v14386_v37 }
 0x426   :  { %v1625_v45 = vpop.permute.xlu0 %1624 }
 0x427   :  { %v1630_v60 = vand.u32 %v1625_v45, %v14386_v37 }
 0x428   :  { %v13985_v44 = vpop.eup %13984 }
 0x429   :  { %v1319_v48 = vmul.f32 %v13985_v44, %v14467_v56  ;;  %v13928_v44 = vld [vmem:[%s14537_s2 + $0x8] sm:$0xff]  }
 0x42b   :  { %v1327_v53 = vpack.c.bf16 %v1319_v48, %v1319_v48  ;;  %v13929_v48 = vld [vmem:[%s14537_s2] sm:$0xff]  }
 0x42c   :  { %v13987_v54 = vpop.eup %13986 }
 0x42d   :  { %v13989_v61 = vpop.eup %13988  ;;  %13457 = vmatmul.mubr.msk.bf16.vlgmr.msra.gmra.mxu1 %vm1333_vm6, %v1327_v53  ;;  %v1321_v63 = vmul.f32 %v13987_v54, %v14473_v36 }
 0x42e   :  { %13467 = vmatpush3.bf16.msra.mxu1 %v1630_v60  ;;  %v1320_v57 = vmul.f32 %v13989_v61, %v14469_v3  ;;  %13468 = vmatprep.mubr.msk.bf16.mxu1 %vm14118_vm0, %v17691_v1 }
 0x42f   :  { %13478 = vmatprep.subr.bf16.mxu1 %v17691_v1  ;;  %v1329_v21 = vpack.c.bf16 %v1321_v63, %v1321_v63 }
 0x430   :  { %v1328_v2 = vpack.c.bf16 %v1320_v57, %v1320_v57  ;;  %v13991_v56 = vpop.eup %13990 }
 0x431   :  { %v1322_v3 = vmul.f32 %v13991_v56, %v14479_v8 }
 0x432   :  { %13463 = vmatmul.mubr.msk.bf16.vlgmr.msra.gmra.mxu0 %vm1333_vm6, %v1328_v2 }
 0x433   :  { %13473 = vmatpush3.bf16.msra.mxu0 %v1678_v52  ;;  %13474 = vmatprep.mubr.msk.bf16.mxu0 %vm14118_vm0, %v17691_v1  ;;  %v1330_v36 = vpack.c.bf16 %v1322_v3, %v1322_v3 }
 0x434   :  { %13486 = vmatprep.subr.bf16.mxu0 %v17691_v1 }
 0x435   :  { %13469 = vmatmul.mubr.msk.bf16.vlgmr.msra.gmra.mxu1 %vm1333_vm6, %v1329_v21 }
 0x436   :  { %13482 = vmatprep.mubr.msk.bf16.mxu1 %vm14118_vm0, %v17691_v1  ;;  %13479 = vmatpush3.bf16.msra.mxu1 %v13928_v44 }
 0x437   :  { %13480 = vmatprep.subr.bf16.mxu1 %v17691_v1 }
 0x43a   :  { %13475 = vmatmul.mubr.msk.bf16.vlgmr.msra.gmra.mxu0 %vm1333_vm6, %v1330_v36  ;;  %13481 = vmatpush3.bf16.msra.mxu1 %v13929_v48 }
 0x43b   :  { %13490 = vmatprep.mubr.msk.bf16.mxu0 %vm14118_vm0, %v17691_v1  ;;  %13494 = vmatprep.subr.bf16.mxu1 %v17691_v1 }
 0x462   :  { %v1426_v49 = vpop.f32.mrf.mxu0 }
 0x464   :  { %v1378_v59 = vpop.f32.mrf.mxu1  ;;  %v13440_v5 = vpop.f32.mrf.mxu0 }
 0x466   :  { %v13434_v10 = vpop.f32.mrf.mxu1  ;;  %v1429_v12 = vpop.f32.mrf.mxu0 }
 0x468   :  { %v1381_v13 = vpop.f32.mrf.mxu1  ;;  %v13441_v8 = vpop.f32.mrf.mxu0 }
 0x46a   :  { %v13435_v14 = vpop.f32.mrf.mxu1 }
 0x4b8   :  { %v1474_v16 = vpop.f32.mrf.mxu1 }
 0x4b9   :  { %1722 = vrot.lane.b32.xlu0 %v1474_v16, %s17695_s27 }
 0x4ba   :  { %v13446_v24 = vpop.f32.mrf.mxu1 }
 0x4bc   :  { %v1477_v35 = vpop.f32.mrf.mxu1  ;;  %v1522_v46 = vpop.f32.mrf.mxu0 }
 0x4bd   :  { %1724 = vrot.lane.b32.xlu1 %v1522_v46, %s17695_s27 }
 0x4be   :  { %v13447_v18 = vpop.f32.mrf.mxu1  ;;  %v13452_v47 = vpop.f32.mrf.mxu0 }
 0x4c0   :  { %v1525_v15 = vpop.f32.mrf.mxu0 }
 0x4c2   :  { %v13453_v19 = vpop.f32.mrf.mxu0 }
 0x4ed   :  { %v1570_v55 = vpop.f32.mrf.mxu1 }
 0x4ee   :  { %1730 = vrot.lane.b32.xlu0 %v1570_v55, %s17693_s28 }
 0x4ef   :  { %v13458_v58 = vpop.f32.mrf.mxu1 }
 0x4f1   :  { %v1573_v31 = vpop.f32.mrf.mxu1 }
 0x4f2   :  { %v1618_v38 = vpop.f32.mrf.mxu0 }
 0x4f3   :  { %1732 = vrot.lane.b32.xlu1 %v1618_v38, %s17693_s28  ;;  %v13459_v39 = vpop.f32.mrf.mxu1 }
 0x4f4   :  { %v13464_v41 = vpop.f32.mrf.mxu0 }
 0x4f5   :  { %v1666_v9 = vpop.f32.mrf.mxu1 }
 0x4f6   :  { %v1621_v0 = vpop.f32.mrf.mxu0  ;;  %1738 = vrot.lane.b32.xlu0 %v1666_v9, %s14132_s3 }
 0x4f7   :  { %v13470_v43 = vpop.f32.mrf.mxu1 }
 0x4f8   :  { %v13465_v34 = vpop.f32.mrf.mxu0 }
 0x4f9   :  { %v1669_v40 = vpop.f32.mrf.mxu1 }
 0x4fa   :  { %v1714_v7 = vpop.f32.mrf.mxu0 }
 0x4fb   :  { %1740 = vrot.lane.b32.xlu1 %v1714_v7, %s14132_s3  ;;  %v13471_v11 = vpop.f32.mrf.mxu1 }
 0x4fc   :  { %v13476_v45 = vpop.f32.mrf.mxu0 }
 0x4fe   :  { %v1717_v53 = vpop.f32.mrf.mxu0 }
 0x500   :  { %v13477_v54 = vpop.f32.mrf.mxu0 }
 0x52b   :  { %v1723_v60 = vpop.permute.xlu0 %1722 }
 0x52c   :  { %v1744_v57 = vsel %vm659_vm2, %v1378_v59, %v1723_v60 }
 0x52f   :  { %v1725_v62 = vpop.permute.xlu1 %1724 }
 0x530   :  { %v1745_v36 = vsel %vm659_vm2, %v1426_v49, %v1725_v62 }
 0x560   :  { %v1731_v61 = vpop.permute.xlu0 %1730 }
 0x561   :  { %v1747_v63 = vsel %vm1746_vm7, %v1744_v57, %v1731_v61 }
 0x565   :  { %v1733_v56 = vpop.permute.xlu1 %1732 }
 0x566   :  { %v1748_v12 = vsel %vm1746_vm7, %v1745_v36, %v1733_v56 }
 0x568   :  { %v1739_v2 = vpop.permute.xlu0 %1738 }
 0x569   :  { %v1750_v52 = vsel %vm1749_vm8, %v1747_v63, %v1739_v2 }
 0x56a   :  { %v1754_v21 = vcombine.high %v1750_v52, %v1750_v52  ;;  %v1761_v3 = vrot.slane %v1750_v52, %v14176_v6 }
 0x56c   :  { %v1768_v5 = vrot.slane %v1754_v21, %v14176_v6  ;;  %v1769_v10 = vcombine.high %v1761_v3, %v1761_v3  ;;  %v1777_v13 = vrot.slane %v1761_v3, %v14176_v6 }
 0x56d   :  { %v1741_v8 = vpop.permute.xlu1 %1740 }
 0x56e   :  { %v1770_v59 = vcombine.high %v1768_v5, %v1768_v5  ;;  %v1784_v14 = vrot.slane %v1768_v5, %v14176_v6  ;;  %v1791_v16 = vrot.slane %v1769_v10, %v14176_v6  ;;  %v1751_v24 = vsel %vm1749_vm8, %v1748_v12, %v1741_v8  ;;  %v12994_v12 = vld [vmem:[%s14581_s7] ss:$0 sm:$0xff] }
 0x56f   :  { %v1802_v35 = vcombine.high %v1751_v24, %v1751_v24  ;;  %v1809_v46 = vrot.slane %v1751_v24, %v14176_v6 }
 0x570   :  { %v1798_v49 = vrot.slane %v1770_v59, %v14176_v6  ;;  %v1850_v18 = vcombine.low %v1777_v13, %v1791_v16  ;;  %v12993_v47 = vcombine.high %v1777_v13, %v1791_v16  ;;  %v1800_v15 = vcombine.high %v1784_v14, %v1784_v14 }
 0x571   :  { %v1816_v19 = vrot.slane %v1802_v35, %v14176_v6  ;;  %v1817_v55 = vcombine.high %v1809_v46, %v1809_v46  ;;  %v1825_v58 = vrot.slane %v1809_v46, %v14176_v6 }
 0x572   :  { %v1852_v31 = vcombine.low %v1784_v14, %v1798_v49  ;;  %v1860_v0 = vrot.slane %v1850_v18, %v14176_v6  ;;  %v1867_v43 = vrot.slane %v12993_v47, %v14176_v6  ;;  %v246_v47 = vcombine.high %v14185_v17, %v14185_v17 }
 0x573   :  { %v1818_v38 = vcombine.high %v1816_v19, %v1816_v19  ;;  %v1832_v39 = vrot.slane %v1816_v19, %v14176_v6  ;;  %v1839_v41 = vrot.slane %v1817_v55, %v14176_v6  ;;  %v1847_v9 = vcombine.high %v1825_v58, %v1825_v58 }
 0x574   :  { %v1874_v34 = vrot.slane %v1852_v31, %v14176_v6  ;;  %v1853_v40 = vcombine.low %v1800_v15, %v1825_v58  ;;  %v1882_v61 = vcombine.low %v1860_v0, %v1867_v43  ;;  %v248_v15 = vcombine.high %v14195_v23, %v14195_v23 }
 0x575   :  { %v1846_v7 = vrot.slane %v1818_v38, %v14176_v6  ;;  %v1848_v11 = vcombine.high %v1832_v39, %v1832_v39  ;;  %v1849_v44 = vcombine.high %v1839_v41, %v1839_v41  ;;  %v1899_v45 = vcombine.low %v1839_v41, %v1847_v9 }
 0x576   :  { %v1881_v48 = vrot.slane %v1853_v40, %v14176_v6  ;;  %v1890_v52 = vrot.slane %v1882_v61, %v14176_v6 }
 0x577   :  { %v1900_v53 = vcombine.low %v1849_v44, %v1832_v39  ;;  %v1901_v54 = vcombine.low %v1846_v7, %v1848_v11  ;;  %v1908_v62 = vrot.slane %v1899_v45, %v14176_v6 }
 0x578   :  { %v1883_v60 = vcombine.low %v1874_v34, %v1881_v48 }
 0x579   :  { %v1915_v57 = vrot.slane %v1900_v53, %v14176_v6  ;;  %v1922_v63 = vrot.slane %v1901_v54, %v14176_v6 }
 0x57a   :  { %v1897_v2 = vrot.slane %v1883_v60, %v14176_v6 }
 0x57b   :  { %v1923_v56 = vcombine.low %v1908_v62, %v1915_v57  ;;  %v1937_v3 = vrot.slane %v1922_v63, %v14176_v6 }
 0x57c   :  { %v1898_v36 = vcombine.low %v1890_v52, %v1897_v2 }
 0x57d   :  { %v1930_v21 = vrot.slane %v1923_v56, %v14176_v6 }
 0x57f   :  { %v1938_v5 = vcombine.low %v1930_v21, %v1937_v3 }
 0x581   :  { %v1941_v10 = vpack.c.bf16 %v1938_v5, %v1898_v36 }
 0x583   :  { %13483 = vmatmul.mubr.msk.bf16.vlgmr.msra.gmra.mxu1 %vm426_vm1, %v1941_v10 }
 0x584   :  { %13498 = vmatprep.mubr.msk.bf16.mxu1 %vm14118_vm0, %v17691_v1 }
 0x643   :  { %v2002_v13 = vpop.f32.mrf.mxu1 }
 0x644   :  { %v2003_v8 = vadd.f32 %v12994_v12, %v2002_v13 }
 0x645   :  { %v13484_v59 = vpop.f32.mrf.mxu1 }
 0x646   :  { %v2011_v14 = vcombine.high %v2003_v8, %v2003_v8  ;;  %v2018_v16 = vrot.slane %v2003_v8, %v14176_v6 }
 0x647   :  { %v2005_v24 = vpop.f32.mrf.mxu1 }
 0x648   :  { %v2025_v35 = vrot.slane %v2011_v14, %v14176_v6  ;;  %v2026_v46 = vcombine.high %v2018_v16, %v2018_v16  ;;  %v2034_v49 = vrot.slane %v2018_v16, %v14176_v6  ;;  %v2006_v18 = vadd.f32 %v12994_v12, %v2005_v24 }
 0x649   :  { %v13485_v19 = vpop.f32.mrf.mxu1 }
 0x64a   :  { %v2027_v55 = vcombine.high %v2025_v35, %v2025_v35  ;;  %v2041_v58 = vrot.slane %v2025_v35, %v14176_v6  ;;  %v2048_v31 = vrot.slane %v2026_v46, %v14176_v6  ;;  %v2056_v38 = vcombine.high %v2034_v49, %v2034_v49 }
 0x64b   :  { %v14594_v39 = vadd.f32 %v2034_v49, %v14185_v17  ;;  %v2060_v41 = vcombine.high %v2006_v18, %v2006_v18  ;;  %v2067_v9 = vrot.slane %v2006_v18, %v14176_v6 }
 0x64c   :  { %v2055_v0 = vrot.slane %v2027_v55, %v14176_v6  ;;  %v2057_v43 = vcombine.high %v2041_v58, %v2041_v58  ;;  %v2058_v34 = vcombine.high %v2048_v31, %v2048_v31  ;;  %v14599_v40 = vadd.f32 %v2048_v31, %v14195_v23 }
 0x64d   :  { %v14601_v7 = vadd.f32 %v2056_v38, %v246_v47  ;;  %v14604_v11 = vadd.f32 %v2041_v58, %v14192_v22  ;;  %v2074_v44 = vrot.slane %v2060_v41, %v14176_v6  ;;  %v2075_v45 = vcombine.high %v2067_v9, %v2067_v9 }
 0x64e   :  { %v2059_v17 = vcombine.high %v2055_v0, %v2055_v0  ;;  %v14607_v48 = vadd.f32 %v2058_v34, %v248_v15  ;;  %v14610_v53 = vadd.f32 %v2055_v0, %v14209_v28  ;;  %v14613_v54 = vadd.f32 %v2057_v43, %v14213_v29 }
 0x64f   :  { %v2151_v23 = vcombine.low %v14594_v39, %v14599_v40  ;;  %v2076_v60 = vcombine.high %v2074_v44, %v2074_v44  ;;  %v2083_v61 = vrot.slane %v2067_v9, %v14176_v6  ;;  %v2090_v22 = vrot.slane %v2074_v44, %v14176_v6 }
 0x650   :  { %v2097_v62 = vrot.slane %v2075_v45, %v14176_v6  ;;  %v14621_v57 = vadd.f32 %v2059_v17, %v14189_v20  ;;  %v2152_v28 = vcombine.low %v14601_v7, %v14607_v48  ;;  %v2153_v29 = vcombine.low %v14604_v11, %v14610_v53 }
 0x651   :  { %v2104_v63 = vrot.slane %v2076_v60, %v14176_v6  ;;  %v2105_v2 = vcombine.high %v2083_v61, %v2083_v61  ;;  %v14629_v56 = vadd.f32 %v2083_v61, %v14202_v26  ;;  %v14635_v3 = vadd.f32 %v2090_v22, %v14216_v30 }
 0x652   :  { %v2106_v52 = vcombine.high %v2097_v62, %v2097_v62  ;;  %v14632_v21 = vadd.f32 %v2097_v62, %v14206_v27  ;;  %v2154_v20 = vcombine.low %v14613_v54, %v14621_v57  ;;  %v2161_v5 = vrot.slane %v2151_v23, %v14176_v6 }
 0x653   :  { %v14640_v36 = vadd.f32 %v2105_v2, %v14226_v33  ;;  %v2168_v10 = vrot.slane %v2152_v28, %v14176_v6  ;;  %v14645_v26 = vadd.f32 %v2104_v63, %v14222_v32  ;;  %v2175_v30 = vrot.slane %v2153_v29, %v14176_v6 }
 0x654   :  { %v14648_v12 = vadd.f32 %v2106_v52, %v14199_v25  ;;  %v2200_v27 = vcombine.low %v14629_v56, %v14632_v21  ;;  %v2182_v13 = vrot.slane %v2154_v20, %v14176_v6  ;;  %v14668_v58 = vsub.s32 1, %v14170_v4 }
 0x655   :  { %v2183_v8 = vcombine.low %v2161_v5, %v2168_v10  ;;  %v2202_v33 = vcombine.low %v14635_v3, %v14645_v26  ;;  %v14671_v31 = vsub.s32 2, %v14170_v4  ;;  %v14674_v38 = vsub.s32 3, %v14170_v4 }
 0x656   :  { %v2184_v59 = vcombine.low %v2175_v30, %v2182_v13  ;;  %v2201_v14 = vcombine.low %v14640_v36, %v14648_v12  ;;  %v2209_v32 = vrot.slane %v2200_v27, %v14176_v6  ;;  %v14677_v9 = vsub.s32 4, %v14170_v4 }
 0x657   :  { %v2191_v25 = vrot.slane %v2183_v8, %v14176_v6  ;;  %v2223_v35 = vrot.slane %v2202_v33, %v14176_v6  ;;  %v14680_v0 = vsub.s32 5, %v14170_v4  ;;  %v14683_v43 = vsub.s32 6, %v14170_v4 }
 0x658   :  { %v2198_v16 = vrot.slane %v2184_v59, %v14176_v6  ;;  %v2216_v24 = vrot.slane %v2201_v14, %v14176_v6  ;;  %v14686_v34 = vsub.s32 7, %v14170_v4 }
 0x659   :  { %v2238_v15 = vrot.slane %v2223_v35, %v14176_v6 }
 0x65a   :  { %v2199_v46 = vcombine.low %v2191_v25, %v2198_v16  ;;  %v2224_v49 = vcombine.low %v2209_v32, %v2216_v24 }
 0x65c   :  { %v2242_v18 = vsel %vm426_vm1, %v2199_v46, 0.0  ;;  %v2231_v47 = vrot.slane %v2224_v49, %v14176_v6 }
 0x65d   :  { %2243 = vadd.xlane.f32.xlu0 %v2242_v18 }
 0x65e   :  { %v2239_v19 = vcombine.low %v2231_v47, %v2238_v15 }
 0x660   :  { %v2246_v55 = vsel %vm2245_vm9, %v2239_v19, 0.0 }
 0x661   :  { %2247 = vadd.xlane.f32.xlu1 %v2246_v55 }
 0x6e6   :  { %v2244_v41 = vpop.xlane.xlu0 %2243 }
 0x6e7   :  { %v2250_v44 = vmul.f32 0.03125, %v2244_v41 }
 0x6e9   :  { %v2257_v45 = vrot.slane %v2250_v44, %v14408_v42  ;;  %v2261_v17 = vrot.slane %v2250_v44, %v14668_v58  ;;  %v2265_v23 = vrot.slane %v2250_v44, %v14671_v31  ;;  %v2269_v60 = vrot.slane %v2250_v44, %v14674_v38 }
 0x6ea   :  { %v2248_v61 = vpop.xlane.xlu1 %2247  ;;  %v2273_v22 = vrot.slane %v2250_v44, %v14677_v9  ;;  %v2277_v62 = vrot.slane %v2250_v44, %v14680_v0  ;;  %v2281_v28 = vrot.slane %v2250_v44, %v14683_v43  ;;  %v2285_v29 = vrot.slane %v2250_v44, %v14686_v34 }
 0x6eb   :  { %v2251_v4 = vmul.f32 0.03125, %v2248_v61  ;;  %v14697_v63 = vsub.f32 %v14594_v39, %v2257_v45  ;;  %v14700_v2 = vsub.f32 %v14599_v40, %v2261_v17  ;;  %v14703_v52 = vsub.f32 %v14601_v7, %v2265_v23 }
 0x6ec   :  { %v14706_v20 = vsub.f32 %v14607_v48, %v2269_v60  ;;  %v14709_v5 = vsub.f32 %v14604_v11, %v2273_v22  ;;  %v14712_v10 = vsub.f32 %v14610_v53, %v2277_v62  ;;  %v14715_v27 = vsub.f32 %v14613_v54, %v2281_v28 }
 0x6ed   :  { %v14718_v39 = vsub.f32 %v14621_v57, %v2285_v29  ;;  %v2338_v40 = vmul.f32 %v14697_v63, %v14697_v63  ;;  %v2339_v7 = vmul.f32 %v14700_v2, %v14700_v2  ;;  %v2340_v48 = vmul.f32 %v14703_v52, %v14703_v52 }
 0x6ee   :  { %v2341_v11 = vmul.f32 %v14706_v20, %v14706_v20  ;;  %v2342_v53 = vmul.f32 %v14709_v5, %v14709_v5  ;;  %v2343_v54 = vmul.f32 %v14712_v10, %v14712_v10  ;;  %v2344_v57 = vmul.f32 %v14715_v27, %v14715_v27 }
 0x6ef   :  { %v2345_v30 = vmul.f32 %v14718_v39, %v14718_v39  ;;  %v2366_v13 = vcombine.low %v2338_v40, %v2339_v7  ;;  %v2289_v8 = vrot.slane %v2251_v4, %v14408_v42  ;;  %v2293_v33 = vrot.slane %v2251_v4, %v14668_v58 }
 0x6f0   :  { %v2367_v59 = vcombine.low %v2340_v48, %v2341_v11  ;;  %v2368_v14 = vcombine.low %v2342_v53, %v2343_v54  ;;  %v2297_v32 = vrot.slane %v2251_v4, %v14671_v31  ;;  %v2301_v25 = vrot.slane %v2251_v4, %v14674_v38 }
 0x6f1   :  { %v2369_v16 = vcombine.low %v2344_v57, %v2345_v30  ;;  %v2376_v24 = vrot.slane %v2366_v13, %v14176_v6  ;;  %v2305_v35 = vrot.slane %v2251_v4, %v14677_v9  ;;  %v2309_v46 = vrot.slane %v2251_v4, %v14680_v0  ;;  %v13930_v13 = vld [vmem:[%s14788_s11 + $0x8] sm:$0xff]  }
 0x6f2   :  { %v2383_v49 = vrot.slane %v2367_v59, %v14176_v6  ;;  %v2390_v18 = vrot.slane %v2368_v14, %v14176_v6  ;;  %v14746_v47 = vsub.f32 %v14629_v56, %v2289_v8  ;;  %v14749_v15 = vsub.f32 %v14632_v21, %v2293_v33  ;;  %v13931_v8 = vld [vmem:[%s14788_s11] sm:$0xff]   ;;  %13495 = vmatpush3.bf16.msra.mxu1 %v13930_v13  ;;  %v126_v59 = vld [vmem:[%s12937_s21 + $0x8] sm:$0xff] }
 0x6f3   :  { %v2397_v19 = vrot.slane %v2369_v16, %v14176_v6  ;;  %v14753_v55 = vsub.f32 %v14640_v36, %v2297_v32  ;;  %v14756_v41 = vsub.f32 %v14648_v12, %v2301_v25  ;;  %v14759_v44 = vsub.f32 %v14635_v3, %v2305_v35  ;;  %v125_v33 = vld [vmem:[%s12937_s21] sm:$0xff]  ;;  %13496 = vmatprep.subr.bf16.mxu1 %v17691_v1  ;;  %v13932_v14 = vld [vmem:[%s14796_s25 + $0x8] sm:$0xff]   ;;  %s14139_s21 = smov 12  }
 0x6f4   :  { %v2398_v45 = vcombine.low %v2376_v24, %v2383_v49  ;;  %v14762_v17 = vsub.f32 %v14645_v26, %v2309_v46  ;;  %v2346_v56 = vmul.f32 %v14746_v47, %v14746_v47  ;;  %v2347_v21 = vmul.f32 %v14749_v15, %v14749_v15  ;;  %13487 = vmatpush3.bf16.msra.mxu0 %v13932_v14  ;;  %v13933_v25 = vld [vmem:[%s14796_s25] sm:$0xff]   ;;  %s14971_s24 = sld [smem:[%s17690_s0 + %s14139_s21]]  }
 0x6f5   :  { %v2399_v23 = vcombine.low %v2390_v18, %v2397_v19  ;;  %v2348_v36 = vmul.f32 %v14753_v55, %v14753_v55  ;;  %v2349_v12 = vmul.f32 %v14756_v41, %v14756_v41  ;;  %v2350_v3 = vmul.f32 %v14759_v44, %v14759_v44  ;;  %13488 = vmatprep.subr.bf16.mxu0 %v17691_v1  ;;  %v12998_v16 = vld [vmem:[%s14815_s1] ss:$0 sm:$0xff]  ;;  %s15794_s21 = sld [smem:[%s17690_s0 + %s14132_s3]]  }
 0x6f6   :  { %v2406_v60 = vrot.slane %v2398_v45, %v14176_v6  ;;  %v2351_v26 = vmul.f32 %v14762_v17, %v14762_v17  ;;  %v2415_v61 = vcombine.low %v2346_v56, %v2347_v21  ;;  %v14802_v32 = vpack.c.bf16 %v126_v59, %v125_v33  ;;  %13497 = vmatpush3.bf16.msra.mxu1 %v13931_v8  ;;  %v12999_v24 = vld [vmem:[%s14820_s9] ss:$0 sm:$0xff] }
 0x6f7   :  { %v2413_v22 = vrot.slane %v2399_v23, %v14176_v6  ;;  %v2416_v62 = vcombine.low %v2348_v36, %v2349_v12  ;;  %13508 = vmatprep.subr.bf16.mxu1 %v17691_v1  ;;  %v2560_v49 = vcombine.high %v12998_v16, %v12998_v16  ;;  %v2636_v18 = vcombine.high %v12999_v24, %v12999_v24 }
 0x6f8   :  { %v2417_v28 = vcombine.low %v2350_v3, %v2351_v26  ;;  %v2424_v29 = vrot.slane %v2415_v61, %v14176_v6  ;;  %17704 = vst [vmem:[#allocation2_spill] sm:$0xff] %v14802_v32  ;;  %13489 = vmatpush3.bf16.msra.mxu0 %v13933_v25  ;;  %v2567_v45 = vrot.slane %v12998_v16, %v14176_v6 }
 0x6f9   :  { %v2414_v4 = vcombine.low %v2406_v60, %v2413_v22  ;;  %v2431_v40 = vrot.slane %v2416_v62, %v14176_v6  ;;  %13499 = vmatmul.mubr.msk.bf16.vlgmr.msra.gmra.mxu1 %vm426_vm1, %v14802_v32  ;;  %13502 = vmatprep.subr.bf16.mxu0 %v17691_v1  ;;  %v2574_v21 = vrot.slane %v2560_v49, %v14176_v6 }
 0x6fa   :  { %v2438_v7 = vrot.slane %v2417_v28, %v14176_v6  ;;  %13510 = vmatprep.mubr.msk.bf16.mxu1 %vm14118_vm0, %v17691_v1  ;;  %v2643_v23 = vrot.slane %v12999_v24, %v14176_v6  ;;  %v2650_v36 = vrot.slane %v2636_v18, %v14176_v6  ;;  %v2575_v60 = vcombine.high %v2567_v45, %v2567_v45 }
 0x6fb   :  { %v2457_v48 = vsel %vm426_vm1, %v2414_v4, 0.0  ;;  %v2439_v11 = vcombine.low %v2424_v29, %v2431_v40  ;;  %v2576_v26 = vcombine.high %v2574_v21, %v2574_v21  ;;  %v2583_v62 = vrot.slane %v2567_v45, %v14176_v6 }
 0x6fc   :  { %2458 = vadd.xlane.f32.xlu0 %v2457_v48  ;;  %v2453_v54 = vrot.slane %v2438_v7, %v14176_v6  ;;  %v2651_v61 = vcombine.high %v2643_v23, %v2643_v23  ;;  %v2652_v22 = vcombine.high %v2650_v36, %v2650_v36  ;;  %v2590_v28 = vrot.slane %v2574_v21, %v14176_v6 }
 0x6fd   :  { %v2446_v53 = vrot.slane %v2439_v11, %v14176_v6  ;;  %v2597_v29 = vrot.slane %v2575_v60, %v14176_v6  ;;  %v14832_v4 = vrot.slane %v2643_v23, %v14176_v6  ;;  %v2604_v40 = vrot.slane %v2576_v26, %v14176_v6 }
 0x6fe   :  { %v14836_v7 = vrot.slane %v2650_v36, %v14176_v6  ;;  %v14839_v48 = vrot.slane %v2651_v61, %v14176_v6  ;;  %v14842_v11 = vrot.slane %v2652_v22, %v14176_v6 }
 0x6ff   :  { %v2454_v57 = vcombine.low %v2446_v53, %v2453_v54  ;;  %v2605_v53 = vcombine.high %v2583_v62, %v2583_v62  ;;  %v2606_v54 = vcombine.high %v2590_v28, %v2590_v28  ;;  %v2608_v8 = vcombine.high %v2604_v40, %v2604_v40 }
 0x700   :  { %v2682_v33 = vcombine.high %v14836_v7, %v14836_v7  ;;  %v2683_v59 = vcombine.high %v14839_v48, %v14839_v48  ;;  %v2684_v14 = vcombine.high %v14842_v11, %v14842_v11 }
 0x701   :  { %v2460_v30 = vsel %vm2245_vm9, %v2454_v57, 0.0  ;;  %v2607_v57 = vcombine.high %v2597_v29, %v2597_v29 }
 0x702   :  { %2461 = vadd.xlane.f32.xlu0 %v2460_v30  ;;  %v2681_v30 = vcombine.high %v14832_v4, %v14832_v4 }
 0x785   :  { %v2459_v35 = vpop.xlane.xlu0 %2458 }
 0x786   :  { %v2463_v46 = vmul.f32 0.03125, %v2459_v35 }
 0x788   :  { %v2465_v19 = vadd.f32 1e-05, %v2463_v46 }
 0x78a   :  { %13992 = vrsqrt.f32 %v2465_v19 }
 0x78b   :  { %v2462_v56 = vpop.xlane.xlu0 %2461 }
 0x78c   :  { %v2464_v12 = vmul.f32 0.03125, %v2462_v56 }
 0x78e   :  { %v2466_v3 = vadd.f32 1e-05, %v2464_v12 }
 0x790   :  { %13994 = vrsqrt.f32 %v2466_v3 }
 0x797   :  { %v13993_v13 = vpop.eup %13992 }
 0x798   :  { %v2474_v25 = vrot.slane %v13993_v13, %v14408_v42  ;;  %v2478_v16 = vrot.slane %v13993_v13, %v14668_v58  ;;  %v2482_v24 = vrot.slane %v13993_v13, %v14671_v31  ;;  %v2486_v35 = vrot.slane %v13993_v13, %v14674_v38 }
 0x799   :  { %v2490_v46 = vrot.slane %v13993_v13, %v14677_v9  ;;  %v2494_v49 = vrot.slane %v13993_v13, %v14680_v0  ;;  %v2498_v18 = vrot.slane %v13993_v13, %v14683_v43  ;;  %v2502_v19 = vrot.slane %v13993_v13, %v14686_v34 }
 0x79a   :  { %v2541_v45 = vmul.f32 %v2474_v25, %v14697_v63  ;;  %v2542_v56 = vmul.f32 %v2478_v16, %v14700_v2  ;;  %v2543_v21 = vmul.f32 %v2482_v24, %v14703_v52  ;;  %v2544_v23 = vmul.f32 %v2486_v35, %v14706_v20 }
 0x79b   :  { %v2545_v36 = vmul.f32 %v2490_v46, %v14709_v5  ;;  %v2546_v12 = vmul.f32 %v2494_v49, %v14712_v10  ;;  %v2547_v3 = vmul.f32 %v2498_v18, %v14715_v27  ;;  %v2548_v60 = vmul.f32 %v2502_v19, %v14718_v39 }
 0x79c   :  { %v2617_v26 = vmul.f32 %v2583_v62, %v2541_v45  ;;  %v2618_v61 = vmul.f32 %v2597_v29, %v2542_v56  ;;  %v2619_v22 = vmul.f32 %v2605_v53, %v2543_v21  ;;  %v2620_v13 = vmul.f32 %v2607_v57, %v2544_v23 }
 0x79d   :  { %v13995_v1 = vpop.eup %13994  ;;  %v2621_v63 = vmul.f32 %v2590_v28, %v2545_v36  ;;  %v2622_v25 = vmul.f32 %v2604_v40, %v2546_v12  ;;  %v2623_v2 = vmul.f32 %v2606_v54, %v2547_v3  ;;  %v2624_v16 = vmul.f32 %v2608_v8, %v2548_v60 }
 0x79e   :  { %v2506_v52 = vrot.slane %v13995_v1, %v14408_v42  ;;  %v2510_v20 = vrot.slane %v13995_v1, %v14668_v58  ;;  %v2514_v5 = vrot.slane %v13995_v1, %v14671_v31  ;;  %v2518_v10 = vrot.slane %v13995_v1, %v14674_v38 }
 0x79f   :  { %v2522_v27 = vrot.slane %v13995_v1, %v14677_v9  ;;  %v2526_v39 = vrot.slane %v13995_v1, %v14680_v0  ;;  %v14875_v24 = vadd.f32 %v14832_v4, %v2617_v26  ;;  %v14878_v35 = vadd.f32 %v14839_v48, %v2618_v61 }
 0x7a0   :  { %v2549_v54 = vmul.f32 %v2506_v52, %v14746_v47  ;;  %v2550_v8 = vmul.f32 %v2510_v20, %v14749_v15  ;;  %v2551_v46 = vmul.f32 %v2514_v5, %v14753_v55  ;;  %v2552_v49 = vmul.f32 %v2518_v10, %v14756_v41 }
 0x7a1   :  { %v2553_v18 = vmul.f32 %v2522_v27, %v14759_v44  ;;  %v2554_v19 = vmul.f32 %v2526_v39, %v14762_v17  ;;  %v14886_v45 = vadd.f32 %v2681_v30, %v2619_v22  ;;  %v14888_v1 = vadd.f32 %v2683_v59, %v2620_v13 }
 0x7a2   :  { %v2625_v56 = vmul.f32 %v2583_v62, %v2549_v54  ;;  %v2626_v21 = vmul.f32 %v2597_v29, %v2550_v8  ;;  %v2627_v23 = vmul.f32 %v2605_v53, %v2551_v46  ;;  %v2628_v36 = vmul.f32 %v2607_v57, %v2552_v49  ;;  %v13005_v54 = vld [vmem:[%s14947_s20] ss:$0 sm:$0xff] }
 0x7a3   :  { %v2629_v12 = vmul.f32 %v2590_v28, %v2553_v18  ;;  %v2630_v47 = vmul.f32 %v2604_v40, %v2554_v19  ;;  %v14891_v15 = vadd.f32 %v14836_v7, %v2621_v63  ;;  %v14894_v55 = vadd.f32 %v14842_v11, %v2622_v25 }
 0x7a4   :  { %v14896_v41 = vadd.f32 %v2682_v33, %v2623_v2  ;;  %v14898_v44 = vadd.f32 %v2684_v14, %v2624_v16  ;;  %v14901_v17 = vadd.f32 %v14832_v4, %v2625_v56  ;;  %v14904_v62 = vadd.f32 %v14839_v48, %v2626_v21 }
 0x7a5   :  { %v14906_v29 = vadd.f32 %v2681_v30, %v2627_v23  ;;  %v14908_v28 = vadd.f32 %v2683_v59, %v2628_v36  ;;  %v14911_v40 = vadd.f32 %v14836_v7, %v2629_v12  ;;  %v14914_v53 = vadd.f32 %v14842_v11, %v2630_v47 }
 0x7a6   :  { %v2721_v57 = vcombine.low %v14875_v24, %v14878_v35  ;;  %v2722_v4 = vcombine.low %v14886_v45, %v14888_v1  ;;  %v2723_v48 = vcombine.low %v14891_v15, %v14894_v55  ;;  %v2724_v30 = vcombine.low %v14896_v41, %v14898_v44 }
 0x7a7   :  { %v2770_v33 = vcombine.low %v14901_v17, %v14904_v62  ;;  %v2771_v7 = vcombine.low %v14906_v29, %v14908_v28  ;;  %v2772_v11 = vcombine.low %v14911_v40, %v14914_v53  ;;  %v17705_v39 = vmov 0.0  }
 0x7a8   :  { %v2731_v59 = vrot.slane %v2721_v57, %v14176_v6  ;;  %v2738_v14 = vrot.slane %v2722_v4, %v14176_v6  ;;  %v2745_v3 = vrot.slane %v2723_v48, %v14176_v6  ;;  %v2752_v60 = vrot.slane %v2724_v30, %v14176_v6  ;;  %v13000_v57 = vld [vmem:[%s14971_s24] ss:$0 sm:$0xff] }
 0x7a9   :  { %v2779_v26 = vrot.slane %v2770_v33, %v14176_v6  ;;  %v2786_v61 = vrot.slane %v2771_v7, %v14176_v6  ;;  %v2793_v22 = vrot.slane %v2772_v11, %v14176_v6 }
 0x7aa   :  { %v2753_v13 = vcombine.low %v2731_v59, %v2738_v14  ;;  %v2754_v63 = vcombine.low %v2745_v3, %v2752_v60 }
 0x7ab   :  { %v2794_v25 = vcombine.low %v2779_v26, %v2786_v61  ;;  %v2808_v20 = vrot.slane %v2793_v22, %v14176_v6 }
 0x7ac   :  { %v2761_v2 = vrot.slane %v2753_v13, %v14176_v6  ;;  %v2768_v16 = vrot.slane %v2754_v63, %v14176_v6 }
 0x7ad   :  { %v2801_v52 = vrot.slane %v2794_v25, %v14176_v6 }
 0x7ae   :  { %v2769_v5 = vcombine.low %v2761_v2, %v2768_v16 }
 0x7af   :  { %v2809_v10 = vcombine.low %v2801_v52, %v2808_v20 }
 0x7b1   :  { %v2812_v27 = vpack.c.bf16 %v2809_v10, %v2769_v5 }
 0x7b3   :  { %13491 = vmatmul.mubr.msk.bf16.vlgmr.msra.gmra.mxu0 %vm426_vm1, %v2812_v27 }
 0x7b4   :  { %13504 = vmatprep.mubr.msk.bf16.mxu0 %vm14118_vm0, %v17705_v39 }
 0x7b9   :  { %v3004_v8 = vpop.f32.mrf.mxu1 }
 0x7ba   :  { %v3005_v46 = vadd.f32 %v13005_v54, %v3004_v8 }
 0x7bb   :  { %v13500_v49 = vpop.f32.mrf.mxu1 }
 0x7bc   :  { %v14950_v18 = vpack.c.bf16 %v3005_v46, %v3005_v46 }
 0x7bd   :  { %v3007_v19 = vpop.f32.mrf.mxu1 }
 0x7be   :  { %v3008_v56 = vadd.f32 %v13005_v54, %v3007_v19  ;;  %3115 = vrot.lane.b32.xlu0 %v14950_v18, %s14122_s15  ;;  %v3155_v36 = vsel %vm659_vm2, %v14950_v18, 0 }
 0x7bf   :  { %v13501_v21 = vpop.f32.mrf.mxu1  ;;  %13503 = vmatpush3.bf16.xpose.msra.mxu0 %v3155_v36 }
 0x7c0   :  { %v14954_v23 = vpack.c.bf16 %v3008_v56, %v3008_v56  ;;  %13514 = vmatprep.subr.bf16.mxu0 %v17705_v39 }
 0x7c2   :  { %3117 = vrot.lane.b32.xlu1 %v14954_v23, %s14122_s15  ;;  %3119 = vrot.lane.b32.xlu0 %v14950_v18, %s14121_s14  ;;  %v3225_v12 = vsel %vm659_vm2, %v14954_v23, 0 }
 0x7c3   :  { %13509 = vmatpush3.bf16.xpose.msra.mxu1 %v3225_v12 }
 0x7c4   :  { %13520 = vmatprep.subr.bf16.mxu1 %v17705_v39 }
 0x7c6   :  { %3121 = vrot.lane.b32.xlu1 %v14954_v23, %s14121_s14 }
 0x873   :  { %v2873_v47 = vpop.f32.mrf.mxu0 }
 0x874   :  { %v2874_v30 = vadd.f32 %v13000_v57, %v2873_v47 }
 0x875   :  { %v13492_v4 = vpop.f32.mrf.mxu0 }
 0x877   :  { %v2876_v48 = vpop.f32.mrf.mxu0 }
 0x878   :  { %v2877_v33 = vadd.f32 %v13000_v57, %v2876_v48  ;;  %v14990_v48 = vpop.permute.xlu0 %3115 }
 0x879   :  { %v13493_v7 = vpop.f32.mrf.mxu0 }
 0x87a   :  { %v2880_v11 = vpack.c.bf16 %v2877_v33, %v2874_v30  ;;  %v13004_v59 = vpack.c.bf16 %v2877_v33, %v2877_v33  ;;  %v3299_v7 = vsel %vm659_vm2, %v14990_v48, 0 }
 0x87c   :  { %v2889_v14 = vrot.slane %v2880_v11, %v14176_v6  ;;  %v2896_v3 = vrot.slane %v13004_v59, %v14176_v6  ;;  %v14999_v59 = vpop.permute.xlu1 %3117 }
 0x87e   :  { %v2897_v60 = vcombine.high %v2889_v14, %v2889_v14  ;;  %v2898_v26 = vcombine.high %v2896_v3, %v2896_v3  ;;  %v2905_v61 = vrot.slane %v2889_v14, %v14176_v6  ;;  %v2912_v22 = vrot.slane %v2896_v3, %v14176_v6  ;;  %v15032_v3 = vpop.permute.xlu0 %3119 }
 0x87f   :  { %v3373_v14 = vsel %vm659_vm2, %v14999_v59, 0 }
 0x880   :  { %v2919_v13 = vrot.slane %v2897_v60, %v14176_v6  ;;  %v2926_v63 = vrot.slane %v2898_v26, %v14176_v6  ;;  %3055 = vrot.lane.b32.xlu0 %v2905_v61, %s14121_s14  ;;  %3025 = vrot.lane.b32.xlu1 %v2905_v61, %s14122_s15  ;;  %v2928_v25 = vcombine.high %v2912_v22, %v2912_v22  ;;  %v2939_v16 = vunpack.i.h.s16 %v2912_v22  ;;  %v15034_v60 = vpop.permute.xlu1 %3121 }
 0x881   :  { %v2927_v20 = vcombine.high %v2905_v61, %v2905_v61 }
 0x882   :  { %v2929_v2 = vcombine.high %v2919_v13, %v2919_v13  ;;  %v2941_v52 = vunpack.i.h.s16 %v2926_v63  ;;  %v3127_v5 = vcombine.low %v2905_v61, %v2919_v13  ;;  %v2943_v54 = vunpack.i.h.s16 %v2928_v25 }
 0x883   :  { %v13012_v49 = vpack.i.b16 %v2926_v63, %v2939_v16 }
 0x884   :  { %v2936_v10 = vunpack.i.l.s16 %v2929_v2  ;;  %v2937_v27 = vunpack.i.h.s16 %v2929_v2  ;;  %3085 = vrot.lane.b32.xlu0 %v2905_v61, %s14123_s16  ;;  %3027 = vrot.lane.b32.xlu1 %v2919_v13, %s14122_s15  ;;  %v13013_v8 = vpack.i.b16 %v2928_v25, %v2941_v52  ;;  %v3135_v21 = vrot.slane %v3127_v5, %v14176_v6 }
 0x886   :  { %v13011_v46 = vpack.i.b16 %v2912_v22, %v2937_v27  ;;  %v3128_v19 = vcombine.low %v2927_v20, %v2936_v10  ;;  %v3198_v56 = vcombine.low %v13013_v8, %v2943_v54 }
 0x888   :  { %3029 = vrot.lane.b32.xlu0 %v2927_v20, %s14122_s15  ;;  %3057 = vrot.lane.b32.xlu1 %v2919_v13, %s14121_s14  ;;  %v3142_v36 = vrot.slane %v3128_v19, %v14176_v6  ;;  %v3197_v12 = vcombine.low %v13011_v46, %v13012_v49  ;;  %v3212_v4 = vrot.slane %v3198_v56, %v14176_v6 }
 0x88a   :  { %v3143_v47 = vcombine.low %v3135_v21, %v3142_v36  ;;  %v3205_v57 = vrot.slane %v3197_v12, %v14176_v6 }
 0x88c   :  { %3059 = vrot.lane.b32.xlu0 %v2927_v20, %s14121_s14  ;;  %3087 = vrot.lane.b32.xlu1 %v2919_v13, %s14123_s16  ;;  %v3150_v30 = vrot.slane %v3143_v47, %v14176_v6  ;;  %v3213_v33 = vcombine.low %v3205_v57, %v3212_v4 }
 0x88e   :  { %13505 = vmatmul.mubr.msk.bf16.vlgmr.msra.gmra.mxu0 %vm659_vm2, %v3150_v30  ;;  %v3220_v11 = vrot.slane %v3213_v33, %v14176_v6 }
 0x88f   :  { %13515 = vmatpush3.bf16.xpose.msra.mxu0 %v3299_v7  ;;  %13516 = vmatprep.mubr.msk.bf16.mxu0 %vm14118_vm0, %v17705_v39 }
 0x890   :  { %3089 = vrot.lane.b32.xlu0 %v2927_v20, %s14123_s16  ;;  %3069 = vrot.lane.b32.xlu1 %v2943_v54, %s14121_s14 }
 0x891   :  { %13511 = vmatmul.mubr.msk.bf16.vlgmr.msra.gmra.mxu1 %vm659_vm2, %v3220_v11  ;;  %13526 = vmatprep.subr.bf16.mxu0 %v17705_v39 }
 0x892   :  { %13521 = vmatpush3.bf16.xpose.msra.mxu1 %v3373_v14  ;;  %13522 = vmatprep.mubr.msk.bf16.mxu1 %vm14118_vm0, %v17705_v39  ;;  %v3447_v14 = vsel %vm659_vm2, %v15032_v3, 0 }
 0x893   :  { %13532 = vmatprep.subr.bf16.mxu1 %v17705_v39 }
 0x894   :  { %3039 = vrot.lane.b32.xlu0 %v2943_v54, %s14122_s15  ;;  %3099 = vrot.lane.b32.xlu1 %v2943_v54, %s14123_s16 }
 0x898   :  { %3035 = vrot.lane.b32.xlu0 %v13012_v49, %s14122_s15  ;;  %3031 = vrot.lane.b32.xlu1 %v2936_v10, %s14122_s15 }
 0x89c   :  { %3065 = vrot.lane.b32.xlu0 %v13012_v49, %s14121_s14  ;;  %3037 = vrot.lane.b32.xlu1 %v13013_v8, %s14122_s15 }
 0x8a0   :  { %3061 = vrot.lane.b32.xlu0 %v2936_v10, %s14121_s14  ;;  %3067 = vrot.lane.b32.xlu1 %v13013_v8, %s14121_s14 }
 0x8a4   :  { %3095 = vrot.lane.b32.xlu0 %v13012_v49, %s14123_s16  ;;  %3033 = vrot.lane.b32.xlu1 %v13011_v46, %s14122_s15 }
 0x8a8   :  { %3091 = vrot.lane.b32.xlu0 %v2936_v10, %s14123_s16  ;;  %3097 = vrot.lane.b32.xlu1 %v13013_v8, %s14123_s16 }
 0x8ac   :  { %3123 = vrot.lane.b32.xlu0 %v14950_v18, %s14123_s16  ;;  %3063 = vrot.lane.b32.xlu1 %v13011_v46, %s14121_s14 }
 0x8b0   :  { %3093 = vrot.lane.b32.xlu1 %v13011_v46, %s14123_s16 }
 0x8b4   :  { %3125 = vrot.lane.b32.xlu1 %v14954_v23, %s14123_s16 }
 0x8b8   :  { %3808 = vrot.lane.b32.xlu1 %v14950_v18, %s14124_s17 }
 0x8f2   :  { %v3056_v26 = vpop.permute.xlu0 %3055  ;;  %v3026_v61 = vpop.permute.xlu1 %3025 }
 0x8f6   :  { %v3086_v22 = vpop.permute.xlu0 %3085  ;;  %v3028_v13 = vpop.permute.xlu1 %3027 }
 0x8f7   :  { %v3271_v18 = vcombine.low %v3026_v61, %v3028_v13 }
 0x8f9   :  { %v3279_v56 = vrot.slane %v3271_v18, %v14176_v6 }
 0x8fa   :  { %v3030_v63 = vpop.permute.xlu0 %3029  ;;  %v3058_v25 = vpop.permute.xlu1 %3057 }
 0x8fb   :  { %v3419_v57 = vcombine.low %v3056_v26, %v3058_v25 }
 0x8fe   :  { %v3060_v2 = vpop.permute.xlu0 %3059  ;;  %v3088_v16 = vpop.permute.xlu1 %3087 }
 0x8ff   :  { %v3567_v18 = vcombine.low %v3086_v22, %v3088_v16 }
 0x901   :  { %v3575_v22 = vrot.slane %v3567_v18, %v14176_v6 }
 0x902   :  { %v3090_v52 = vpop.permute.xlu0 %3089  ;;  %v3070_v20 = vpop.permute.xlu1 %3069 }
 0x906   :  { %v3040_v5 = vpop.permute.xlu0 %3039  ;;  %v15036_v10 = vpop.permute.xlu1 %3099 }
 0x907   :  { %v3054_v4 = vunpack.i.l.s16 %v3040_v5 }
 0x90a   :  { %v3036_v27 = vpop.permute.xlu0 %3035  ;;  %v3032_v54 = vpop.permute.xlu1 %3031 }
 0x90b   :  { %v3047_v8 = vunpack.i.l.s16 %v3032_v54 }
 0x90d   :  { %v3272_v46 = vcombine.low %v3030_v63, %v3047_v8  ;;  %v3427_v63 = vrot.slane %v3419_v57, %v14176_v6 }
 0x90e   :  { %v3066_v49 = vpop.permute.xlu0 %3065  ;;  %v3038_v19 = vpop.permute.xlu1 %3037 }
 0x90f   :  { %v3286_v21 = vrot.slane %v3272_v46, %v14176_v6  ;;  %v3346_v7 = vcombine.low %v3038_v19, %v3054_v4  ;;  %v3084_v19 = vunpack.i.l.s16 %v3070_v20 }
 0x911   :  { %v3287_v36 = vcombine.low %v3279_v56, %v3286_v21 }
 0x912   :  { %v3062_v12 = vpop.permute.xlu0 %3061  ;;  %v3068_v47 = vpop.permute.xlu1 %3067 }
 0x913   :  { %v3294_v30 = vrot.slane %v3287_v36, %v14176_v6  ;;  %v3077_v33 = vunpack.i.l.s16 %v3062_v12  ;;  %v3494_v12 = vcombine.low %v3068_v47, %v3084_v19  ;;  %v3114_v47 = vunpack.i.l.s16 %v15036_v10 }
 0x915   :  { %v3420_v11 = vcombine.low %v3060_v2, %v3077_v33  ;;  %13517 = vmatmul.mubr.msk.bf16.vlgmr.msra.gmra.mxu0 %vm659_vm2, %v3294_v30  ;;  %v3360_v2 = vrot.slane %v3346_v7, %v14176_v6  ;;  %v3521_v33 = vsel %vm659_vm2, %v15034_v60, 0  ;;  %v3508_v7 = vrot.slane %v3494_v12, %v14176_v6 }
 0x916   :  { %13527 = vmatpush3.bf16.xpose.msra.mxu0 %v3447_v14  ;;  %v3096_v61 = vpop.permute.xlu0 %3095  ;;  %v3034_v13 = vpop.permute.xlu1 %3033  ;;  %13528 = vmatprep.mubr.msk.bf16.mxu0 %vm14118_vm0, %v17705_v39 }
 0x917   :  { %v3434_v26 = vrot.slane %v3420_v11, %v14176_v6  ;;  %v3345_v25 = vcombine.low %v3034_v13, %v3036_v27  ;;  %13538 = vmatprep.subr.bf16.mxu0 %v17705_v39 }
 0x919   :  { %v3435_v5 = vcombine.low %v3427_v63, %v3434_v26  ;;  %v3353_v54 = vrot.slane %v3345_v25, %v14176_v6 }
 0x91a   :  { %v3092_v8 = vpop.permute.xlu0 %3091  ;;  %v3098_v46 = vpop.permute.xlu1 %3097 }
 0x91b   :  { %v3442_v56 = vrot.slane %v3435_v5, %v14176_v6  ;;  %v3361_v21 = vcombine.low %v3353_v54, %v3360_v2  ;;  %v3107_v36 = vunpack.i.l.s16 %v3092_v8  ;;  %v3642_v13 = vcombine.low %v3098_v46, %v3114_v47 }
 0x91d   :  { %v3368_v57 = vrot.slane %v3361_v21, %v14176_v6  ;;  %v3568_v4 = vcombine.low %v3090_v52, %v3107_v36  ;;  %13529 = vmatmul.mubr.msk.bf16.vlgmr.msra.gmra.mxu0 %vm659_vm2, %v3442_v56  ;;  %v3656_v54 = vrot.slane %v3642_v13, %v14176_v6  ;;  %v12967_v56 = vld.sshfl [vmem:[%s12940_s4] sm:$0x11 pattern:$0x75316420]  ;;  %s14143_s4 = smov 21  }
 0x91e   :  { %v15054_v27 = vpop.permute.xlu0 %3123  ;;  %v3064_v30 = vpop.permute.xlu1 %3063  ;;  %13540 = vmatprep.mubr.msk.bf16.mxu0 %vm14118_vm0, %v17705_v39  ;;  %v173_v21 = vcombine.high %v12967_v56, %v12967_v56  ;;  %v180_v36 = vrot.slane %v12967_v56, %v14176_v6  ;;  %s15462_s10 = sld [smem:[%s17690_s0 + %s14143_s4]]  }
 0x91f   :  { %v3582_v16 = vrot.slane %v3568_v4, %v14176_v6  ;;  %v3493_v20 = vcombine.low %v3064_v30, %v3066_v49  ;;  %13523 = vmatmul.mubr.msk.bf16.vlgmr.msra.gmra.mxu1 %vm659_vm2, %v3368_v57  ;;  %v3595_v52 = vsel %vm659_vm2, %v15054_v27, 0  ;;  %s15788_s4 = sld [smem:[%s17690_s0 + %s14148_s29]]   ;;  %s17710_s29 = smov 16  }
 0x920   :  { %13533 = vmatpush3.bf16.xpose.msra.mxu1 %v3521_v33  ;;  %13539 = vmatpush3.bf16.xpose.msra.mxu0 %v3595_v52  ;;  %v187_v12 = vrot.slane %v173_v21, %v14176_v6  ;;  %v15099_v57 = vrot.slane %v180_v36, %v14408_v42 }
 0x921   :  { %v3583_v11 = vcombine.low %v3575_v22, %v3582_v16  ;;  %v3501_v14 = vrot.slane %v3493_v20, %v14176_v6  ;;  %13534 = vmatprep.mubr.msk.bf16.mxu1 %vm14118_vm0, %v17705_v39  ;;  %13544 = vmatprep.subr.bf16.mxu1 %v17705_v39 }
 0x922   :  { %v3094_v49 = vpop.permute.xlu1 %3093  ;;  %13550 = vmatprep.subr.bf16.mxu0 %v17705_v39  ;;  %17706 = vst [vmem:[#allocation3_spill] sm:$0xff] %v15099_v57  ;;  %v15102_v30 = vrot.slane %v187_v12, %v14408_v42 }
 0x923   :  { %v3509_v63 = vcombine.low %v3501_v14, %v3508_v7  ;;  %v3641_v26 = vcombine.low %v3094_v49, %v3096_v61  ;;  %v3590_v25 = vrot.slane %v3583_v11, %v14176_v6 }
 0x924   :  { %17707 = vst [vmem:[#allocation4_spill] sm:$0xff] %v15102_v30 }
 0x925   :  { %v3516_v10 = vrot.slane %v3509_v63, %v14176_v6  ;;  %v3649_v2 = vrot.slane %v3641_v26, %v14176_v6 }
 0x926   :  { %v15075_v5 = vpop.permute.xlu1 %3125 }
 0x927   :  { %13535 = vmatmul.mubr.msk.bf16.vlgmr.msra.gmra.mxu1 %vm659_vm2, %v3516_v10  ;;  %13541 = vmatmul.mubr.msk.bf16.vlgmr.msra.gmra.mxu0 %vm659_vm2, %v3590_v25  ;;  %v3669_v18 = vsel %vm659_vm2, %v15075_v5, 0  ;;  %v3657_v61 = vcombine.low %v3649_v2, %v3656_v54 }
 0x928   :  { %13545 = vmatpush3.bf16.xpose.msra.mxu1 %v3669_v18  ;;  %13546 = vmatprep.mubr.msk.bf16.mxu1 %vm14118_vm0, %v17705_v39 }
 0x929   :  { %13556 = vmatprep.subr.bf16.mxu1 %v17705_v39  ;;  %13552 = vmatprep.mubr.msk.bf16.mxu0 %vm14118_vm0, %v17705_v39  ;;  %v3664_v19 = vrot.slane %v3657_v61, %v14176_v6 }
 0x92a   :  { %v3809_v8 = vpop.permute.xlu1 %3808 }
 0x92b   :  { %v3814_v46 = vsel %vm1338_vm4, %v3809_v8, 0 }
 0x92c   :  { %13551 = vmatpush3.bf16.msra.mxu0 %v3814_v46 }
 0x92d   :  { %13562 = vmatprep.subr.bf16.mxu0 %v17705_v39 }
 0x92f   :  { %13547 = vmatmul.mubr.msk.bf16.vlgmr.msra.gmra.mxu1 %vm659_vm2, %v3664_v19 }
 0x930   :  { %13558 = vmatprep.mubr.msk.bf16.mxu1 %vm14118_vm0, %v17705_v39 }
 0x94e   :  { %v3191_v4 = vpop.f32.mrf.mxu0 }
 0x94f   :  { %v15105_v33 = vadd.f32 %v3191_v4, %v15099_v57 }
 0x950   :  { %v13506_v22 = vpop.f32.mrf.mxu0 }
 0x951   :  { %v3261_v16 = vpop.f32.mrf.mxu1  ;;  %v3712_v20 = vsel %vm3711_vm10, %v15105_v33, -inf }
 0x952   :  { %v3262_v52 = vadd.f32 %v3261_v16, %v15102_v30  ;;  %3713 = vmax.xlane.f32.xlu0 %v3712_v20  ;;  %v3194_v47 = vpop.f32.mrf.mxu0 }
 0x953   :  { %v13512_v7 = vpop.f32.mrf.mxu1 }
 0x954   :  { %v3715_v11 = vsel %vm3711_vm10, %v3262_v52, -inf  ;;  %v13507_v14 = vpop.f32.mrf.mxu0 }
 0x955   :  { %v3264_v49 = vpop.f32.mrf.mxu1  ;;  %3716 = vmax.xlane.f32.xlu1 %v3715_v11 }
 0x957   :  { %v13513_v13 = vpop.f32.mrf.mxu1 }
 0x9d5   :  { %v3335_v63 = vpop.f32.mrf.mxu0 }
 0x9d6   :  { %v3336_v26 = vadd.f32 %v3335_v63, %v15099_v57 }
 0x9d7   :  { %v13518_v25 = vpop.f32.mrf.mxu0 }
 0x9d8   :  { %v3718_v10 = vsel %vm3711_vm10, %v3336_v26, -inf }
 0x9d9   :  { %3719 = vmax.xlane.f32.xlu0 %v3718_v10  ;;  %v3338_v2 = vpop.f32.mrf.mxu0 }
 0x9db   :  { %v13519_v54 = vpop.f32.mrf.mxu0 }
 0x9dd   :  { %v3483_v18 = vpop.f32.mrf.mxu0 }
 0x9de   :  { %v15114_v61 = vadd.f32 %v3483_v18, %v15099_v57 }
 0x9df   :  { %v3409_v8 = vpop.f32.mrf.mxu1  ;;  %v13530_v46 = vpop.f32.mrf.mxu0 }
 0x9e0   :  { %v3410_v19 = vadd.f32 %v3409_v8, %v15102_v30  ;;  %v3724_v56 = vsel %vm3711_vm10, %v15114_v61, -inf }
 0x9e1   :  { %v13524_v21 = vpop.f32.mrf.mxu1  ;;  %3725 = vmax.xlane.f32.xlu1 %v3724_v56  ;;  %v3486_v36 = vpop.f32.mrf.mxu0 }
 0x9e2   :  { %v3721_v12 = vsel %vm3711_vm10, %v3410_v19, -inf }
 0x9e3   :  { %v3412_v4 = vpop.f32.mrf.mxu1  ;;  %3722 = vmax.xlane.f32.xlu0 %v3721_v12  ;;  %v13531_v22 = vpop.f32.mrf.mxu0  ;;  %v13024_v12 = vcombine.low %v14990_v48, %v14990_v48 }
 0x9e4   :  { %v13026_v4 = vcombine.low %v14999_v59, %v14999_v59  ;;  %v3714_v22 = vpop.xlane.xlu0 %3713 }
 0x9e5   :  { %v13525_v16 = vpop.f32.mrf.mxu1 }
 0x9e6   :  { %v3736_v16 = vsub.f32 %v15105_v33, %v3714_v22 }
 0x9e7   :  { %v3557_v20 = vpop.f32.mrf.mxu1  ;;  %v3631_v47 = vpop.f32.mrf.mxu0 }
 0x9e8   :  { %v15121_v7 = vadd.f32 %v3557_v20, %v15102_v30  ;;  %v15124_v11 = vadd.f32 %v3631_v47, %v15099_v57  ;;  %v3717_v20 = vpop.xlane.xlu1 %3716  ;;  %v3744_v47 = vmul.f32 1.442695, %v3736_v16 }
 0x9e9   :  { %v13536_v14 = vpop.f32.mrf.mxu1  ;;  %v13542_v49 = vpop.f32.mrf.mxu0 }
 0x9ea   :  { %v3727_v13 = vsel %vm3711_vm10, %v15121_v7, -inf  ;;  %v3730_v63 = vsel %vm3711_vm10, %v15124_v11, -inf  ;;  %v3737_v14 = vsub.f32 %v3262_v52, %v3717_v20  ;;  %13996 = vpow2.f32 %v3744_v47 }
 0x9eb   :  { %v3560_v25 = vpop.f32.mrf.mxu1  ;;  %3728 = vmax.xlane.f32.xlu0 %v3727_v13  ;;  %3731 = vmax.xlane.f32.xlu1 %v3730_v63  ;;  %v3634_v10 = vpop.f32.mrf.mxu0  ;;  %v13028_v20 = vcombine.low %v15032_v3, %v15032_v3 }
 0x9ec   :  { %v3746_v49 = vmul.f32 1.442695, %v3737_v14 }
 0x9ed   :  { %v13537_v2 = vpop.f32.mrf.mxu1  ;;  %v13543_v54 = vpop.f32.mrf.mxu0 }
 0x9ee   :  { %13998 = vpow2.f32 %v3746_v49 }
 0x9ef   :  { %v3705_v18 = vpop.f32.mrf.mxu1 }
 0x9f0   :  { %v3706_v8 = vadd.f32 %v3705_v18, %v15102_v30 }
 0x9f1   :  { %v13548_v46 = vpop.f32.mrf.mxu1 }
 0x9f2   :  { %v3733_v56 = vsel %vm3711_vm10, %v3706_v8, -inf }
 0x9f3   :  { %v3708_v21 = vpop.f32.mrf.mxu1  ;;  %3734 = vmax.xlane.f32.xlu0 %v3733_v56 }
 0x9f5   :  { %v13549_v36 = vpop.f32.mrf.mxu1 }
 0x9f7   :  { %v15141_v48 = vpop.eup %13996 }
 0x9f8   :  { %v3760_v13 = vsel %vm3711_vm10, %v15141_v48, 0.0 }
 0x9fb   :  { %v15145_v59 = vpop.eup %13998 }
 0x9fc   :  { %3906 = vrot.lane.b32.xlu1 %v13024_v12, %s14124_s17  ;;  %v3763_v63 = vsel %vm3711_vm10, %v15145_v59, 0.0 }
 0xa00   :  { %3956 = vrot.lane.b32.xlu1 %v13026_v4, %s14124_s17 }
 0xa09   :  { %3856 = vrot.lane.b32.xlu0 %v14954_v23, %s14124_s17 }
 0xa24   :  { %3761 = vadd.xlane.f32.xlu1 %v3760_v13 }
 0xa28   :  { %3764 = vadd.xlane.f32.xlu0 %v3763_v63 }
 0xa62   :  { %v3720_v23 = vpop.xlane.xlu0 %3719 }
 0xa63   :  { %v3738_v33 = vsub.f32 %v3336_v26, %v3720_v23 }
 0xa65   :  { %v3748_v25 = vmul.f32 1.442695, %v3738_v33 }
 0xa67   :  { %14000 = vpow2.f32 %v3748_v25 }
 0xa6a   :  { %v3726_v4 = vpop.xlane.xlu1 %3725 }
 0xa6b   :  { %v3740_v22 = vsub.f32 %v15114_v61, %v3726_v4 }
 0xa6c   :  { %v3723_v52 = vpop.xlane.xlu0 %3722 }
 0xa6d   :  { %v3739_v10 = vsub.f32 %v3410_v19, %v3723_v52  ;;  %v13030_v19 = vcombine.low %v15034_v60, %v15034_v60  ;;  %v3752_v47 = vmul.f32 1.442695, %v3740_v22 }
 0xa6f   :  { %v3750_v2 = vmul.f32 1.442695, %v3739_v10 }
 0xa71   :  { %14002 = vpow2.f32 %v3750_v2 }
 0xa72   :  { %14004 = vpow2.f32 %v3752_v47 }
 0xa74   :  { %v15149_v54 = vpop.eup %14000  ;;  %v3729_v46 = vpop.xlane.xlu0 %3728 }
 0xa75   :  { %v3766_v18 = vsel %vm3711_vm10, %v15149_v54, 0.0  ;;  %v3732_v16 = vpop.xlane.xlu1 %3731  ;;  %v3741_v13 = vsub.f32 %v15121_v7, %v3729_v46 }
 0xa76   :  { %3767 = vadd.xlane.f32.xlu1 %v3766_v18  ;;  %v3742_v14 = vsub.f32 %v15124_v11, %v3732_v16 }
 0xa77   :  { %v3754_v60 = vmul.f32 1.442695, %v3741_v13 }
 0xa78   :  { %v3756_v49 = vmul.f32 1.442695, %v3742_v14 }
 0xa79   :  { %v3907_v23 = vpop.permute.xlu1 %3906 }
 0xa7a   :  { %14006 = vpow2.f32 %v3756_v49  ;;  %v3912_v4 = vsel %vm1338_vm4, %v3907_v23, 0 }
 0xa7b   :  { %14008 = vpow2.f32 %v3754_v60 }
 0xa7c   :  { %v3735_v56 = vpop.xlane.xlu0 %3734 }
 0xa7d   :  { %v3743_v63 = vsub.f32 %v3706_v8, %v3735_v56  ;;  %v3957_v25 = vpop.permute.xlu1 %3956 }
 0xa7e   :  { %v15153_v21 = vpop.eup %14002 }
 0xa7f   :  { %v3769_v36 = vsel %vm3711_vm10, %v15153_v21, 0.0  ;;  %v3758_v33 = vmul.f32 1.442695, %v3743_v63  ;;  %v15168_v61 = vpop.eup %14004 }
 0xa80   :  { %3770 = vadd.xlane.f32.xlu0 %v3769_v36  ;;  %v3857_v26 = vpop.permute.xlu0 %3856  ;;  %v3772_v3 = vsel %vm3711_vm10, %v15168_v61, 0.0 }
 0xa81   :  { %v3862_v12 = vsel %vm1338_vm4, %v3857_v26, 0  ;;  %14010 = vpow2.f32 %v3758_v33  ;;  %v13034_v26 = vcombine.low %v15075_v5, %v15075_v5  ;;  %v13032_v5 = vcombine.low %v15054_v27, %v15054_v27 }
 0xa82   :  { %13557 = vmatpush3.bf16.msra.mxu1 %v3862_v12 }
 0xa83   :  { %13568 = vmatprep.subr.bf16.mxu1 %v17705_v39 }
 0xa87   :  { %4056 = vrot.lane.b32.xlu1 %v13030_v19, %s14124_s17  ;;  %v15172_v11 = vpop.eup %14006 }
 0xa88   :  { %v3778_v7 = vsel %vm3711_vm10, %v15172_v11, 0.0  ;;  %v15176_v8 = vpop.eup %14008 }
 0xa89   :  { %v3775_v2 = vsel %vm3711_vm10, %v15176_v8, 0.0 }
 0xa8e   :  { %v15180_v18 = vpop.eup %14010 }
 0xa8f   :  { %v3781_v46 = vsel %vm3711_vm10, %v15180_v18, 0.0 }
 0xa96   :  { %4006 = vrot.lane.b32.xlu0 %v13028_v20, %s14124_s17 }
 0xaab   :  { %3773 = vadd.xlane.f32.xlu1 %v3772_v3 }
 0xaad   :  { %v3762_v52 = vpop.xlane.xlu1 %3761 }
 0xaae   :  { %14012 = vrcp.f32 %v3762_v52 }
 0xaaf   :  { %3779 = vadd.xlane.f32.xlu1 %v3778_v7 }
 0xab1   :  { %v3765_v10 = vpop.xlane.xlu0 %3764 }
 0xab2   :  { %14014 = vrcp.f32 %v3765_v10 }
 0xab5   :  { %3776 = vadd.xlane.f32.xlu0 %v3775_v2 }
 0xab9   :  { %3782 = vadd.xlane.f32.xlu0 %v3781_v46 }
 0xabb   :  { %v14013_v56 = vpop.eup %14012 }
 0xabc   :  { %v3792_v36 = vmul.f32 %v14013_v56, %v15141_v48  ;;  %v3962_v48 = vsel %vm1338_vm4, %v3957_v25, 0 }
 0xabe   :  { %v3800_v12 = vpack.c.bf16 %v3792_v36, %v3792_v36 }
 0xabf   :  { %v14015_v19 = vpop.eup %14014 }
 0xac0   :  { %4156 = vrot.lane.b32.xlu1 %v13034_v26, %s14124_s17  ;;  %13553 = vmatmul.mubr.msk.bf16.vlgmr.msra.gmra.mxu0 %vm659_vm2, %v3800_v12  ;;  %v3793_v22 = vmul.f32 %v14015_v19, %v15145_v59 }
 0xac1   :  { %13563 = vmatpush3.bf16.msra.mxu0 %v3912_v4  ;;  %13564 = vmatprep.mubr.msk.bf16.mxu0 %vm14118_vm0, %v17705_v39 }
 0xac2   :  { %v3801_v16 = vpack.c.bf16 %v3793_v22, %v3793_v22  ;;  %13574 = vmatprep.subr.bf16.mxu0 %v17705_v39 }
 0xac4   :  { %13559 = vmatmul.mubr.msk.bf16.vlgmr.msra.gmra.mxu1 %vm659_vm2, %v3801_v16 }
 0xac5   :  { %13569 = vmatpush3.bf16.msra.mxu1 %v3962_v48  ;;  %13570 = vmatprep.mubr.msk.bf16.mxu1 %vm14118_vm0, %v17705_v39 }
 0xac6   :  { %13580 = vmatprep.subr.bf16.mxu1 %v17705_v39 }
 0xacf   :  { %4106 = vrot.lane.b32.xlu0 %v13032_v5, %s14124_s17 }
 0xaff   :  { %v3768_v59 = vpop.xlane.xlu1 %3767 }
 0xb00   :  { %14016 = vrcp.f32 %v3768_v59 }
 0xb03   :  { %v4057_v23 = vpop.permute.xlu1 %4056 }
 0xb04   :  { %v4062_v25 = vsel %vm1338_vm4, %v4057_v23, 0 }
 0xb09   :  { %v3771_v20 = vpop.xlane.xlu0 %3770 }
 0xb0a   :  { %14018 = vrcp.f32 %v3771_v20 }
 0xb0d   :  { %v14017_v47 = vpop.eup %14016  ;;  %v4007_v49 = vpop.permute.xlu0 %4006 }
 0xb0e   :  { %v3794_v14 = vmul.f32 %v14017_v47, %v15149_v54  ;;  %v4012_v60 = vsel %vm1338_vm4, %v4007_v49, 0 }
 0xb10   :  { %v3802_v13 = vpack.c.bf16 %v3794_v14, %v3794_v14 }
 0xb12   :  { %13565 = vmatmul.mubr.msk.bf16.vlgmr.msra.gmra.mxu0 %vm659_vm2, %v3802_v13 }
 0xb13   :  { %13575 = vmatpush3.bf16.msra.mxu0 %v4012_v60  ;;  %13576 = vmatprep.mubr.msk.bf16.mxu0 %vm14118_vm0, %v17705_v39 }
 0xb14   :  { %13586 = vmatprep.subr.bf16.mxu0 %v17705_v39 }
 0xb17   :  { %v14019_v27 = vpop.eup %14018 }
 0xb18   :  { %v3795_v63 = vmul.f32 %v14019_v27, %v15153_v21 }
 0xb1a   :  { %v3803_v33 = vpack.c.bf16 %v3795_v63, %v3795_v63 }
 0xb1c   :  { %13571 = vmatmul.mubr.msk.bf16.vlgmr.msra.gmra.mxu1 %vm659_vm2, %v3803_v33 }
 0xb1d   :  { %13581 = vmatpush3.bf16.msra.mxu1 %v4062_v25  ;;  %13582 = vmatprep.mubr.msk.bf16.mxu1 %vm14118_vm0, %v17705_v39 }
 0xb1e   :  { %13592 = vmatprep.subr.bf16.mxu1 %v17705_v39 }
 0xb34   :  { %v3774_v54 = vpop.xlane.xlu1 %3773 }
 0xb35   :  { %14020 = vrcp.f32 %v3774_v54 }
 0xb38   :  { %v3780_v3 = vpop.xlane.xlu1 %3779 }
 0xb39   :  { %14022 = vrcp.f32 %v3780_v3 }
 0xb3e   :  { %v3777_v52 = vpop.xlane.xlu0 %3776 }
 0xb3f   :  { %14024 = vrcp.f32 %v3777_v52 }
 0xb42   :  { %v14021_v7 = vpop.eup %14020  ;;  %v3783_v21 = vpop.xlane.xlu0 %3782 }
 0xb43   :  { %14026 = vrcp.f32 %v3783_v21  ;;  %v3796_v10 = vmul.f32 %v14021_v7, %v15168_v61  ;;  %v4157_v61 = vpop.permute.xlu1 %4156 }
 0xb44   :  { %v4162_v48 = vsel %vm1338_vm4, %v4157_v61, 0 }
 0xb45   :  { %v3804_v2 = vpack.c.bf16 %v3796_v10, %v3796_v10 }
 0xb46   :  { %v14023_v46 = vpop.eup %14022  ;;  %v4107_v56 = vpop.permute.xlu0 %4106 }
 0xb47   :  { %v4112_v36 = vsel %vm1338_vm4, %v4107_v56, 0  ;;  %13577 = vmatmul.mubr.msk.bf16.vlgmr.msra.gmra.mxu0 %vm659_vm2, %v3804_v2  ;;  %v3798_v26 = vmul.f32 %v14023_v46, %v15172_v11 }
 0xb48   :  { %13587 = vmatpush3.bf16.msra.mxu0 %v4112_v36  ;;  %13588 = vmatprep.mubr.msk.bf16.mxu0 %vm14118_vm0, %v17705_v39 }
 0xb49   :  { %13598 = vmatprep.subr.bf16.mxu0 %v17705_v39  ;;  %v3806_v19 = vpack.c.bf16 %v3798_v26, %v3798_v26 }
 0xb4c   :  { %v14025_v12 = vpop.eup %14024 }
 0xb4d   :  { %v3797_v4 = vmul.f32 %v14025_v12, %v15176_v8 }
 0xb4f   :  { %13589 = vmatmul.mubr.msk.bf16.vlgmr.msra.gmra.mxu0 %vm659_vm2, %v3806_v19  ;;  %v3805_v22 = vpack.c.bf16 %v3797_v4, %v3797_v4 }
 0xb50   :  { %v14027_v16 = vpop.eup %14026  ;;  %13602 = vmatprep.mubr.msk.bf16.mxu0 %vm14118_vm0, %v17705_v39 }
 0xb51   :  { %13583 = vmatmul.mubr.msk.bf16.vlgmr.msra.gmra.mxu1 %vm659_vm2, %v3805_v22  ;;  %v3799_v11 = vmul.f32 %v14027_v16, %v15180_v18  ;;  %v13934_v16 = vld [vmem:[%s15242_s12 + $0x8] sm:$0xff]  }
 0xb52   :  { %13593 = vmatpush3.bf16.msra.mxu1 %v4162_v48  ;;  %13594 = vmatprep.mubr.msk.bf16.mxu1 %vm14118_vm0, %v17705_v39 }
 0xb53   :  { %13606 = vmatprep.subr.bf16.mxu1 %v17705_v39  ;;  %v3807_v8 = vpack.c.bf16 %v3799_v11, %v3799_v11  ;;  %v13935_v11 = vld [vmem:[%s15242_s12] sm:$0xff]   ;;  %13599 = vmatpush3.bf16.msra.mxu0 %v13934_v16 }
 0xb54   :  { %13600 = vmatprep.subr.bf16.mxu0 %v17705_v39 }
 0xb57   :  { %13601 = vmatpush3.bf16.msra.mxu0 %v13935_v11 }
 0xb58   :  { %13614 = vmatprep.subr.bf16.mxu0 %v17705_v39 }
 0xb59   :  { %13595 = vmatmul.mubr.msk.bf16.vlgmr.msra.gmra.mxu1 %vm659_vm2, %v3807_v8 }
 0xb5a   :  { %13610 = vmatprep.mubr.msk.bf16.mxu1 %vm14118_vm0, %v17705_v39 }
 0xb80   :  { %v3850_v5 = vpop.f32.mrf.mxu0 }
 0xb82   :  { %v13554_v59 = vpop.f32.mrf.mxu0 }
 0xb84   :  { %v3853_v20 = vpop.f32.mrf.mxu0  ;;  %v3898_v47 = vpop.f32.mrf.mxu1 }
 0xb86   :  { %v13555_v14 = vpop.f32.mrf.mxu0  ;;  %v13560_v49 = vpop.f32.mrf.mxu1 }
 0xb88   :  { %v3901_v13 = vpop.f32.mrf.mxu1 }
 0xb8a   :  { %v13561_v60 = vpop.f32.mrf.mxu1 }
 0xbd2   :  { %v3948_v27 = vpop.f32.mrf.mxu0 }
 0xbd3   :  { %4206 = vrot.lane.b32.xlu0 %v3948_v27, %s17695_s27 }
 0xbd4   :  { %v13566_v18 = vpop.f32.mrf.mxu0 }
 0xbd6   :  { %v3951_v63 = vpop.f32.mrf.mxu0 }
 0xbd8   :  { %v13567_v23 = vpop.f32.mrf.mxu0 }
 0xbdc   :  { %v3998_v33 = vpop.f32.mrf.mxu1 }
 0xbdd   :  { %4208 = vrot.lane.b32.xlu1 %v3998_v33, %s17695_s27  ;;  %s14146_s27 = smov 20  }
 0xbde   :  { %v13572_v25 = vpop.f32.mrf.mxu1  ;;  %s15607_s5 = sld [smem:[%s17690_s0 + %s14146_s27]]  }
 0xbe0   :  { %v4001_v54 = vpop.f32.mrf.mxu1 }
 0xbe2   :  { %v13573_v3 = vpop.f32.mrf.mxu1 }
 0xc07   :  { %v4048_v52 = vpop.f32.mrf.mxu0 }
 0xc08   :  { %4214 = vrot.lane.b32.xlu0 %v4048_v52, %s17693_s28 }
 0xc09   :  { %v13578_v7 = vpop.f32.mrf.mxu0 }
 0xc0b   :  { %v4051_v21 = vpop.f32.mrf.mxu0 }
 0xc0d   :  { %v13579_v10 = vpop.f32.mrf.mxu0 }
 0xc0f   :  { %v4148_v2 = vpop.f32.mrf.mxu0 }
 0xc10   :  { %4222 = vrot.lane.b32.xlu0 %v4148_v2, %s14132_s3 }
 0xc11   :  { %v4098_v46 = vpop.f32.mrf.mxu1  ;;  %v13590_v56 = vpop.f32.mrf.mxu0 }
 0xc12   :  { %4216 = vrot.lane.b32.xlu1 %v4098_v46, %s17693_s28 }
 0xc13   :  { %v13584_v36 = vpop.f32.mrf.mxu1  ;;  %v4151_v26 = vpop.f32.mrf.mxu0 }
 0xc15   :  { %v4101_v12 = vpop.f32.mrf.mxu1  ;;  %v13591_v19 = vpop.f32.mrf.mxu0 }
 0xc17   :  { %v13585_v4 = vpop.f32.mrf.mxu1 }
 0xc19   :  { %v4198_v61 = vpop.f32.mrf.mxu1 }
 0xc1a   :  { %4224 = vrot.lane.b32.xlu1 %v4198_v61, %s14132_s3 }
 0xc1b   :  { %v13596_v22 = vpop.f32.mrf.mxu1 }
 0xc1d   :  { %v4201_v48 = vpop.f32.mrf.mxu1 }
 0xc1f   :  { %v13597_v8 = vpop.f32.mrf.mxu1 }
 0xc45   :  { %v4207_v59 = vpop.permute.xlu0 %4206 }
 0xc46   :  { %v4228_v14 = vsel %vm659_vm2, %v3850_v5, %v4207_v59 }
 0xc4f   :  { %v4209_v27 = vpop.permute.xlu1 %4208 }
 0xc50   :  { %v4229_v3 = vsel %vm659_vm2, %v3898_v47, %v4209_v27 }
 0xc7a   :  { %v4215_v20 = vpop.permute.xlu0 %4214 }
 0xc7b   :  { %v4230_v49 = vsel %vm1746_vm7, %v4228_v14, %v4215_v20 }
 0xc82   :  { %v4223_v13 = vpop.permute.xlu0 %4222 }
 0xc83   :  { %v4232_v60 = vsel %vm1749_vm8, %v4230_v49, %v4223_v13 }
 0xc84   :  { %v4236_v18 = vcombine.high %v4232_v60, %v4232_v60  ;;  %v4243_v63 = vrot.slane %v4232_v60, %v14176_v6  ;;  %v4217_v25 = vpop.permute.xlu1 %4216 }
 0xc85   :  { %v4231_v5 = vsel %vm1746_vm7, %v4229_v3, %v4217_v25 }
 0xc86   :  { %v4250_v23 = vrot.slane %v4236_v18, %v14176_v6  ;;  %v4251_v33 = vcombine.high %v4243_v63, %v4243_v63  ;;  %v4259_v21 = vrot.slane %v4243_v63, %v14176_v6 }
 0xc88   :  { %v4252_v54 = vcombine.high %v4250_v23, %v4250_v23  ;;  %v4273_v52 = vrot.slane %v4251_v33, %v14176_v6  ;;  %v4266_v10 = vrot.slane %v4250_v23, %v14176_v6 }
 0xc8a   :  { %v4280_v2 = vrot.slane %v4252_v54, %v14176_v6  ;;  %v4332_v26 = vcombine.low %v4259_v21, %v4273_v52  ;;  %v13036_v12 = vcombine.high %v4259_v21, %v4273_v52  ;;  %v4282_v22 = vcombine.high %v4266_v10, %v4266_v10 }
 0xc8c   :  { %v4225_v7 = vpop.permute.xlu1 %4224  ;;  %v4334_v61 = vcombine.low %v4266_v10, %v4280_v2  ;;  %v4342_v59 = vrot.slane %v4332_v26, %v14176_v6  ;;  %v4349_v20 = vrot.slane %v13036_v12, %v14176_v6  ;;  %v13037_v12 = vld [vmem:[%s15285_s22] ss:$0 sm:$0xff] }
 0xc8d   :  { %v4233_v46 = vsel %vm1749_vm8, %v4231_v5, %v4225_v7 }
 0xc8e   :  { %v4284_v56 = vcombine.high %v4233_v46, %v4233_v46  ;;  %v4291_v36 = vrot.slane %v4233_v46, %v14176_v6  ;;  %v4356_v18 = vrot.slane %v4334_v61, %v14176_v6  ;;  %v4364_v54 = vcombine.low %v4342_v59, %v4349_v20 }
 0xc90   :  { %v4298_v47 = vrot.slane %v4284_v56, %v14176_v6  ;;  %v4299_v19 = vcombine.high %v4291_v36, %v4291_v36  ;;  %v4307_v4 = vrot.slane %v4291_v36, %v14176_v6  ;;  %v4372_v10 = vrot.slane %v4364_v54, %v14176_v6 }
 0xc92   :  { %v4300_v16 = vcombine.high %v4298_v47, %v4298_v47  ;;  %v4314_v48 = vrot.slane %v4298_v47, %v14176_v6  ;;  %v4321_v11 = vrot.slane %v4299_v19, %v14176_v6  ;;  %v4329_v8 = vcombine.high %v4307_v4, %v4307_v4 }
 0xc93   :  { %v4335_v14 = vcombine.low %v4282_v22, %v4307_v4 }
 0xc94   :  { %v4328_v49 = vrot.slane %v4300_v16, %v14176_v6  ;;  %v4330_v13 = vcombine.high %v4314_v48, %v4314_v48  ;;  %v4331_v60 = vcombine.high %v4321_v11, %v4321_v11  ;;  %v4381_v27 = vcombine.low %v4321_v11, %v4329_v8 }
 0xc95   :  { %v4363_v63 = vrot.slane %v4335_v14, %v14176_v6 }
 0xc96   :  { %v4382_v23 = vcombine.low %v4331_v60, %v4314_v48  ;;  %v4383_v33 = vcombine.low %v4328_v49, %v4330_v13  ;;  %v4390_v3 = vrot.slane %v4381_v27, %v14176_v6 }
 0xc97   :  { %v4365_v25 = vcombine.low %v4356_v18, %v4363_v63 }
 0xc98   :  { %v4397_v52 = vrot.slane %v4382_v23, %v14176_v6  ;;  %v4404_v5 = vrot.slane %v4383_v33, %v14176_v6 }
 0xc99   :  { %v4379_v7 = vrot.slane %v4365_v25, %v14176_v6 }
 0xc9a   :  { %v4405_v21 = vcombine.low %v4390_v3, %v4397_v52  ;;  %v4419_v46 = vrot.slane %v4404_v5, %v14176_v6 }
 0xc9b   :  { %v4380_v56 = vcombine.low %v4372_v10, %v4379_v7 }
 0xc9c   :  { %v4412_v2 = vrot.slane %v4405_v21, %v14176_v6 }
 0xc9e   :  { %v4420_v36 = vcombine.low %v4412_v2, %v4419_v46 }
 0xca0   :  { %v4423_v26 = vpack.c.bf16 %v4420_v36, %v4380_v56 }
 0xca2   :  { %13603 = vmatmul.mubr.msk.bf16.vlgmr.msra.gmra.mxu0 %vm426_vm1, %v4423_v26 }
 0xca3   :  { %13622 = vmatprep.mubr.msk.bf16.mxu0 %vm14118_vm0, %v17705_v39 }
 0xd62   :  { %v4484_v47 = vpop.f32.mrf.mxu0 }
 0xd63   :  { %v4485_v19 = vadd.f32 %v13037_v12, %v4484_v47 }
 0xd64   :  { %v13604_v4 = vpop.f32.mrf.mxu0 }
 0xd65   :  { %v4493_v61 = vcombine.high %v4485_v19, %v4485_v19  ;;  %v4500_v22 = vrot.slane %v4485_v19, %v14176_v6 }
 0xd66   :  { %v4487_v16 = vpop.f32.mrf.mxu0 }
 0xd67   :  { %v4507_v48 = vrot.slane %v4493_v61, %v14176_v6  ;;  %v4508_v11 = vcombine.high %v4500_v22, %v4500_v22  ;;  %v4516_v8 = vrot.slane %v4500_v22, %v14176_v6  ;;  %v4488_v59 = vadd.f32 %v13037_v12, %v4487_v16 }
 0xd68   :  { %v13605_v20 = vpop.f32.mrf.mxu0 }
 0xd69   :  { %v4509_v14 = vcombine.high %v4507_v48, %v4507_v48  ;;  %v4523_v49 = vrot.slane %v4507_v48, %v14176_v6  ;;  %v4530_v13 = vrot.slane %v4508_v11, %v14176_v6  ;;  %v4538_v60 = vcombine.high %v4516_v8, %v4516_v8 }
 0xd6a   :  { %v15294_v27 = vadd.f32 %v4516_v8, %v14875_v24  ;;  %v4542_v18 = vcombine.high %v4488_v59, %v4488_v59  ;;  %v4549_v63 = vrot.slane %v4488_v59, %v14176_v6 }
 0xd6b   :  { %v4537_v23 = vrot.slane %v4509_v14, %v14176_v6  ;;  %v4539_v33 = vcombine.high %v4523_v49, %v4523_v49  ;;  %v4540_v25 = vcombine.high %v4530_v13, %v4530_v13  ;;  %v15299_v54 = vadd.f32 %v4530_v13, %v14878_v35 }
 0xd6c   :  { %v15302_v3 = vadd.f32 %v4538_v60, %v14886_v45  ;;  %v15305_v52 = vadd.f32 %v4523_v49, %v14891_v15  ;;  %v4556_v5 = vrot.slane %v4542_v18, %v14176_v6  ;;  %v4557_v24 = vcombine.high %v4549_v63, %v4549_v63 }
 0xd6d   :  { %v4541_v7 = vcombine.high %v4537_v23, %v4537_v23  ;;  %v4606_v21 = vadd.f32 %v4540_v25, %v14888_v1  ;;  %v4608_v10 = vadd.f32 %v4537_v23, %v14894_v55  ;;  %v4609_v2 = vadd.f32 %v4539_v33, %v14896_v41 }
 0xd6e   :  { %v4633_v35 = vcombine.low %v15294_v27, %v15299_v54  ;;  %v4558_v46 = vcombine.high %v4556_v5, %v4556_v5  ;;  %v4565_v45 = vrot.slane %v4549_v63, %v14176_v6  ;;  %v4572_v56 = vrot.slane %v4556_v5, %v14176_v6 }
 0xd6f   :  { %v4610_v15 = vadd.f32 %v4541_v7, %v14898_v44  ;;  %v4634_v36 = vcombine.low %v15302_v3, %v4606_v21  ;;  %v4635_v26 = vcombine.low %v15305_v52, %v4608_v10  ;;  %v4579_v1 = vrot.slane %v4557_v24, %v14176_v6 }
 0xd70   :  { %v4586_v55 = vrot.slane %v4558_v46, %v14176_v6  ;;  %v4587_v12 = vcombine.high %v4565_v45, %v4565_v45  ;;  %v15321_v41 = vadd.f32 %v4565_v45, %v14901_v17  ;;  %v15327_v4 = vadd.f32 %v4572_v56, %v14911_v40 }
 0xd71   :  { %v4588_v47 = vcombine.high %v4579_v1, %v4579_v1  ;;  %v15324_v19 = vadd.f32 %v4579_v1, %v14904_v62  ;;  %v4636_v44 = vcombine.low %v4609_v2, %v4610_v15  ;;  %v4643_v16 = vrot.slane %v4633_v35, %v14176_v6 }
 0xd72   :  { %v15330_v61 = vadd.f32 %v4587_v12, %v14906_v29  ;;  %v15333_v22 = vadd.f32 %v4586_v55, %v14914_v53  ;;  %v4650_v48 = vrot.slane %v4634_v36, %v14176_v6  ;;  %v4657_v40 = vrot.slane %v4635_v26, %v14176_v6 }
 0xd73   :  { %v15338_v17 = vadd.f32 %v4588_v47, %v14908_v28  ;;  %v4682_v62 = vcombine.low %v15321_v41, %v15324_v19  ;;  %v4664_v11 = vrot.slane %v4636_v44, %v14176_v6 }
 0xd74   :  { %v4665_v8 = vcombine.low %v4643_v16, %v4650_v48  ;;  %v4684_v29 = vcombine.low %v15327_v4, %v15333_v22 }
 0xd75   :  { %v4683_v53 = vcombine.low %v15330_v61, %v15338_v17  ;;  %v4666_v59 = vcombine.low %v4657_v40, %v4664_v11  ;;  %v4691_v20 = vrot.slane %v4682_v62, %v14176_v6 }
 0xd76   :  { %v4673_v28 = vrot.slane %v4665_v8, %v14176_v6  ;;  %v4705_v13 = vrot.slane %v4684_v29, %v14176_v6 }
 0xd77   :  { %v4680_v14 = vrot.slane %v4666_v59, %v14176_v6  ;;  %v4698_v49 = vrot.slane %v4683_v53, %v14176_v6 }
 0xd78   :  { %v4720_v33 = vrot.slane %v4705_v13, %v14176_v6 }
 0xd79   :  { %v4681_v60 = vcombine.low %v4673_v28, %v4680_v14  ;;  %v4706_v18 = vcombine.low %v4691_v20, %v4698_v49 }
 0xd7b   :  { %v4724_v63 = vsel %vm426_vm1, %v4681_v60, 0.0  ;;  %v4713_v23 = vrot.slane %v4706_v18, %v14176_v6 }
 0xd7c   :  { %4725 = vadd.xlane.f32.xlu0 %v4724_v63 }
 0xd7d   :  { %v4721_v25 = vcombine.low %v4713_v23, %v4720_v33 }
 0xd7f   :  { %v4727_v5 = vsel %vm2245_vm9, %v4721_v25, 0.0 }
 0xd80   :  { %4728 = vadd.xlane.f32.xlu1 %v4727_v5 }
 0xe05   :  { %v4726_v24 = vpop.xlane.xlu0 %4725 }
 0xe06   :  { %v4730_v7 = vmul.f32 0.03125, %v4726_v24 }
 0xe08   :  { %v4737_v35 = vrot.slane %v4730_v7, %v14408_v42  ;;  %v4741_v46 = vrot.slane %v4730_v7, %v14668_v58  ;;  %v4745_v45 = vrot.slane %v4730_v7, %v14671_v31  ;;  %v4749_v56 = vrot.slane %v4730_v7, %v14674_v38 }
 0xe09   :  { %v4729_v36 = vpop.xlane.xlu1 %4728  ;;  %v4753_v26 = vrot.slane %v4730_v7, %v14677_v9  ;;  %v4757_v1 = vrot.slane %v4730_v7, %v14680_v0  ;;  %v4761_v55 = vrot.slane %v4730_v7, %v14683_v43  ;;  %v4765_v12 = vrot.slane %v4730_v7, %v14686_v34 }
 0xe0a   :  { %v4731_v47 = vmul.f32 0.03125, %v4729_v36  ;;  %v15366_v44 = vsub.f32 %v15294_v27, %v4737_v35  ;;  %v15369_v16 = vsub.f32 %v15299_v54, %v4741_v46  ;;  %v15372_v48 = vsub.f32 %v15302_v3, %v4745_v45 }
 0xe0b   :  { %v15374_v62 = vsub.f32 %v4606_v21, %v4749_v56  ;;  %v15377_v40 = vsub.f32 %v15305_v52, %v4753_v26  ;;  %v15379_v11 = vsub.f32 %v4608_v10, %v4757_v1  ;;  %v15381_v8 = vsub.f32 %v4609_v2, %v4761_v55 }
 0xe0c   :  { %v15383_v29 = vsub.f32 %v4610_v15, %v4765_v12  ;;  %v4818_v27 = vmul.f32 %v15366_v44, %v15366_v44  ;;  %v4819_v54 = vmul.f32 %v15369_v16, %v15369_v16  ;;  %v4820_v3 = vmul.f32 %v15372_v48, %v15372_v48 }
 0xe0d   :  { %v4821_v21 = vmul.f32 %v15374_v62, %v15374_v62  ;;  %v4822_v52 = vmul.f32 %v15377_v40, %v15377_v40  ;;  %v4823_v10 = vmul.f32 %v15379_v11, %v15379_v11  ;;  %v4824_v2 = vmul.f32 %v15381_v8, %v15381_v8 }
 0xe0e   :  { %v4825_v15 = vmul.f32 %v15383_v29, %v15383_v29  ;;  %v4846_v53 = vcombine.low %v4818_v27, %v4819_v54  ;;  %v4769_v59 = vrot.slane %v4731_v47, %v14408_v42  ;;  %v4773_v20 = vrot.slane %v4731_v47, %v14668_v58 }
 0xe0f   :  { %v4847_v28 = vcombine.low %v4820_v3, %v4821_v21  ;;  %v4848_v14 = vcombine.low %v4822_v52, %v4823_v10  ;;  %v4777_v49 = vrot.slane %v4731_v47, %v14671_v31  ;;  %v4781_v13 = vrot.slane %v4731_v47, %v14674_v38 }
 0xe10   :  { %v4849_v60 = vcombine.low %v4824_v2, %v4825_v15  ;;  %v4856_v18 = vrot.slane %v4846_v53, %v14176_v6  ;;  %v4785_v63 = vrot.slane %v4731_v47, %v14677_v9  ;;  %v4789_v23 = vrot.slane %v4731_v47, %v14680_v0 }
 0xe11   :  { %v4863_v33 = vrot.slane %v4847_v28, %v14176_v6  ;;  %v4870_v25 = vrot.slane %v4848_v14, %v14176_v6  ;;  %v15411_v5 = vsub.f32 %v15321_v41, %v4769_v59  ;;  %v15414_v24 = vsub.f32 %v15324_v19, %v4773_v20  ;;  %v13936_v28 = vld [vmem:[%s15453_s30 + $0x8] sm:$0xff]   ;;  %v13937_v14 = vld [vmem:[%s15453_s30] sm:$0xff]  }
 0xe12   :  { %v4877_v7 = vrot.slane %v4849_v60, %v14176_v6  ;;  %v15418_v35 = vsub.f32 %v15330_v61, %v4777_v49  ;;  %v15421_v46 = vsub.f32 %v15338_v17, %v4781_v13  ;;  %v15424_v45 = vsub.f32 %v15327_v4, %v4785_v63  ;;  %13607 = vmatpush3.bf16.msra.mxu1 %v13936_v28  ;;  %v13938_v49 = vld [vmem:[%s15462_s10 + $0x18] sm:$0xff]   ;;  %v13041_v13 = vld [vmem:[%s15469_s26] ss:$0 sm:$0xff] }
 0xe13   :  { %v4878_v56 = vcombine.low %v4856_v18, %v4863_v33  ;;  %v15427_v36 = vsub.f32 %v15333_v22, %v4789_v23  ;;  %v4826_v41 = vmul.f32 %v15411_v5, %v15411_v5  ;;  %v4827_v19 = vmul.f32 %v15414_v24, %v15414_v24  ;;  %13608 = vmatprep.subr.bf16.mxu1 %v17705_v39  ;;  %v13042_v60 = vld [vmem:[%s15474_s18] ss:$0 sm:$0xff] }
 0xe14   :  { %v4879_v26 = vcombine.low %v4870_v25, %v4877_v7  ;;  %v4828_v61 = vmul.f32 %v15418_v35, %v15418_v35  ;;  %v4829_v17 = vmul.f32 %v15421_v46, %v15421_v46  ;;  %v4830_v4 = vmul.f32 %v15424_v45, %v15424_v45  ;;  %13615 = vmatpush3.bf16.msra.mxu0 %v13938_v49 }
 0xe15   :  { %v4886_v1 = vrot.slane %v4878_v56, %v14176_v6  ;;  %v4831_v22 = vmul.f32 %v15427_v36, %v15427_v36  ;;  %v4895_v55 = vcombine.low %v4826_v41, %v4827_v19  ;;  %13616 = vmatprep.subr.bf16.mxu0 %v17705_v39  ;;  %v5040_v23 = vcombine.high %v13041_v13, %v13041_v13 }
 0xe16   :  { %v4893_v12 = vrot.slane %v4879_v26, %v14176_v6  ;;  %v4896_v47 = vcombine.low %v4828_v61, %v4829_v17  ;;  %13609 = vmatpush3.bf16.msra.mxu1 %v13937_v14  ;;  %v5116_v33 = vcombine.high %v13042_v60, %v13042_v60  ;;  %v5047_v7 = vrot.slane %v13041_v13, %v14176_v6 }
 0xe17   :  { %v4897_v27 = vcombine.low %v4830_v4, %v4831_v22  ;;  %v4904_v54 = vrot.slane %v4895_v55, %v14176_v6  ;;  %13626 = vmatprep.subr.bf16.mxu1 %v17705_v39  ;;  %v5054_v56 = vrot.slane %v5040_v23, %v14176_v6  ;;  %v5123_v19 = vrot.slane %v13042_v60, %v14176_v6 }
 0xe18   :  { %v4894_v3 = vcombine.low %v4886_v1, %v4893_v12  ;;  %v4911_v21 = vrot.slane %v4896_v47, %v14176_v6  ;;  %v5130_v26 = vrot.slane %v5116_v33, %v14176_v6  ;;  %v5055_v4 = vcombine.high %v5047_v7, %v5047_v7 }
 0xe19   :  { %v4918_v52 = vrot.slane %v4897_v27, %v14176_v6  ;;  %v5056_v1 = vcombine.high %v5054_v56, %v5054_v56  ;;  %v5131_v22 = vcombine.high %v5123_v19, %v5123_v19  ;;  %v5063_v12 = vrot.slane %v5047_v7, %v14176_v6 }
 0xe1a   :  { %v4937_v10 = vsel %vm426_vm1, %v4894_v3, 0.0  ;;  %v4919_v2 = vcombine.low %v4904_v54, %v4911_v21  ;;  %v5132_v55 = vcombine.high %v5130_v26, %v5130_v26  ;;  %v5070_v47 = vrot.slane %v5054_v56, %v14176_v6 }
 0xe1b   :  { %4938 = vadd.xlane.f32.xlu0 %v4937_v10  ;;  %v4933_v53 = vrot.slane %v4918_v52, %v14176_v6  ;;  %v5077_v27 = vrot.slane %v5055_v4, %v14176_v6  ;;  %v5084_v54 = vrot.slane %v5056_v1, %v14176_v6  ;;  %v15487_v3 = vrot.slane %v5123_v19, %v14176_v6 }
 0xe1c   :  { %v4926_v15 = vrot.slane %v4919_v2, %v14176_v6  ;;  %v15490_v21 = vrot.slane %v5130_v26, %v14176_v6  ;;  %v15493_v52 = vrot.slane %v5131_v22, %v14176_v6  ;;  %v15496_v10 = vrot.slane %v5132_v55, %v14176_v6 }
 0xe1d   :  { %v5085_v2 = vcombine.high %v5063_v12, %v5063_v12  ;;  %v5161_v28 = vcombine.high %v15487_v3, %v15487_v3 }
 0xe1e   :  { %v4934_v59 = vcombine.low %v4926_v15, %v4933_v53  ;;  %v5086_v15 = vcombine.high %v5070_v47, %v5070_v47  ;;  %v5087_v53 = vcombine.high %v5077_v27, %v5077_v27  ;;  %v5162_v14 = vcombine.high %v15490_v21, %v15490_v21 }
 0xe1f   :  { %v5163_v49 = vcombine.high %v15493_v52, %v15493_v52  ;;  %v5164_v13 = vcombine.high %v15496_v10, %v15496_v10 }
 0xe20   :  { %v4940_v20 = vsel %vm2245_vm9, %v4934_v59, 0.0  ;;  %v5088_v59 = vcombine.high %v5084_v54, %v5084_v54 }
 0xe21   :  { %4941 = vadd.xlane.f32.xlu0 %v4940_v20 }
 0xea4   :  { %v4939_v18 = vpop.xlane.xlu0 %4938 }
 0xea5   :  { %v4943_v63 = vmul.f32 0.03125, %v4939_v18 }
 0xea7   :  { %v4945_v25 = vadd.f32 1e-05, %v4943_v63 }
 0xea9   :  { %14028 = vrsqrt.f32 %v4945_v25 }
 0xeaa   :  { %v4942_v41 = vpop.xlane.xlu0 %4941 }
 0xeab   :  { %v4944_v61 = vmul.f32 0.03125, %v4942_v41 }
 0xead   :  { %v4946_v17 = vadd.f32 1e-05, %v4944_v61 }
 0xeaf   :  { %14030 = vrsqrt.f32 %v4946_v17 }
 0xeb6   :  { %v14029_v20 = vpop.eup %14028 }
 0xeb7   :  { %v4954_v60 = vrot.slane %v14029_v20, %v14408_v42  ;;  %v4958_v18 = vrot.slane %v14029_v20, %v14668_v58  ;;  %v4962_v63 = vrot.slane %v14029_v20, %v14671_v31  ;;  %v4966_v23 = vrot.slane %v14029_v20, %v14674_v38 }
 0xeb8   :  { %v4970_v33 = vrot.slane %v14029_v20, %v14677_v9  ;;  %v4974_v25 = vrot.slane %v14029_v20, %v14680_v0  ;;  %v4978_v7 = vrot.slane %v14029_v20, %v14683_v43  ;;  %v4982_v56 = vrot.slane %v14029_v20, %v14686_v34 }
 0xeb9   :  { %v5021_v41 = vmul.f32 %v4954_v60, %v15366_v44  ;;  %v5022_v19 = vmul.f32 %v4958_v18, %v15369_v16  ;;  %v5023_v26 = vmul.f32 %v4962_v63, %v15372_v48  ;;  %v5024_v61 = vmul.f32 %v4966_v23, %v15374_v62 }
 0xeba   :  { %v5025_v17 = vmul.f32 %v4970_v33, %v15377_v40  ;;  %v5026_v4 = vmul.f32 %v4974_v25, %v15379_v11  ;;  %v5027_v1 = vmul.f32 %v4978_v7, %v15381_v8  ;;  %v5028_v22 = vmul.f32 %v4982_v56, %v15383_v29 }
 0xebb   :  { %v5097_v55 = vmul.f32 %v5063_v12, %v5021_v41  ;;  %v5098_v30 = vmul.f32 %v5077_v27, %v5022_v19  ;;  %v5099_v57 = vmul.f32 %v5085_v2, %v5023_v26  ;;  %v5100_v20 = vmul.f32 %v5087_v53, %v5024_v61 }
 0xebc   :  { %v14031_v32 = vpop.eup %14030  ;;  %v5101_v44 = vmul.f32 %v5070_v47, %v5025_v17  ;;  %v5102_v60 = vmul.f32 %v5084_v54, %v5026_v4  ;;  %v5103_v16 = vmul.f32 %v5086_v15, %v5027_v1  ;;  %v5104_v18 = vmul.f32 %v5088_v59, %v5028_v22 }
 0xebd   :  { %v4986_v48 = vrot.slane %v14031_v32, %v14408_v42  ;;  %v4990_v62 = vrot.slane %v14031_v32, %v14668_v58  ;;  %v4994_v40 = vrot.slane %v14031_v32, %v14671_v31  ;;  %v4998_v11 = vrot.slane %v14031_v32, %v14674_v38 }
 0xebe   :  { %v5002_v8 = vrot.slane %v14031_v32, %v14677_v9  ;;  %v5006_v29 = vrot.slane %v14031_v32, %v14680_v0  ;;  %v15529_v63 = vadd.f32 %v15487_v3, %v5097_v55  ;;  %v15532_v23 = vadd.f32 %v15493_v52, %v5098_v30 }
 0xebf   :  { %v5029_v15 = vmul.f32 %v4986_v48, %v15411_v5  ;;  %v5030_v59 = vmul.f32 %v4990_v62, %v15414_v24  ;;  %v5031_v33 = vmul.f32 %v4994_v40, %v15418_v35  ;;  %v5032_v25 = vmul.f32 %v4998_v11, %v15421_v46 }
 0xec0   :  { %v5033_v7 = vmul.f32 %v5002_v8, %v15424_v45  ;;  %v5034_v56 = vmul.f32 %v5006_v29, %v15427_v36  ;;  %v15540_v41 = vadd.f32 %v5161_v28, %v5099_v57  ;;  %v15542_v32 = vadd.f32 %v5163_v49, %v5100_v20  ;;  %v13939_v29 = vld [vmem:[%s15462_s10 + $0x10] sm:$0xff]  }
 0xec1   :  { %v5105_v19 = vmul.f32 %v5063_v12, %v5029_v15  ;;  %v5106_v26 = vmul.f32 %v5077_v27, %v5030_v59  ;;  %v5107_v30 = vmul.f32 %v5085_v2, %v5031_v33  ;;  %v5108_v61 = vmul.f32 %v5087_v53, %v5032_v25  ;;  %13617 = vmatpush3.bf16.msra.mxu0 %v13939_v29  ;;  %v13940_v15 = vld [vmem:[%s15462_s10 + $0x8] sm:$0xff]   ;;  %v13941_v59 = vld [vmem:[%s15462_s10] sm:$0xff]  }
 0xec2   :  { %v5109_v17 = vmul.f32 %v5070_v47, %v5033_v7  ;;  %v5110_v5 = vmul.f32 %v5084_v54, %v5034_v56  ;;  %v15545_v24 = vadd.f32 %v15490_v21, %v5101_v44  ;;  %v15548_v35 = vadd.f32 %v15496_v10, %v5102_v60  ;;  %13618 = vmatprep.subr.bf16.mxu0 %v17705_v39  ;;  %v13043_v33 = vld [vmem:[%s15607_s5] ss:$0 sm:$0xff] }
 0xec3   :  { %v15550_v46 = vadd.f32 %v5162_v14, %v5103_v16  ;;  %v15552_v45 = vadd.f32 %v5164_v13, %v5104_v18  ;;  %v15555_v57 = vadd.f32 %v15487_v3, %v5105_v19  ;;  %v15558_v36 = vadd.f32 %v15493_v52, %v5106_v26 }
 0xec4   :  { %v15560_v12 = vadd.f32 %v5161_v28, %v5107_v30  ;;  %v15562_v47 = vadd.f32 %v5163_v49, %v5108_v61  ;;  %v15565_v27 = vadd.f32 %v15490_v21, %v5109_v17  ;;  %v15568_v54 = vadd.f32 %v15496_v10, %v5110_v5 }
 0xec5   :  { %v5201_v2 = vcombine.low %v15529_v63, %v15532_v23  ;;  %v5202_v3 = vcombine.low %v15540_v41, %v15542_v32  ;;  %v5203_v52 = vcombine.low %v15545_v24, %v15548_v35  ;;  %v5204_v53 = vcombine.low %v15550_v46, %v15552_v45  ;;  %13619 = vmatpush3.bf16.msra.mxu0 %v13940_v15 }
 0xec6   :  { %v5250_v28 = vcombine.low %v15555_v57, %v15558_v36  ;;  %v5251_v21 = vcombine.low %v15560_v12, %v15562_v47  ;;  %v5252_v10 = vcombine.low %v15565_v27, %v15568_v54  ;;  %13620 = vmatprep.subr.bf16.mxu0 %v17705_v39 }
 0xec7   :  { %v5211_v14 = vrot.slane %v5201_v2, %v14176_v6  ;;  %v5218_v49 = vrot.slane %v5202_v3, %v14176_v6  ;;  %v5225_v13 = vrot.slane %v5203_v52, %v14176_v6  ;;  %v5232_v4 = vrot.slane %v5204_v53, %v14176_v6  ;;  %v13047_v2 = vld [vmem:[%s15616_s23] ss:$0 sm:$0xff] }
 0xec8   :  { %v5259_v1 = vrot.slane %v5250_v28, %v14176_v6  ;;  %v5266_v22 = vrot.slane %v5251_v21, %v14176_v6  ;;  %v5273_v55 = vrot.slane %v5252_v10, %v14176_v6 }
 0xec9   :  { %v5233_v20 = vcombine.low %v5211_v14, %v5218_v49  ;;  %v5234_v44 = vcombine.low %v5225_v13, %v5232_v4  ;;  %13621 = vmatpush3.bf16.msra.mxu0 %v13941_v59 }
 0xeca   :  { %v5274_v60 = vcombine.low %v5259_v1, %v5266_v22  ;;  %v5288_v62 = vrot.slane %v5273_v55, %v14176_v6  ;;  %13640 = vmatprep.subr.bf16.mxu0 %v17705_v39 }
 0xecb   :  { %v5241_v16 = vrot.slane %v5233_v20, %v14176_v6  ;;  %v5248_v18 = vrot.slane %v5234_v44, %v14176_v6 }
 0xecc   :  { %v5281_v48 = vrot.slane %v5274_v60, %v14176_v6 }
 0xecd   :  { %v5249_v40 = vcombine.low %v5241_v16, %v5248_v18 }
 0xece   :  { %v5289_v11 = vcombine.low %v5281_v48, %v5288_v62 }
 0xed0   :  { %v5292_v8 = vpack.c.bf16 %v5289_v11, %v5249_v40 }
 0xed2   :  { %13611 = vmatmul.mubr.msk.bf16.vlgmr.msra.gmra.mxu1 %vm426_vm1, %v5292_v8 }
 0xed3   :  { %13630 = vmatprep.mubr.msk.bf16.mxu1 %vm14118_vm0, %v17705_v39 }
 0xf92   :  { %v5353_v25 = vpop.f32.mrf.mxu1 }
 0xf93   :  { %v5354_v56 = vadd.f32 %v13043_v33, %v5353_v25 }
 0xf94   :  { %v13612_v7 = vpop.f32.mrf.mxu1 }
 0xf95   :  { %v5360_v61 = vmax.f32 %v5354_v56, 0.0 }
 0xf96   :  { %v5356_v19 = vpop.f32.mrf.mxu1 }
 0xf97   :  { %v5357_v26 = vadd.f32 %v13043_v33, %v5356_v19 }
 0xf98   :  { %v13613_v30 = vpop.f32.mrf.mxu1 }
 0xf99   :  { %v5361_v17 = vmax.f32 %v5357_v26, 0.0 }
 0xf9b   :  { %v5362_v5 = vpack.c.bf16 %v5361_v17, %v5360_v61 }
 0xf9d   :  { %13623 = vmatmul.mubr.msk.bf16.vlgmr.msra.gmra.mxu0 %vm5402_vm11, %v5362_v5 }
 0xf9e   :  { %13642 = vmatprep.mubr.msk.bf16.mxu0 %vm14118_vm0, %v17705_v39 }
0x105d   :  { %v5440_v3 = vpop.f32.mrf.mxu0 }
0x105e   :  { %v5441_v52 = vadd.f32 %v13047_v2, %v5440_v3 }
0x105f   :  { %v13624_v53 = vpop.f32.mrf.mxu0 }
0x1060   :  { %v5449_v28 = vcombine.high %v5441_v52, %v5441_v52  ;;  %v5456_v21 = vrot.slane %v5441_v52, %v14176_v6 }
0x1061   :  { %v5443_v10 = vpop.f32.mrf.mxu0 }
0x1062   :  { %v5463_v14 = vrot.slane %v5449_v28, %v14176_v6  ;;  %v5464_v49 = vcombine.high %v5456_v21, %v5456_v21  ;;  %v5472_v13 = vrot.slane %v5456_v21, %v14176_v6  ;;  %v5444_v4 = vadd.f32 %v13047_v2, %v5443_v10 }
0x1063   :  { %v13625_v1 = vpop.f32.mrf.mxu0 }
0x1064   :  { %v5465_v22 = vcombine.high %v5463_v14, %v5463_v14  ;;  %v5479_v55 = vrot.slane %v5463_v14, %v14176_v6  ;;  %v5486_v20 = vrot.slane %v5464_v49, %v14176_v6  ;;  %v5494_v44 = vcombine.high %v5472_v13, %v5472_v13 }
0x1065   :  { %v15625_v60 = vadd.f32 %v5472_v13, %v15529_v63  ;;  %v5498_v16 = vcombine.high %v5444_v4, %v5444_v4  ;;  %v5505_v18 = vrot.slane %v5444_v4, %v14176_v6 }
0x1066   :  { %v5493_v48 = vrot.slane %v5465_v22, %v14176_v6  ;;  %v5495_v62 = vcombine.high %v5479_v55, %v5479_v55  ;;  %v5496_v40 = vcombine.high %v5486_v20, %v5486_v20  ;;  %v15630_v11 = vadd.f32 %v5486_v20, %v15532_v23 }
0x1067   :  { %v15633_v8 = vadd.f32 %v5494_v44, %v15540_v41  ;;  %v15636_v29 = vadd.f32 %v5479_v55, %v15545_v24  ;;  %v5512_v15 = vrot.slane %v5498_v16, %v14176_v6  ;;  %v5513_v63 = vcombine.high %v5505_v18, %v5505_v18 }
0x1068   :  { %v5497_v59 = vcombine.high %v5493_v48, %v5493_v48  ;;  %v5562_v33 = vadd.f32 %v5496_v40, %v15542_v32  ;;  %v5564_v25 = vadd.f32 %v5493_v48, %v15548_v35  ;;  %v5565_v7 = vadd.f32 %v5495_v62, %v15550_v46 }
0x1069   :  { %v5589_v23 = vcombine.low %v15625_v60, %v15630_v11  ;;  %v5514_v56 = vcombine.high %v5512_v15, %v5512_v15  ;;  %v5521_v41 = vrot.slane %v5505_v18, %v14176_v6  ;;  %v5528_v19 = vrot.slane %v5512_v15, %v14176_v6 }
0x106a   :  { %v5566_v24 = vadd.f32 %v5497_v59, %v15552_v45  ;;  %v5590_v26 = vcombine.low %v15633_v8, %v5562_v33  ;;  %v5591_v30 = vcombine.low %v15636_v29, %v5564_v25  ;;  %v5535_v32 = vrot.slane %v5513_v63, %v14176_v6 }
0x106b   :  { %v5542_v35 = vrot.slane %v5514_v56, %v14176_v6  ;;  %v5543_v61 = vcombine.high %v5521_v41, %v5521_v41  ;;  %v15652_v46 = vadd.f32 %v5521_v41, %v15555_v57  ;;  %v15658_v2 = vadd.f32 %v5528_v19, %v15565_v27 }
0x106c   :  { %v5544_v17 = vcombine.high %v5535_v32, %v5535_v32  ;;  %v15655_v5 = vadd.f32 %v5535_v32, %v15558_v36  ;;  %v5592_v45 = vcombine.low %v5565_v7, %v5566_v24  ;;  %v5599_v53 = vrot.slane %v5589_v23, %v14176_v6 }
0x106d   :  { %v15661_v3 = vadd.f32 %v5543_v61, %v15560_v12  ;;  %v15664_v52 = vadd.f32 %v5542_v35, %v15568_v54  ;;  %v5606_v28 = vrot.slane %v5590_v26, %v14176_v6  ;;  %v5613_v27 = vrot.slane %v5591_v30, %v14176_v6 }
0x106e   :  { %v15669_v57 = vadd.f32 %v5544_v17, %v15562_v47  ;;  %v5638_v36 = vcombine.low %v15652_v46, %v15655_v5  ;;  %v5620_v21 = vrot.slane %v5592_v45, %v14176_v6 }
0x106f   :  { %v5621_v10 = vcombine.low %v5599_v53, %v5606_v28  ;;  %v5640_v12 = vcombine.low %v15658_v2, %v15664_v52 }
0x1070   :  { %v5639_v54 = vcombine.low %v15661_v3, %v15669_v57  ;;  %v5622_v14 = vcombine.low %v5613_v27, %v5620_v21  ;;  %v5647_v49 = vrot.slane %v5638_v36, %v14176_v6 }
0x1071   :  { %v5629_v47 = vrot.slane %v5621_v10, %v14176_v6  ;;  %v5661_v1 = vrot.slane %v5640_v12, %v14176_v6 }
0x1072   :  { %v5636_v13 = vrot.slane %v5622_v14, %v14176_v6  ;;  %v5654_v4 = vrot.slane %v5639_v54, %v14176_v6 }
0x1073   :  { %v5676_v16 = vrot.slane %v5661_v1, %v14176_v6 }
0x1074   :  { %v5637_v22 = vcombine.low %v5629_v47, %v5636_v13  ;;  %v5662_v55 = vcombine.low %v5647_v49, %v5654_v4 }
0x1076   :  { %v5680_v20 = vsel %vm426_vm1, %v5637_v22, 0.0  ;;  %v5669_v44 = vrot.slane %v5662_v55, %v14176_v6 }
0x1077   :  { %5681 = vadd.xlane.f32.xlu1 %v5680_v20 }
0x1078   :  { %v5677_v18 = vcombine.low %v5669_v44, %v5676_v16 }
0x107a   :  { %v5683_v48 = vsel %vm2245_vm9, %v5677_v18, 0.0 }
0x107b   :  { %5684 = vadd.xlane.f32.xlu0 %v5683_v48 }
0x1100   :  { %v5682_v62 = vpop.xlane.xlu1 %5681 }
0x1101   :  { %v5686_v40 = vmul.f32 0.03125, %v5682_v62 }
0x1103   :  { %v5693_v15 = vrot.slane %v5686_v40, %v14408_v42  ;;  %v5697_v63 = vrot.slane %v5686_v40, %v14668_v58  ;;  %v5701_v59 = vrot.slane %v5686_v40, %v14671_v31  ;;  %v5705_v23 = vrot.slane %v5686_v40, %v14674_v38 }
0x1104   :  { %v5685_v56 = vpop.xlane.xlu0 %5684  ;;  %v5709_v41 = vrot.slane %v5686_v40, %v14677_v9  ;;  %v5713_v19 = vrot.slane %v5686_v40, %v14680_v0  ;;  %v5717_v26 = vrot.slane %v5686_v40, %v14683_v43  ;;  %v5721_v30 = vrot.slane %v5686_v40, %v14686_v34 }
0x1105   :  { %v5687_v32 = vmul.f32 0.03125, %v5685_v56  ;;  %v15697_v35 = vsub.f32 %v15625_v60, %v5693_v15  ;;  %v15700_v61 = vsub.f32 %v15630_v11, %v5697_v63  ;;  %v15703_v17 = vsub.f32 %v15633_v8, %v5701_v59 }
0x1106   :  { %v15705_v45 = vsub.f32 %v5562_v33, %v5705_v23  ;;  %v15708_v53 = vsub.f32 %v15636_v29, %v5709_v41  ;;  %v15710_v28 = vsub.f32 %v5564_v25, %v5713_v19  ;;  %v15712_v36 = vsub.f32 %v5565_v7, %v5717_v26 }
0x1107   :  { %v15714_v27 = vsub.f32 %v5566_v24, %v5721_v30  ;;  %v5774_v60 = vmul.f32 %v15697_v35, %v15697_v35  ;;  %v5775_v11 = vmul.f32 %v15700_v61, %v15700_v61  ;;  %v5776_v8 = vmul.f32 %v15703_v17, %v15703_v17 }
0x1108   :  { %v5777_v33 = vmul.f32 %v15705_v45, %v15705_v45  ;;  %v5778_v29 = vmul.f32 %v15708_v53, %v15708_v53  ;;  %v5779_v25 = vmul.f32 %v15710_v28, %v15710_v28  ;;  %v5780_v7 = vmul.f32 %v15712_v36, %v15712_v36 }
0x1109   :  { %v5781_v24 = vmul.f32 %v15714_v27, %v15714_v27  ;;  %v5802_v21 = vcombine.low %v5774_v60, %v5775_v11  ;;  %v5725_v10 = vrot.slane %v5687_v32, %v14408_v42  ;;  %v5729_v12 = vrot.slane %v5687_v32, %v14668_v58 }
0x110a   :  { %v5803_v54 = vcombine.low %v5776_v8, %v5777_v33  ;;  %v5804_v14 = vcombine.low %v5778_v29, %v5779_v25  ;;  %v5733_v49 = vrot.slane %v5687_v32, %v14671_v31  ;;  %v5737_v47 = vrot.slane %v5687_v32, %v14674_v38 }
0x110b   :  { %v5805_v13 = vcombine.low %v5780_v7, %v5781_v24  ;;  %v5812_v4 = vrot.slane %v5802_v21, %v14176_v6  ;;  %v5741_v1 = vrot.slane %v5687_v32, %v14677_v9  ;;  %v5745_v22 = vrot.slane %v5687_v32, %v14680_v0  ;;  %v13942_v21 = vld [vmem:[%s14163_s6 + $0x18] sm:$0xff]  }
0x110c   :  { %v5819_v55 = vrot.slane %v5803_v54, %v14176_v6  ;;  %v5826_v20 = vrot.slane %v5804_v14, %v14176_v6  ;;  %v15742_v44 = vsub.f32 %v15652_v46, %v5725_v10  ;;  %v15745_v16 = vsub.f32 %v15655_v5, %v5729_v12  ;;  %13627 = vmatpush3.bf16.msra.mxu1 %v13942_v21  ;;  %v13943_v10 = vld [vmem:[%s14163_s6 + $0x10] sm:$0xff]   ;;  %v13053_v12 = vld [vmem:[%s15788_s4] ss:$0 sm:$0xff]  ;;  %s17708_s6 = smov 64  }
0x110d   :  { %v5833_v18 = vrot.slane %v5805_v13, %v14176_v6  ;;  %v15749_v48 = vsub.f32 %v15661_v3, %v5733_v49  ;;  %v15752_v62 = vsub.f32 %v15669_v57, %v5737_v47  ;;  %v15755_v40 = vsub.f32 %v15658_v2, %v5741_v1  ;;  %13628 = vmatprep.subr.bf16.mxu1 %v17705_v39  ;;  %v13054_v54 = vld [vmem:[%s15794_s21] ss:$0 sm:$0xff] }
0x110e   :  { %v5834_v15 = vcombine.low %v5812_v4, %v5819_v55  ;;  %v15758_v63 = vsub.f32 %v15664_v52, %v5745_v22  ;;  %v5782_v46 = vmul.f32 %v15742_v44, %v15742_v44  ;;  %v5783_v5 = vmul.f32 %v15745_v16, %v15745_v16 }
0x110f   :  { %v5835_v59 = vcombine.low %v5826_v20, %v5833_v18  ;;  %v5784_v3 = vmul.f32 %v15749_v48, %v15749_v48  ;;  %v5785_v57 = vmul.f32 %v15752_v62, %v15752_v62  ;;  %v5786_v2 = vmul.f32 %v15755_v40, %v15755_v40 }
0x1110   :  { %v5842_v23 = vrot.slane %v5834_v15, %v14176_v6  ;;  %v5787_v52 = vmul.f32 %v15758_v63, %v15758_v63  ;;  %v5851_v56 = vcombine.low %v5782_v46, %v5783_v5  ;;  %13629 = vmatpush3.bf16.msra.mxu1 %v13943_v10  ;;  %v5996_v47 = vcombine.high %v13053_v12, %v13053_v12 }
0x1111   :  { %v5849_v41 = vrot.slane %v5835_v59, %v14176_v6  ;;  %v5852_v19 = vcombine.low %v5784_v3, %v5785_v57  ;;  %13634 = vmatprep.subr.bf16.mxu1 %v17705_v39  ;;  %v6072_v13 = vcombine.high %v13054_v54, %v13054_v54  ;;  %v6003_v1 = vrot.slane %v13053_v12, %v14176_v6 }
0x1112   :  { %v5853_v26 = vcombine.low %v5786_v2, %v5787_v52  ;;  %v5860_v30 = vrot.slane %v5851_v56, %v14176_v6  ;;  %v6010_v22 = vrot.slane %v5996_v47, %v14176_v6  ;;  %v6079_v20 = vrot.slane %v13054_v54, %v14176_v6 }
0x1113   :  { %v5850_v32 = vcombine.low %v5842_v23, %v5849_v41  ;;  %v5867_v60 = vrot.slane %v5852_v19, %v14176_v6  ;;  %v6086_v18 = vrot.slane %v6072_v13, %v14176_v6  ;;  %v6011_v5 = vcombine.high %v6003_v1, %v6003_v1 }
0x1114   :  { %v5874_v11 = vrot.slane %v5853_v26, %v14176_v6  ;;  %v6012_v59 = vcombine.high %v6010_v22, %v6010_v22  ;;  %v6087_v3 = vcombine.high %v6079_v20, %v6079_v20  ;;  %v6019_v2 = vrot.slane %v6003_v1, %v14176_v6 }
0x1115   :  { %v5893_v8 = vsel %vm426_vm1, %v5850_v32, 0.0  ;;  %v5875_v33 = vcombine.low %v5860_v30, %v5867_v60  ;;  %v6088_v57 = vcombine.high %v6086_v18, %v6086_v18  ;;  %v6026_v23 = vrot.slane %v6010_v22, %v14176_v6 }
0x1116   :  { %5894 = vadd.xlane.f32.xlu1 %v5893_v8  ;;  %v5889_v25 = vrot.slane %v5874_v11, %v14176_v6  ;;  %v6033_v52 = vrot.slane %v6011_v5, %v14176_v6  ;;  %v6040_v56 = vrot.slane %v6012_v59, %v14176_v6  ;;  %v15807_v41 = vrot.slane %v6079_v20, %v14176_v6 }
0x1117   :  { %v5882_v29 = vrot.slane %v5875_v33, %v14176_v6  ;;  %v15810_v19 = vrot.slane %v6086_v18, %v14176_v6  ;;  %v15813_v26 = vrot.slane %v6087_v3, %v14176_v6  ;;  %v15816_v30 = vrot.slane %v6088_v57, %v14176_v6 }
0x1118   :  { %v6041_v32 = vcombine.high %v6019_v2, %v6019_v2  ;;  %v6042_v60 = vcombine.high %v6026_v23, %v6026_v23  ;;  %v6043_v11 = vcombine.high %v6033_v52, %v6033_v52  ;;  %v6044_v8 = vcombine.high %v6040_v56, %v6040_v56 }
0x1119   :  { %v5890_v7 = vcombine.low %v5882_v29, %v5889_v25  ;;  %v6117_v29 = vcombine.high %v15807_v41, %v15807_v41  ;;  %v6118_v25 = vcombine.high %v15810_v19, %v15810_v19 }
0x111b   :  { %v5896_v24 = vsel %vm2245_vm9, %v5890_v7, 0.0  ;;  %v6119_v7 = vcombine.high %v15813_v26, %v15813_v26 }
0x111c   :  { %5897 = vadd.xlane.f32.xlu0 %v5896_v24  ;;  %v6120_v24 = vcombine.high %v15816_v30, %v15816_v30 }
0x119f   :  { %v5895_v14 = vpop.xlane.xlu1 %5894 }
0x11a0   :  { %v5899_v49 = vmul.f32 0.03125, %v5895_v14 }
0x11a2   :  { %v5901_v4 = vadd.f32 1e-05, %v5899_v49 }
0x11a4   :  { %14032 = vrsqrt.f32 %v5901_v4 }
0x11a5   :  { %v5898_v55 = vpop.xlane.xlu0 %5897 }
0x11a6   :  { %v5900_v15 = vmul.f32 0.03125, %v5898_v55 }
0x11a8   :  { %v5902_v46 = vadd.f32 1e-05, %v5900_v15 }
0x11aa   :  { %14034 = vrsqrt.f32 %v5902_v46 }
0x11b1   :  { %v14033_v33 = vpop.eup %14032 }
0x11b2   :  { %v5910_v21 = vrot.slane %v14033_v33, %v14408_v42  ;;  %v5914_v10 = vrot.slane %v14033_v33, %v14668_v58  ;;  %v5918_v12 = vrot.slane %v14033_v33, %v14671_v31  ;;  %v5922_v54 = vrot.slane %v14033_v33, %v14674_v38 }
0x11b3   :  { %v5926_v14 = vrot.slane %v14033_v33, %v14677_v9  ;;  %v5930_v49 = vrot.slane %v14033_v33, %v14680_v0  ;;  %v5934_v47 = vrot.slane %v14033_v33, %v14683_v43  ;;  %v5938_v13 = vrot.slane %v14033_v33, %v14686_v34 }
0x11b4   :  { %v5977_v4 = vmul.f32 %v5910_v21, %v15697_v35  ;;  %v5978_v1 = vmul.f32 %v5914_v10, %v15700_v61  ;;  %v5979_v22 = vmul.f32 %v5918_v12, %v15703_v17  ;;  %v5980_v55 = vmul.f32 %v5922_v54, %v15705_v45 }
0x11b5   :  { %v5981_v20 = vmul.f32 %v5926_v14, %v15708_v53  ;;  %v5982_v18 = vmul.f32 %v5930_v49, %v15710_v28  ;;  %v5983_v15 = vmul.f32 %v5934_v47, %v15712_v36  ;;  %v5984_v46 = vmul.f32 %v5938_v13, %v15714_v27 }
0x11b6   :  { %v6053_v5 = vmul.f32 %v6019_v2, %v5977_v4  ;;  %v6054_v59 = vmul.f32 %v6033_v52, %v5978_v1  ;;  %v6055_v3 = vmul.f32 %v6041_v32, %v5979_v22  ;;  %v6056_v57 = vmul.f32 %v6043_v11, %v5980_v55 }
0x11b7   :  { %v14035_v33 = vpop.eup %14034  ;;  %v6057_v35 = vmul.f32 %v6026_v23, %v5981_v20  ;;  %v6058_v21 = vmul.f32 %v6040_v56, %v5982_v18  ;;  %v6059_v61 = vmul.f32 %v6042_v60, %v5983_v15  ;;  %v6060_v10 = vmul.f32 %v6044_v8, %v5984_v46 }
0x11b8   :  { %v5942_v17 = vrot.slane %v14035_v33, %v14408_v42  ;;  %v5946_v45 = vrot.slane %v14035_v33, %v14668_v58  ;;  %v5950_v53 = vrot.slane %v14035_v33, %v14671_v31  ;;  %v5954_v28 = vrot.slane %v14035_v33, %v14674_v38 }
0x11b9   :  { %v5958_v36 = vrot.slane %v14035_v33, %v14677_v9  ;;  %v5962_v27 = vrot.slane %v14035_v33, %v14680_v0  ;;  %v15849_v12 = vadd.f32 %v15807_v41, %v6053_v5  ;;  %v15852_v54 = vadd.f32 %v15813_v26, %v6054_v59 }
0x11ba   :  { %v5985_v60 = vmul.f32 %v5942_v17, %v15742_v44  ;;  %v5986_v8 = vmul.f32 %v5946_v45, %v15745_v16  ;;  %v5987_v14 = vmul.f32 %v5950_v53, %v15749_v48  ;;  %v5988_v49 = vmul.f32 %v5954_v28, %v15752_v62 }
0x11bb   :  { %v5989_v47 = vmul.f32 %v5958_v36, %v15755_v40  ;;  %v5990_v13 = vmul.f32 %v5962_v27, %v15758_v63  ;;  %v15860_v4 = vadd.f32 %v6117_v29, %v6055_v3  ;;  %v15862_v1 = vadd.f32 %v6119_v7, %v6056_v57 }
0x11bc   :  { %v6061_v22 = vmul.f32 %v6019_v2, %v5985_v60  ;;  %v6062_v55 = vmul.f32 %v6033_v52, %v5986_v8  ;;  %v6063_v20 = vmul.f32 %v6041_v32, %v5987_v14  ;;  %v6064_v18 = vmul.f32 %v6043_v11, %v5988_v49  ;;  %v13060_v60 = vld [vmem:[%s14257_s13 + $0x1] ss:$0 sm:$0xff]  ;;  %s17709_s13 = smov 8  }
0x11bd   :  { %v6065_v15 = vmul.f32 %v6026_v23, %v5989_v47  ;;  %v6066_v44 = vmul.f32 %v6040_v56, %v5990_v13  ;;  %v15865_v16 = vadd.f32 %v15810_v19, %v6057_v35  ;;  %v15868_v48 = vadd.f32 %v15816_v30, %v6058_v21 }
0x11be   :  { %v15870_v62 = vadd.f32 %v6118_v25, %v6059_v61  ;;  %v15872_v40 = vadd.f32 %v6120_v24, %v6060_v10  ;;  %v15875_v63 = vadd.f32 %v15807_v41, %v6061_v22  ;;  %v15878_v2 = vadd.f32 %v15813_v26, %v6062_v55 }
0x11bf   :  { %v15880_v52 = vadd.f32 %v6117_v29, %v6063_v20  ;;  %v15882_v23 = vadd.f32 %v6119_v7, %v6064_v18  ;;  %v15885_v56 = vadd.f32 %v15810_v19, %v6065_v15  ;;  %v15888_v32 = vadd.f32 %v15816_v30, %v6066_v44 }
0x11c0   :  { %v6157_v11 = vcombine.low %v15849_v12, %v15852_v54  ;;  %v6158_v41 = vcombine.low %v15860_v4, %v15862_v1  ;;  %v6159_v26 = vcombine.low %v15865_v16, %v15868_v48  ;;  %v6160_v29 = vcombine.low %v15870_v62, %v15872_v40 }
0x11c1   :  { %v6206_v25 = vcombine.low %v15875_v63, %v15878_v2  ;;  %v6207_v19 = vcombine.low %v15880_v52, %v15882_v23  ;;  %v6208_v30 = vcombine.low %v15885_v56, %v15888_v32 }
0x11c2   :  { %v6167_v7 = vrot.slane %v6157_v11, %v14176_v6  ;;  %v6174_v24 = vrot.slane %v6158_v41, %v14176_v6  ;;  %v6181_v46 = vrot.slane %v6159_v26, %v14176_v6  ;;  %v6188_v5 = vrot.slane %v6160_v29, %v14176_v6 }
0x11c3   :  { %v6215_v59 = vrot.slane %v6206_v25, %v14176_v6  ;;  %v6222_v3 = vrot.slane %v6207_v19, %v14176_v6  ;;  %v6229_v57 = vrot.slane %v6208_v30, %v14176_v6 }
0x11c4   :  { %v6189_v33 = vcombine.low %v6167_v7, %v6174_v24  ;;  %v6190_v35 = vcombine.low %v6181_v46, %v6188_v5 }
0x11c5   :  { %v6230_v21 = vcombine.low %v6215_v59, %v6222_v3  ;;  %v6244_v45 = vrot.slane %v6229_v57, %v14176_v6 }
0x11c6   :  { %v6197_v61 = vrot.slane %v6189_v33, %v14176_v6  ;;  %v6204_v10 = vrot.slane %v6190_v35, %v14176_v6 }
0x11c7   :  { %v6237_v17 = vrot.slane %v6230_v21, %v14176_v6 }
0x11c8   :  { %v6205_v53 = vcombine.low %v6197_v61, %v6204_v10 }
0x11c9   :  { %v6245_v28 = vcombine.low %v6237_v17, %v6244_v45 }
0x11cb   :  { %v6248_v36 = vpack.c.bf16 %v6245_v28, %v6205_v53 }
0x11cd   :  { %13631 = vmatmul.mubr.msk.bf16.vlgmr.msra.gmra.mxu1 %vm426_vm1, %v6248_v36 }
0x11ce   :  { %13636 = vmatprep.mubr.msk.bf16.mxu1 %vm14118_vm0, %v17705_v39 }
0x128d   :  { %v6311_v27 = vpop.f32.mrf.mxu1 }
0x128e   :  { %v6312_v49 = vadd.f32 %v13060_v60, %v6311_v27 }
0x128f   :  { %v13632_v8 = vpop.f32.mrf.mxu1 }
0x1291   :  { %v6314_v14 = vpop.f32.mrf.mxu1 }
0x1292   :  { %v6315_v47 = vadd.f32 %v13060_v60, %v6314_v14 }
0x1293   :  { %v13633_v13 = vpop.f32.mrf.mxu1 }
0x1294   :  { %v6318_v22 = vpack.c.bf16 %v6315_v47, %v6312_v49  ;;  %v13064_v55 = vpack.c.bf16 %v6315_v47, %v6315_v47 }
0x1296   :  { %v6327_v20 = vrot.slane %v6318_v22, %v14176_v6  ;;  %v6334_v18 = vrot.slane %v13064_v55, %v14176_v6 }
0x1298   :  { %v6335_v15 = vcombine.high %v6327_v20, %v6327_v20  ;;  %v6343_v44 = vrot.slane %v6327_v20, %v14176_v6  ;;  %v6350_v11 = vrot.slane %v6334_v18, %v14176_v6  ;;  %v6336_v25 = vcombine.high %v6334_v18, %v6334_v18 }
0x129a   :  { %6420 = vrot.lane.b32.xlu0 %v6343_v44, %s14121_s14  ;;  %6390 = vrot.lane.b32.xlu1 %v6343_v44, %s14122_s15  ;;  %v6357_v41 = vrot.slane %v6335_v15, %v14176_v6  ;;  %v6365_v26 = vcombine.high %v6343_v44, %v6343_v44  ;;  %v6366_v29 = vcombine.high %v6350_v11, %v6350_v11  ;;  %v6377_v7 = vunpack.i.h.s16 %v6350_v11 }
0x129b   :  { %v6364_v30 = vrot.slane %v6336_v25, %v14176_v6 }
0x129c   :  { %v6381_v19 = vunpack.i.h.s16 %v6366_v29  ;;  %v6367_v24 = vcombine.high %v6357_v41, %v6357_v41  ;;  %v6480_v21 = vcombine.low %v6343_v44, %v6357_v41 }
0x129d   :  { %v13066_v46 = vpack.i.b16 %v6364_v30, %v6377_v7  ;;  %v6379_v59 = vunpack.i.h.s16 %v6364_v30 }
0x129e   :  { %6450 = vrot.lane.b32.xlu0 %v6343_v44, %s14123_s16  ;;  %6392 = vrot.lane.b32.xlu1 %v6357_v41, %s14122_s15  ;;  %v6374_v5 = vunpack.i.l.s16 %v6367_v24  ;;  %v6375_v57 = vunpack.i.h.s16 %v6367_v24  ;;  %v6488_v10 = vrot.slane %v6480_v21, %v14176_v6 }
0x129f   :  { %v13067_v3 = vpack.i.b16 %v6366_v29, %v6379_v59 }
0x12a0   :  { %v13065_v33 = vpack.i.b16 %v6350_v11, %v6375_v57  ;;  %v6481_v35 = vcombine.low %v6365_v26, %v6374_v5 }
0x12a1   :  { %v6553_v53 = vcombine.low %v13067_v3, %v6381_v19 }
0x12a2   :  { %6394 = vrot.lane.b32.xlu0 %v6365_v26, %s14122_s15  ;;  %6422 = vrot.lane.b32.xlu1 %v6357_v41, %s14121_s14  ;;  %v6495_v61 = vrot.slane %v6481_v35, %v14176_v6  ;;  %v6552_v45 = vcombine.low %v13065_v33, %v13066_v46 }
0x12a3   :  { %v6567_v27 = vrot.slane %v6553_v53, %v14176_v6 }
0x12a4   :  { %v6496_v17 = vcombine.low %v6488_v10, %v6495_v61  ;;  %v6560_v36 = vrot.slane %v6552_v45, %v14176_v6 }
0x12a6   :  { %6424 = vrot.lane.b32.xlu0 %v6365_v26, %s14121_s14  ;;  %6434 = vrot.lane.b32.xlu1 %v6381_v19, %s14121_s14  ;;  %v15950_v28 = vrot.slane %v6496_v17, %v14176_v6  ;;  %v6568_v60 = vcombine.low %v6560_v36, %v6567_v27 }
0x12a8   :  { %v15959_v8 = vrot.slane %v6568_v60, %v14176_v6 }
0x12aa   :  { %6404 = vrot.lane.b32.xlu0 %v6381_v19, %s14122_s15  ;;  %6464 = vrot.lane.b32.xlu1 %v6381_v19, %s14123_s16 }
0x12ae   :  { %6400 = vrot.lane.b32.xlu0 %v13066_v46, %s14122_s15  ;;  %6396 = vrot.lane.b32.xlu1 %v6374_v5, %s14122_s15 }
0x12b2   :  { %6430 = vrot.lane.b32.xlu0 %v13066_v46, %s14121_s14  ;;  %6402 = vrot.lane.b32.xlu1 %v13067_v3, %s14122_s15 }
0x12b6   :  { %6426 = vrot.lane.b32.xlu0 %v6374_v5, %s14121_s14  ;;  %6432 = vrot.lane.b32.xlu1 %v13067_v3, %s14121_s14 }
0x12ba   :  { %6456 = vrot.lane.b32.xlu0 %v6374_v5, %s14123_s16  ;;  %6398 = vrot.lane.b32.xlu1 %v13065_v33, %s14122_s15 }
0x12be   :  { %6454 = vrot.lane.b32.xlu0 %v6365_v26, %s14123_s16  ;;  %6452 = vrot.lane.b32.xlu1 %v6357_v41, %s14123_s16 }
0x12c2   :  { %6460 = vrot.lane.b32.xlu0 %v13066_v46, %s14123_s16  ;;  %6428 = vrot.lane.b32.xlu1 %v13065_v33, %s14121_s14 }
0x12c6   :  { %6458 = vrot.lane.b32.xlu1 %v13065_v33, %s14123_s16  ;;  %6504 = vrot.lane.b32.xlu0 %v15950_v28, %s14124_s17 }
0x12ca   :  { %6462 = vrot.lane.b32.xlu1 %v13067_v3, %s14123_s16 }
0x12ce   :  { %6576 = vrot.lane.b32.xlu1 %v15959_v8, %s14124_s17 }
0x130c   :  { %v6421_v14 = vpop.permute.xlu0 %6420  ;;  %v6391_v49 = vpop.permute.xlu1 %6390 }
0x1310   :  { %v6451_v47 = vpop.permute.xlu0 %6450  ;;  %v6393_v13 = vpop.permute.xlu1 %6392 }
0x1311   :  { %v6628_v26 = vcombine.low %v6391_v49, %v6393_v13 }
0x1313   :  { %v6636_v7 = vrot.slane %v6628_v26, %v14176_v6 }
0x1314   :  { %v6395_v22 = vpop.permute.xlu0 %6394  ;;  %v6423_v55 = vpop.permute.xlu1 %6422 }
0x1315   :  { %v6780_v3 = vcombine.low %v6421_v14, %v6423_v55 }
0x1317   :  { %v6788_v45 = vrot.slane %v6780_v3, %v14176_v6 }
0x1318   :  { %v6425_v20 = vpop.permute.xlu0 %6424  ;;  %v6435_v18 = vpop.permute.xlu1 %6434 }
0x1319   :  { %v6449_v13 = vunpack.i.l.s16 %v6435_v18 }
0x131c   :  { %v6405_v15 = vpop.permute.xlu0 %6404  ;;  %v6465_v44 = vpop.permute.xlu1 %6464 }
0x131d   :  { %v6419_v57 = vunpack.i.l.s16 %v6405_v15 }
0x1320   :  { %v6401_v11 = vpop.permute.xlu0 %6400  ;;  %v6397_v41 = vpop.permute.xlu1 %6396 }
0x1321   :  { %v6412_v29 = vunpack.i.l.s16 %v6397_v41 }
0x1323   :  { %v6629_v25 = vcombine.low %v6395_v22, %v6412_v29 }
0x1324   :  { %v6431_v19 = vpop.permute.xlu0 %6430  ;;  %v6403_v30 = vpop.permute.xlu1 %6402 }
0x1325   :  { %v6643_v24 = vrot.slane %v6629_v25, %v14176_v6  ;;  %v6705_v21 = vcombine.low %v6403_v30, %v6419_v57 }
0x1327   :  { %v6644_v46 = vcombine.low %v6636_v7, %v6643_v24  ;;  %v6719_v27 = vrot.slane %v6705_v21, %v14176_v6 }
0x1328   :  { %v6427_v5 = vpop.permute.xlu0 %6426  ;;  %v6433_v59 = vpop.permute.xlu1 %6432 }
0x1329   :  { %v6442_v33 = vunpack.i.l.s16 %v6427_v5  ;;  %v15966_v35 = vrot.slane %v6644_v46, %v14176_v6  ;;  %v6857_v29 = vcombine.low %v6433_v59, %v6449_v13 }
0x132b   :  { %v6781_v61 = vcombine.low %v6425_v20, %v6442_v33  ;;  %6652 = vrot.lane.b32.xlu0 %v15966_v35, %s14124_s17 }
0x132c   :  { %v6457_v10 = vpop.permute.xlu0 %6456  ;;  %v6399_v17 = vpop.permute.xlu1 %6398 }
0x132d   :  { %v6795_v53 = vrot.slane %v6781_v61, %v14176_v6  ;;  %v6704_v36 = vcombine.low %v6399_v17, %v6401_v11  ;;  %v6472_v14 = vunpack.i.l.s16 %v6457_v10 }
0x132f   :  { %v6796_v60 = vcombine.low %v6788_v45, %v6795_v53  ;;  %v6712_v49 = vrot.slane %v6704_v36, %v14176_v6 }
0x1330   :  { %v6455_v22 = vpop.permute.xlu0 %6454  ;;  %v6453_v55 = vpop.permute.xlu1 %6452 }
0x1331   :  { %v6720_v20 = vcombine.low %v6712_v49, %v6719_v27  ;;  %v6933_v15 = vcombine.low %v6455_v22, %v6472_v14  ;;  %v6932_v41 = vcombine.low %v6451_v47, %v6453_v55  ;;  %v15975_v26 = vrot.slane %v6796_v60, %v14176_v6 }
0x1332   :  { %v6871_v47 = vrot.slane %v6857_v29, %v14176_v6 }
0x1333   :  { %v6947_v25 = vrot.slane %v6933_v15, %v14176_v6  ;;  %v6940_v11 = vrot.slane %v6932_v41, %v14176_v6  ;;  %6804 = vrot.lane.b32.xlu0 %v15975_v26, %s14124_s17  ;;  %v15982_v30 = vrot.slane %v6720_v20, %v14176_v6 }
0x1334   :  { %v6461_v18 = vpop.permute.xlu0 %6460  ;;  %v6429_v7 = vpop.permute.xlu1 %6428 }
0x1335   :  { %v6948_v24 = vcombine.low %v6940_v11, %v6947_v25  ;;  %v6856_v46 = vcombine.low %v6429_v7, %v6431_v19  ;;  %6728 = vrot.lane.b32.xlu1 %v15982_v30, %s14124_s17  ;;  %v6479_v19 = vunpack.i.l.s16 %v6465_v44 }
0x1337   :  { %v6864_v5 = vrot.slane %v6856_v46, %v14176_v6  ;;  %v15989_v59 = vrot.slane %v6948_v24, %v14176_v6 }
0x1338   :  { %v6459_v3 = vpop.permute.xlu1 %6458  ;;  %v6505_v57 = vpop.permute.xlu0 %6504 }
0x1339   :  { %v6872_v33 = vcombine.low %v6864_v5, %v6871_v47  ;;  %v6510_v21 = vsel %vm659_vm2, %v6505_v57, 0  ;;  %6956 = vrot.lane.b32.xlu0 %v15989_v59, %s14124_s17  ;;  %v7008_v61 = vcombine.low %v6459_v3, %v6461_v18 }
0x133a   :  { %13635 = vmatpush3.bf16.xpose.msra.mxu1 %v6510_v21 }
0x133b   :  { %v15995_v10 = vrot.slane %v6872_v33, %v14176_v6  ;;  %13646 = vmatprep.subr.bf16.mxu1 %v17705_v39  ;;  %v7016_v53 = vrot.slane %v7008_v61, %v14176_v6 }
0x133c   :  { %v6463_v17 = vpop.permute.xlu1 %6462 }
0x133d   :  { %v7009_v45 = vcombine.low %v6463_v17, %v6479_v19  ;;  %6880 = vrot.lane.b32.xlu1 %v15995_v10, %s14124_s17 }
0x133f   :  { %v7023_v36 = vrot.slane %v7009_v45, %v14176_v6 }
0x1340   :  { %v6577_v27 = vpop.permute.xlu1 %6576 }
0x1341   :  { %v7024_v60 = vcombine.low %v7016_v53, %v7023_v36  ;;  %v6582_v14 = vsel %vm659_vm2, %v6577_v27, 0  ;;  %13637 = vmatmul.mubr.msk.bf16.vlgmr.msra.gmra.mxu1 %vm659_vm2, %v15950_v28 }
0x1342   :  { %13641 = vmatpush3.bf16.xpose.msra.mxu0 %v6582_v14  ;;  %13648 = vmatprep.mubr.msk.bf16.mxu1 %vm14118_vm0, %v17705_v39 }
0x1343   :  { %v16008_v44 = vrot.slane %v7024_v60, %v14176_v6  ;;  %13652 = vmatprep.subr.bf16.mxu0 %v17705_v39 }
0x1345   :  { %7032 = vrot.lane.b32.xlu1 %v16008_v44, %s14124_s17 }
0x1349   :  { %13643 = vmatmul.mubr.msk.bf16.vlgmr.msra.gmra.mxu0 %vm659_vm2, %v15959_v8  ;;  %7176 = vrot.lane.b32.xlu1 %v15950_v28, %s17708_s6 }
0x134a   :  { %13654 = vmatprep.mubr.msk.bf16.mxu0 %vm14118_vm0, %v17705_v39 }
0x139d   :  { %v6653_v49 = vpop.permute.xlu0 %6652 }
0x139e   :  { %v6658_v13 = vsel %vm659_vm2, %v6653_v49, 0 }
0x139f   :  { %13647 = vmatpush3.bf16.xpose.msra.mxu1 %v6658_v13 }
0x13a0   :  { %13658 = vmatprep.subr.bf16.mxu1 %v17705_v39 }
0x13a5   :  { %v6805_v22 = vpop.permute.xlu0 %6804 }
0x13a6   :  { %v6810_v55 = vsel %vm659_vm2, %v6805_v22, 0  ;;  %13649 = vmatmul.mubr.msk.bf16.vlgmr.msra.gmra.mxu1 %vm659_vm2, %v15966_v35 }
0x13a7   :  { %v6729_v20 = vpop.permute.xlu1 %6728  ;;  %13659 = vmatpush3.bf16.xpose.msra.mxu1 %v6810_v55  ;;  %13660 = vmatprep.mubr.msk.bf16.mxu1 %vm14118_vm0, %v17705_v39 }
0x13a8   :  { %v6734_v28 = vsel %vm659_vm2, %v6729_v20, 0  ;;  %13670 = vmatprep.subr.bf16.mxu1 %v17705_v39 }
0x13a9   :  { %13653 = vmatpush3.bf16.xpose.msra.mxu0 %v6734_v28 }
0x13aa   :  { %13664 = vmatprep.subr.bf16.mxu0 %v17705_v39 }
0x13ab   :  { %v6957_v15 = vpop.permute.xlu0 %6956 }
0x13ac   :  { %v6962_v41 = vsel %vm659_vm2, %v6957_v15, 0 }
0x13ae   :  { %13661 = vmatmul.mubr.msk.bf16.vlgmr.msra.gmra.mxu1 %vm659_vm2, %v15975_v26 }
0x13af   :  { %v6881_v29 = vpop.permute.xlu1 %6880  ;;  %13671 = vmatpush3.bf16.xpose.msra.mxu1 %v6962_v41  ;;  %13672 = vmatprep.mubr.msk.bf16.mxu1 %vm14118_vm0, %v17705_v39 }
0x13b0   :  { %v6886_v25 = vsel %vm659_vm2, %v6881_v29, 0  ;;  %13655 = vmatmul.mubr.msk.bf16.vlgmr.msra.gmra.mxu0 %vm659_vm2, %v15982_v30  ;;  %13682 = vmatprep.subr.bf16.mxu1 %v17705_v39 }
0x13b1   :  { %13665 = vmatpush3.bf16.xpose.msra.mxu0 %v6886_v25  ;;  %13666 = vmatprep.mubr.msk.bf16.mxu0 %vm14118_vm0, %v17705_v39 }
0x13b2   :  { %13676 = vmatprep.subr.bf16.mxu0 %v17705_v39 }
0x13b6   :  { %13673 = vmatmul.mubr.msk.bf16.vlgmr.msra.gmra.mxu1 %vm659_vm2, %v15989_v59 }
0x13b7   :  { %v7033_v11 = vpop.permute.xlu1 %7032  ;;  %13684 = vmatprep.mubr.msk.bf16.mxu1 %vm14118_vm0, %v17705_v39 }
0x13b8   :  { %v7038_v18 = vsel %vm659_vm2, %v7033_v11, 0  ;;  %13667 = vmatmul.mubr.msk.bf16.vlgmr.msra.gmra.mxu0 %vm659_vm2, %v15995_v10 }
0x13b9   :  { %13677 = vmatpush3.bf16.xpose.msra.mxu0 %v7038_v18  ;;  %13678 = vmatprep.mubr.msk.bf16.mxu0 %vm14118_vm0, %v17705_v39 }
0x13ba   :  { %13688 = vmatprep.subr.bf16.mxu0 %v17705_v39 }
0x13bb   :  { %v7177_v7 = vpop.permute.xlu1 %7176 }
0x13bc   :  { %v7182_v24 = vand.u32 %v7177_v7, %v14386_v37 }
0x13be   :  { %13683 = vmatpush3.bf16.msra.mxu1 %v7182_v24 }
0x13bf   :  { %13694 = vmatprep.subr.bf16.mxu1 %v17705_v39 }
0x13c0   :  { %13679 = vmatmul.mubr.msk.bf16.vlgmr.msra.gmra.mxu0 %vm659_vm2, %v16008_v44 }
0x13c1   :  { %13690 = vmatprep.mubr.msk.bf16.mxu0 %vm14118_vm0, %v17705_v39 }
0x1401   :  { %v6546_v46 = vpop.f32.mrf.mxu1 }
0x1402   :  { %v6547_v47 = vadd.f32 %v6546_v46, %v14416_v51 }
0x1403   :  { %v13638_v5 = vpop.f32.mrf.mxu1 }
0x1404   :  { %v7080_v3 = vsel %vm1234_vm5, %v6547_v47, -inf }
0x1405   :  { %7081 = vmax.xlane.f32.xlu0 %v7080_v3  ;;  %v6549_v57 = vpop.f32.mrf.mxu1 }
0x1407   :  { %v13639_v33 = vpop.f32.mrf.mxu1 }
0x1409   :  { %v6618_v21 = vpop.f32.mrf.mxu0 }
0x140a   :  { %v6619_v19 = vadd.f32 %v6618_v21, %v14414_v50 }
0x140b   :  { %v13644_v61 = vpop.f32.mrf.mxu0 }
0x140c   :  { %v7083_v17 = vsel %vm1234_vm5, %v6619_v19, -inf }
0x140d   :  { %7084 = vmax.xlane.f32.xlu1 %v7083_v17  ;;  %v6621_v45 = vpop.f32.mrf.mxu0 }
0x140f   :  { %v13645_v53 = vpop.f32.mrf.mxu0 }
0x1466   :  { %v6694_v36 = vpop.f32.mrf.mxu1 }
0x1467   :  { %v6695_v27 = vadd.f32 %v6694_v36, %v14416_v51 }
0x1468   :  { %v13650_v60 = vpop.f32.mrf.mxu1 }
0x1469   :  { %v7086_v14 = vsel %vm1234_vm5, %v6695_v27, -inf }
0x146a   :  { %7087 = vmax.xlane.f32.xlu0 %v7086_v14  ;;  %v6697_v49 = vpop.f32.mrf.mxu1 }
0x146c   :  { %v13651_v13 = vpop.f32.mrf.mxu1 }
0x146e   :  { %v6846_v22 = vpop.f32.mrf.mxu1 }
0x146f   :  { %v16064_v55 = vadd.f32 %v6846_v22, %v14416_v51 }
0x1470   :  { %v6770_v20 = vpop.f32.mrf.mxu0  ;;  %v13662_v28 = vpop.f32.mrf.mxu1 }
0x1471   :  { %v6771_v15 = vadd.f32 %v6770_v20, %v14414_v50  ;;  %v7092_v41 = vsel %vm1234_vm5, %v16064_v55, -inf }
0x1472   :  { %v6849_v29 = vpop.f32.mrf.mxu1  ;;  %7093 = vmax.xlane.f32.xlu1 %v7092_v41  ;;  %v13656_v25 = vpop.f32.mrf.mxu0 }
0x1473   :  { %v7089_v11 = vsel %vm1234_vm5, %v6771_v15, -inf }
0x1474   :  { %v13663_v18 = vpop.f32.mrf.mxu1  ;;  %7090 = vmax.xlane.f32.xlu0 %v7089_v11  ;;  %v6773_v7 = vpop.f32.mrf.mxu0 }
0x1476   :  { %v13657_v24 = vpop.f32.mrf.mxu0  ;;  %v6998_v46 = vpop.f32.mrf.mxu1 }
0x1477   :  { %v16071_v5 = vadd.f32 %v6998_v46, %v14416_v51 }
0x1478   :  { %v6922_v3 = vpop.f32.mrf.mxu0  ;;  %v13674_v57 = vpop.f32.mrf.mxu1 }
0x1479   :  { %v16074_v33 = vadd.f32 %v6922_v3, %v14414_v50  ;;  %v7098_v21 = vsel %vm1234_vm5, %v16071_v5, -inf }
0x147a   :  { %v7001_v61 = vpop.f32.mrf.mxu1  ;;  %7099 = vmax.xlane.f32.xlu1 %v7098_v21  ;;  %v13668_v17 = vpop.f32.mrf.mxu0 }
0x147b   :  { %v7095_v45 = vsel %vm1234_vm5, %v16074_v33, -inf }
0x147c   :  { %v13675_v53 = vpop.f32.mrf.mxu1  ;;  %7096 = vmax.xlane.f32.xlu0 %v7095_v45  ;;  %v6925_v36 = vpop.f32.mrf.mxu0 }
0x147e   :  { %v13669_v60 = vpop.f32.mrf.mxu0 }
0x1480   :  { %v7074_v51 = vpop.f32.mrf.mxu0 }
0x1481   :  { %v7075_v14 = vadd.f32 %v7074_v51, %v14414_v50 }
0x1482   :  { %v13680_v49 = vpop.f32.mrf.mxu0 }
0x1483   :  { %v7101_v13 = vsel %vm1234_vm5, %v7075_v14, -inf }
0x1484   :  { %7102 = vmax.xlane.f32.xlu0 %v7101_v13  ;;  %v7077_v22 = vpop.f32.mrf.mxu0 }
0x1486   :  { %v13681_v20 = vpop.f32.mrf.mxu0 }
0x148b   :  { %7272 = vrot.lane.b32.xlu1 %v15966_v35, %s17708_s6 }
0x148e   :  { %v7082_v28 = vpop.xlane.xlu0 %7081 }
0x148f   :  { %7320 = vrot.lane.b32.xlu1 %v15982_v30, %s17708_s6  ;;  %v7104_v41 = vsub.f32 %v6547_v47, %v7082_v28 }
0x1491   :  { %v7112_v25 = vmul.f32 1.442695, %v7104_v41 }
0x1493   :  { %14036 = vpow2.f32 %v7112_v25 }
0x1496   :  { %v7085_v29 = vpop.xlane.xlu1 %7084 }
0x1497   :  { %v7105_v50 = vsub.f32 %v6619_v19, %v7085_v29 }
0x1499   :  { %v7114_v11 = vmul.f32 1.442695, %v7105_v50 }
0x149a   :  { %7224 = vrot.lane.b32.xlu0 %v15959_v8, %s17708_s6 }
0x149b   :  { %14038 = vpow2.f32 %v7114_v11 }
0x14a0   :  { %v14037_v18 = vpop.eup %14036 }
0x14a1   :  { %v7128_v7 = vsel %vm1234_vm5, %v14037_v18, 0.0 }
0x14a8   :  { %v16089_v24 = vpop.eup %14038 }
0x14a9   :  { %v7131_v35 = vsel %vm1234_vm5, %v16089_v24, 0.0 }
0x14b3   :  { %7129 = vadd.xlane.f32.xlu1 %v7128_v7 }
0x14b9   :  { %7132 = vadd.xlane.f32.xlu0 %v7131_v35 }
0x14f3   :  { %v7088_v30 = vpop.xlane.xlu0 %7087 }
0x14f4   :  { %v7106_v47 = vsub.f32 %v6695_v27, %v7088_v30 }
0x14f6   :  { %v7116_v46 = vmul.f32 1.442695, %v7106_v47 }
0x14f8   :  { %14040 = vpow2.f32 %v7116_v46 }
0x14fd   :  { %v7091_v8 = vpop.xlane.xlu0 %7090 }
0x14fe   :  { %v7107_v3 = vsub.f32 %v6771_v15, %v7091_v8  ;;  %v7094_v15 = vpop.xlane.xlu1 %7093 }
0x14ff   :  { %v7108_v60 = vsub.f32 %v16064_v55, %v7094_v15 }
0x1500   :  { %v7118_v19 = vmul.f32 1.442695, %v7107_v3 }
0x1501   :  { %v7120_v49 = vmul.f32 1.442695, %v7108_v60 }
0x1502   :  { %14042 = vpow2.f32 %v7118_v19 }
0x1503   :  { %v7100_v51 = vpop.xlane.xlu1 %7099  ;;  %14044 = vpow2.f32 %v7120_v49 }
0x1504   :  { %v7110_v13 = vsub.f32 %v16071_v5, %v7100_v51 }
0x1505   :  { %v16093_v57 = vpop.eup %14040  ;;  %v7097_v61 = vpop.xlane.xlu0 %7096 }
0x1506   :  { %v7134_v21 = vsel %vm1234_vm5, %v16093_v57, 0.0  ;;  %v7124_v22 = vmul.f32 1.442695, %v7110_v13  ;;  %v7109_v20 = vsub.f32 %v16074_v33, %v7097_v61 }
0x1507   :  { %7135 = vadd.xlane.f32.xlu1 %v7134_v21  ;;  %v7273_v29 = vpop.permute.xlu1 %7272 }
0x1508   :  { %14046 = vpow2.f32 %v7124_v22  ;;  %v7122_v28 = vmul.f32 1.442695, %v7109_v20  ;;  %v7278_v3 = vand.u32 %v7273_v29, %v14386_v37 }
0x150a   :  { %14048 = vpow2.f32 %v7122_v28 }
0x150b   :  { %v7321_v55 = vpop.permute.xlu1 %7320 }
0x150d   :  { %v7103_v17 = vpop.xlane.xlu0 %7102 }
0x150e   :  { %v7111_v41 = vsub.f32 %v7075_v14, %v7103_v17 }
0x150f   :  { %v16097_v45 = vpop.eup %14042 }
0x1510   :  { %v7137_v53 = vsel %vm1234_vm5, %v16097_v45, 0.0  ;;  %v16110_v25 = vpop.eup %14044 }
0x1511   :  { %7138 = vadd.xlane.f32.xlu0 %v7137_v53  ;;  %v7225_v27 = vpop.permute.xlu0 %7224  ;;  %v7140_v5 = vsel %vm1234_vm5, %v16110_v25, 0.0 }
0x1512   :  { %v7230_v36 = vand.u32 %v7225_v27, %v14386_v37 }
0x1514   :  { %13689 = vmatpush3.bf16.msra.mxu0 %v7230_v36 }
0x1515   :  { %13700 = vmatprep.subr.bf16.mxu0 %v17705_v39  ;;  %v16114_v50 = vpop.eup %14046 }
0x1516   :  { %v7146_v33 = vsel %vm1234_vm5, %v16114_v50, 0.0 }
0x1517   :  { %v16118_v14 = vpop.eup %14048 }
0x1518   :  { %7416 = vrot.lane.b32.xlu1 %v15995_v10, %s17708_s6  ;;  %v7126_v10 = vmul.f32 1.442695, %v7111_v41  ;;  %v7143_v7 = vsel %vm1234_vm5, %v16118_v14, 0.0 }
0x151a   :  { %14050 = vpow2.f32 %v7126_v10 }
0x1527   :  { %7368 = vrot.lane.b32.xlu0 %v15975_v26, %s17708_s6  ;;  %v16122_v35 = vpop.eup %14050 }
0x1528   :  { %v7149_v30 = vsel %vm1234_vm5, %v16122_v35, 0.0 }
0x153c   :  { %7141 = vadd.xlane.f32.xlu1 %v7140_v5  ;;  %v7130_v26 = vpop.xlane.xlu1 %7129 }
0x153d   :  { %14052 = vrcp.f32 %v7130_v26 }
0x1540   :  { %7147 = vadd.xlane.f32.xlu1 %v7146_v33 }
0x1542   :  { %v7133_v11 = vpop.xlane.xlu0 %7132 }
0x1543   :  { %14054 = vrcp.f32 %v7133_v11 }
0x1546   :  { %7144 = vadd.xlane.f32.xlu0 %v7143_v7 }
0x154a   :  { %v14053_v47 = vpop.eup %14052  ;;  %7150 = vadd.xlane.f32.xlu0 %v7149_v30 }
0x154b   :  { %v7160_v46 = vmul.f32 %v14053_v47, %v14037_v18  ;;  %v7326_v18 = vand.u32 %v7321_v55, %v14386_v37 }
0x154d   :  { %v7168_v8 = vpack.c.bf16 %v7160_v46, %v7160_v46 }
0x154f   :  { %13685 = vmatmul.mubr.msk.bf16.vlgmr.msra.gmra.mxu1 %vm1333_vm6, %v7168_v8 }
0x1550   :  { %v14055_v19 = vpop.eup %14054  ;;  %13695 = vmatpush3.bf16.msra.mxu1 %v7278_v3  ;;  %13696 = vmatprep.mubr.msk.bf16.mxu1 %vm14118_vm0, %v17705_v39 }
0x1551   :  { %7512 = vrot.lane.b32.xlu1 %v16008_v44, %s17708_s6  ;;  %v7161_v21 = vmul.f32 %v14055_v19, %v16089_v24  ;;  %13706 = vmatprep.subr.bf16.mxu1 %v17705_v39 }
0x1553   :  { %v7169_v61 = vpack.c.bf16 %v7161_v21, %v7161_v21 }
0x1555   :  { %13691 = vmatmul.mubr.msk.bf16.vlgmr.msra.gmra.mxu0 %vm1333_vm6, %v7169_v61 }
0x1556   :  { %13701 = vmatpush3.bf16.msra.mxu0 %v7326_v18  ;;  %13702 = vmatprep.mubr.msk.bf16.mxu0 %vm14118_vm0, %v17705_v39 }
0x1557   :  { %13712 = vmatprep.subr.bf16.mxu0 %v17705_v39 }
0x1560   :  { %7464 = vrot.lane.b32.xlu0 %v15989_v59, %s17708_s6 }
0x1590   :  { %v7136_v17 = vpop.xlane.xlu1 %7135 }
0x1591   :  { %14056 = vrcp.f32 %v7136_v17 }
0x1594   :  { %v7417_v60 = vpop.permute.xlu1 %7416 }
0x1595   :  { %v7422_v13 = vand.u32 %v7417_v60, %v14386_v37 }
0x159a   :  { %v7139_v44 = vpop.xlane.xlu0 %7138 }
0x159b   :  { %14058 = vrcp.f32 %v7139_v44 }
0x159e   :  { %v14057_v24 = vpop.eup %14056  ;;  %v7369_v53 = vpop.permute.xlu0 %7368 }
0x159f   :  { %v7162_v27 = vmul.f32 %v14057_v24, %v16093_v57  ;;  %v7374_v15 = vand.u32 %v7369_v53, %v14386_v37 }
0x15a1   :  { %v7170_v36 = vpack.c.bf16 %v7162_v27, %v7162_v27 }
0x15a3   :  { %13697 = vmatmul.mubr.msk.bf16.vlgmr.msra.gmra.mxu1 %vm1333_vm6, %v7170_v36 }
0x15a4   :  { %13707 = vmatpush3.bf16.msra.mxu1 %v7374_v15  ;;  %13708 = vmatprep.mubr.msk.bf16.mxu1 %vm14118_vm0, %v17705_v39 }
0x15a5   :  { %13718 = vmatprep.subr.bf16.mxu1 %v17705_v39 }
0x15a8   :  { %v14059_v59 = vpop.eup %14058 }
0x15a9   :  { %v7163_v51 = vmul.f32 %v14059_v59, %v16097_v45 }
0x15ab   :  { %v7171_v49 = vpack.c.bf16 %v7163_v51, %v7163_v51 }
0x15ad   :  { %13703 = vmatmul.mubr.msk.bf16.vlgmr.msra.gmra.mxu0 %vm1333_vm6, %v7171_v49 }
0x15ae   :  { %13713 = vmatpush3.bf16.msra.mxu0 %v7422_v13  ;;  %13714 = vmatprep.mubr.msk.bf16.mxu0 %vm14118_vm0, %v17705_v39 }
0x15af   :  { %13724 = vmatprep.subr.bf16.mxu0 %v17705_v39 }
0x15c5   :  { %v7142_v57 = vpop.xlane.xlu1 %7141 }
0x15c6   :  { %14060 = vrcp.f32 %v7142_v57 }
0x15c9   :  { %v7148_v22 = vpop.xlane.xlu1 %7147 }
0x15ca   :  { %14062 = vrcp.f32 %v7148_v22 }
0x15cd   :  { %v7513_v11 = vpop.permute.xlu1 %7512 }
0x15ce   :  { %v7518_v46 = vand.u32 %v7513_v11, %v14386_v37  ;;  %v13945_v11 = vld [vmem:[%s14537_s2 + $0x10] sm:$0xff]  }
0x15cf   :  { %v7145_v20 = vpop.xlane.xlu0 %7144 }
0x15d0   :  { %14064 = vrcp.f32 %v7145_v20 }
0x15d3   :  { %v14061_v28 = vpop.eup %14060  ;;  %v7151_v41 = vpop.xlane.xlu0 %7150 }
0x15d4   :  { %14066 = vrcp.f32 %v7151_v41  ;;  %v7164_v45 = vmul.f32 %v14061_v28, %v16110_v25 }
0x15d6   :  { %v7172_v29 = vpack.c.bf16 %v7164_v45, %v7164_v45 }
0x15d7   :  { %v14063_v10 = vpop.eup %14062  ;;  %v7465_v55 = vpop.permute.xlu0 %7464 }
0x15d8   :  { %v7470_v5 = vand.u32 %v7465_v55, %v14386_v37  ;;  %13709 = vmatmul.mubr.msk.bf16.vlgmr.msra.gmra.mxu1 %vm1333_vm6, %v7172_v29  ;;  %v7166_v26 = vmul.f32 %v14063_v10, %v16114_v50 }
0x15d9   :  { %13720 = vmatprep.mubr.msk.bf16.mxu1 %vm14118_vm0, %v17705_v39 }
0x15da   :  { %13719 = vmatpush3.bf16.msra.mxu1 %v7470_v5  ;;  %v7174_v7 = vpack.c.bf16 %v7166_v26, %v7166_v26  ;;  %v13944_v5 = vld [vmem:[%s14537_s2 + $0x18] sm:$0xff]  }
0x15db   :  { %13730 = vmatprep.subr.bf16.mxu1 %v17705_v39 }
0x15dd   :  { %v14065_v33 = vpop.eup %14064 }
0x15de   :  { %v7165_v25 = vmul.f32 %v14065_v33, %v16118_v14 }
0x15e0   :  { %13721 = vmatmul.mubr.msk.bf16.vlgmr.msra.gmra.mxu1 %vm1333_vm6, %v7174_v7  ;;  %v7173_v30 = vpack.c.bf16 %v7165_v25, %v7165_v25 }
0x15e1   :  { %v14067_v47 = vpop.eup %14066  ;;  %13734 = vmatprep.mubr.msk.bf16.mxu1 %vm14118_vm0, %v17705_v39  ;;  %13731 = vmatpush3.bf16.msra.mxu1 %v13944_v5 }
0x15e2   :  { %13715 = vmatmul.mubr.msk.bf16.vlgmr.msra.gmra.mxu0 %vm1333_vm6, %v7173_v30  ;;  %v7167_v50 = vmul.f32 %v14067_v47, %v16122_v35  ;;  %13732 = vmatprep.subr.bf16.mxu1 %v17705_v39 }
0x15e3   :  { %13725 = vmatpush3.bf16.msra.mxu0 %v7518_v46  ;;  %13726 = vmatprep.mubr.msk.bf16.mxu0 %vm14118_vm0, %v17705_v39 }
0x15e4   :  { %13738 = vmatprep.subr.bf16.mxu0 %v17705_v39  ;;  %v7175_v14 = vpack.c.bf16 %v7167_v50, %v7167_v50 }
0x15e5   :  { %13733 = vmatpush3.bf16.msra.mxu1 %v13945_v11 }
0x15e6   :  { %13746 = vmatprep.subr.bf16.mxu1 %v17705_v39 }
0x15ea   :  { %13727 = vmatmul.mubr.msk.bf16.vlgmr.msra.gmra.mxu0 %vm1333_vm6, %v7175_v14 }
0x15eb   :  { %13742 = vmatprep.mubr.msk.bf16.mxu0 %vm14118_vm0, %v17705_v39 }
0x160f   :  { %v7218_v37 = vpop.f32.mrf.mxu1 }
0x1611   :  { %v13686_v8 = vpop.f32.mrf.mxu1 }
0x1613   :  { %v7221_v3 = vpop.f32.mrf.mxu1 }
0x1615   :  { %v13687_v19 = vpop.f32.mrf.mxu1  ;;  %v7266_v21 = vpop.f32.mrf.mxu0 }
0x1617   :  { %v13692_v61 = vpop.f32.mrf.mxu0 }
0x1619   :  { %v7269_v18 = vpop.f32.mrf.mxu0 }
0x161b   :  { %v13693_v17 = vpop.f32.mrf.mxu0 }
0x1663   :  { %v7314_v44 = vpop.f32.mrf.mxu1 }
0x1664   :  { %7562 = vrot.lane.b32.xlu0 %v7314_v44, %s17709_s13 }
0x1665   :  { %v13698_v35 = vpop.f32.mrf.mxu1 }
0x1667   :  { %v7317_v24 = vpop.f32.mrf.mxu1 }
0x1669   :  { %v13699_v53 = vpop.f32.mrf.mxu1 }
0x166d   :  { %v7362_v27 = vpop.f32.mrf.mxu0 }
0x166e   :  { %7564 = vrot.lane.b32.xlu1 %v7362_v27, %s17709_s13 }
0x166f   :  { %v13704_v36 = vpop.f32.mrf.mxu0 }
0x1671   :  { %v7365_v15 = vpop.f32.mrf.mxu0 }
0x1673   :  { %v13705_v59 = vpop.f32.mrf.mxu0 }
0x1698   :  { %v7410_v60 = vpop.f32.mrf.mxu1 }
0x1699   :  { %7570 = vrot.lane.b32.xlu0 %v7410_v60, %s17710_s29 }
0x169a   :  { %v13710_v51 = vpop.f32.mrf.mxu1 }
0x169c   :  { %v7413_v49 = vpop.f32.mrf.mxu1 }
0x169e   :  { %v13711_v13 = vpop.f32.mrf.mxu1 }
0x16a0   :  { %v7506_v57 = vpop.f32.mrf.mxu1 }
0x16a1   :  { %7578 = vrot.lane.b32.xlu0 %v7506_v57, %s14132_s3 }
0x16a2   :  { %v7458_v22 = vpop.f32.mrf.mxu0  ;;  %v13722_v20 = vpop.f32.mrf.mxu1 }
0x16a3   :  { %7572 = vrot.lane.b32.xlu1 %v7458_v22, %s17710_s29 }
0x16a4   :  { %v13716_v28 = vpop.f32.mrf.mxu0  ;;  %v7509_v41 = vpop.f32.mrf.mxu1 }
0x16a6   :  { %v7461_v45 = vpop.f32.mrf.mxu0  ;;  %v13723_v29 = vpop.f32.mrf.mxu1 }
0x16a8   :  { %v13717_v10 = vpop.f32.mrf.mxu0 }
0x16aa   :  { %v7554_v55 = vpop.f32.mrf.mxu0 }
0x16ab   :  { %7580 = vrot.lane.b32.xlu1 %v7554_v55, %s14132_s3 }
0x16ac   :  { %v13728_v26 = vpop.f32.mrf.mxu0 }
0x16ae   :  { %v7557_v33 = vpop.f32.mrf.mxu0 }
0x16b0   :  { %v13729_v7 = vpop.f32.mrf.mxu0 }
0x16d6   :  { %v7563_v25 = vpop.permute.xlu0 %7562 }
0x16d7   :  { %v7584_v47 = vsel %vm659_vm2, %v7218_v37, %v7563_v25 }
0x16e0   :  { %v7565_v8 = vpop.permute.xlu1 %7564 }
0x16e1   :  { %v7585_v35 = vsel %vm659_vm2, %v7266_v21, %v7565_v8 }
0x170b   :  { %v7571_v30 = vpop.permute.xlu0 %7570 }
0x170c   :  { %v7586_v46 = vsel %vm1746_vm7, %v7584_v47, %v7571_v30 }
0x1713   :  { %v7579_v50 = vpop.permute.xlu0 %7578 }
0x1714   :  { %v7588_v14 = vsel %vm1749_vm8, %v7586_v46, %v7579_v50 }
0x1715   :  { %v7592_v3 = vcombine.high %v7588_v14, %v7588_v14  ;;  %v7599_v19 = vrot.slane %v7588_v14, %v14176_v6  ;;  %v7573_v17 = vpop.permute.xlu1 %7572 }
0x1716   :  { %v7587_v37 = vsel %vm1746_vm7, %v7585_v35, %v7573_v17 }
0x1717   :  { %v7606_v61 = vrot.slane %v7592_v3, %v14176_v6  ;;  %v7607_v18 = vcombine.high %v7599_v19, %v7599_v19  ;;  %v7615_v27 = vrot.slane %v7599_v19, %v14176_v6 }
0x1719   :  { %v7608_v44 = vcombine.high %v7606_v61, %v7606_v61  ;;  %v7629_v24 = vrot.slane %v7607_v18, %v14176_v6  ;;  %v7622_v36 = vrot.slane %v7606_v61, %v14176_v6 }
0x171b   :  { %v7636_v15 = vrot.slane %v7608_v44, %v14176_v6  ;;  %v7688_v49 = vcombine.low %v7615_v27, %v7629_v24  ;;  %v13084_v13 = vcombine.high %v7615_v27, %v7629_v24  ;;  %v7638_v28 = vcombine.high %v7622_v36, %v7622_v36 }
0x171d   :  { %v7581_v53 = vpop.permute.xlu1 %7580  ;;  %v7690_v20 = vcombine.low %v7622_v36, %v7636_v15  ;;  %v7698_v55 = vrot.slane %v7688_v49, %v14176_v6  ;;  %v7705_v5 = vrot.slane %v13084_v13, %v14176_v6  ;;  %v13090_v36 = vld [vmem:[%s14581_s7 + $0x1] ss:$0 sm:$0xff] }
0x171e   :  { %v7589_v59 = vsel %vm1749_vm8, %v7587_v37, %v7581_v53 }
0x171f   :  { %v7640_v60 = vcombine.high %v7589_v59, %v7589_v59  ;;  %v7647_v51 = vrot.slane %v7589_v59, %v14176_v6  ;;  %v7712_v30 = vrot.slane %v7690_v20, %v14176_v6  ;;  %v7720_v8 = vcombine.low %v7698_v55, %v7705_v5 }
0x1721   :  { %v7654_v21 = vrot.slane %v7640_v60, %v14176_v6  ;;  %v7655_v57 = vcombine.high %v7647_v51, %v7647_v51  ;;  %v7663_v22 = vrot.slane %v7647_v51, %v14176_v6  ;;  %v7728_v44 = vrot.slane %v7720_v8, %v14176_v6 }
0x1723   :  { %v7656_v41 = vcombine.high %v7654_v21, %v7654_v21  ;;  %v7670_v45 = vrot.slane %v7654_v21, %v14176_v6  ;;  %v7677_v29 = vrot.slane %v7655_v57, %v14176_v6  ;;  %v7685_v10 = vcombine.high %v7663_v22, %v7663_v22 }
0x1724   :  { %v7691_v26 = vcombine.low %v7638_v28, %v7663_v22 }
0x1725   :  { %v7684_v33 = vrot.slane %v7656_v41, %v14176_v6  ;;  %v7686_v11 = vcombine.high %v7670_v45, %v7670_v45  ;;  %v7687_v7 = vcombine.high %v7677_v29, %v7677_v29  ;;  %v7737_v25 = vcombine.low %v7677_v29, %v7685_v10 }
0x1726   :  { %v7719_v47 = vrot.slane %v7691_v26, %v14176_v6 }
0x1727   :  { %v7738_v46 = vcombine.low %v7687_v7, %v7670_v45  ;;  %v7739_v50 = vcombine.low %v7684_v33, %v7686_v11  ;;  %v7746_v3 = vrot.slane %v7737_v25, %v14176_v6 }
0x1728   :  { %v7721_v14 = vcombine.low %v7712_v30, %v7719_v47 }
0x1729   :  { %v7753_v19 = vrot.slane %v7738_v46, %v14176_v6  ;;  %v7760_v61 = vrot.slane %v7739_v50, %v14176_v6 }
0x172a   :  { %v7735_v18 = vrot.slane %v7721_v14, %v14176_v6 }
0x172b   :  { %v7761_v17 = vcombine.low %v7746_v3, %v7753_v19  ;;  %v7775_v24 = vrot.slane %v7760_v61, %v14176_v6 }
0x172c   :  { %v7736_v37 = vcombine.low %v7728_v44, %v7735_v18 }
0x172d   :  { %v7768_v35 = vrot.slane %v7761_v17, %v14176_v6 }
0x172f   :  { %v7776_v53 = vcombine.low %v7768_v35, %v7775_v24 }
0x1731   :  { %v7779_v27 = vpack.c.bf16 %v7776_v53, %v7736_v37 }
0x1733   :  { %13735 = vmatmul.mubr.msk.bf16.vlgmr.msra.gmra.mxu1 %vm426_vm1, %v7779_v27 }
0x1734   :  { %13750 = vmatprep.mubr.msk.bf16.mxu1 %vm14118_vm0, %v17705_v39 }
0x17f3   :  { %v7842_v15 = vpop.f32.mrf.mxu1 }
0x17f4   :  { %v7843_v59 = vadd.f32 %v13090_v36, %v7842_v15 }
0x17f5   :  { %v13736_v60 = vpop.f32.mrf.mxu1 }
0x17f6   :  { %v7851_v51 = vcombine.high %v7843_v59, %v7843_v59  ;;  %v7858_v49 = vrot.slane %v7843_v59, %v14176_v6 }
0x17f7   :  { %v7845_v13 = vpop.f32.mrf.mxu1 }
0x17f8   :  { %v7865_v21 = vrot.slane %v7851_v51, %v14176_v6  ;;  %v7866_v57 = vcombine.high %v7858_v49, %v7858_v49  ;;  %v7874_v22 = vrot.slane %v7858_v49, %v14176_v6  ;;  %v7846_v20 = vadd.f32 %v13090_v36, %v7845_v13 }
0x17f9   :  { %v13737_v28 = vpop.f32.mrf.mxu1 }
0x17fa   :  { %v7867_v41 = vcombine.high %v7865_v21, %v7865_v21  ;;  %v7881_v45 = vrot.slane %v7865_v21, %v14176_v6  ;;  %v7888_v29 = vrot.slane %v7866_v57, %v14176_v6  ;;  %v7896_v10 = vcombine.high %v7874_v22, %v7874_v22 }
0x17fb   :  { %v16222_v55 = vadd.f32 %v7874_v22, %v15849_v12  ;;  %v7900_v5 = vcombine.high %v7846_v20, %v7846_v20  ;;  %v7907_v26 = vrot.slane %v7846_v20, %v14176_v6 }
0x17fc   :  { %v7895_v33 = vrot.slane %v7867_v41, %v14176_v6  ;;  %v7897_v11 = vcombine.high %v7881_v45, %v7881_v45  ;;  %v7898_v7 = vcombine.high %v7888_v29, %v7888_v29  ;;  %v16227_v25 = vadd.f32 %v7888_v29, %v15852_v54 }
0x17fd   :  { %v16230_v30 = vadd.f32 %v7896_v10, %v15860_v4  ;;  %v16233_v47 = vadd.f32 %v7881_v45, %v15865_v16  ;;  %v7914_v46 = vrot.slane %v7900_v5, %v14176_v6  ;;  %v7915_v12 = vcombine.high %v7907_v26, %v7907_v26 }
0x17fe   :  { %v7899_v50 = vcombine.high %v7895_v33, %v7895_v33  ;;  %v7964_v14 = vadd.f32 %v7898_v7, %v15862_v1  ;;  %v7966_v8 = vadd.f32 %v7895_v33, %v15868_v48  ;;  %v7967_v3 = vadd.f32 %v7897_v11, %v15870_v62 }
0x17ff   :  { %v7993_v54 = vcombine.low %v16222_v55, %v16227_v25  ;;  %v7916_v19 = vcombine.high %v7914_v46, %v7914_v46  ;;  %v7923_v4 = vrot.slane %v7907_v26, %v14176_v6  ;;  %v7930_v61 = vrot.slane %v7914_v46, %v14176_v6 }
0x1800   :  { %v7968_v16 = vadd.f32 %v7899_v50, %v15872_v40  ;;  %v7994_v18 = vcombine.low %v16230_v30, %v7964_v14  ;;  %v7995_v17 = vcombine.low %v16233_v47, %v7966_v8  ;;  %v7937_v1 = vrot.slane %v7915_v12, %v14176_v6 }
0x1801   :  { %v7944_v48 = vrot.slane %v7916_v19, %v14176_v6  ;;  %v7945_v44 = vcombine.high %v7923_v4, %v7923_v4  ;;  %v16249_v62 = vadd.f32 %v7923_v4, %v15875_v63  ;;  %v16255_v37 = vadd.f32 %v7930_v61, %v15885_v56 }
0x1802   :  { %v7946_v35 = vcombine.high %v7937_v1, %v7937_v1  ;;  %v16252_v24 = vadd.f32 %v7937_v1, %v15878_v2  ;;  %v7996_v40 = vcombine.low %v7967_v3, %v7968_v16  ;;  %v8003_v36 = vrot.slane %v7993_v54, %v14176_v6 }
0x1803   :  { %v16258_v53 = vadd.f32 %v7945_v44, %v15880_v52  ;;  %v16261_v27 = vadd.f32 %v7944_v48, %v15888_v32  ;;  %v8010_v15 = vrot.slane %v7994_v18, %v14176_v6  ;;  %v8017_v56 = vrot.slane %v7995_v17, %v14176_v6 }
0x1804   :  { %v16266_v63 = vadd.f32 %v7946_v35, %v15882_v23  ;;  %v8042_v2 = vcombine.low %v16249_v62, %v16252_v24  ;;  %v8024_v59 = vrot.slane %v7996_v40, %v14176_v6 }
0x1805   :  { %v8025_v60 = vcombine.low %v8003_v36, %v8010_v15  ;;  %v8044_v52 = vcombine.low %v16255_v37, %v16261_v27 }
0x1806   :  { %v8043_v32 = vcombine.low %v16258_v53, %v16266_v63  ;;  %v8026_v51 = vcombine.low %v8017_v56, %v8024_v59  ;;  %v8051_v49 = vrot.slane %v8042_v2, %v14176_v6 }
0x1807   :  { %v8033_v23 = vrot.slane %v8025_v60, %v14176_v6  ;;  %v8065_v57 = vrot.slane %v8044_v52, %v14176_v6 }
0x1808   :  { %v8040_v13 = vrot.slane %v8026_v51, %v14176_v6  ;;  %v8058_v21 = vrot.slane %v8043_v32, %v14176_v6 }
0x1809   :  { %v8080_v45 = vrot.slane %v8065_v57, %v14176_v6 }
0x180a   :  { %v8041_v22 = vcombine.low %v8033_v23, %v8040_v13  ;;  %v8066_v20 = vcombine.low %v8051_v49, %v8058_v21 }
0x180c   :  { %v8084_v28 = vsel %vm426_vm1, %v8041_v22, 0.0  ;;  %v8073_v41 = vrot.slane %v8066_v20, %v14176_v6 }
0x180d   :  { %8085 = vadd.xlane.f32.xlu0 %v8084_v28 }
0x180e   :  { %v8081_v29 = vcombine.low %v8073_v41, %v8080_v45 }
0x1810   :  { %v8087_v10 = vsel %vm2245_vm9, %v8081_v29, 0.0 }
0x1811   :  { %8088 = vadd.xlane.f32.xlu1 %v8087_v10 }
0x1896   :  { %v8086_v5 = vpop.xlane.xlu0 %8085 }
0x1897   :  { %v8090_v26 = vmul.f32 0.03125, %v8086_v5 }
0x1899   :  { %v8097_v33 = vrot.slane %v8090_v26, %v14408_v42  ;;  %v8101_v11 = vrot.slane %v8090_v26, %v14668_v58  ;;  %v8105_v7 = vrot.slane %v8090_v26, %v14671_v31  ;;  %v8109_v46 = vrot.slane %v8090_v26, %v14674_v38 }
0x189a   :  { %v8089_v12 = vpop.xlane.xlu1 %8088  ;;  %v8113_v50 = vrot.slane %v8090_v26, %v14677_v9  ;;  %v8117_v54 = vrot.slane %v8090_v26, %v14680_v0  ;;  %v8121_v19 = vrot.slane %v8090_v26, %v14683_v43  ;;  %v8125_v4 = vrot.slane %v8090_v26, %v14686_v34 }
0x189b   :  { %v8091_v61 = vmul.f32 0.03125, %v8089_v12  ;;  %v16294_v18 = vsub.f32 %v16222_v55, %v8097_v33  ;;  %v16297_v17 = vsub.f32 %v16227_v25, %v8101_v11  ;;  %v16300_v1 = vsub.f32 %v16230_v30, %v8105_v7 }
0x189c   :  { %v16302_v48 = vsub.f32 %v7964_v14, %v8109_v46  ;;  %v16305_v44 = vsub.f32 %v16233_v47, %v8113_v50  ;;  %v16307_v35 = vsub.f32 %v7966_v8, %v8117_v54  ;;  %v16309_v40 = vsub.f32 %v7967_v3, %v8121_v19 }
0x189d   :  { %v16311_v36 = vsub.f32 %v7968_v16, %v8125_v4  ;;  %v8178_v55 = vmul.f32 %v16294_v18, %v16294_v18  ;;  %v8179_v25 = vmul.f32 %v16297_v17, %v16297_v17  ;;  %v8180_v30 = vmul.f32 %v16300_v1, %v16300_v1 }
0x189e   :  { %v8181_v14 = vmul.f32 %v16302_v48, %v16302_v48  ;;  %v8182_v47 = vmul.f32 %v16305_v44, %v16305_v44  ;;  %v8183_v8 = vmul.f32 %v16307_v35, %v16307_v35  ;;  %v8184_v3 = vmul.f32 %v16309_v40, %v16309_v40 }
0x189f   :  { %v8185_v16 = vmul.f32 %v16311_v36, %v16311_v36  ;;  %v8206_v15 = vcombine.low %v8178_v55, %v8179_v25  ;;  %v8129_v2 = vrot.slane %v8091_v61, %v14408_v42  ;;  %v8133_v56 = vrot.slane %v8091_v61, %v14668_v58 }
0x18a0   :  { %v8207_v59 = vcombine.low %v8180_v30, %v8181_v14  ;;  %v8208_v60 = vcombine.low %v8182_v47, %v8183_v8  ;;  %v8137_v52 = vrot.slane %v8091_v61, %v14671_v31  ;;  %v8141_v32 = vrot.slane %v8091_v61, %v14674_v38  ;;  %v13946_v8 = vld [vmem:[%s14788_s11 + $0x18] sm:$0xff]  }
0x18a1   :  { %v8209_v51 = vcombine.low %v8184_v3, %v8185_v16  ;;  %v8216_v49 = vrot.slane %v8206_v15, %v14176_v6  ;;  %v8145_v23 = vrot.slane %v8091_v61, %v14677_v9  ;;  %v8149_v13 = vrot.slane %v8091_v61, %v14680_v0  ;;  %v13948_v3 = vld [vmem:[%s14796_s25 + $0x18] sm:$0xff]   ;;  %13747 = vmatpush3.bf16.msra.mxu1 %v13946_v8  ;;  %v13947_v16 = vld [vmem:[%s14788_s11 + $0x10] sm:$0xff]   ;;  %s14151_s11 = smov 26  }
0x18a2   :  { %v8223_v21 = vrot.slane %v8207_v59, %v14176_v6  ;;  %v8230_v57 = vrot.slane %v8208_v60, %v14176_v6  ;;  %v16339_v22 = vsub.f32 %v16249_v62, %v8129_v2  ;;  %v16342_v20 = vsub.f32 %v16252_v24, %v8133_v56  ;;  %13739 = vmatpush3.bf16.msra.mxu0 %v13948_v3  ;;  %v13949_v15 = vld [vmem:[%s14796_s25 + $0x10] sm:$0xff]   ;;  %v17711_v2 = vld [vmem:[#allocation2_spill] sm:$0xff] }
0x18a3   :  { %v8237_v28 = vrot.slane %v8209_v51, %v14176_v6  ;;  %v16346_v41 = vsub.f32 %v16258_v53, %v8137_v52  ;;  %v16349_v45 = vsub.f32 %v16266_v63, %v8141_v32  ;;  %v16352_v29 = vsub.f32 %v16255_v37, %v8145_v23  ;;  %13748 = vmatprep.subr.bf16.mxu1 %v17705_v39  ;;  %v13096_v56 = vld [vmem:[%s14815_s1 + $0x1] ss:$0 sm:$0xff] }
0x18a4   :  { %v8238_v10 = vcombine.low %v8216_v49, %v8223_v21  ;;  %v16355_v5 = vsub.f32 %v16261_v27, %v8149_v13  ;;  %v8186_v62 = vmul.f32 %v16339_v22, %v16339_v22  ;;  %v8187_v24 = vmul.f32 %v16342_v20, %v16342_v20  ;;  %13740 = vmatprep.subr.bf16.mxu0 %v17705_v39  ;;  %v13097_v59 = vld [vmem:[%s14820_s9 + $0x1] ss:$0 sm:$0xff]  ;;  %s12962_s9 = sld [smem:[%s17690_s0 + %s14151_s11]]  }
0x18a5   :  { %v8239_v26 = vcombine.low %v8230_v57, %v8237_v28  ;;  %v8188_v53 = vmul.f32 %v16346_v41, %v16346_v41  ;;  %v8189_v63 = vmul.f32 %v16349_v45, %v16349_v45  ;;  %v8190_v37 = vmul.f32 %v16352_v29, %v16352_v29  ;;  %13749 = vmatpush3.bf16.msra.mxu1 %v13947_v16 }
0x18a6   :  { %v8246_v33 = vrot.slane %v8238_v10, %v14176_v6  ;;  %v8191_v27 = vmul.f32 %v16355_v5, %v16355_v5  ;;  %v8255_v11 = vcombine.low %v8186_v62, %v8187_v24  ;;  %13741 = vmatpush3.bf16.msra.mxu0 %v13949_v15  ;;  %13760 = vmatprep.subr.bf16.mxu1 %v17705_v39 }
0x18a7   :  { %v8253_v7 = vrot.slane %v8239_v26, %v14176_v6  ;;  %v8256_v46 = vcombine.low %v8188_v53, %v8189_v63  ;;  %13754 = vmatprep.subr.bf16.mxu0 %v17705_v39  ;;  %v8400_v32 = vcombine.high %v13096_v56, %v13096_v56  ;;  %v8476_v51 = vcombine.high %v13097_v59, %v13097_v59 }
0x18a8   :  { %v8257_v12 = vcombine.low %v8190_v37, %v8191_v27  ;;  %v8264_v50 = vrot.slane %v8255_v11, %v14176_v6  ;;  %13751 = vmatmul.mubr.msk.bf16.vlgmr.msra.gmra.mxu1 %vm426_vm1, %v17711_v2  ;;  %v8407_v23 = vrot.slane %v13096_v56, %v14176_v6  ;;  %v8483_v57 = vrot.slane %v13097_v59, %v14176_v6 }
0x18a9   :  { %v8254_v54 = vcombine.low %v8246_v33, %v8253_v7  ;;  %v8271_v19 = vrot.slane %v8256_v46, %v14176_v6  ;;  %13762 = vmatprep.mubr.msk.bf16.mxu1 %vm14118_vm0, %v17705_v39  ;;  %v8414_v13 = vrot.slane %v8400_v32, %v14176_v6  ;;  %v8490_v28 = vrot.slane %v8476_v51, %v14176_v6 }
0x18aa   :  { %v8278_v4 = vrot.slane %v8257_v12, %v14176_v6  ;;  %v8415_v24 = vcombine.high %v8407_v23, %v8407_v23  ;;  %v8491_v53 = vcombine.high %v8483_v57, %v8483_v57  ;;  %v8423_v37 = vrot.slane %v8407_v23, %v14176_v6 }
0x18ab   :  { %v8297_v61 = vsel %vm426_vm1, %v8254_v54, 0.0  ;;  %v8279_v55 = vcombine.low %v8264_v50, %v8271_v19  ;;  %v8416_v26 = vcombine.high %v8414_v13, %v8414_v13  ;;  %v8492_v63 = vcombine.high %v8490_v28, %v8490_v28 }
0x18ac   :  { %8298 = vadd.xlane.f32.xlu0 %v8297_v61  ;;  %v8293_v30 = vrot.slane %v8278_v4, %v14176_v6  ;;  %v8430_v33 = vrot.slane %v8414_v13, %v14176_v6  ;;  %v8437_v27 = vrot.slane %v8415_v24, %v14176_v6  ;;  %v16401_v7 = vrot.slane %v8483_v57, %v14176_v6 }
0x18ad   :  { %v8286_v25 = vrot.slane %v8279_v55, %v14176_v6  ;;  %v8444_v11 = vrot.slane %v8416_v26, %v14176_v6  ;;  %v16404_v46 = vrot.slane %v8490_v28, %v14176_v6  ;;  %v16407_v12 = vrot.slane %v8491_v53, %v14176_v6 }
0x18ae   :  { %v16410_v50 = vrot.slane %v8492_v63, %v14176_v6  ;;  %v8445_v54 = vcombine.high %v8423_v37, %v8423_v37  ;;  %v8446_v19 = vcombine.high %v8430_v33, %v8430_v33  ;;  %v8447_v4 = vcombine.high %v8437_v27, %v8437_v27 }
0x18af   :  { %v8294_v14 = vcombine.low %v8286_v25, %v8293_v30  ;;  %v8448_v61 = vcombine.high %v8444_v11, %v8444_v11  ;;  %v8521_v25 = vcombine.high %v16401_v7, %v16401_v7  ;;  %v8522_v30 = vcombine.high %v16404_v46, %v16404_v46 }
0x18b1   :  { %v8300_v47 = vsel %vm2245_vm9, %v8294_v14, 0.0  ;;  %v8523_v14 = vcombine.high %v16407_v12, %v16407_v12 }
0x18b2   :  { %8301 = vadd.xlane.f32.xlu0 %v8300_v47  ;;  %v8524_v47 = vcombine.high %v16410_v50, %v16410_v50 }
0x1935   :  { %v8299_v60 = vpop.xlane.xlu0 %8298 }
0x1936   :  { %v8303_v52 = vmul.f32 0.03125, %v8299_v60 }
0x1938   :  { %v8305_v49 = vadd.f32 1e-05, %v8303_v52 }
0x193a   :  { %14068 = vrsqrt.f32 %v8305_v49 }
0x193b   :  { %v8302_v21 = vpop.xlane.xlu0 %8301 }
0x193c   :  { %v8304_v10 = vmul.f32 0.03125, %v8302_v21 }
0x193e   :  { %v8306_v62 = vadd.f32 1e-05, %v8304_v10 }
0x1940   :  { %14070 = vrsqrt.f32 %v8306_v62 }
0x1947   :  { %v14069_v55 = vpop.eup %14068 }
0x1948   :  { %v8314_v8 = vrot.slane %v14069_v55, %v14408_v42  ;;  %v8318_v3 = vrot.slane %v14069_v55, %v14668_v58  ;;  %v8322_v16 = vrot.slane %v14069_v55, %v14671_v31  ;;  %v8326_v15 = vrot.slane %v14069_v55, %v14674_v38 }
0x1949   :  { %v8330_v2 = vrot.slane %v14069_v55, %v14677_v9  ;;  %v8334_v56 = vrot.slane %v14069_v55, %v14680_v0  ;;  %v8338_v59 = vrot.slane %v14069_v55, %v14683_v43  ;;  %v8342_v60 = vrot.slane %v14069_v55, %v14686_v34 }
0x194a   :  { %v8381_v52 = vmul.f32 %v8314_v8, %v16294_v18  ;;  %v8382_v32 = vmul.f32 %v8318_v3, %v16297_v17  ;;  %v8383_v51 = vmul.f32 %v8322_v16, %v16300_v1  ;;  %v8384_v49 = vmul.f32 %v8326_v15, %v16302_v48 }
0x194b   :  { %v8385_v23 = vmul.f32 %v8330_v2, %v16305_v44  ;;  %v8386_v13 = vmul.f32 %v8334_v56, %v16307_v35  ;;  %v8387_v21 = vmul.f32 %v8338_v59, %v16309_v40  ;;  %v8388_v57 = vmul.f32 %v8342_v60, %v16311_v36 }
0x194c   :  { %v8457_v28 = vmul.f32 %v8423_v37, %v8381_v52  ;;  %v8458_v10 = vmul.f32 %v8437_v27, %v8382_v32  ;;  %v8459_v62 = vmul.f32 %v8445_v54, %v8383_v51  ;;  %v8460_v24 = vmul.f32 %v8447_v4, %v8384_v49 }
0x194d   :  { %v14071_v26 = vpop.eup %14070  ;;  %v8461_v18 = vmul.f32 %v8430_v33, %v8385_v23  ;;  %v8462_v53 = vmul.f32 %v8444_v11, %v8386_v13  ;;  %v8463_v17 = vmul.f32 %v8446_v19, %v8387_v21  ;;  %v8464_v63 = vmul.f32 %v8448_v61, %v8388_v57 }
0x194e   :  { %v8346_v1 = vrot.slane %v14071_v26, %v14408_v42  ;;  %v8350_v48 = vrot.slane %v14071_v26, %v14668_v58  ;;  %v8354_v44 = vrot.slane %v14071_v26, %v14671_v31  ;;  %v8358_v35 = vrot.slane %v14071_v26, %v14674_v38 }
0x194f   :  { %v8362_v40 = vrot.slane %v14071_v26, %v14677_v9  ;;  %v8366_v36 = vrot.slane %v14071_v26, %v14680_v0  ;;  %v16443_v55 = vadd.f32 %v16401_v7, %v8457_v28  ;;  %v16446_v8 = vadd.f32 %v16407_v12, %v8458_v10 }
0x1950   :  { %v8389_v19 = vmul.f32 %v8346_v1, %v16339_v22  ;;  %v8390_v61 = vmul.f32 %v8350_v48, %v16342_v20  ;;  %v8391_v3 = vmul.f32 %v8354_v44, %v16346_v41  ;;  %v8392_v16 = vmul.f32 %v8358_v35, %v16349_v45  ;;  %v13113_v44 = vld [vmem:[%s14947_s20 + $0x1] ss:$0 sm:$0xff]  ;;  %s14152_s20 = smov 28  }
0x1951   :  { %v8393_v15 = vmul.f32 %v8362_v40, %v16352_v29  ;;  %v8394_v2 = vmul.f32 %v8366_v36, %v16355_v5  ;;  %v16454_v56 = vadd.f32 %v8521_v25, %v8459_v62  ;;  %v16456_v59 = vadd.f32 %v8523_v14, %v8460_v24 }
0x1952   :  { %v8465_v60 = vmul.f32 %v8423_v37, %v8389_v19  ;;  %v8466_v52 = vmul.f32 %v8437_v27, %v8390_v61  ;;  %v8467_v32 = vmul.f32 %v8445_v54, %v8391_v3  ;;  %v8468_v51 = vmul.f32 %v8447_v4, %v8392_v16 }
0x1953   :  { %v8469_v49 = vmul.f32 %v8430_v33, %v8393_v15  ;;  %v8470_v22 = vmul.f32 %v8444_v11, %v8394_v2  ;;  %v16459_v20 = vadd.f32 %v16404_v46, %v8461_v18  ;;  %v16462_v41 = vadd.f32 %v16410_v50, %v8462_v53 }
0x1954   :  { %v16464_v45 = vadd.f32 %v8522_v30, %v8463_v17  ;;  %v16466_v29 = vadd.f32 %v8524_v47, %v8464_v63  ;;  %v16469_v5 = vadd.f32 %v16401_v7, %v8465_v60  ;;  %v16472_v37 = vadd.f32 %v16407_v12, %v8466_v52 }
0x1955   :  { %v16474_v27 = vadd.f32 %v8521_v25, %v8467_v32  ;;  %v16476_v33 = vadd.f32 %v8523_v14, %v8468_v51  ;;  %v16479_v11 = vadd.f32 %v16404_v46, %v8469_v49  ;;  %v16482_v54 = vadd.f32 %v16410_v50, %v8470_v22  ;;  %v13103_v32 = vld [vmem:[%s14971_s24 + $0x1] ss:$0 sm:$0xff] }
0x1956   :  { %v8561_v4 = vcombine.low %v16443_v55, %v16446_v8  ;;  %v8562_v7 = vcombine.low %v16454_v56, %v16456_v59  ;;  %v8563_v12 = vcombine.low %v16459_v20, %v16462_v41  ;;  %v8564_v25 = vcombine.low %v16464_v45, %v16466_v29 }
0x1957   :  { %v8610_v30 = vcombine.low %v16469_v5, %v16472_v37  ;;  %v8611_v46 = vcombine.low %v16474_v27, %v16476_v33  ;;  %v8612_v50 = vcombine.low %v16479_v11, %v16482_v54 }
0x1958   :  { %v8571_v14 = vrot.slane %v8561_v4, %v14176_v6  ;;  %v8578_v47 = vrot.slane %v8562_v7, %v14176_v6  ;;  %v8585_v23 = vrot.slane %v8563_v12, %v14176_v6  ;;  %v8592_v13 = vrot.slane %v8564_v25, %v14176_v6 }
0x1959   :  { %v8619_v21 = vrot.slane %v8610_v30, %v14176_v6  ;;  %v8626_v57 = vrot.slane %v8611_v46, %v14176_v6  ;;  %v8633_v28 = vrot.slane %v8612_v50, %v14176_v6 }
0x195a   :  { %v8593_v10 = vcombine.low %v8571_v14, %v8578_v47  ;;  %v8594_v62 = vcombine.low %v8585_v23, %v8592_v13 }
0x195b   :  { %v8634_v24 = vcombine.low %v8619_v21, %v8626_v57  ;;  %v8648_v17 = vrot.slane %v8633_v28, %v14176_v6 }
0x195c   :  { %v8601_v26 = vrot.slane %v8593_v10, %v14176_v6  ;;  %v8608_v18 = vrot.slane %v8594_v62, %v14176_v6 }
0x195d   :  { %v8641_v53 = vrot.slane %v8634_v24, %v14176_v6 }
0x195e   :  { %v8609_v63 = vcombine.low %v8601_v26, %v8608_v18 }
0x195f   :  { %v8649_v1 = vcombine.low %v8641_v53, %v8648_v17 }
0x1961   :  { %v8652_v48 = vpack.c.bf16 %v8649_v1, %v8609_v63 }
0x1963   :  { %13743 = vmatmul.mubr.msk.bf16.vlgmr.msra.gmra.mxu0 %vm426_vm1, %v8652_v48 }
0x1964   :  { %13756 = vmatprep.mubr.msk.bf16.mxu0 %vm14118_vm0, %v17705_v39 }
0x1968   :  { %v8845_v35 = vpop.f32.mrf.mxu1 }
0x1969   :  { %v8846_v40 = vadd.f32 %v13113_v44, %v8845_v35 }
0x196a   :  { %v13752_v36 = vpop.f32.mrf.mxu1 }
0x196b   :  { %v16513_v19 = vpack.c.bf16 %v8846_v40, %v8846_v40 }
0x196c   :  { %v8848_v61 = vpop.f32.mrf.mxu1 }
0x196d   :  { %v8849_v3 = vadd.f32 %v13113_v44, %v8848_v61  ;;  %8956 = vrot.lane.b32.xlu0 %v16513_v19, %s14122_s15  ;;  %v8996_v2 = vsel %vm659_vm2, %v16513_v19, 0 }
0x196e   :  { %v13753_v16 = vpop.f32.mrf.mxu1  ;;  %13755 = vmatpush3.bf16.xpose.msra.mxu0 %v8996_v2 }
0x196f   :  { %v16517_v15 = vpack.c.bf16 %v8849_v3, %v8849_v3  ;;  %13766 = vmatprep.subr.bf16.mxu0 %v17705_v39 }
0x1971   :  { %8958 = vrot.lane.b32.xlu1 %v16517_v15, %s14122_s15  ;;  %8960 = vrot.lane.b32.xlu0 %v16513_v19, %s14121_s14  ;;  %v9066_v60 = vsel %vm659_vm2, %v16517_v15, 0 }
0x1972   :  { %13761 = vmatpush3.bf16.xpose.msra.mxu1 %v9066_v60 }
0x1973   :  { %13772 = vmatprep.subr.bf16.mxu1 %v17705_v39 }
0x1975   :  { %8962 = vrot.lane.b32.xlu1 %v16517_v15, %s14121_s14 }
0x19df   :  { %v16548_v60 = vpop.permute.xlu0 %8956 }
0x1a23   :  { %v8715_v52 = vpop.f32.mrf.mxu0 }
0x1a24   :  { %v8716_v22 = vadd.f32 %v13103_v32, %v8715_v52 }
0x1a25   :  { %v13744_v51 = vpop.f32.mrf.mxu0 }
0x1a26   :  { %v9140_v51 = vsel %vm659_vm2, %v16548_v60, 0 }
0x1a27   :  { %v8718_v49 = vpop.f32.mrf.mxu0 }
0x1a28   :  { %v8719_v4 = vadd.f32 %v13103_v32, %v8718_v49 }
0x1a29   :  { %v13745_v7 = vpop.f32.mrf.mxu0 }
0x1a2a   :  { %v8722_v12 = vpack.c.bf16 %v8719_v4, %v8716_v22  ;;  %v13107_v25 = vpack.c.bf16 %v8719_v4, %v8719_v4  ;;  %v16557_v22 = vpop.permute.xlu1 %8958  ;;  %v16590_v7 = vpop.permute.xlu0 %8960 }
0x1a2b   :  { %v9214_v4 = vsel %vm659_vm2, %v16557_v22, 0 }
0x1a2c   :  { %v8731_v30 = vrot.slane %v8722_v12, %v14176_v6  ;;  %v8738_v46 = vrot.slane %v13107_v25, %v14176_v6 }
0x1a2e   :  { %v8739_v50 = vcombine.high %v8731_v30, %v8731_v30  ;;  %v8740_v14 = vcombine.high %v8738_v46, %v8738_v46  ;;  %v8747_v47 = vrot.slane %v8731_v30, %v14176_v6  ;;  %v8754_v23 = vrot.slane %v8738_v46, %v14176_v6  ;;  %v16592_v12 = vpop.permute.xlu1 %8962 }
0x1a30   :  { %v8761_v13 = vrot.slane %v8739_v50, %v14176_v6  ;;  %v8768_v21 = vrot.slane %v8740_v14, %v14176_v6  ;;  %8896 = vrot.lane.b32.xlu0 %v8747_v47, %s14121_s14  ;;  %8866 = vrot.lane.b32.xlu1 %v8747_v47, %s14122_s15  ;;  %v8770_v57 = vcombine.high %v8754_v23, %v8754_v23  ;;  %v8781_v10 = vunpack.i.h.s16 %v8754_v23 }
0x1a31   :  { %v8769_v26 = vcombine.high %v8747_v47, %v8747_v47 }
0x1a32   :  { %v8771_v28 = vcombine.high %v8761_v13, %v8761_v13  ;;  %v8783_v62 = vunpack.i.h.s16 %v8768_v21  ;;  %v8968_v24 = vcombine.low %v8747_v47, %v8761_v13  ;;  %v8785_v17 = vunpack.i.h.s16 %v8770_v57 }
0x1a33   :  { %v13120_v48 = vpack.i.b16 %v8768_v21, %v8781_v10 }
0x1a34   :  { %v8778_v18 = vunpack.i.l.s16 %v8771_v28  ;;  %v8779_v53 = vunpack.i.h.s16 %v8771_v28  ;;  %8926 = vrot.lane.b32.xlu0 %v8747_v47, %s14123_s16  ;;  %8868 = vrot.lane.b32.xlu1 %v8761_v13, %s14122_s15  ;;  %v13121_v63 = vpack.i.b16 %v8770_v57, %v8783_v62  ;;  %v8976_v40 = vrot.slane %v8968_v24, %v14176_v6 }
0x1a36   :  { %v13119_v1 = vpack.i.b16 %v8754_v23, %v8779_v53  ;;  %v8969_v44 = vcombine.low %v8769_v26, %v8778_v18  ;;  %v9039_v35 = vcombine.low %v13121_v63, %v8785_v17 }
0x1a38   :  { %v9038_v36 = vcombine.low %v13119_v1, %v13120_v48  ;;  %8870 = vrot.lane.b32.xlu0 %v8769_v26, %s14122_s15  ;;  %v8983_v61 = vrot.slane %v8969_v44, %v14176_v6  ;;  %8898 = vrot.lane.b32.xlu1 %v8761_v13, %s14121_s14  ;;  %v9053_v2 = vrot.slane %v9039_v35, %v14176_v6 }
0x1a3a   :  { %v9046_v3 = vrot.slane %v9038_v36, %v14176_v6  ;;  %v8984_v16 = vcombine.low %v8976_v40, %v8983_v61 }
0x1a3c   :  { %8900 = vrot.lane.b32.xlu0 %v8769_v26, %s14121_s14  ;;  %8928 = vrot.lane.b32.xlu1 %v8761_v13, %s14123_s16  ;;  %v8991_v52 = vrot.slane %v8984_v16, %v14176_v6  ;;  %v9054_v32 = vcombine.low %v9046_v3, %v9053_v2  ;;  %v9288_v16 = vsel %vm659_vm2, %v16590_v7, 0 }
0x1a3e   :  { %13757 = vmatmul.mubr.msk.bf16.vlgmr.msra.gmra.mxu0 %vm659_vm2, %v8991_v52  ;;  %v9061_v49 = vrot.slane %v9054_v32, %v14176_v6 }
0x1a3f   :  { %13767 = vmatpush3.bf16.xpose.msra.mxu0 %v9140_v51  ;;  %13768 = vmatprep.mubr.msk.bf16.mxu0 %vm14118_vm0, %v17705_v39 }
0x1a40   :  { %8930 = vrot.lane.b32.xlu0 %v8769_v26, %s14123_s16  ;;  %8910 = vrot.lane.b32.xlu1 %v8785_v17, %s14121_s14 }
0x1a41   :  { %13763 = vmatmul.mubr.msk.bf16.vlgmr.msra.gmra.mxu1 %vm659_vm2, %v9061_v49  ;;  %13778 = vmatprep.subr.bf16.mxu0 %v17705_v39 }
0x1a42   :  { %13773 = vmatpush3.bf16.xpose.msra.mxu1 %v9214_v4  ;;  %13774 = vmatprep.mubr.msk.bf16.mxu1 %vm14118_vm0, %v17705_v39 }
0x1a43   :  { %13784 = vmatprep.subr.bf16.mxu1 %v17705_v39 }
0x1a44   :  { %8880 = vrot.lane.b32.xlu0 %v8785_v17, %s14122_s15  ;;  %8940 = vrot.lane.b32.xlu1 %v8785_v17, %s14123_s16 }
0x1a48   :  { %8876 = vrot.lane.b32.xlu0 %v13120_v48, %s14122_s15  ;;  %8872 = vrot.lane.b32.xlu1 %v8778_v18, %s14122_s15 }
0x1a4c   :  { %8906 = vrot.lane.b32.xlu0 %v13120_v48, %s14121_s14  ;;  %8878 = vrot.lane.b32.xlu1 %v13121_v63, %s14122_s15 }
0x1a50   :  { %8902 = vrot.lane.b32.xlu0 %v8778_v18, %s14121_s14  ;;  %8908 = vrot.lane.b32.xlu1 %v13121_v63, %s14121_s14 }
0x1a54   :  { %8936 = vrot.lane.b32.xlu0 %v13120_v48, %s14123_s16  ;;  %8874 = vrot.lane.b32.xlu1 %v13119_v1, %s14122_s15 }
0x1a58   :  { %8932 = vrot.lane.b32.xlu0 %v8778_v18, %s14123_s16  ;;  %8938 = vrot.lane.b32.xlu1 %v13121_v63, %s14123_s16 }
0x1a5c   :  { %8964 = vrot.lane.b32.xlu0 %v16513_v19, %s14123_s16  ;;  %8904 = vrot.lane.b32.xlu1 %v13119_v1, %s14121_s14  ;;  %s14149_s14 = smov 27  }
0x1a60   :  { %8934 = vrot.lane.b32.xlu1 %v13119_v1, %s14123_s16 }
0x1a64   :  { %8966 = vrot.lane.b32.xlu1 %v16517_v15, %s14123_s16 }
0x1a68   :  { %9648 = vrot.lane.b32.xlu1 %v16513_v19, %s14124_s17 }
0x1aa2   :  { %v8897_v25 = vpop.permute.xlu0 %8896  ;;  %v8867_v30 = vpop.permute.xlu1 %8866 }
0x1aa6   :  { %v8927_v46 = vpop.permute.xlu0 %8926  ;;  %v8869_v50 = vpop.permute.xlu1 %8868 }
0x1aa7   :  { %v9112_v19 = vcombine.low %v8867_v30, %v8869_v50 }
0x1aa9   :  { %v9120_v63 = vrot.slane %v9112_v19, %v14176_v6 }
0x1aaa   :  { %v8871_v14 = vpop.permute.xlu0 %8870  ;;  %v8899_v47 = vpop.permute.xlu1 %8898 }
0x1aab   :  { %v9260_v40 = vcombine.low %v8897_v25, %v8899_v47 }
0x1aad   :  { %v9268_v49 = vrot.slane %v9260_v40, %v14176_v6 }
0x1aae   :  { %v8901_v23 = vpop.permute.xlu0 %8900  ;;  %v8929_v13 = vpop.permute.xlu1 %8928 }
0x1aaf   :  { %v9408_v47 = vcombine.low %v8927_v46, %v8929_v13 }
0x1ab1   :  { %v9416_v46 = vrot.slane %v9408_v47, %v14176_v6 }
0x1ab2   :  { %v8931_v21 = vpop.permute.xlu0 %8930  ;;  %v8911_v57 = vpop.permute.xlu1 %8910 }
0x1ab6   :  { %v8881_v28 = vpop.permute.xlu0 %8880  ;;  %v16594_v10 = vpop.permute.xlu1 %8940 }
0x1ab7   :  { %v8895_v36 = vunpack.i.l.s16 %v8881_v28 }
0x1aba   :  { %v8877_v62 = vpop.permute.xlu0 %8876  ;;  %v8873_v24 = vpop.permute.xlu1 %8872 }
0x1abb   :  { %v8888_v26 = vunpack.i.l.s16 %v8873_v24  ;;  %v8925_v24 = vunpack.i.l.s16 %v8911_v57 }
0x1abd   :  { %v9113_v18 = vcombine.low %v8871_v14, %v8888_v26 }
0x1abe   :  { %v8907_v53 = vpop.permute.xlu0 %8906  ;;  %v8879_v17 = vpop.permute.xlu1 %8878 }
0x1abf   :  { %v9127_v1 = vrot.slane %v9113_v18, %v14176_v6  ;;  %v9187_v2 = vcombine.low %v8879_v17, %v8895_v36 }
0x1ac1   :  { %v9128_v48 = vcombine.low %v9120_v63, %v9127_v1  ;;  %v9201_v30 = vrot.slane %v9187_v2, %v14176_v6 }
0x1ac2   :  { %v8903_v44 = vpop.permute.xlu0 %8902  ;;  %v8909_v35 = vpop.permute.xlu1 %8908 }
0x1ac3   :  { %v9135_v61 = vrot.slane %v9128_v48, %v14176_v6  ;;  %v8918_v3 = vunpack.i.l.s16 %v8903_v44  ;;  %v9335_v17 = vcombine.low %v8909_v35, %v8925_v24 }
0x1ac5   :  { %v9261_v52 = vcombine.low %v8901_v23, %v8918_v3  ;;  %13769 = vmatmul.mubr.msk.bf16.vlgmr.msra.gmra.mxu0 %vm659_vm2, %v9135_v61  ;;  %v9349_v40 = vrot.slane %v9335_v17, %v14176_v6 }
0x1ac6   :  { %13779 = vmatpush3.bf16.xpose.msra.mxu0 %v9288_v16  ;;  %v8937_v32 = vpop.permute.xlu0 %8936  ;;  %v8875_v51 = vpop.permute.xlu1 %8874  ;;  %13780 = vmatprep.mubr.msk.bf16.mxu0 %vm14118_vm0, %v17705_v39 }
0x1ac7   :  { %v9275_v4 = vrot.slane %v9261_v52, %v14176_v6  ;;  %v9186_v25 = vcombine.low %v8875_v51, %v8877_v62  ;;  %13790 = vmatprep.subr.bf16.mxu0 %v17705_v39  ;;  %v9362_v62 = vsel %vm659_vm2, %v16592_v12, 0 }
0x1ac9   :  { %v9276_v50 = vcombine.low %v9268_v49, %v9275_v4  ;;  %v9194_v14 = vrot.slane %v9186_v25, %v14176_v6 }
0x1aca   :  { %v8933_v23 = vpop.permute.xlu0 %8932  ;;  %v8939_v28 = vpop.permute.xlu1 %8938 }
0x1acb   :  { %v9283_v19 = vrot.slane %v9276_v50, %v14176_v6  ;;  %v9202_v26 = vcombine.low %v9194_v14, %v9201_v30  ;;  %v8948_v18 = vunpack.i.l.s16 %v8933_v23  ;;  %v17712_v23 = vld [vmem:[#allocation3_spill] sm:$0xff] }
0x1acd   :  { %v9209_v63 = vrot.slane %v9202_v26, %v14176_v6  ;;  %v9409_v1 = vcombine.low %v8931_v21, %v8948_v18  ;;  %13781 = vmatmul.mubr.msk.bf16.vlgmr.msra.gmra.mxu0 %vm659_vm2, %v9283_v19  ;;  %v8955_v21 = vunpack.i.l.s16 %v16594_v10  ;;  %v17713_v18 = vld [vmem:[#allocation4_spill] sm:$0xff] }
0x1ace   :  { %v16614_v48 = vpop.permute.xlu0 %8964  ;;  %v8905_v44 = vpop.permute.xlu1 %8904  ;;  %13792 = vmatprep.mubr.msk.bf16.mxu0 %vm14118_vm0, %v17705_v39 }
0x1acf   :  { %v9423_v13 = vrot.slane %v9409_v1, %v14176_v6  ;;  %v9436_v57 = vsel %vm659_vm2, %v16614_v48, 0  ;;  %v9334_v35 = vcombine.low %v8905_v44, %v8907_v53  ;;  %13775 = vmatmul.mubr.msk.bf16.vlgmr.msra.gmra.mxu1 %vm659_vm2, %v9209_v63  ;;  %v9483_v53 = vcombine.low %v8939_v28, %v8955_v21 }
0x1ad0   :  { %13785 = vmatpush3.bf16.xpose.msra.mxu1 %v9362_v62  ;;  %13791 = vmatpush3.bf16.xpose.msra.mxu0 %v9436_v57 }
0x1ad1   :  { %v9424_v36 = vcombine.low %v9416_v46, %v9423_v13  ;;  %v9342_v61 = vrot.slane %v9334_v35, %v14176_v6  ;;  %13786 = vmatprep.mubr.msk.bf16.mxu1 %vm14118_vm0, %v17705_v39  ;;  %13796 = vmatprep.subr.bf16.mxu1 %v17705_v39  ;;  %v9497_v4 = vrot.slane %v9483_v53, %v14176_v6 }
0x1ad2   :  { %v8935_v3 = vpop.permute.xlu1 %8934  ;;  %13802 = vmatprep.subr.bf16.mxu0 %v17705_v39 }
0x1ad3   :  { %v9350_v16 = vcombine.low %v9342_v61, %v9349_v40  ;;  %v9482_v2 = vcombine.low %v8935_v3, %v8937_v32  ;;  %v9431_v52 = vrot.slane %v9424_v36, %v14176_v6 }
0x1ad5   :  { %v9357_v10 = vrot.slane %v9350_v16, %v14176_v6  ;;  %v9490_v51 = vrot.slane %v9482_v2, %v14176_v6 }
0x1ad6   :  { %v16633_v49 = vpop.permute.xlu1 %8966 }
0x1ad7   :  { %v9510_v25 = vsel %vm659_vm2, %v16633_v49, 0  ;;  %13787 = vmatmul.mubr.msk.bf16.vlgmr.msra.gmra.mxu1 %vm659_vm2, %v9357_v10  ;;  %13793 = vmatmul.mubr.msk.bf16.vlgmr.msra.gmra.mxu0 %vm659_vm2, %v9431_v52  ;;  %v9498_v32 = vcombine.low %v9490_v51, %v9497_v4 }
0x1ad8   :  { %13797 = vmatpush3.bf16.xpose.msra.mxu1 %v9510_v25  ;;  %13798 = vmatprep.mubr.msk.bf16.mxu1 %vm14118_vm0, %v17705_v39 }
0x1ad9   :  { %13808 = vmatprep.subr.bf16.mxu1 %v17705_v39  ;;  %13804 = vmatprep.mubr.msk.bf16.mxu0 %vm14118_vm0, %v17705_v39  ;;  %v9505_v14 = vrot.slane %v9498_v32, %v14176_v6 }
0x1ada   :  { %v9649_v30 = vpop.permute.xlu1 %9648 }
0x1adb   :  { %v9654_v50 = vsel %vm1338_vm4, %v9649_v30, 0 }
0x1adc   :  { %13803 = vmatpush3.bf16.msra.mxu0 %v9654_v50 }
0x1add   :  { %13814 = vmatprep.subr.bf16.mxu0 %v17705_v39 }
0x1adf   :  { %13799 = vmatmul.mubr.msk.bf16.vlgmr.msra.gmra.mxu1 %vm659_vm2, %v9505_v14 }
0x1ae0   :  { %13810 = vmatprep.mubr.msk.bf16.mxu1 %vm14118_vm0, %v17705_v39 }
0x1afe   :  { %v9032_v47 = vpop.f32.mrf.mxu0 }
0x1aff   :  { %v16652_v28 = vadd.f32 %v9032_v47, %v17712_v23 }
0x1b00   :  { %v13758_v24 = vpop.f32.mrf.mxu0 }
0x1b01   :  { %v9102_v19 = vpop.f32.mrf.mxu1  ;;  %v9552_v26 = vsel %vm3711_vm10, %v16652_v28, -inf }
0x1b02   :  { %v9103_v17 = vadd.f32 %v9102_v19, %v17713_v18  ;;  %9553 = vmax.xlane.f32.xlu0 %v9552_v26  ;;  %v9035_v63 = vpop.f32.mrf.mxu0 }
0x1b03   :  { %v13764_v1 = vpop.f32.mrf.mxu1 }
0x1b04   :  { %v9555_v62 = vsel %vm3711_vm10, %v9103_v17, -inf  ;;  %v13759_v44 = vpop.f32.mrf.mxu0 }
0x1b05   :  { %v9105_v46 = vpop.f32.mrf.mxu1  ;;  %9556 = vmax.xlane.f32.xlu1 %v9555_v62 }
0x1b07   :  { %v13765_v13 = vpop.f32.mrf.mxu1 }
0x1b85   :  { %v9176_v57 = vpop.f32.mrf.mxu0 }
0x1b86   :  { %v9177_v35 = vadd.f32 %v9176_v57, %v17712_v23 }
0x1b87   :  { %v13770_v21 = vpop.f32.mrf.mxu0 }
0x1b88   :  { %v9558_v40 = vsel %vm3711_vm10, %v9177_v35, -inf }
0x1b89   :  { %9559 = vmax.xlane.f32.xlu0 %v9558_v40  ;;  %v9179_v36 = vpop.f32.mrf.mxu0 }
0x1b8b   :  { %v13771_v61 = vpop.f32.mrf.mxu0 }
0x1b8d   :  { %v9324_v3 = vpop.f32.mrf.mxu0 }
0x1b8e   :  { %v16661_v53 = vadd.f32 %v9324_v3, %v17712_v23 }
0x1b8f   :  { %v9250_v16 = vpop.f32.mrf.mxu1  ;;  %v13782_v2 = vpop.f32.mrf.mxu0 }
0x1b90   :  { %v9251_v52 = vadd.f32 %v9250_v16, %v17713_v18  ;;  %v9564_v10 = vsel %vm3711_vm10, %v16661_v53, -inf  ;;  %v13132_v16 = vcombine.low %v16548_v60, %v16548_v60  ;;  %v13134_v2 = vcombine.low %v16557_v22, %v16557_v22 }
0x1b91   :  { %v13776_v51 = vpop.f32.mrf.mxu1  ;;  %9565 = vmax.xlane.f32.xlu1 %v9564_v10  ;;  %v9327_v4 = vpop.f32.mrf.mxu0 }
0x1b92   :  { %v9561_v25 = vsel %vm3711_vm10, %v9251_v52, -inf  ;;  %v9554_v10 = vpop.xlane.xlu0 %9553  ;;  %v9557_v51 = vpop.xlane.xlu1 %9556 }
0x1b93   :  { %v9253_v32 = vpop.f32.mrf.mxu1  ;;  %9562 = vmax.xlane.f32.xlu0 %v9561_v25  ;;  %v13783_v30 = vpop.f32.mrf.mxu0  ;;  %v9577_v25 = vsub.f32 %v9103_v17, %v9557_v51 }
0x1b95   :  { %v13777_v50 = vpop.f32.mrf.mxu1  ;;  %v9586_v32 = vmul.f32 1.442695, %v9577_v25 }
0x1b97   :  { %v9398_v14 = vpop.f32.mrf.mxu1  ;;  %v9472_v47 = vpop.f32.mrf.mxu0 }
0x1b98   :  { %v16668_v24 = vadd.f32 %v9398_v14, %v17713_v18  ;;  %v16671_v19 = vadd.f32 %v9472_v47, %v17712_v23 }
0x1b99   :  { %v13788_v26 = vpop.f32.mrf.mxu1  ;;  %v13794_v63 = vpop.f32.mrf.mxu0 }
0x1b9a   :  { %v9567_v1 = vsel %vm3711_vm10, %v16668_v24, -inf  ;;  %v9570_v62 = vsel %vm3711_vm10, %v16671_v19, -inf }
0x1b9b   :  { %v9401_v44 = vpop.f32.mrf.mxu1  ;;  %9568 = vmax.xlane.f32.xlu0 %v9567_v1  ;;  %9571 = vmax.xlane.f32.xlu1 %v9570_v62  ;;  %v9475_v46 = vpop.f32.mrf.mxu0 }
0x1b9d   :  { %v13789_v13 = vpop.f32.mrf.mxu1  ;;  %v13795_v57 = vpop.f32.mrf.mxu0 }
0x1b9f   :  { %v9546_v21 = vpop.f32.mrf.mxu1 }
0x1ba0   :  { %v9547_v40 = vadd.f32 %v9546_v21, %v17713_v18  ;;  %v9576_v18 = vsub.f32 %v16652_v28, %v9554_v10 }
0x1ba1   :  { %v13800_v36 = vpop.f32.mrf.mxu1 }
0x1ba2   :  { %v9573_v23 = vsel %vm3711_vm10, %v9547_v40, -inf  ;;  %v9584_v4 = vmul.f32 1.442695, %v9576_v18 }
0x1ba3   :  { %v9549_v61 = vpop.f32.mrf.mxu1  ;;  %9574 = vmax.xlane.f32.xlu0 %v9573_v23 }
0x1ba4   :  { %14072 = vpow2.f32 %v9584_v4  ;;  %v13136_v61 = vcombine.low %v16590_v7, %v16590_v7 }
0x1ba5   :  { %v13801_v3 = vpop.f32.mrf.mxu1  ;;  %14074 = vpow2.f32 %v9586_v32 }
0x1bac   :  { %9746 = vrot.lane.b32.xlu1 %v13132_v16, %s14124_s17 }
0x1bb0   :  { %9796 = vrot.lane.b32.xlu1 %v13134_v2, %s14124_s17 }
0x1bb1   :  { %v16688_v60 = vpop.eup %14072 }
0x1bb2   :  { %v9600_v30 = vsel %vm3711_vm10, %v16688_v60, 0.0  ;;  %v16692_v22 = vpop.eup %14074 }
0x1bb3   :  { %v9603_v50 = vsel %vm3711_vm10, %v16692_v22, 0.0 }
0x1bb9   :  { %9696 = vrot.lane.b32.xlu0 %v16517_v15, %s14124_s17 }
0x1bd4   :  { %9601 = vadd.xlane.f32.xlu1 %v9600_v30 }
0x1bd8   :  { %9604 = vadd.xlane.f32.xlu0 %v9603_v50 }
0x1c12   :  { %v9560_v15 = vpop.xlane.xlu0 %9559 }
0x1c13   :  { %v9578_v28 = vsub.f32 %v9177_v35, %v9560_v15 }
0x1c15   :  { %v9588_v14 = vmul.f32 1.442695, %v9578_v28 }
0x1c17   :  { %14076 = vpow2.f32 %v9588_v14 }
0x1c1a   :  { %v9566_v21 = vpop.xlane.xlu1 %9565 }
0x1c1b   :  { %v9580_v36 = vsub.f32 %v16661_v53, %v9566_v21 }
0x1c1c   :  { %v9563_v17 = vpop.xlane.xlu0 %9562 }
0x1c1d   :  { %v9579_v47 = vsub.f32 %v9251_v52, %v9563_v17  ;;  %v13138_v52 = vcombine.low %v16592_v12, %v16592_v12  ;;  %v9592_v3 = vmul.f32 1.442695, %v9580_v36 }
0x1c1f   :  { %v9590_v26 = vmul.f32 1.442695, %v9579_v47  ;;  %v13142_v47 = vcombine.low %v16633_v49, %v16633_v49  ;;  %v13140_v49 = vcombine.low %v16614_v48, %v16614_v48 }
0x1c21   :  { %14078 = vpow2.f32 %v9590_v26 }
0x1c22   :  { %14080 = vpow2.f32 %v9592_v3 }
0x1c24   :  { %v16696_v63 = vpop.eup %14076  ;;  %v9569_v62 = vpop.xlane.xlu0 %9568 }
0x1c25   :  { %v9606_v1 = vsel %vm3711_vm10, %v16696_v63, 0.0  ;;  %v9572_v23 = vpop.xlane.xlu1 %9571  ;;  %v9581_v10 = vsub.f32 %v16668_v24, %v9569_v62 }
0x1c26   :  { %9607 = vadd.xlane.f32.xlu1 %v9606_v1  ;;  %v9582_v16 = vsub.f32 %v16671_v19, %v9572_v23 }
0x1c27   :  { %v9594_v12 = vmul.f32 1.442695, %v9581_v10 }
0x1c28   :  { %v9596_v2 = vmul.f32 1.442695, %v9582_v16 }
0x1c29   :  { %v9747_v51 = vpop.permute.xlu1 %9746 }
0x1c2a   :  { %14082 = vpow2.f32 %v9596_v2  ;;  %v9752_v62 = vsel %vm1338_vm4, %v9747_v51, 0 }
0x1c2b   :  { %14084 = vpow2.f32 %v9594_v12 }
0x1c2c   :  { %v9575_v44 = vpop.xlane.xlu0 %9574 }
0x1c2d   :  { %v9583_v18 = vsub.f32 %v9547_v40, %v9575_v44  ;;  %v9797_v25 = vpop.permute.xlu1 %9796 }
0x1c2e   :  { %v16700_v46 = vpop.eup %14078 }
0x1c2f   :  { %v9609_v13 = vsel %vm3711_vm10, %v16700_v46, 0.0  ;;  %v9598_v4 = vmul.f32 1.442695, %v9583_v18  ;;  %v16715_v53 = vpop.eup %14080 }
0x1c30   :  { %9610 = vadd.xlane.f32.xlu0 %v9609_v13  ;;  %v9697_v35 = vpop.permute.xlu0 %9696  ;;  %v9612_v7 = vsel %vm3711_vm10, %v16715_v53, 0.0 }
0x1c31   :  { %v9702_v57 = vsel %vm1338_vm4, %v9697_v35, 0  ;;  %14086 = vpow2.f32 %v9598_v4 }
0x1c32   :  { %13809 = vmatpush3.bf16.msra.mxu1 %v9702_v57 }
0x1c33   :  { %13820 = vmatprep.subr.bf16.mxu1 %v17705_v39 }
0x1c37   :  { %9896 = vrot.lane.b32.xlu1 %v13138_v52, %s14124_s17  ;;  %v16719_v19 = vpop.eup %14082 }
0x1c38   :  { %v9618_v24 = vsel %vm3711_vm10, %v16719_v19, 0.0  ;;  %v16723_v40 = vpop.eup %14084 }
0x1c39   :  { %v9615_v50 = vsel %vm3711_vm10, %v16723_v40, 0.0 }
0x1c3e   :  { %v16727_v15 = vpop.eup %14086 }
0x1c3f   :  { %v9621_v28 = vsel %vm3711_vm10, %v16727_v15, 0.0 }
0x1c46   :  { %9846 = vrot.lane.b32.xlu0 %v13136_v61, %s14124_s17 }
0x1c5b   :  { %9613 = vadd.xlane.f32.xlu1 %v9612_v7 }
0x1c5d   :  { %v9602_v32 = vpop.xlane.xlu1 %9601 }
0x1c5e   :  { %14088 = vrcp.f32 %v9602_v32 }
0x1c5f   :  { %9619 = vadd.xlane.f32.xlu1 %v9618_v24 }
0x1c61   :  { %v9605_v30 = vpop.xlane.xlu0 %9604 }
0x1c62   :  { %14090 = vrcp.f32 %v9605_v30 }
0x1c65   :  { %9616 = vadd.xlane.f32.xlu0 %v9615_v50 }
0x1c69   :  { %9622 = vadd.xlane.f32.xlu0 %v9621_v28 }
0x1c6b   :  { %v14089_v14 = vpop.eup %14088 }
0x1c6c   :  { %v9632_v17 = vmul.f32 %v14089_v14, %v16688_v60  ;;  %v9802_v60 = vsel %vm1338_vm4, %v9797_v25, 0 }
0x1c6e   :  { %v9640_v26 = vpack.c.bf16 %v9632_v17, %v9632_v17 }
0x1c6f   :  { %v14091_v1 = vpop.eup %14090 }
0x1c70   :  { %v9633_v44 = vmul.f32 %v14091_v1, %v16692_v22  ;;  %9996 = vrot.lane.b32.xlu1 %v13142_v47, %s14124_s17  ;;  %13805 = vmatmul.mubr.msk.bf16.vlgmr.msra.gmra.mxu0 %vm659_vm2, %v9640_v26 }
0x1c71   :  { %13815 = vmatpush3.bf16.msra.mxu0 %v9752_v62  ;;  %13816 = vmatprep.mubr.msk.bf16.mxu0 %vm14118_vm0, %v17705_v39 }
0x1c72   :  { %v9641_v13 = vpack.c.bf16 %v9633_v44, %v9633_v44  ;;  %13826 = vmatprep.subr.bf16.mxu0 %v17705_v39 }
0x1c74   :  { %13811 = vmatmul.mubr.msk.bf16.vlgmr.msra.gmra.mxu1 %vm659_vm2, %v9641_v13 }
0x1c75   :  { %13821 = vmatpush3.bf16.msra.mxu1 %v9802_v60  ;;  %13822 = vmatprep.mubr.msk.bf16.mxu1 %vm14118_vm0, %v17705_v39 }
0x1c76   :  { %13832 = vmatprep.subr.bf16.mxu1 %v17705_v39 }
0x1c7f   :  { %9946 = vrot.lane.b32.xlu0 %v13140_v49, %s14124_s17  ;;  %s12963_s17 = sld [smem:[%s17690_s0 + %s14149_s14]]  }
0x1caf   :  { %v9608_v22 = vpop.xlane.xlu1 %9607 }
0x1cb0   :  { %14092 = vrcp.f32 %v9608_v22 }
0x1cb3   :  { %v9897_v3 = vpop.permute.xlu1 %9896 }
0x1cb4   :  { %v9902_v2 = vsel %vm1338_vm4, %v9897_v3, 0 }
0x1cb9   :  { %v9611_v35 = vpop.xlane.xlu0 %9610 }
0x1cba   :  { %14094 = vrcp.f32 %v9611_v35 }
0x1cbd   :  { %v14093_v57 = vpop.eup %14092  ;;  %v9847_v21 = vpop.permute.xlu0 %9846 }
0x1cbe   :  { %v9634_v52 = vmul.f32 %v14093_v57, %v16696_v63  ;;  %v9852_v23 = vsel %vm1338_vm4, %v9847_v21, 0 }
0x1cc0   :  { %v9642_v36 = vpack.c.bf16 %v9634_v52, %v9634_v52 }
0x1cc2   :  { %13817 = vmatmul.mubr.msk.bf16.vlgmr.msra.gmra.mxu0 %vm659_vm2, %v9642_v36 }
0x1cc3   :  { %13827 = vmatpush3.bf16.msra.mxu0 %v9852_v23  ;;  %13828 = vmatprep.mubr.msk.bf16.mxu0 %vm14118_vm0, %v17705_v39 }
0x1cc4   :  { %13838 = vmatprep.subr.bf16.mxu0 %v17705_v39 }
0x1cc7   :  { %v14095_v48 = vpop.eup %14094 }
0x1cc8   :  { %v9635_v61 = vmul.f32 %v14095_v48, %v16700_v46 }
0x1cca   :  { %v9643_v16 = vpack.c.bf16 %v9635_v61, %v9635_v61 }
0x1ccc   :  { %13823 = vmatmul.mubr.msk.bf16.vlgmr.msra.gmra.mxu1 %vm659_vm2, %v9643_v16 }
0x1ccd   :  { %13833 = vmatpush3.bf16.msra.mxu1 %v9902_v2  ;;  %13834 = vmatprep.mubr.msk.bf16.mxu1 %vm14118_vm0, %v17705_v39 }
0x1cce   :  { %13844 = vmatprep.subr.bf16.mxu1 %v17705_v39 }
0x1ce4   :  { %v9614_v63 = vpop.xlane.xlu1 %9613 }
0x1ce5   :  { %14096 = vrcp.f32 %v9614_v63 }
0x1ce8   :  { %v9620_v10 = vpop.xlane.xlu1 %9619 }
0x1ce9   :  { %14098 = vrcp.f32 %v9620_v10 }
0x1cec   :  { %v9997_v28 = vpop.permute.xlu1 %9996 }
0x1ced   :  { %v10002_v47 = vsel %vm1338_vm4, %v9997_v28, 0 }
0x1cee   :  { %v9617_v12 = vpop.xlane.xlu0 %9616 }
0x1cef   :  { %14100 = vrcp.f32 %v9617_v12 }
0x1cf2   :  { %v14097_v18 = vpop.eup %14096  ;;  %v9623_v46 = vpop.xlane.xlu0 %9622 }
0x1cf3   :  { %v9636_v51 = vmul.f32 %v14097_v18, %v16715_v53  ;;  %14102 = vrcp.f32 %v9623_v46 }
0x1cf5   :  { %v9644_v4 = vpack.c.bf16 %v9636_v51, %v9636_v51 }
0x1cf6   :  { %v14099_v25 = vpop.eup %14098  ;;  %v9947_v7 = vpop.permute.xlu0 %9946 }
0x1cf7   :  { %v9952_v32 = vsel %vm1338_vm4, %v9947_v7, 0  ;;  %13829 = vmatmul.mubr.msk.bf16.vlgmr.msra.gmra.mxu0 %vm659_vm2, %v9644_v4  ;;  %v9638_v24 = vmul.f32 %v14099_v25, %v16719_v19 }
0x1cf8   :  { %13839 = vmatpush3.bf16.msra.mxu0 %v9952_v32  ;;  %13840 = vmatprep.mubr.msk.bf16.mxu0 %vm14118_vm0, %v17705_v39 }
0x1cf9   :  { %13850 = vmatprep.subr.bf16.mxu0 %v17705_v39  ;;  %v9646_v50 = vpack.c.bf16 %v9638_v24, %v9638_v24  ;;  %v13950_v24 = vld [vmem:[%s15242_s12 + $0x18] sm:$0xff]  }
0x1cfc   :  { %v14101_v30 = vpop.eup %14100 }
0x1cfd   :  { %v9637_v53 = vmul.f32 %v14101_v30, %v16723_v40 }
0x1cff   :  { %v9645_v14 = vpack.c.bf16 %v9637_v53, %v9637_v53  ;;  %13841 = vmatmul.mubr.msk.bf16.vlgmr.msra.gmra.mxu0 %vm659_vm2, %v9646_v50  ;;  %v13951_v53 = vld [vmem:[%s15242_s12 + $0x10] sm:$0xff]  }
0x1d00   :  { %v14103_v17 = vpop.eup %14102  ;;  %13854 = vmatprep.mubr.msk.bf16.mxu0 %vm14118_vm0, %v17705_v39  ;;  %13851 = vmatpush3.bf16.msra.mxu0 %v13950_v24 }
0x1d01   :  { %13835 = vmatmul.mubr.msk.bf16.vlgmr.msra.gmra.mxu1 %vm659_vm2, %v9645_v14  ;;  %v9639_v19 = vmul.f32 %v14103_v17, %v16727_v15  ;;  %13852 = vmatprep.subr.bf16.mxu0 %v17705_v39 }
0x1d02   :  { %13845 = vmatpush3.bf16.msra.mxu1 %v10002_v47  ;;  %13846 = vmatprep.mubr.msk.bf16.mxu1 %vm14118_vm0, %v17705_v39 }
0x1d03   :  { %13858 = vmatprep.subr.bf16.mxu1 %v17705_v39  ;;  %v9647_v40 = vpack.c.bf16 %v9639_v19, %v9639_v19 }
0x1d04   :  { %13853 = vmatpush3.bf16.msra.mxu0 %v13951_v53 }
0x1d05   :  { %13866 = vmatprep.subr.bf16.mxu0 %v17705_v39 }
0x1d09   :  { %13847 = vmatmul.mubr.msk.bf16.vlgmr.msra.gmra.mxu1 %vm659_vm2, %v9647_v40 }
0x1d0a   :  { %13862 = vmatprep.mubr.msk.bf16.mxu1 %vm14118_vm0, %v17705_v39 }
0x1d30   :  { %v9690_v26 = vpop.f32.mrf.mxu0 }
0x1d32   :  { %v13806_v1 = vpop.f32.mrf.mxu0 }
0x1d34   :  { %v9693_v62 = vpop.f32.mrf.mxu0  ;;  %v9738_v44 = vpop.f32.mrf.mxu1 }
0x1d36   :  { %v13807_v13 = vpop.f32.mrf.mxu0  ;;  %v13812_v60 = vpop.f32.mrf.mxu1 }
0x1d38   :  { %v9741_v49 = vpop.f32.mrf.mxu1 }
0x1d3a   :  { %v13813_v22 = vpop.f32.mrf.mxu1 }
0x1d82   :  { %v9788_v35 = vpop.f32.mrf.mxu0 }
0x1d83   :  { %10046 = vrot.lane.b32.xlu0 %v9788_v35, %s17709_s13 }
0x1d84   :  { %v13818_v15 = vpop.f32.mrf.mxu0 }
0x1d86   :  { %v9791_v57 = vpop.f32.mrf.mxu0 }
0x1d88   :  { %v13819_v52 = vpop.f32.mrf.mxu0 }
0x1d8c   :  { %v9838_v21 = vpop.f32.mrf.mxu1 }
0x1d8d   :  { %10048 = vrot.lane.b32.xlu1 %v9838_v21, %s17709_s13 }
0x1d8e   :  { %v13824_v36 = vpop.f32.mrf.mxu1 }
0x1d90   :  { %v9841_v23 = vpop.f32.mrf.mxu1 }
0x1d92   :  { %v13825_v48 = vpop.f32.mrf.mxu1 }
0x1db7   :  { %v9888_v61 = vpop.f32.mrf.mxu0 }
0x1db8   :  { %10054 = vrot.lane.b32.xlu0 %v9888_v61, %s17710_s29 }
0x1db9   :  { %v13830_v3 = vpop.f32.mrf.mxu0 }
0x1dbb   :  { %v9891_v16 = vpop.f32.mrf.mxu0 }
0x1dbd   :  { %v13831_v2 = vpop.f32.mrf.mxu0 }
0x1dbf   :  { %v9988_v63 = vpop.f32.mrf.mxu0 }
0x1dc0   :  { %10062 = vrot.lane.b32.xlu0 %v9988_v63, %s14132_s3 }
0x1dc1   :  { %v9938_v10 = vpop.f32.mrf.mxu1  ;;  %v13842_v12 = vpop.f32.mrf.mxu0 }
0x1dc2   :  { %10056 = vrot.lane.b32.xlu1 %v9938_v10, %s17710_s29 }
0x1dc3   :  { %v13836_v18 = vpop.f32.mrf.mxu1  ;;  %v9991_v46 = vpop.f32.mrf.mxu0 }
0x1dc5   :  { %v9941_v51 = vpop.f32.mrf.mxu1  ;;  %v13843_v4 = vpop.f32.mrf.mxu0 }
0x1dc7   :  { %v13837_v25 = vpop.f32.mrf.mxu1 }
0x1dc9   :  { %v10038_v7 = vpop.f32.mrf.mxu1 }
0x1dca   :  { %10064 = vrot.lane.b32.xlu1 %v10038_v7, %s14132_s3 }
0x1dcb   :  { %v13848_v32 = vpop.f32.mrf.mxu1 }
0x1dcd   :  { %v10041_v30 = vpop.f32.mrf.mxu1 }
0x1dcf   :  { %v13849_v50 = vpop.f32.mrf.mxu1 }
0x1df5   :  { %v10047_v28 = vpop.permute.xlu0 %10046 }
0x1df6   :  { %v10068_v17 = vsel %vm659_vm2, %v9690_v26, %v10047_v28 }
0x1dff   :  { %v10049_v1 = vpop.permute.xlu1 %10048 }
0x1e00   :  { %v10069_v15 = vsel %vm659_vm2, %v9738_v44, %v10049_v1 }
0x1e2a   :  { %v10055_v14 = vpop.permute.xlu0 %10054 }
0x1e2b   :  { %v10070_v47 = vsel %vm1746_vm7, %v10068_v17, %v10055_v14 }
0x1e32   :  { %v10063_v19 = vpop.permute.xlu0 %10062 }
0x1e33   :  { %v10072_v40 = vsel %vm1749_vm8, %v10070_v47, %v10063_v19 }
0x1e34   :  { %v10076_v62 = vcombine.high %v10072_v40, %v10072_v40  ;;  %v10083_v13 = vrot.slane %v10072_v40, %v14176_v6  ;;  %v10057_v22 = vpop.permute.xlu1 %10056 }
0x1e35   :  { %v10071_v26 = vsel %vm1746_vm7, %v10069_v15, %v10057_v22 }
0x1e36   :  { %v10090_v60 = vrot.slane %v10076_v62, %v14176_v6  ;;  %v10091_v49 = vcombine.high %v10083_v13, %v10083_v13  ;;  %v10099_v21 = vrot.slane %v10083_v13, %v14176_v6 }
0x1e38   :  { %v10092_v35 = vcombine.high %v10090_v60, %v10090_v60  ;;  %v10113_v57 = vrot.slane %v10091_v49, %v14176_v6  ;;  %v10106_v36 = vrot.slane %v10090_v60, %v14176_v6 }
0x1e3a   :  { %v10120_v23 = vrot.slane %v10092_v35, %v14176_v6  ;;  %v10172_v16 = vcombine.low %v10099_v21, %v10113_v57  ;;  %v13144_v2 = vcombine.high %v10099_v21, %v10113_v57  ;;  %v10122_v18 = vcombine.high %v10106_v36, %v10106_v36 }
0x1e3c   :  { %v10065_v52 = vpop.permute.xlu1 %10064  ;;  %v10174_v12 = vcombine.low %v10106_v36, %v10120_v23  ;;  %v10182_v7 = vrot.slane %v10172_v16, %v14176_v6  ;;  %v10189_v32 = vrot.slane %v13144_v2, %v14176_v6  ;;  %v13150_v36 = vld [vmem:[%s15285_s22 + $0x1] ss:$0 sm:$0xff]  ;;  %s12964_s22 = sld [smem:[%s17690_s0 + %s14152_s20]]  }
0x1e3d   :  { %v10073_v48 = vsel %vm1749_vm8, %v10071_v26, %v10065_v52 }
0x1e3e   :  { %v10124_v61 = vcombine.high %v10073_v48, %v10073_v48  ;;  %v10131_v3 = vrot.slane %v10073_v48, %v14176_v6  ;;  %v10196_v14 = vrot.slane %v10174_v12, %v14176_v6  ;;  %v10204_v1 = vcombine.low %v10182_v7, %v10189_v32 }
0x1e40   :  { %v10138_v44 = vrot.slane %v10124_v61, %v14176_v6  ;;  %v10139_v63 = vcombine.high %v10131_v3, %v10131_v3  ;;  %v10147_v10 = vrot.slane %v10131_v3, %v14176_v6  ;;  %v10212_v35 = vrot.slane %v10204_v1, %v14176_v6 }
0x1e42   :  { %v10140_v46 = vcombine.high %v10138_v44, %v10138_v44  ;;  %v10154_v51 = vrot.slane %v10138_v44, %v14176_v6  ;;  %v10161_v4 = vrot.slane %v10139_v63, %v14176_v6  ;;  %v10169_v25 = vcombine.high %v10147_v10, %v10147_v10 }
0x1e43   :  { %v10175_v24 = vcombine.low %v10122_v18, %v10147_v10 }
0x1e44   :  { %v10168_v30 = vrot.slane %v10140_v46, %v14176_v6  ;;  %v10170_v50 = vcombine.high %v10154_v51, %v10154_v51  ;;  %v10171_v53 = vcombine.high %v10161_v4, %v10161_v4  ;;  %v10221_v28 = vcombine.low %v10161_v4, %v10169_v25 }
0x1e45   :  { %v10203_v17 = vrot.slane %v10175_v24, %v14176_v6 }
0x1e46   :  { %v10222_v47 = vcombine.low %v10171_v53, %v10154_v51  ;;  %v10223_v19 = vcombine.low %v10168_v30, %v10170_v50  ;;  %v10230_v62 = vrot.slane %v10221_v28, %v14176_v6 }
0x1e47   :  { %v10205_v40 = vcombine.low %v10196_v14, %v10203_v17 }
0x1e48   :  { %v10237_v13 = vrot.slane %v10222_v47, %v14176_v6  ;;  %v10244_v60 = vrot.slane %v10223_v19, %v14176_v6 }
0x1e49   :  { %v10219_v49 = vrot.slane %v10205_v40, %v14176_v6 }
0x1e4a   :  { %v10245_v22 = vcombine.low %v10230_v62, %v10237_v13  ;;  %v10259_v57 = vrot.slane %v10244_v60, %v14176_v6 }
0x1e4b   :  { %v10220_v26 = vcombine.low %v10212_v35, %v10219_v49 }
0x1e4c   :  { %v10252_v15 = vrot.slane %v10245_v22, %v14176_v6 }
0x1e4e   :  { %v10260_v52 = vcombine.low %v10252_v15, %v10259_v57 }
0x1e50   :  { %v10263_v21 = vpack.c.bf16 %v10260_v52, %v10220_v26 }
0x1e52   :  { %13855 = vmatmul.mubr.msk.bf16.vlgmr.msra.gmra.mxu0 %vm426_vm1, %v10263_v21 }
0x1e53   :  { %13874 = vmatprep.mubr.msk.bf16.mxu0 %vm14118_vm0, %v17705_v39 }
0x1f12   :  { %v10326_v23 = vpop.f32.mrf.mxu0 }
0x1f13   :  { %v10327_v48 = vadd.f32 %v13150_v36, %v10326_v23 }
0x1f14   :  { %v13856_v61 = vpop.f32.mrf.mxu0 }
0x1f15   :  { %v10335_v3 = vcombine.high %v10327_v48, %v10327_v48  ;;  %v10342_v16 = vrot.slane %v10327_v48, %v14176_v6 }
0x1f16   :  { %v10329_v2 = vpop.f32.mrf.mxu0 }
0x1f17   :  { %v10349_v44 = vrot.slane %v10335_v3, %v14176_v6  ;;  %v10350_v63 = vcombine.high %v10342_v16, %v10342_v16  ;;  %v10358_v10 = vrot.slane %v10342_v16, %v14176_v6  ;;  %v10330_v12 = vadd.f32 %v13150_v36, %v10329_v2 }
0x1f18   :  { %v13857_v18 = vpop.f32.mrf.mxu0 }
0x1f19   :  { %v10351_v46 = vcombine.high %v10349_v44, %v10349_v44  ;;  %v10365_v51 = vrot.slane %v10349_v44, %v14176_v6  ;;  %v10372_v4 = vrot.slane %v10350_v63, %v14176_v6  ;;  %v10380_v25 = vcombine.high %v10358_v10, %v10358_v10 }
0x1f1a   :  { %v16830_v7 = vadd.f32 %v10358_v10, %v16443_v55  ;;  %v10384_v32 = vcombine.high %v10330_v12, %v10330_v12  ;;  %v10391_v24 = vrot.slane %v10330_v12, %v14176_v6 }
0x1f1b   :  { %v10379_v30 = vrot.slane %v10351_v46, %v14176_v6  ;;  %v10381_v50 = vcombine.high %v10365_v51, %v10365_v51  ;;  %v10382_v53 = vcombine.high %v10372_v4, %v10372_v4  ;;  %v16835_v28 = vadd.f32 %v10372_v4, %v16446_v8 }
0x1f1c   :  { %v16838_v14 = vadd.f32 %v10380_v25, %v16454_v56  ;;  %v16841_v17 = vadd.f32 %v10365_v51, %v16459_v20  ;;  %v10398_v47 = vrot.slane %v10384_v32, %v14176_v6  ;;  %v10399_v55 = vcombine.high %v10391_v24, %v10391_v24 }
0x1f1d   :  { %v10383_v19 = vcombine.high %v10379_v30, %v10379_v30  ;;  %v10448_v40 = vadd.f32 %v10382_v53, %v16456_v59  ;;  %v10450_v1 = vadd.f32 %v10379_v30, %v16462_v41  ;;  %v10451_v62 = vadd.f32 %v10381_v50, %v16464_v45 }
0x1f1e   :  { %v10477_v8 = vcombine.low %v16830_v7, %v16835_v28  ;;  %v10400_v13 = vcombine.high %v10398_v47, %v10398_v47  ;;  %v10407_v56 = vrot.slane %v10391_v24, %v14176_v6  ;;  %v10414_v60 = vrot.slane %v10398_v47, %v14176_v6 }
0x1f1f   :  { %v10452_v20 = vadd.f32 %v10383_v19, %v16466_v29  ;;  %v10478_v49 = vcombine.low %v16838_v14, %v10448_v40  ;;  %v10479_v22 = vcombine.low %v16841_v17, %v10450_v1  ;;  %v10421_v59 = vrot.slane %v10399_v55, %v14176_v6 }
0x1f20   :  { %v10428_v41 = vrot.slane %v10400_v13, %v14176_v6  ;;  %v10429_v35 = vcombine.high %v10407_v56, %v10407_v56  ;;  %v16857_v45 = vadd.f32 %v10407_v56, %v16469_v5  ;;  %v16863_v26 = vadd.f32 %v10414_v60, %v16479_v11 }
0x1f21   :  { %v10430_v15 = vcombine.high %v10421_v59, %v10421_v59  ;;  %v16860_v57 = vadd.f32 %v10421_v59, %v16472_v37  ;;  %v10480_v29 = vcombine.low %v10451_v62, %v10452_v20  ;;  %v10487_v36 = vrot.slane %v10477_v8, %v14176_v6 }
0x1f22   :  { %v16866_v52 = vadd.f32 %v10429_v35, %v16474_v27  ;;  %v16869_v21 = vadd.f32 %v10428_v41, %v16482_v54  ;;  %v10494_v23 = vrot.slane %v10478_v49, %v14176_v6  ;;  %v10501_v11 = vrot.slane %v10479_v22, %v14176_v6 }
0x1f23   :  { %v16874_v5 = vadd.f32 %v10430_v15, %v16476_v33  ;;  %v10526_v37 = vcombine.low %v16857_v45, %v16860_v57  ;;  %v10508_v48 = vrot.slane %v10480_v29, %v14176_v6 }
0x1f24   :  { %v10509_v61 = vcombine.low %v10487_v36, %v10494_v23  ;;  %v10528_v27 = vcombine.low %v16863_v26, %v16869_v21 }
0x1f25   :  { %v10527_v54 = vcombine.low %v16866_v52, %v16874_v5  ;;  %v10510_v3 = vcombine.low %v10501_v11, %v10508_v48  ;;  %v10535_v16 = vrot.slane %v10526_v37, %v14176_v6 }
0x1f26   :  { %v10517_v33 = vrot.slane %v10509_v61, %v14176_v6  ;;  %v10549_v63 = vrot.slane %v10528_v27, %v14176_v6 }
0x1f27   :  { %v10524_v2 = vrot.slane %v10510_v3, %v14176_v6  ;;  %v10542_v44 = vrot.slane %v10527_v54, %v14176_v6 }
0x1f28   :  { %v10564_v51 = vrot.slane %v10549_v63, %v14176_v6 }
0x1f29   :  { %v10525_v10 = vcombine.low %v10517_v33, %v10524_v2  ;;  %v10550_v12 = vcombine.low %v10535_v16, %v10542_v44 }
0x1f2b   :  { %v10568_v18 = vsel %vm426_vm1, %v10525_v10, 0.0  ;;  %v10557_v46 = vrot.slane %v10550_v12, %v14176_v6 }
0x1f2c   :  { %10569 = vadd.xlane.f32.xlu0 %v10568_v18 }
0x1f2d   :  { %v10565_v4 = vcombine.low %v10557_v46, %v10564_v51 }
0x1f2f   :  { %v10571_v25 = vsel %vm2245_vm9, %v10565_v4, 0.0 }
0x1f30   :  { %10572 = vadd.xlane.f32.xlu1 %v10571_v25 }
0x1fb5   :  { %v10570_v32 = vpop.xlane.xlu0 %10569 }
0x1fb6   :  { %v10574_v24 = vmul.f32 0.03125, %v10570_v32 }
0x1fb8   :  { %v10581_v30 = vrot.slane %v10574_v24, %v14408_v42  ;;  %v10585_v50 = vrot.slane %v10574_v24, %v14668_v58  ;;  %v10589_v53 = vrot.slane %v10574_v24, %v14671_v31  ;;  %v10593_v47 = vrot.slane %v10574_v24, %v14674_v38 }
0x1fb9   :  { %v10573_v55 = vpop.xlane.xlu1 %10572  ;;  %v10597_v19 = vrot.slane %v10574_v24, %v14677_v9  ;;  %v10601_v8 = vrot.slane %v10574_v24, %v14680_v0  ;;  %v10605_v13 = vrot.slane %v10574_v24, %v14683_v43  ;;  %v10609_v56 = vrot.slane %v10574_v24, %v14686_v34 }
0x1fba   :  { %v10575_v60 = vmul.f32 0.03125, %v10573_v55  ;;  %v16902_v49 = vsub.f32 %v16830_v7, %v10581_v30  ;;  %v16905_v22 = vsub.f32 %v16835_v28, %v10585_v50  ;;  %v16908_v59 = vsub.f32 %v16838_v14, %v10589_v53 }
0x1fbb   :  { %v16910_v41 = vsub.f32 %v10448_v40, %v10593_v47  ;;  %v16913_v35 = vsub.f32 %v16841_v17, %v10597_v19  ;;  %v16915_v15 = vsub.f32 %v10450_v1, %v10601_v8  ;;  %v16917_v29 = vsub.f32 %v10451_v62, %v10605_v13 }
0x1fbc   :  { %v16919_v36 = vsub.f32 %v10452_v20, %v10609_v56  ;;  %v10662_v7 = vmul.f32 %v16902_v49, %v16902_v49  ;;  %v10663_v28 = vmul.f32 %v16905_v22, %v16905_v22  ;;  %v10664_v14 = vmul.f32 %v16908_v59, %v16908_v59 }
0x1fbd   :  { %v10665_v40 = vmul.f32 %v16910_v41, %v16910_v41  ;;  %v10666_v17 = vmul.f32 %v16913_v35, %v16913_v35  ;;  %v10667_v1 = vmul.f32 %v16915_v15, %v16915_v15  ;;  %v10668_v62 = vmul.f32 %v16917_v29, %v16917_v29 }
0x1fbe   :  { %v10669_v20 = vmul.f32 %v16919_v36, %v16919_v36  ;;  %v10690_v23 = vcombine.low %v10662_v7, %v10663_v28  ;;  %v10613_v37 = vrot.slane %v10575_v60, %v14408_v42  ;;  %v10617_v11 = vrot.slane %v10575_v60, %v14668_v58 }
0x1fbf   :  { %v10691_v48 = vcombine.low %v10664_v14, %v10665_v40  ;;  %v10692_v61 = vcombine.low %v10666_v17, %v10667_v1  ;;  %v10621_v27 = vrot.slane %v10575_v60, %v14671_v31  ;;  %v10625_v54 = vrot.slane %v10575_v60, %v14674_v38  ;;  %v13952_v1 = vld [vmem:[%s15453_s30 + $0x18] sm:$0xff]  }
0x1fc0   :  { %v10693_v3 = vcombine.low %v10668_v62, %v10669_v20  ;;  %v10700_v16 = vrot.slane %v10690_v23, %v14176_v6  ;;  %v10629_v33 = vrot.slane %v10575_v60, %v14677_v9  ;;  %v10633_v2 = vrot.slane %v10575_v60, %v14680_v0  ;;  %13859 = vmatpush3.bf16.msra.mxu1 %v13952_v1  ;;  %v13953_v62 = vld [vmem:[%s15453_s30 + $0x10] sm:$0xff]   ;;  %v13954_v20 = vld [vmem:[%s15462_s10 + $0x38] sm:$0xff]   ;;  %v13156_v23 = vld [vmem:[%s15469_s26 + $0x1] ss:$0 sm:$0xff]  ;;  %s14153_s30 = smov 29  }
0x1fc1   :  { %v10707_v44 = vrot.slane %v10691_v48, %v14176_v6  ;;  %v10714_v63 = vrot.slane %v10692_v61, %v14176_v6  ;;  %v16947_v10 = vsub.f32 %v16857_v45, %v10613_v37  ;;  %v16950_v12 = vsub.f32 %v16860_v57, %v10617_v11  ;;  %13860 = vmatprep.subr.bf16.mxu1 %v17705_v39  ;;  %v13157_v37 = vld [vmem:[%s15474_s18 + $0x1] ss:$0 sm:$0xff]  ;;  %s14150_s18 = smov 25  }
0x1fc2   :  { %v10721_v18 = vrot.slane %v10693_v3, %v14176_v6  ;;  %v16954_v46 = vsub.f32 %v16866_v52, %v10621_v27  ;;  %v16957_v51 = vsub.f32 %v16874_v5, %v10625_v54  ;;  %v16960_v4 = vsub.f32 %v16863_v26, %v10629_v33  ;;  %13867 = vmatpush3.bf16.msra.mxu0 %v13954_v20  ;;  %s12961_s7 = sld [smem:[%s17690_s0 + %s14150_s18]]  }
0x1fc3   :  { %v10722_v25 = vcombine.low %v10700_v16, %v10707_v44  ;;  %v16963_v32 = vsub.f32 %v16869_v21, %v10633_v2  ;;  %v10670_v45 = vmul.f32 %v16947_v10, %v16947_v10  ;;  %v10671_v57 = vmul.f32 %v16950_v12, %v16950_v12  ;;  %13868 = vmatprep.subr.bf16.mxu0 %v17705_v39 }
0x1fc4   :  { %v10723_v24 = vcombine.low %v10714_v63, %v10721_v18  ;;  %v10672_v52 = vmul.f32 %v16954_v46, %v16954_v46  ;;  %v10673_v5 = vmul.f32 %v16957_v51, %v16957_v51  ;;  %v10674_v26 = vmul.f32 %v16960_v4, %v16960_v4  ;;  %13861 = vmatpush3.bf16.msra.mxu1 %v13953_v62 }
0x1fc5   :  { %v10730_v30 = vrot.slane %v10722_v25, %v14176_v6  ;;  %v10675_v21 = vmul.f32 %v16963_v32, %v16963_v32  ;;  %v10739_v50 = vcombine.low %v10670_v45, %v10671_v57  ;;  %13878 = vmatprep.subr.bf16.mxu1 %v17705_v39  ;;  %v10884_v61 = vcombine.high %v13156_v23, %v13156_v23 }
0x1fc6   :  { %v10737_v53 = vrot.slane %v10723_v24, %v14176_v6  ;;  %v10740_v47 = vcombine.low %v10672_v52, %v10673_v5  ;;  %v10960_v27 = vcombine.high %v13157_v37, %v13157_v37  ;;  %v10891_v3 = vrot.slane %v13156_v23, %v14176_v6 }
0x1fc7   :  { %v10741_v55 = vcombine.low %v10674_v26, %v10675_v21  ;;  %v10748_v19 = vrot.slane %v10739_v50, %v14176_v6  ;;  %v10898_v16 = vrot.slane %v10884_v61, %v14176_v6  ;;  %v10967_v2 = vrot.slane %v13157_v37, %v14176_v6 }
0x1fc8   :  { %v10738_v8 = vcombine.low %v10730_v30, %v10737_v53  ;;  %v10755_v13 = vrot.slane %v10740_v47, %v14176_v6  ;;  %v10974_v44 = vrot.slane %v10960_v27, %v14176_v6  ;;  %v10899_v25 = vcombine.high %v10891_v3, %v10891_v3 }
0x1fc9   :  { %v10762_v56 = vrot.slane %v10741_v55, %v14176_v6  ;;  %v10900_v45 = vcombine.high %v10898_v16, %v10898_v16  ;;  %v10975_v57 = vcombine.high %v10967_v2, %v10967_v2  ;;  %v10907_v52 = vrot.slane %v10891_v3, %v14176_v6 }
0x1fca   :  { %v10781_v60 = vsel %vm426_vm1, %v10738_v8, 0.0  ;;  %v10763_v7 = vcombine.low %v10748_v19, %v10755_v13  ;;  %v10976_v24 = vcombine.high %v10974_v44, %v10974_v44  ;;  %v10914_v5 = vrot.slane %v10898_v16, %v14176_v6 }
0x1fcb   :  { %10782 = vadd.xlane.f32.xlu0 %v10781_v60  ;;  %v10777_v14 = vrot.slane %v10762_v56, %v14176_v6  ;;  %v10921_v26 = vrot.slane %v10899_v25, %v14176_v6  ;;  %v10928_v30 = vrot.slane %v10900_v45, %v14176_v6  ;;  %v17003_v21 = vrot.slane %v10967_v2, %v14176_v6 }
0x1fcc   :  { %v10770_v28 = vrot.slane %v10763_v7, %v14176_v6  ;;  %v17006_v50 = vrot.slane %v10974_v44, %v14176_v6  ;;  %v17009_v53 = vrot.slane %v10975_v57, %v14176_v6  ;;  %v17012_v47 = vrot.slane %v10976_v24, %v14176_v6 }
0x1fcd   :  { %v10929_v55 = vcombine.high %v10907_v52, %v10907_v52  ;;  %v10930_v19 = vcombine.high %v10914_v5, %v10914_v5  ;;  %v10931_v8 = vcombine.high %v10921_v26, %v10921_v26  ;;  %v10932_v13 = vcombine.high %v10928_v30, %v10928_v30 }
0x1fce   :  { %v10778_v40 = vcombine.low %v10770_v28, %v10777_v14  ;;  %v11005_v60 = vcombine.high %v17003_v21, %v17003_v21  ;;  %v11006_v7 = vcombine.high %v17006_v50, %v17006_v50  ;;  %v11007_v28 = vcombine.high %v17009_v53, %v17009_v53 }
0x1fcf   :  { %v11008_v14 = vcombine.high %v17012_v47, %v17012_v47 }
0x1fd0   :  { %v10784_v17 = vsel %vm2245_vm9, %v10778_v40, 0.0 }
0x1fd1   :  { %10785 = vadd.xlane.f32.xlu0 %v10784_v17 }
0x2054   :  { %v10783_v11 = vpop.xlane.xlu0 %10782 }
0x2055   :  { %v10787_v48 = vmul.f32 0.03125, %v10783_v11 }
0x2057   :  { %v10789_v54 = vadd.f32 1e-05, %v10787_v48 }
0x2059   :  { %14104 = vrsqrt.f32 %v10789_v54 }
0x205a   :  { %v10786_v33 = vpop.xlane.xlu0 %10785 }
0x205b   :  { %v10788_v63 = vmul.f32 0.03125, %v10786_v33 }
0x205d   :  { %v10790_v18 = vadd.f32 1e-05, %v10788_v63 }
0x205f   :  { %14106 = vrsqrt.f32 %v10790_v18 }
0x2066   :  { %v14105_v56 = vpop.eup %14104 }
0x2067   :  { %v10798_v40 = vrot.slane %v14105_v56, %v14408_v42  ;;  %v10802_v17 = vrot.slane %v14105_v56, %v14668_v58  ;;  %v10806_v1 = vrot.slane %v14105_v56, %v14671_v31  ;;  %v10810_v62 = vrot.slane %v14105_v56, %v14674_v38 }
0x2068   :  { %v10814_v20 = vrot.slane %v14105_v56, %v14677_v9  ;;  %v10818_v23 = vrot.slane %v14105_v56, %v14680_v0  ;;  %v10822_v37 = vrot.slane %v14105_v56, %v14683_v43  ;;  %v10826_v11 = vrot.slane %v14105_v56, %v14686_v34 }
0x2069   :  { %v10865_v48 = vmul.f32 %v10798_v40, %v16902_v49  ;;  %v10866_v61 = vmul.f32 %v10802_v17, %v16905_v22  ;;  %v10867_v27 = vmul.f32 %v10806_v1, %v16908_v59  ;;  %v10868_v54 = vmul.f32 %v10810_v62, %v16910_v41 }
0x206a   :  { %v10869_v3 = vmul.f32 %v10814_v20, %v16913_v35  ;;  %v10870_v16 = vmul.f32 %v10818_v23, %v16915_v15  ;;  %v10871_v33 = vmul.f32 %v10822_v37, %v16917_v29  ;;  %v10872_v2 = vmul.f32 %v10826_v11, %v16919_v36 }
0x206b   :  { %v10941_v44 = vmul.f32 %v10907_v52, %v10865_v48  ;;  %v10942_v63 = vmul.f32 %v10921_v26, %v10866_v61  ;;  %v10943_v18 = vmul.f32 %v10929_v55, %v10867_v27  ;;  %v10944_v25 = vmul.f32 %v10931_v8, %v10868_v54 }
0x206c   :  { %v14107_v45 = vpop.eup %14106  ;;  %v10945_v49 = vmul.f32 %v10914_v5, %v10869_v3  ;;  %v10946_v57 = vmul.f32 %v10928_v30, %v10870_v16  ;;  %v10947_v22 = vmul.f32 %v10930_v19, %v10871_v33  ;;  %v10948_v24 = vmul.f32 %v10932_v13, %v10872_v2 }
0x206d   :  { %v10830_v59 = vrot.slane %v14107_v45, %v14408_v42  ;;  %v10834_v41 = vrot.slane %v14107_v45, %v14668_v58  ;;  %v10838_v35 = vrot.slane %v14107_v45, %v14671_v31  ;;  %v10842_v15 = vrot.slane %v14107_v45, %v14674_v38 }
0x206e   :  { %v10846_v29 = vrot.slane %v14107_v45, %v14677_v9  ;;  %v10850_v36 = vrot.slane %v14107_v45, %v14680_v0  ;;  %v17045_v56 = vadd.f32 %v17003_v21, %v10941_v44  ;;  %v17048_v40 = vadd.f32 %v17009_v53, %v10942_v63 }
0x206f   :  { %v10873_v19 = vmul.f32 %v10830_v59, %v16947_v10  ;;  %v10874_v13 = vmul.f32 %v10834_v41, %v16950_v12  ;;  %v10875_v17 = vmul.f32 %v10838_v35, %v16954_v46  ;;  %v10876_v1 = vmul.f32 %v10842_v15, %v16957_v51  ;;  %v13955_v35 = vld [vmem:[%s15462_s10 + $0x30] sm:$0xff]   ;;  %v13956_v15 = vld [vmem:[%s15462_s10 + $0x28] sm:$0xff]  }
0x2070   :  { %v10877_v62 = vmul.f32 %v10846_v29, %v16960_v4  ;;  %v10878_v20 = vmul.f32 %v10850_v36, %v16963_v32  ;;  %v17056_v23 = vadd.f32 %v11005_v60, %v10943_v18  ;;  %v17058_v37 = vadd.f32 %v11007_v28, %v10944_v25  ;;  %13869 = vmatpush3.bf16.msra.mxu0 %v13955_v35  ;;  %v13957_v29 = vld [vmem:[%s15462_s10 + $0x20] sm:$0xff]  }
0x2071   :  { %v10949_v11 = vmul.f32 %v10907_v52, %v10873_v19  ;;  %v10950_v48 = vmul.f32 %v10921_v26, %v10874_v13  ;;  %v10951_v61 = vmul.f32 %v10929_v55, %v10875_v17  ;;  %v10952_v27 = vmul.f32 %v10931_v8, %v10876_v1  ;;  %13870 = vmatprep.subr.bf16.mxu0 %v17705_v39  ;;  %v13163_v36 = vld [vmem:[%s15607_s5 + $0x1] ss:$0 sm:$0xff]  ;;  %s12965_s5 = sld [smem:[%s17690_s0 + %s14153_s30]]  }
0x2072   :  { %v10953_v54 = vmul.f32 %v10914_v5, %v10877_v62  ;;  %v10954_v10 = vmul.f32 %v10928_v30, %v10878_v20  ;;  %v17061_v12 = vadd.f32 %v17006_v50, %v10945_v49  ;;  %v17064_v46 = vadd.f32 %v17012_v47, %v10946_v57 }
0x2073   :  { %v17066_v51 = vadd.f32 %v11006_v7, %v10947_v22  ;;  %v17068_v4 = vadd.f32 %v11008_v14, %v10948_v24  ;;  %v17071_v32 = vadd.f32 %v17003_v21, %v10949_v11  ;;  %v17074_v52 = vadd.f32 %v17009_v53, %v10950_v48 }
0x2074   :  { %v17076_v26 = vadd.f32 %v11005_v60, %v10951_v61  ;;  %v17078_v5 = vadd.f32 %v11007_v28, %v10952_v27  ;;  %v17081_v30 = vadd.f32 %v17006_v50, %v10953_v54  ;;  %v17084_v55 = vadd.f32 %v17012_v47, %v10954_v10  ;;  %13871 = vmatpush3.bf16.msra.mxu0 %v13956_v15  ;;  %v13176_v27 = vld [vmem:[%s15616_s23 + $0x1] ss:$0 sm:$0xff] }
0x2075   :  { %v11045_v8 = vcombine.low %v17045_v56, %v17048_v40  ;;  %v11046_v21 = vcombine.low %v17056_v23, %v17058_v37  ;;  %v11047_v53 = vcombine.low %v17061_v12, %v17064_v46  ;;  %v11048_v60 = vcombine.low %v17066_v51, %v17068_v4  ;;  %13872 = vmatprep.subr.bf16.mxu0 %v17705_v39 }
0x2076   :  { %v11094_v7 = vcombine.low %v17071_v32, %v17074_v52  ;;  %v11095_v50 = vcombine.low %v17076_v26, %v17078_v5  ;;  %v11096_v47 = vcombine.low %v17081_v30, %v17084_v55 }
0x2077   :  { %v11055_v28 = vrot.slane %v11045_v8, %v14176_v6  ;;  %v11062_v14 = vrot.slane %v11046_v21, %v14176_v6  ;;  %v11069_v3 = vrot.slane %v11047_v53, %v14176_v6  ;;  %v11076_v16 = vrot.slane %v11048_v60, %v14176_v6 }
0x2078   :  { %v11103_v33 = vrot.slane %v11094_v7, %v14176_v6  ;;  %v11110_v2 = vrot.slane %v11095_v50, %v14176_v6  ;;  %v11117_v44 = vrot.slane %v11096_v47, %v14176_v6  ;;  %13873 = vmatpush3.bf16.msra.mxu0 %v13957_v29 }
0x2079   :  { %v11077_v63 = vcombine.low %v11055_v28, %v11062_v14  ;;  %v11078_v18 = vcombine.low %v11069_v3, %v11076_v16 }
0x207a   :  { %v11118_v25 = vcombine.low %v11103_v33, %v11110_v2  ;;  %v11132_v22 = vrot.slane %v11117_v44, %v14176_v6 }
0x207b   :  { %v11085_v45 = vrot.slane %v11077_v63, %v14176_v6  ;;  %v11092_v49 = vrot.slane %v11078_v18, %v14176_v6 }
0x207c   :  { %v11125_v57 = vrot.slane %v11118_v25, %v14176_v6 }
0x207d   :  { %v11093_v24 = vcombine.low %v11085_v45, %v11092_v49 }
0x207e   :  { %v11133_v59 = vcombine.low %v11125_v57, %v11132_v22 }
0x2080   :  { %v11136_v41 = vpack.c.bf16 %v11133_v59, %v11093_v24 }
0x2082   :  { %13863 = vmatmul.mubr.msk.bf16.vlgmr.msra.gmra.mxu1 %vm426_vm1, %v11136_v41 }
0x2083   :  { %13882 = vmatprep.mubr.msk.bf16.mxu1 %vm14118_vm0, %v17705_v39 }
0x2142   :  { %v11199_v19 = vpop.f32.mrf.mxu1 }
0x2143   :  { %v11200_v17 = vadd.f32 %v13163_v36, %v11199_v19 }
0x2144   :  { %v13864_v13 = vpop.f32.mrf.mxu1 }
0x2145   :  { %v11206_v11 = vmax.f32 %v11200_v17, 0.0 }
0x2146   :  { %v11202_v1 = vpop.f32.mrf.mxu1 }
0x2147   :  { %v11203_v62 = vadd.f32 %v13163_v36, %v11202_v1 }
0x2148   :  { %v13865_v20 = vpop.f32.mrf.mxu1 }
0x2149   :  { %v11207_v48 = vmax.f32 %v11203_v62, 0.0 }
0x214b   :  { %v11208_v61 = vpack.c.bf16 %v11207_v48, %v11206_v11 }
0x214d   :  { %13875 = vmatmul.mubr.msk.bf16.vlgmr.msra.gmra.mxu0 %vm5402_vm11, %v11208_v61 }
0x220d   :  { %v11287_v54 = vpop.f32.mrf.mxu0 }
0x220e   :  { %v11288_v10 = vadd.f32 %v13176_v27, %v11287_v54 }
0x220f   :  { %v13876_v8 = vpop.f32.mrf.mxu0 }
0x2210   :  { %v11296_v21 = vcombine.high %v11288_v10, %v11288_v10  ;;  %v11303_v53 = vrot.slane %v11288_v10, %v14176_v6 }
0x2211   :  { %v11290_v60 = vpop.f32.mrf.mxu0 }
0x2212   :  { %v11310_v7 = vrot.slane %v11296_v21, %v14176_v6  ;;  %v11311_v50 = vcombine.high %v11303_v53, %v11303_v53  ;;  %v11319_v47 = vrot.slane %v11303_v53, %v14176_v6  ;;  %v11291_v28 = vadd.f32 %v13176_v27, %v11290_v60 }
0x2213   :  { %v13877_v14 = vpop.f32.mrf.mxu0 }
0x2214   :  { %v11312_v3 = vcombine.high %v11310_v7, %v11310_v7  ;;  %v11326_v16 = vrot.slane %v11310_v7, %v14176_v6  ;;  %v11333_v33 = vrot.slane %v11311_v50, %v14176_v6  ;;  %v11341_v2 = vcombine.high %v11319_v47, %v11319_v47 }
0x2215   :  { %v17128_v44 = vadd.f32 %v11319_v47, %v17045_v56  ;;  %v11345_v63 = vcombine.high %v11291_v28, %v11291_v28  ;;  %v11352_v18 = vrot.slane %v11291_v28, %v14176_v6 }
0x2216   :  { %v11340_v25 = vrot.slane %v11312_v3, %v14176_v6  ;;  %v11342_v45 = vcombine.high %v11326_v16, %v11326_v16  ;;  %v11343_v49 = vcombine.high %v11333_v33, %v11333_v33  ;;  %v17133_v57 = vadd.f32 %v11333_v33, %v17048_v40 }
0x2217   :  { %v17136_v22 = vadd.f32 %v11341_v2, %v17056_v23  ;;  %v17139_v24 = vadd.f32 %v11326_v16, %v17061_v12  ;;  %v11359_v59 = vrot.slane %v11345_v63, %v14176_v6  ;;  %v11360_v56 = vcombine.high %v11352_v18, %v11352_v18 }
0x2218   :  { %v11344_v41 = vcombine.high %v11340_v25, %v11340_v25  ;;  %v11409_v35 = vadd.f32 %v11343_v49, %v17058_v37  ;;  %v11411_v15 = vadd.f32 %v11340_v25, %v17064_v46  ;;  %v11412_v29 = vadd.f32 %v11342_v45, %v17066_v51 }
0x2219   :  { %v11438_v40 = vcombine.low %v17128_v44, %v17133_v57  ;;  %v11361_v36 = vcombine.high %v11359_v59, %v11359_v59  ;;  %v11368_v23 = vrot.slane %v11352_v18, %v14176_v6  ;;  %v11375_v19 = vrot.slane %v11359_v59, %v14176_v6 }
0x221a   :  { %v11413_v12 = vadd.f32 %v11344_v41, %v17068_v4  ;;  %v11439_v13 = vcombine.low %v17136_v22, %v11409_v35  ;;  %v11440_v17 = vcombine.low %v17139_v24, %v11411_v15  ;;  %v11382_v37 = vrot.slane %v11360_v56, %v14176_v6 }
0x221b   :  { %v11389_v46 = vrot.slane %v11361_v36, %v14176_v6  ;;  %v11390_v1 = vcombine.high %v11368_v23, %v11368_v23  ;;  %v17155_v51 = vadd.f32 %v11368_v23, %v17071_v32  ;;  %v17161_v11 = vadd.f32 %v11375_v19, %v17081_v30 }
0x221c   :  { %v11391_v62 = vcombine.high %v11382_v37, %v11382_v37  ;;  %v17158_v20 = vadd.f32 %v11382_v37, %v17074_v52  ;;  %v11441_v4 = vcombine.low %v11412_v29, %v11413_v12  ;;  %v11448_v27 = vrot.slane %v11438_v40, %v14176_v6 }
0x221d   :  { %v17164_v48 = vadd.f32 %v11390_v1, %v17076_v26  ;;  %v17167_v61 = vadd.f32 %v11389_v46, %v17084_v55  ;;  %v11455_v54 = vrot.slane %v11439_v13, %v14176_v6  ;;  %v11462_v30 = vrot.slane %v11440_v17, %v14176_v6 }
0x221e   :  { %v17172_v32 = vadd.f32 %v11391_v62, %v17078_v5  ;;  %v11487_v52 = vcombine.low %v17155_v51, %v17158_v20  ;;  %v11469_v10 = vrot.slane %v11441_v4, %v14176_v6 }
0x221f   :  { %v11470_v8 = vcombine.low %v11448_v27, %v11455_v54  ;;  %v11489_v26 = vcombine.low %v17161_v11, %v17167_v61 }
0x2220   :  { %v11488_v55 = vcombine.low %v17164_v48, %v17172_v32  ;;  %v11471_v21 = vcombine.low %v11462_v30, %v11469_v10  ;;  %v11496_v53 = vrot.slane %v11487_v52, %v14176_v6 }
0x2221   :  { %v11478_v5 = vrot.slane %v11470_v8, %v14176_v6  ;;  %v11510_v50 = vrot.slane %v11489_v26, %v14176_v6 }
0x2222   :  { %v11485_v60 = vrot.slane %v11471_v21, %v14176_v6  ;;  %v11503_v7 = vrot.slane %v11488_v55, %v14176_v6 }
0x2223   :  { %v11525_v16 = vrot.slane %v11510_v50, %v14176_v6 }
0x2224   :  { %v11486_v47 = vcombine.low %v11478_v5, %v11485_v60  ;;  %v11511_v28 = vcombine.low %v11496_v53, %v11503_v7 }
0x2226   :  { %v11529_v14 = vsel %vm426_vm1, %v11486_v47, 0.0  ;;  %v11518_v3 = vrot.slane %v11511_v28, %v14176_v6 }
0x2227   :  { %11530 = vadd.xlane.f32.xlu1 %v11529_v14 }
0x2228   :  { %v11526_v33 = vcombine.low %v11518_v3, %v11525_v16 }
0x222a   :  { %v11532_v2 = vsel %vm2245_vm9, %v11526_v33, 0.0 }
0x222b   :  { %11533 = vadd.xlane.f32.xlu0 %v11532_v2 }
0x22b0   :  { %v11531_v63 = vpop.xlane.xlu1 %11530 }
0x22b1   :  { %v11535_v18 = vmul.f32 0.03125, %v11531_v63 }
0x22b3   :  { %v11542_v25 = vrot.slane %v11535_v18, %v14408_v42  ;;  %v11546_v45 = vrot.slane %v11535_v18, %v14668_v58  ;;  %v11550_v49 = vrot.slane %v11535_v18, %v14671_v31  ;;  %v11554_v59 = vrot.slane %v11535_v18, %v14674_v38 }
0x22b4   :  { %v11534_v56 = vpop.xlane.xlu0 %11533  ;;  %v11558_v41 = vrot.slane %v11535_v18, %v14677_v9  ;;  %v11562_v40 = vrot.slane %v11535_v18, %v14680_v0  ;;  %v11566_v36 = vrot.slane %v11535_v18, %v14683_v43  ;;  %v11570_v23 = vrot.slane %v11535_v18, %v14686_v34 }
0x22b5   :  { %v11536_v19 = vmul.f32 0.03125, %v11534_v56  ;;  %v17200_v13 = vsub.f32 %v17128_v44, %v11542_v25  ;;  %v17203_v17 = vsub.f32 %v17133_v57, %v11546_v45  ;;  %v17206_v37 = vsub.f32 %v17136_v22, %v11550_v49 }
0x22b6   :  { %v17208_v46 = vsub.f32 %v11409_v35, %v11554_v59  ;;  %v17211_v1 = vsub.f32 %v17139_v24, %v11558_v41  ;;  %v17213_v62 = vsub.f32 %v11411_v15, %v11562_v40  ;;  %v17215_v4 = vsub.f32 %v11412_v29, %v11566_v36 }
0x22b7   :  { %v17217_v27 = vsub.f32 %v11413_v12, %v11570_v23  ;;  %v11623_v44 = vmul.f32 %v17200_v13, %v17200_v13  ;;  %v11624_v57 = vmul.f32 %v17203_v17, %v17203_v17  ;;  %v11625_v22 = vmul.f32 %v17206_v37, %v17206_v37 }
0x22b8   :  { %v11626_v35 = vmul.f32 %v17208_v46, %v17208_v46  ;;  %v11627_v24 = vmul.f32 %v17211_v1, %v17211_v1  ;;  %v11628_v15 = vmul.f32 %v17213_v62, %v17213_v62  ;;  %v11629_v29 = vmul.f32 %v17215_v4, %v17215_v4 }
0x22b9   :  { %v11630_v12 = vmul.f32 %v17217_v27, %v17217_v27  ;;  %v11651_v54 = vcombine.low %v11623_v44, %v11624_v57  ;;  %v11574_v52 = vrot.slane %v11536_v19, %v14408_v42  ;;  %v11578_v30 = vrot.slane %v11536_v19, %v14668_v58 }
0x22ba   :  { %v11652_v10 = vcombine.low %v11625_v22, %v11626_v35  ;;  %v11653_v8 = vcombine.low %v11627_v24, %v11628_v15  ;;  %v11582_v26 = vrot.slane %v11536_v19, %v14671_v31  ;;  %v11586_v55 = vrot.slane %v11536_v19, %v14674_v38  ;;  %v13184_v15 = vld [vmem:[%s15788_s4 + $0x1] ss:$0 sm:$0xff] }
0x22bb   :  { %v11654_v21 = vcombine.low %v11629_v29, %v11630_v12  ;;  %v11661_v53 = vrot.slane %v11651_v54, %v14176_v6  ;;  %v11590_v5 = vrot.slane %v11536_v19, %v14677_v9  ;;  %v11594_v60 = vrot.slane %v11536_v19, %v14680_v0  ;;  %v13185_v29 = vld [vmem:[%s15794_s21 + $0x1] ss:$0 sm:$0xff] }
0x22bc   :  { %v11668_v7 = vrot.slane %v11652_v10, %v14176_v6  ;;  %v11675_v50 = vrot.slane %v11653_v8, %v14176_v6  ;;  %v17245_v47 = vsub.f32 %v17155_v51, %v11574_v52  ;;  %v17248_v28 = vsub.f32 %v17158_v20, %v11578_v30 }
0x22bd   :  { %v11682_v14 = vrot.slane %v11654_v21, %v14176_v6  ;;  %v17252_v3 = vsub.f32 %v17164_v48, %v11582_v26  ;;  %v17255_v16 = vsub.f32 %v17172_v32, %v11586_v55  ;;  %v17258_v33 = vsub.f32 %v17161_v11, %v11590_v5 }
0x22be   :  { %v11683_v2 = vcombine.low %v11661_v53, %v11668_v7  ;;  %v17261_v63 = vsub.f32 %v17167_v61, %v11594_v60  ;;  %v11631_v51 = vmul.f32 %v17245_v47, %v17245_v47  ;;  %v11632_v20 = vmul.f32 %v17248_v28, %v17248_v28 }
0x22bf   :  { %v11684_v18 = vcombine.low %v11675_v50, %v11682_v14  ;;  %v11633_v48 = vmul.f32 %v17252_v3, %v17252_v3  ;;  %v11634_v32 = vmul.f32 %v17255_v16, %v17255_v16  ;;  %v11635_v11 = vmul.f32 %v17258_v33, %v17258_v33 }
0x22c0   :  { %v11691_v25 = vrot.slane %v11683_v2, %v14176_v6  ;;  %v11636_v61 = vmul.f32 %v17261_v63, %v17261_v63  ;;  %v11700_v45 = vcombine.low %v11631_v51, %v11632_v20  ;;  %v11845_v52 = vcombine.high %v13184_v15, %v13184_v15 }
0x22c1   :  { %v11698_v49 = vrot.slane %v11684_v18, %v14176_v6  ;;  %v11701_v59 = vcombine.low %v11633_v48, %v11634_v32  ;;  %v11921_v30 = vcombine.high %v13185_v29, %v13185_v29  ;;  %v11852_v8 = vrot.slane %v13184_v15, %v14176_v6 }
0x22c2   :  { %v11702_v56 = vcombine.low %v11635_v11, %v11636_v61  ;;  %v11709_v41 = vrot.slane %v11700_v45, %v14176_v6  ;;  %v11859_v26 = vrot.slane %v11845_v52, %v14176_v6  ;;  %v11928_v21 = vrot.slane %v13185_v29, %v14176_v6 }
0x22c3   :  { %v11699_v40 = vcombine.low %v11691_v25, %v11698_v49  ;;  %v11716_v36 = vrot.slane %v11701_v59, %v14176_v6  ;;  %v11935_v53 = vrot.slane %v11921_v30, %v14176_v6  ;;  %v11860_v7 = vcombine.high %v11852_v8, %v11852_v8 }
0x22c4   :  { %v11723_v23 = vrot.slane %v11702_v56, %v14176_v6  ;;  %v11861_v50 = vcombine.high %v11859_v26, %v11859_v26  ;;  %v11936_v14 = vcombine.high %v11928_v21, %v11928_v21  ;;  %v17291_v51 = vrot.slane %v11852_v8, %v14176_v6 }
0x22c5   :  { %v11742_v19 = vsel %vm426_vm1, %v11699_v40, 0.0  ;;  %v11724_v44 = vcombine.low %v11709_v41, %v11716_v36  ;;  %v11937_v2 = vcombine.high %v11935_v53, %v11935_v53  ;;  %v17294_v20 = vrot.slane %v11859_v26, %v14176_v6 }
0x22c6   :  { %11743 = vadd.xlane.f32.xlu1 %v11742_v19  ;;  %v11738_v22 = vrot.slane %v11723_v23, %v14176_v6  ;;  %v17297_v18 = vrot.slane %v11860_v7, %v14176_v6  ;;  %v17300_v48 = vrot.slane %v11861_v50, %v14176_v6  ;;  %v17303_v32 = vrot.slane %v11928_v21, %v14176_v6 }
0x22c7   :  { %v11731_v57 = vrot.slane %v11724_v44, %v14176_v6  ;;  %v17306_v11 = vrot.slane %v11935_v53, %v14176_v6  ;;  %v17309_v25 = vrot.slane %v11936_v14, %v14176_v6  ;;  %v17312_v61 = vrot.slane %v11937_v2, %v14176_v6 }
0x22c8   :  { %v17316_v45 = vcombine.high %v17291_v51, %v17291_v51  ;;  %v11891_v49 = vcombine.high %v17294_v20, %v17294_v20  ;;  %v17322_v59 = vcombine.high %v17297_v18, %v17297_v18  ;;  %v11893_v56 = vcombine.high %v17300_v48, %v17300_v48 }
0x22c9   :  { %v11739_v35 = vcombine.low %v11731_v57, %v11738_v22  ;;  %v17328_v40 = vcombine.high %v17303_v32, %v17303_v32  ;;  %v11967_v36 = vcombine.high %v17306_v11, %v17306_v11  ;;  %v17334_v23 = vcombine.high %v17309_v25, %v17309_v25 }
0x22ca   :  { %v11969_v19 = vcombine.high %v17312_v61, %v17312_v61 }
0x22cb   :  { %v11745_v24 = vsel %vm2245_vm9, %v11739_v35, 0.0 }
0x22cc   :  { %11746 = vadd.xlane.f32.xlu0 %v11745_v24 }
0x234f   :  { %v11744_v12 = vpop.xlane.xlu1 %11743 }
0x2350   :  { %v11748_v54 = vmul.f32 0.03125, %v11744_v12 }
0x2352   :  { %v11750_v10 = vadd.f32 1e-05, %v11748_v54 }
0x2354   :  { %14108 = vrsqrt.f32 %v11750_v10 }
0x2355   :  { %v11747_v55 = vpop.xlane.xlu0 %11746 }
0x2356   :  { %v11749_v5 = vmul.f32 0.03125, %v11747_v55 }
0x2358   :  { %v11751_v60 = vadd.f32 1e-05, %v11749_v5 }
0x235a   :  { %14110 = vrsqrt.f32 %v11751_v60 }
0x2361   :  { %v14109_v41 = vpop.eup %14108 }
0x2362   :  { %v11759_v44 = vrot.slane %v14109_v41, %v14408_v42  ;;  %v11763_v57 = vrot.slane %v14109_v41, %v14668_v58  ;;  %v11767_v22 = vrot.slane %v14109_v41, %v14671_v31  ;;  %v11771_v35 = vrot.slane %v14109_v41, %v14674_v38 }
0x2363   :  { %v11775_v24 = vrot.slane %v14109_v41, %v14677_v9  ;;  %v11779_v15 = vrot.slane %v14109_v41, %v14680_v0  ;;  %v11783_v29 = vrot.slane %v14109_v41, %v14683_v43  ;;  %v11787_v12 = vrot.slane %v14109_v41, %v14686_v34 }
0x2364   :  { %v11826_v54 = vmul.f32 %v11759_v44, %v17200_v13  ;;  %v11827_v52 = vmul.f32 %v11763_v57, %v17203_v17  ;;  %v11828_v30 = vmul.f32 %v11767_v22, %v17206_v37  ;;  %v11829_v10 = vmul.f32 %v11771_v35, %v17208_v46 }
0x2365   :  { %v11830_v8 = vmul.f32 %v11775_v24, %v17211_v1  ;;  %v11831_v26 = vmul.f32 %v11779_v15, %v17213_v62  ;;  %v11832_v55 = vmul.f32 %v11783_v29, %v17215_v4  ;;  %v11833_v21 = vmul.f32 %v11787_v12, %v17217_v27 }
0x2366   :  { %v11902_v53 = vmul.f32 %v17291_v51, %v11826_v54  ;;  %v11903_v5 = vmul.f32 %v17297_v18, %v11827_v52  ;;  %v11904_v13 = vmul.f32 %v17316_v45, %v11828_v30  ;;  %v11905_v17 = vmul.f32 %v17322_v59, %v11829_v10 }
0x2367   :  { %v14111_v60 = vpop.eup %14110  ;;  %v11906_v37 = vmul.f32 %v17294_v20, %v11830_v8  ;;  %v11907_v46 = vmul.f32 %v17300_v48, %v11831_v26  ;;  %v11908_v1 = vmul.f32 %v11891_v49, %v11832_v55  ;;  %v11909_v7 = vmul.f32 %v11893_v56, %v11833_v21 }
0x2368   :  { %v17361_v62 = vadd.f32 %v17303_v32, %v11902_v53  ;;  %v17364_v4 = vadd.f32 %v17309_v25, %v11903_v5  ;;  %v17367_v27 = vadd.f32 %v17328_v40, %v11904_v13  ;;  %v17370_v50 = vadd.f32 %v17334_v23, %v11905_v17 }
0x2369   :  { %v17373_v14 = vadd.f32 %v17306_v11, %v11906_v37  ;;  %v17376_v2 = vadd.f32 %v17312_v61, %v11907_v46  ;;  %v17378_v49 = vadd.f32 %v11967_v36, %v11908_v1  ;;  %v17380_v56 = vadd.f32 %v11969_v19, %v11909_v7 }
0x236a   :  { %v12008_v41 = vcombine.low %v17361_v62, %v17364_v4  ;;  %v12009_v44 = vcombine.low %v17367_v27, %v17370_v50  ;;  %v11791_v57 = vrot.slane %v14111_v60, %v14408_v42  ;;  %v11795_v22 = vrot.slane %v14111_v60, %v14668_v58 }
0x236b   :  { %v12010_v35 = vcombine.low %v17373_v14, %v17376_v2  ;;  %v12011_v24 = vcombine.low %v17378_v49, %v17380_v56  ;;  %v11799_v36 = vrot.slane %v14111_v60, %v14671_v31  ;;  %v11803_v19 = vrot.slane %v14111_v60, %v14674_v38 }
0x236c   :  { %v12018_v15 = vrot.slane %v12008_v41, %v14176_v6  ;;  %v12025_v29 = vrot.slane %v12009_v44, %v14176_v6  ;;  %v11807_v12 = vrot.slane %v14111_v60, %v14677_v9  ;;  %v11811_v54 = vrot.slane %v14111_v60, %v14680_v0 }
0x236d   :  { %v12032_v52 = vrot.slane %v12010_v35, %v14176_v6  ;;  %v12039_v30 = vrot.slane %v12011_v24, %v14176_v6  ;;  %v11834_v10 = vmul.f32 %v11791_v57, %v17245_v47  ;;  %v11835_v8 = vmul.f32 %v11795_v22, %v17248_v28 }
0x236e   :  { %v12040_v26 = vcombine.low %v12018_v15, %v12025_v29  ;;  %v11836_v55 = vmul.f32 %v11799_v36, %v17252_v3  ;;  %v11837_v21 = vmul.f32 %v11803_v19, %v17255_v16  ;;  %v11838_v53 = vmul.f32 %v11807_v12, %v17258_v33 }
0x236f   :  { %v12041_v5 = vcombine.low %v12032_v52, %v12039_v30  ;;  %v11839_v13 = vmul.f32 %v11811_v54, %v17261_v63  ;;  %v11910_v17 = vmul.f32 %v17291_v51, %v11834_v10  ;;  %v11911_v60 = vmul.f32 %v17297_v18, %v11835_v8 }
0x2370   :  { %v12048_v37 = vrot.slane %v12040_v26, %v14176_v6  ;;  %v11912_v47 = vmul.f32 %v17316_v45, %v11836_v55  ;;  %v11913_v28 = vmul.f32 %v17322_v59, %v11837_v21  ;;  %v11914_v46 = vmul.f32 %v17294_v20, %v11838_v53 }
0x2371   :  { %v12055_v3 = vrot.slane %v12041_v5, %v14176_v6  ;;  %v11915_v16 = vmul.f32 %v17300_v48, %v11839_v13  ;;  %v17415_v33 = vadd.f32 %v17303_v32, %v11910_v17  ;;  %v17418_v63 = vadd.f32 %v17309_v25, %v11911_v60 }
0x2372   :  { %v17421_v51 = vadd.f32 %v17328_v40, %v11912_v47  ;;  %v17424_v18 = vadd.f32 %v17334_v23, %v11913_v28  ;;  %v17427_v45 = vadd.f32 %v17306_v11, %v11914_v46 }
0x2373   :  { %v12056_v20 = vcombine.low %v12048_v37, %v12055_v3  ;;  %v17430_v59 = vadd.f32 %v17312_v61, %v11915_v16  ;;  %v12057_v48 = vcombine.low %v17415_v33, %v17418_v63 }
0x2374   :  { %v12058_v32 = vcombine.low %v17421_v51, %v17424_v18 }
0x2375   :  { %v12099_v25 = vsel %vm426_vm1, %v12056_v20, 0.0  ;;  %v12059_v40 = vcombine.low %v17427_v45, %v17430_v59  ;;  %v12066_v23 = vrot.slane %v12057_v48, %v14176_v6 }
0x2376   :  { %12100 = vadd.xlane.f32.xlu1 %v12099_v25  ;;  %v12073_v11 = vrot.slane %v12058_v32, %v14176_v6 }
0x2377   :  { %v12080_v1 = vrot.slane %v12059_v40, %v14176_v6 }
0x2378   :  { %v12081_v61 = vcombine.low %v12066_v23, %v12073_v11 }
0x2379   :  { %v12095_v41 = vrot.slane %v12080_v1, %v14176_v6 }
0x237a   :  { %v12088_v7 = vrot.slane %v12081_v61, %v14176_v6 }
0x237c   :  { %v12096_v44 = vcombine.low %v12088_v7, %v12095_v41 }
0x237e   :  { %v12102_v57 = vsel %vm2245_vm9, %v12096_v44, 0.0 }
0x237f   :  { %12103 = vadd.xlane.f32.xlu0 %v12102_v57 }
0x23ff   :  { %v12101_v22 = vpop.xlane.xlu1 %12100 }
0x2400   :  { %v12105_v35 = vmul.f32 0.03125, %v12101_v22 }
0x2402   :  { %v12112_v24 = vrot.slane %v12105_v35, %v14408_v42  ;;  %v12116_v36 = vrot.slane %v12105_v35, %v14668_v58  ;;  %v12120_v19 = vrot.slane %v12105_v35, %v14671_v31  ;;  %v12124_v15 = vrot.slane %v12105_v35, %v14674_v38 }
0x2403   :  { %v12128_v29 = vrot.slane %v12105_v35, %v14677_v9  ;;  %v12132_v12 = vrot.slane %v12105_v35, %v14680_v0  ;;  %v12136_v54 = vrot.slane %v12105_v35, %v14683_v43  ;;  %v12140_v52 = vrot.slane %v12105_v35, %v14686_v34 }
0x2404   :  { %v17454_v30 = vsub.f32 %v17361_v62, %v12112_v24  ;;  %v17457_v10 = vsub.f32 %v17364_v4, %v12116_v36  ;;  %v17460_v8 = vsub.f32 %v17367_v27, %v12120_v19  ;;  %v17463_v26 = vsub.f32 %v17370_v50, %v12124_v15 }
0x2405   :  { %v17466_v55 = vsub.f32 %v17373_v14, %v12128_v29  ;;  %v17469_v21 = vsub.f32 %v17376_v2, %v12132_v12  ;;  %v17472_v53 = vsub.f32 %v17378_v49, %v12136_v54  ;;  %v17475_v62 = vsub.f32 %v17380_v56, %v12140_v52 }
0x2406   :  { %v12193_v4 = vmul.f32 %v17454_v30, %v17454_v30  ;;  %v12194_v27 = vmul.f32 %v17457_v10, %v17457_v10  ;;  %v12195_v50 = vmul.f32 %v17460_v8, %v17460_v8  ;;  %v12196_v14 = vmul.f32 %v17463_v26, %v17463_v26 }
0x2407   :  { %v12197_v2 = vmul.f32 %v17466_v55, %v17466_v55  ;;  %v12198_v49 = vmul.f32 %v17469_v21, %v17469_v21  ;;  %v12199_v56 = vmul.f32 %v17472_v53, %v17472_v53  ;;  %v12200_v5 = vmul.f32 %v17475_v62, %v17475_v62 }
0x2408   :  { %v12104_v13 = vpop.xlane.xlu0 %12103  ;;  %v12221_v17 = vcombine.low %v12193_v4, %v12194_v27  ;;  %v12222_v60 = vcombine.low %v12195_v50, %v12196_v14 }
0x2409   :  { %v12106_v37 = vmul.f32 0.03125, %v12104_v13  ;;  %v12223_v47 = vcombine.low %v12197_v2, %v12198_v49  ;;  %v12224_v28 = vcombine.low %v12199_v56, %v12200_v5  ;;  %v13958_v5 = vld [vmem:[%s12963_s17 + $0x8] sm:$0xff]   ;;  %v13959_v13 = vld [vmem:[%s12963_s17] sm:$0xff]  }
0x240a   :  { %v12231_v46 = vrot.slane %v12221_v17, %v14176_v6  ;;  %v12238_v3 = vrot.slane %v12222_v60, %v14176_v6  ;;  %13879 = vmatpush3.bf16.msra.mxu1 %v13958_v5  ;;  %v13186_v17 = vld [vmem:[%s12961_s7] ss:$0 sm:$0xff] }
0x240b   :  { %v12245_v16 = vrot.slane %v12223_v47, %v14176_v6  ;;  %v12252_v20 = vrot.slane %v12224_v28, %v14176_v6  ;;  %v12144_v48 = vrot.slane %v12106_v37, %v14408_v42  ;;  %v12148_v32 = vrot.slane %v12106_v37, %v14668_v58  ;;  %13880 = vmatprep.subr.bf16.mxu1 %v17705_v39  ;;  %v13187_v60 = vld [vmem:[%s12962_s9] ss:$0 sm:$0xff] }
0x240c   :  { %v12253_v25 = vcombine.low %v12231_v46, %v12238_v3  ;;  %v12152_v40 = vrot.slane %v12106_v37, %v14671_v31  ;;  %v12156_v23 = vrot.slane %v12106_v37, %v14674_v38  ;;  %v12160_v11 = vrot.slane %v12106_v37, %v14677_v9 }
0x240d   :  { %v12254_v1 = vcombine.low %v12245_v16, %v12252_v20  ;;  %v12164_v61 = vrot.slane %v12106_v37, %v14680_v0  ;;  %v17504_v7 = vsub.f32 %v17415_v33, %v12144_v48  ;;  %v17507_v41 = vsub.f32 %v17418_v63, %v12148_v32 }
0x240e   :  { %v12261_v44 = vrot.slane %v12253_v25, %v14176_v6  ;;  %v17511_v57 = vsub.f32 %v17421_v51, %v12152_v40  ;;  %v17514_v22 = vsub.f32 %v17424_v18, %v12156_v23  ;;  %v17517_v35 = vsub.f32 %v17427_v45, %v12160_v11  ;;  %13881 = vmatpush3.bf16.msra.mxu1 %v13959_v13 }
0x240f   :  { %v12268_v24 = vrot.slane %v12254_v1, %v14176_v6  ;;  %v17521_v36 = vsub.f32 %v17430_v59, %v12164_v61  ;;  %v12201_v33 = vmul.f32 %v17504_v7, %v17504_v7  ;;  %v12202_v63 = vmul.f32 %v17507_v41, %v17507_v41 }
0x2410   :  { %v12203_v51 = vmul.f32 %v17511_v57, %v17511_v57  ;;  %v12204_v18 = vmul.f32 %v17514_v22, %v17514_v22  ;;  %v12205_v45 = vmul.f32 %v17517_v35, %v17517_v35  ;;  %v12415_v28 = vcombine.high %v13186_v17, %v13186_v17 }
0x2411   :  { %v12269_v19 = vcombine.low %v12261_v44, %v12268_v24  ;;  %v12206_v59 = vmul.f32 %v17521_v36, %v17521_v36  ;;  %v12270_v15 = vcombine.low %v12201_v33, %v12202_v63  ;;  %v12491_v46 = vcombine.high %v13187_v60, %v13187_v60 }
0x2412   :  { %v12271_v29 = vcombine.low %v12203_v51, %v12204_v18  ;;  %v12422_v39 = vrot.slane %v13186_v17, %v14176_v6  ;;  %v12429_v16 = vrot.slane %v12415_v28, %v14176_v6  ;;  %v12498_v20 = vrot.slane %v13187_v60, %v14176_v6 }
0x2413   :  { %v12312_v12 = vsel %vm426_vm1, %v12269_v19, 0.0  ;;  %v12272_v54 = vcombine.low %v12205_v45, %v12206_v59  ;;  %v12279_v52 = vrot.slane %v12270_v15, %v14176_v6  ;;  %v12505_v48 = vrot.slane %v12491_v46, %v14176_v6 }
0x2414   :  { %12313 = vadd.xlane.f32.xlu1 %v12312_v12  ;;  %v12286_v4 = vrot.slane %v12271_v29, %v14176_v6  ;;  %v12430_v25 = vcombine.high %v12422_v39, %v12422_v39  ;;  %v12431_v40 = vcombine.high %v12429_v16, %v12429_v16  ;;  %v12506_v11 = vcombine.high %v12498_v20, %v12498_v20 }
0x2415   :  { %v12293_v27 = vrot.slane %v12272_v54, %v14176_v6  ;;  %v12507_v1 = vcombine.high %v12505_v48, %v12505_v48  ;;  %v17557_v44 = vrot.slane %v12422_v39, %v14176_v6  ;;  %v17560_v24 = vrot.slane %v12429_v16, %v14176_v6 }
0x2416   :  { %v12294_v50 = vcombine.low %v12279_v52, %v12286_v4  ;;  %v17563_v33 = vrot.slane %v12430_v25, %v14176_v6  ;;  %v17566_v63 = vrot.slane %v12431_v40, %v14176_v6  ;;  %v17569_v51 = vrot.slane %v12498_v20, %v14176_v6 }
0x2417   :  { %v12308_v2 = vrot.slane %v12293_v27, %v14176_v6  ;;  %v17572_v18 = vrot.slane %v12505_v48, %v14176_v6  ;;  %v17575_v45 = vrot.slane %v12506_v11, %v14176_v6  ;;  %v17578_v19 = vrot.slane %v12507_v1, %v14176_v6 }
0x2418   :  { %v12301_v14 = vrot.slane %v12294_v50, %v14176_v6  ;;  %v12460_v59 = vcombine.high %v17557_v44, %v17557_v44  ;;  %v12461_v15 = vcombine.high %v17560_v24, %v17560_v24  ;;  %v12462_v29 = vcombine.high %v17563_v33, %v17563_v33 }
0x2419   :  { %v12463_v12 = vcombine.high %v17566_v63, %v17566_v63  ;;  %v17590_v52 = vcombine.high %v17569_v51, %v17569_v51  ;;  %v12537_v4 = vcombine.high %v17572_v18, %v17572_v18  ;;  %v17596_v27 = vcombine.high %v17575_v45, %v17575_v45 }
0x241a   :  { %v12309_v49 = vcombine.low %v12301_v14, %v12308_v2  ;;  %v12539_v50 = vcombine.high %v17578_v19, %v17578_v19 }
0x241c   :  { %v12315_v56 = vsel %vm2245_vm9, %v12309_v49, 0.0 }
0x241d   :  { %12316 = vadd.xlane.f32.xlu0 %v12315_v56 }
0x249d   :  { %v12314_v37 = vpop.xlane.xlu1 %12313 }
0x249e   :  { %v12318_v47 = vmul.f32 0.03125, %v12314_v37 }
0x24a0   :  { %v12320_v3 = vadd.f32 1e-05, %v12318_v47 }
0x24a2   :  { %14112 = vrsqrt.f32 %v12320_v3 }
0x24a6   :  { %v12317_v32 = vpop.xlane.xlu0 %12316 }
0x24a7   :  { %v12319_v23 = vmul.f32 0.03125, %v12317_v32 }
0x24a9   :  { %v12321_v61 = vadd.f32 1e-05, %v12319_v23 }
0x24ab   :  { %14114 = vrsqrt.f32 %v12321_v61 }
0x24af   :  { %v14113_v54 = vpop.eup %14112 }
0x24b0   :  { %v12329_v14 = vrot.slane %v14113_v54, %v14408_v42  ;;  %v12333_v2 = vrot.slane %v14113_v54, %v14668_v58  ;;  %v12337_v49 = vrot.slane %v14113_v54, %v14671_v31  ;;  %v12341_v56 = vrot.slane %v14113_v54, %v14674_v38 }
0x24b1   :  { %v12345_v5 = vrot.slane %v14113_v54, %v14677_v9  ;;  %v12349_v13 = vrot.slane %v14113_v54, %v14680_v0  ;;  %v12353_v17 = vrot.slane %v14113_v54, %v14683_v43  ;;  %v12357_v60 = vrot.slane %v14113_v54, %v14686_v34 }
0x24b2   :  { %v12396_v37 = vmul.f32 %v12329_v14, %v17454_v30  ;;  %v12397_v47 = vmul.f32 %v12333_v2, %v17457_v10  ;;  %v12398_v28 = vmul.f32 %v12337_v49, %v17460_v8  ;;  %v12399_v46 = vmul.f32 %v12341_v56, %v17463_v26 }
0x24b3   :  { %v12400_v3 = vmul.f32 %v12345_v5, %v17466_v55  ;;  %v12401_v39 = vmul.f32 %v12349_v13, %v17469_v21  ;;  %v12402_v16 = vmul.f32 %v12353_v17, %v17472_v53  ;;  %v12403_v20 = vmul.f32 %v12357_v60, %v17475_v62 }
0x24b4   :  { %v12472_v43 = vmul.f32 %v17557_v44, %v12396_v37  ;;  %v12473_v34 = vmul.f32 %v17563_v33, %v12397_v47  ;;  %v12474_v48 = vmul.f32 %v12460_v59, %v12398_v28  ;;  %v12475_v30 = vmul.f32 %v12462_v29, %v12399_v46 }
0x24b5   :  { %v12476_v10 = vmul.f32 %v17560_v24, %v12400_v3  ;;  %v12477_v8 = vmul.f32 %v17566_v63, %v12401_v39  ;;  %v12478_v32 = vmul.f32 %v12461_v15, %v12402_v16  ;;  %v12479_v26 = vmul.f32 %v12463_v12, %v12403_v20 }
0x24b6   :  { %v12548_v55 = vadd.f32 %v17569_v51, %v12472_v43  ;;  %v12549_v21 = vadd.f32 %v17575_v45, %v12473_v34  ;;  %v12550_v53 = vadd.f32 %v17590_v52, %v12474_v48  ;;  %v12551_v62 = vadd.f32 %v17596_v27, %v12475_v30  ;;  %v13188_v48 = vld [vmem:[%s12964_s22] ss:$0 sm:$0xff] }
0x24b7   :  { %v12552_v25 = vadd.f32 %v17572_v18, %v12476_v10  ;;  %v12553_v40 = vadd.f32 %v17578_v19, %v12477_v8  ;;  %v12554_v23 = vadd.f32 %v12537_v4, %v12478_v32  ;;  %v12555_v11 = vadd.f32 %v12539_v50, %v12479_v26 }
0x24b8   :  { %v14115_v1 = vpop.eup %14114  ;;  %v12576_v61 = vcombine.low %v12548_v55, %v12549_v21  ;;  %v12577_v54 = vcombine.low %v12550_v53, %v12551_v62 }
0x24b9   :  { %v12361_v15 = vrot.slane %v14115_v1, %v14408_v42  ;;  %v12365_v12 = vrot.slane %v14115_v1, %v14668_v58  ;;  %v12369_v14 = vrot.slane %v14115_v1, %v14671_v31  ;;  %v12373_v2 = vrot.slane %v14115_v1, %v14674_v38 }
0x24ba   :  { %v12377_v49 = vrot.slane %v14115_v1, %v14677_v9  ;;  %v12381_v56 = vrot.slane %v14115_v1, %v14680_v0  ;;  %v12578_v5 = vcombine.low %v12552_v25, %v12553_v40  ;;  %v12579_v13 = vcombine.low %v12554_v23, %v12555_v11 }
0x24bb   :  { %v12404_v4 = vmul.f32 %v12361_v15, %v17504_v7  ;;  %v12405_v50 = vmul.f32 %v12365_v12, %v17507_v41  ;;  %v12406_v17 = vmul.f32 %v12369_v14, %v17511_v57  ;;  %v12407_v42 = vmul.f32 %v12373_v2, %v17514_v22 }
0x24bc   :  { %v12408_v58 = vmul.f32 %v12377_v49, %v17517_v35  ;;  %v12409_v31 = vmul.f32 %v12381_v56, %v17521_v36  ;;  %v12586_v38 = vrot.slane %v12576_v61, %v14176_v6  ;;  %v12593_v9 = vrot.slane %v12577_v54, %v14176_v6 }
0x24bd   :  { %v12480_v0 = vmul.f32 %v17557_v44, %v12404_v4  ;;  %v12481_v60 = vmul.f32 %v17563_v33, %v12405_v50  ;;  %v12482_v37 = vmul.f32 %v12460_v59, %v12406_v17  ;;  %v12483_v7 = vmul.f32 %v12462_v29, %v12407_v42 }
0x24be   :  { %v12484_v41 = vmul.f32 %v17560_v24, %v12408_v58  ;;  %v12485_v57 = vmul.f32 %v17566_v63, %v12409_v31  ;;  %v12600_v22 = vrot.slane %v12578_v5, %v14176_v6  ;;  %v12607_v35 = vrot.slane %v12579_v13, %v14176_v6 }
0x24bf   :  { %v12556_v36 = vadd.f32 %v17569_v51, %v12480_v0  ;;  %v12557_v47 = vadd.f32 %v17575_v45, %v12481_v60  ;;  %v12558_v28 = vadd.f32 %v17590_v52, %v12482_v37  ;;  %v12559_v44 = vadd.f32 %v17596_v27, %v12483_v7 }
0x24c0   :  { %v12560_v33 = vadd.f32 %v17572_v18, %v12484_v41  ;;  %v12561_v59 = vadd.f32 %v17578_v19, %v12485_v57  ;;  %v12608_v29 = vcombine.low %v12586_v38, %v12593_v9  ;;  %v12609_v24 = vcombine.low %v12600_v22, %v12607_v35 }
0x24c1   :  { %v12625_v46 = vcombine.low %v12556_v36, %v12557_v47  ;;  %v12626_v63 = vcombine.low %v12558_v28, %v12559_v44 }
0x24c2   :  { %v12627_v3 = vcombine.low %v12560_v33, %v12561_v59  ;;  %v12616_v45 = vrot.slane %v12608_v29, %v14176_v6  ;;  %v12623_v52 = vrot.slane %v12609_v24, %v14176_v6 }
0x24c3   :  { %v12634_v39 = vrot.slane %v12625_v46, %v14176_v6  ;;  %v12641_v16 = vrot.slane %v12626_v63, %v14176_v6 }
0x24c4   :  { %v12648_v51 = vrot.slane %v12627_v3, %v14176_v6  ;;  %v12624_v20 = vcombine.low %v12616_v45, %v12623_v52 }
0x24c5   :  { %v12649_v27 = vcombine.low %v12634_v39, %v12641_v16 }
0x24c6   :  { %v12663_v19 = vrot.slane %v12648_v51, %v14176_v6 }
0x24c7   :  { %v12656_v18 = vrot.slane %v12649_v27, %v14176_v6 }
0x24c9   :  { %v12664_v43 = vcombine.low %v12656_v18, %v12663_v19 }
0x24cb   :  { %v12667_v34 = vpack.c.bf16 %v12664_v43, %v12624_v20 }
0x24cd   :  { %13883 = vmatmul.mubr.msk.bf16.vlgmr.msra.gmra.mxu1 %vm426_vm1, %v12667_v34 }
0x258d   :  { %v12728_v30 = vpop.f32.mrf.mxu1 }
0x258e   :  { %v12729_v10 = vadd.f32 %v13188_v48, %v12728_v30 }
0x258f   :  { %v13884_v8 = vpop.f32.mrf.mxu1 }
0x2590   :  { %v12737_v32 = vcombine.high %v12729_v10, %v12729_v10  ;;  %v12744_v26 = vrot.slane %v12729_v10, %v14176_v6 }
0x2591   :  { %v12731_v55 = vpop.f32.mrf.mxu1 }
0x2592   :  { %v12751_v21 = vrot.slane %v12737_v32, %v14176_v6  ;;  %v12752_v53 = vcombine.high %v12744_v26, %v12744_v26  ;;  %v12732_v62 = vadd.f32 %v13188_v48, %v12731_v55  ;;  %v12760_v25 = vrot.slane %v12744_v26, %v14176_v6 }
0x2593   :  { %v13885_v40 = vpop.f32.mrf.mxu1 }
0x2594   :  { %v12753_v23 = vcombine.high %v12751_v21, %v12751_v21  ;;  %v12767_v11 = vrot.slane %v12751_v21, %v14176_v6  ;;  %v12774_v1 = vrot.slane %v12752_v53, %v14176_v6  ;;  %v12786_v61 = vcombine.high %v12732_v62, %v12732_v62 }
0x2595   :  { %v12793_v54 = vrot.slane %v12732_v62, %v14176_v6 }
0x2596   :  { %v12781_v15 = vrot.slane %v12753_v23, %v14176_v6  ;;  %v12783_v12 = vcombine.high %v12767_v11, %v12767_v11  ;;  %v12833_v14 = vcombine.low %v12760_v25, %v12774_v1  ;;  %v13192_v2 = vcombine.high %v12760_v25, %v12774_v1 }
0x2597   :  { %v12800_v49 = vrot.slane %v12786_v61, %v14176_v6  ;;  %v12801_v56 = vcombine.high %v12793_v54, %v12793_v54  ;;  %v12809_v5 = vrot.slane %v12793_v54, %v14176_v6 }
0x2598   :  { %v12835_v13 = vcombine.low %v12767_v11, %v12781_v15  ;;  %v12842_v4 = vrot.slane %v12833_v14, %v14176_v6  ;;  %v12849_v50 = vrot.slane %v13192_v2, %v14176_v6  ;;  %v12785_v17 = vcombine.high %v12781_v15, %v12781_v15 }
0x2599   :  { %v12802_v42 = vcombine.high %v12800_v49, %v12800_v49  ;;  %v12823_v58 = vrot.slane %v12801_v56, %v14176_v6  ;;  %v12863_v38 = vrot.slane %v12783_v12, %v14176_v6  ;;  %v12831_v0 = vcombine.high %v12809_v5, %v12809_v5 }
0x259a   :  { %v12856_v31 = vrot.slane %v12835_v13, %v14176_v6  ;;  %v12864_v9 = vcombine.low %v12842_v4, %v12849_v50  ;;  %v12816_v60 = vrot.slane %v12800_v49, %v14176_v6  ;;  %v12881_v41 = vcombine.low %v12785_v17, %v12809_v5 }
0x259b   :  { %v12830_v37 = vrot.slane %v12802_v42, %v14176_v6  ;;  %v12832_v7 = vcombine.high %v12823_v58, %v12823_v58  ;;  %v12882_v22 = vcombine.low %v12823_v58, %v12831_v0 }
0x259c   :  { %v12865_v57 = vcombine.low %v12856_v31, %v12863_v38  ;;  %v12890_v36 = vrot.slane %v12881_v41, %v14176_v6  ;;  %v12872_v47 = vrot.slane %v12864_v9, %v14176_v6 }
0x259d   :  { %v12883_v35 = vcombine.low %v12832_v7, %v12816_v60  ;;  %v12897_v44 = vrot.slane %v12882_v22, %v14176_v6  ;;  %v12911_v59 = vrot.slane %v12830_v37, %v14176_v6 }
0x259e   :  { %v12879_v28 = vrot.slane %v12865_v57, %v14176_v6 }
0x259f   :  { %v12904_v33 = vrot.slane %v12883_v35, %v14176_v6  ;;  %v12912_v24 = vcombine.low %v12890_v36, %v12897_v44 }
0x25a0   :  { %v12880_v29 = vcombine.low %v12872_v47, %v12879_v28 }
0x25a1   :  { %v12913_v46 = vcombine.low %v12904_v33, %v12911_v59  ;;  %v12920_v63 = vrot.slane %v12912_v24, %v14176_v6 }
0x25a2   :  { %12931 = vst [vmem:[%s12965_s5] sm:$0x7f] %v12880_v29 }
0x25a3   :  { %v12927_v3 = vrot.slane %v12913_v46, %v14176_v6 }
0x25a5   :  { %v12928_v39 = vcombine.low %v12920_v63, %v12927_v3 }
0x25a7   :  { %12932 = vst [vmem:[%s12965_s5 + $0x8] sm:$0x7f] %v12928_v39 }

</bundles_post_ra>
